<compile_context>
chip_gen: v5e
topology: v5e:2x2
jax: 0.10.0
libtpu: 0.0.40
codegen_flags: <defaults>
</compile_context>

<pallas_src>
import functools

import numpy as np
import jax
import jax.numpy as jnp
from jax import lax
from jax.experimental import pallas as pl
from jax.experimental.pallas import tpu as pltpu

LEAKY_SLOPE = 0.2
BN_EPS = 1e-5
LANE = 128


def _round_up(x, m):
    return (x + m - 1) // m * m


# ------------------------------- fused kernel ------------------------------ #

def fused_discriminator_kernel(*refs, meta, matmul_dtype):
    """Entire discriminator forward; activations never leave VMEM.

    refs layout (positional):
      [x_ref, per-layer params (w,b | w,gamma,beta)..., o_ref,
       pad-scratch for the output of every layer except the last]
    meta: tuple of per-layer static dicts {kind, act, K, Ho, Wo, cin}.
    """
    n_layers = len(meta)
    x_ref = refs[0]
    pos = 1
    layer_params = []
    for m in meta:
        n = 3 if m["kind"] == "bn" else 2
        layer_params.append(refs[pos:pos + n])
        pos += n
    o_ref = refs[pos]
    scratches = refs[pos + 1:]

    N = x_ref.shape[0]
    a_ref = x_ref
    for li, (m, prm) in enumerate(zip(meta, layer_params)):
        K, Ho, Wo, cin = m["K"], m["Ho"], m["Wo"], m["cin"]
        w_ref = prm[0]                              # (K*K*cin, cout_pad)
        cp = w_ref.shape[1]

        # im2col over the REAL channels only -> contraction K*K*cin.
        taps = [a_ref[:, r:r + Ho, c:c + Wo, :cin]
                for r in range(K) for c in range(K)]
        xcol = jnp.concatenate(taps, axis=-1)       # (N, Ho, Wo, K*K*cin)
        xcol = xcol.reshape(N * Ho * Wo, K * K * cin)
        acc = jnp.dot(xcol.astype(matmul_dtype), w_ref[...],
                      preferred_element_type=jnp.float32)

        if m["kind"] == "bn":
            # Two-pass batch stats over N,H,W rows; biased variance (train mode).
            mean = jnp.mean(acc, axis=0, keepdims=True)
            cent = acc - mean
            var = jnp.mean(cent * cent, axis=0, keepdims=True)
            y = cent * lax.rsqrt(var + BN_EPS)
            y = y * prm[1][...] + prm[2][...]       # gamma, beta (zero on pad lanes)
            y = jnp.where(y >= 0, y, LEAKY_SLOPE * y)
        else:
            y = acc + prm[1][...]                   # bias (zero on pad lanes)
            if m["act"]:
                y = jnp.where(y >= 0, y, LEAKY_SLOPE * y)

        y = y.reshape(N, Ho, Wo, cp)
        if li == n_layers - 1:
            o_ref[...] = y.astype(o_ref.dtype)      # lane-dense (Cout padded to 128)
        else:
            # p=1 spatial pad for the next conv: zero ONLY the 1-px border
            # frame (interior is fully rewritten every layer).
            scr = scratches[li]
            Hp, Wp = Ho + 2, Wo + 2
            Cs = scr.shape[3]
            zrow = jnp.zeros((N, 1, Wp, Cs), jnp.float32)
            zcol = jnp.zeros((N, Ho, 1, Cs), jnp.float32)
            scr[:, 0:1, :, :] = zrow
            scr[:, Hp - 1:Hp, :, :] = zrow
            scr[:, 1:1 + Ho, 0:1, :] = zcol
            scr[:, 1:1 + Ho, Wp - 1:Wp, :] = zcol
            scr[:, 1:1 + Ho, 1:1 + Wo, :] = y
            a_ref = scr


# --------------------------- wrapper-side packing --------------------------- #

def _pad_cols(v, cpad):
    """1-D per-channel param -> (1, cpad) f32 row, zero on pad lanes."""
    return jnp.pad(v.astype(jnp.float32), (0, cpad - v.shape[0])).reshape(1, cpad)


def _pack_stride1_weight(w_oihw, cout_pad, dtype):
    """(Cout,Cin,4,4) -> (4*4*Cin, cout_pad), tap-major, real Cin rows."""
    Cout, Cin, KH, KW = w_oihw.shape
    w = jnp.transpose(w_oihw, (2, 3, 1, 0))                    # (KH, KW, Cin, Cout)
    w = jnp.pad(w, ((0, 0), (0, 0), (0, 0), (0, cout_pad - Cout)))
    return w.reshape(KH * KW * Cin, cout_pad).astype(dtype)


def _pack_stride2_conv(x_nhwc, w_oihw, cout_pad, dtype):
    """Rewrite stride-2 4x4 conv (p=1) as a stride-1 2x2 'valid' conv.

    x_pad[2i+kh, 2j+kw] with kh=2a+p, kw=2b+q  ==>  2x2 conv over four
    parity-phase slices concatenated on the channel axis (order p, q, cin).
    x_eff keeps its real 4*Cin channels (no HBM lane padding).
    """
    Cout, Cin, KH, KW = w_oihw.shape                           # 4x4
    xp = jnp.pad(x_nhwc, ((0, 0), (1, 1), (1, 1), (0, 0)))     # one-time input pad
    phases = [xp[:, p::2, q::2, :] for p in (0, 1) for q in (0, 1)]
    x_eff = jnp.concatenate(phases, axis=-1)                   # (N, H/2+1, W/2+1, 4*Cin)
    w_r = w_oihw.reshape(Cout, Cin, 2, 2, 2, 2)                # (cout, cin, a, p, b, q)
    w_eff = jnp.transpose(w_r, (2, 4, 3, 5, 1, 0))             # (a, b, p, q, cin, cout)
    w_eff = w_eff.reshape(2 * 2 * 4 * Cin, Cout)
    w_eff = jnp.pad(w_eff, ((0, 0), (0, cout_pad - Cout)))
    return x_eff, w_eff.astype(dtype)


def discriminator_forward(x_nchw, params, matmul_dtype=jnp.float32):
    """PatchGAN discriminator forward. Input/output NCHW like the PyTorch module."""
    x = jnp.transpose(x_nchw, (0, 2, 3, 1)).astype(jnp.float32)   # NCHW -> NHWC
    N, H, W, cin0 = x.shape
    assert H % 2 == 0 and W % 2 == 0, "stride-2 phase packing assumes even H, W"

    inputs, meta, scratch_shapes = [], [], []

    # layer 0: Conv(k4,s2,p1)+bias -> LeakyReLU, rewritten as 2x2 valid conv
    p0 = params[0]
    cout0 = p0["w"].shape[0]
    cout_pad = _round_up(cout0, LANE)
    x_eff, w_eff = _pack_stride2_conv(x, p0["w"], cout_pad, matmul_dtype)
    Ho, Wo = x_eff.shape[1] - 1, x_eff.shape[2] - 1
    inputs += [w_eff, _pad_cols(p0["b"], cout_pad)]
    meta.append(dict(kind="bias", act=True, K=2, Ho=Ho, Wo=Wo, cin=4 * cin0))
    prev_cout, prev_cpad = cout0, cout_pad

    # middle layers: Conv(k4,s1,p1,no bias) -> BatchNorm(batch stats) -> LeakyReLU
    for p in params[1:-1]:
        cout = p["w"].shape[0]
        cout_pad = _round_up(cout, LANE)
        scratch_shapes.append((N, Ho + 2, Wo + 2, prev_cpad))
        inputs += [_pack_stride1_weight(p["w"], cout_pad, matmul_dtype),
                   _pad_cols(p["gamma"], cout_pad), _pad_cols(p["beta"], cout_pad)]
        Ho, Wo = Ho - 1, Wo - 1
        meta.append(dict(kind="bn", act=True, K=4, Ho=Ho, Wo=Wo, cin=prev_cout))
        prev_cout, prev_cpad = cout, cout_pad

    # final layer: Conv(k4,s1,p1)+bias, Cout=1 padded to 128 lanes (lane-dense out)
    p_last = params[-1]
    cout_last = p_last["w"].shape[0]
    cout_pad = _round_up(cout_last, LANE)
    scratch_shapes.append((N, Ho + 2, Wo + 2, prev_cpad))
    inputs += [_pack_stride1_weight(p_last["w"], cout_pad, matmul_dtype),
               _pad_cols(p_last["b"], cout_pad)]
    Ho, Wo = Ho - 1, Wo - 1
    meta.append(dict(kind="bias", act=False, K=4, Ho=Ho, Wo=Wo, cin=prev_cout))

    all_inputs = [x_eff] + inputs

    # VMEM budget: actual need + headroom, capped well below physical VMEM
    # (64 MiB == the whole per-TC VMEM on v7x, so never ask for that much).
    mm_itemsize = jnp.dtype(matmul_dtype).itemsize
    est = sum(int(np.prod(a.shape)) * a.dtype.itemsize for a in all_inputs)
    est += sum(int(np.prod(s)) * 4 for s in scratch_shapes)
    est += N * Ho * Wo * cout_pad * 4                                  # output
    xcol_peak = max(N * m["Ho"] * m["Wo"] * m["K"] * m["K"] * m["cin"]
                    for m in meta) * mm_itemsize
    est += 4 * xcol_peak                                               # xcol/acc/temps
    try:
        cap = int(0.75 * pltpu.get_tpu_info().vmem_capacity_bytes)
    except Exception:
        cap = 48 * 1024 * 1024
    vmem_limit = int(min(cap, max(16 * 1024 * 1024, 2 * est)))

    vmem = pl.BlockSpec(memory_space=pltpu.MemorySpace.VMEM)
    out_padded = pl.pallas_call(
        functools.partial(fused_discriminator_kernel, meta=tuple(meta),
                          matmul_dtype=matmul_dtype),
        out_shape=jax.ShapeDtypeStruct((N, Ho, Wo, cout_pad), jnp.float32),
        in_specs=[vmem] * len(all_inputs),
        out_specs=vmem,
        scratch_shapes=[pltpu.VMEM(s, jnp.float32) for s in scratch_shapes],
        compiler_params=pltpu.CompilerParams(vmem_limit_bytes=vmem_limit),
    )(*all_inputs)

    out = out_padded[..., :cout_last]               # drop lane padding
    return jnp.transpose(out, (0, 3, 1, 2))         # NHWC -> NCHW


# ----------------------------- parameter init ------------------------------ #

def init_params(key, input_nc, ndf=64, n_layers=3):
    """Deterministic synthetic parameters matching the module's __init__ shapes."""
    kw = 4
    keys = iter(jax.random.split(key, 2 + 3 * n_layers + 2))

    def conv_w(cout, cin):
        return 0.02 * jax.random.normal(next(keys), (cout, cin, kw, kw), jnp.float32)

    layers = [{"w": conv_w(ndf, input_nc),
               "b": 0.02 * jax.random.normal(next(keys), (ndf,), jnp.float32)}]
    nf_mult = 1
    for n in range(1, n_layers + 1):
        nf_mult_prev, nf_mult = nf_mult, min(2 ** n, 8)
        cout, cin = ndf * nf_mult, ndf * nf_mult_prev
        layers.append({
            "w": conv_w(cout, cin),
            "gamma": 1.0 + 0.02 * jax.random.normal(next(keys), (cout,), jnp.float32),
            "beta": 0.02 * jax.random.normal(next(keys), (cout,), jnp.float32),
        })
    layers.append({"w": conv_w(1, ndf * nf_mult),
                   "b": 0.02 * jax.random.normal(next(keys), (1,), jnp.float32)})
    return layers


# --------------------------- pure-JAX reference ---------------------------- #

def _conv_ref(x, w_oihw, b, stride):
    w_hwio = jnp.transpose(w_oihw, (2, 3, 1, 0))
    out = lax.conv_general_dilated(
        x, w_hwio, window_strides=(stride, stride), padding=((1, 1), (1, 1)),
        dimension_numbers=("NHWC", "HWIO", "NHWC"),
        precision=lax.Precision.HIGHEST)
    if b is not None:
        out = out + b
    return out


def discriminator_ref(x_nchw, params):
    x = jnp.transpose(x_nchw, (0, 2, 3, 1))
    p = params[0]
    x = _conv_ref(x, p["w"], p["b"], 2)
    x = jnp.where(x >= 0, x, LEAKY_SLOPE * x)
    for p in params[1:-1]:
        x = _conv_ref(x, p["w"], None, 1)
        mean = jnp.mean(x, axis=(0, 1, 2), keepdims=True)
        var = jnp.mean((x - mean) ** 2, axis=(0, 1, 2), keepdims=True)
        x = (x - mean) * lax.rsqrt(var + BN_EPS) * p["gamma"] + p["beta"]
        x = jnp.where(x >= 0, x, LEAKY_SLOPE * x)
    p = params[-1]
    x = _conv_ref(x, p["w"], p["b"], 1)
    return jnp.transpose(x, (0, 3, 1, 2))


# ----------------------------------- main ----------------------------------- #

if __name__ == "__main__":
    key = jax.random.PRNGKey(0)
    k_x, k_p = jax.random.split(key)

    # Small shapes consistent with the module: N=2, input_nc=4, 16x16, ndf=16.
    N, input_nc, H, W = 2, 4, 16, 16
    ndf, n_layers = 16, 3

    x = jax.random.normal(k_x, (N, input_nc, H, W), jnp.float32)
    params = init_params(k_p, input_nc, ndf=ndf, n_layers=n_layers)

    # matmul_dtype=jnp.bfloat16 enables the review's bf16 MXU path; kept f32
    # here so the strict 1e-3 check against the f32 reference holds.
    fwd = jax.jit(lambda inp: discriminator_forward(inp, params,
                                                    matmul_dtype=jnp.float32))
    out = jax.block_until_ready(fwd(x))

    # PatchGAN output for 16x16 input: (N, 1, 4, 4)
    assert out.shape == (N, 1, 4, 4), out.shape

    ref = jax.block_until_ready(discriminator_ref(x, params))
    np.testing.assert_allclose(np.asarray(out), np.asarray(ref), rtol=1e-3, atol=1e-3)

    print("KERNEL_OK")
</pallas_src>

<mosaic_0001>
module attributes {stable_mosaic.version = 11 : i64} {
  func.func @fused_discriminator_kernel(%arg0: memref<2x9x9x16xf32, #tpu.memory_space<vmem>>, %arg1: memref<64x128xf32, #tpu.memory_space<vmem>>, %arg2: memref<1x128xf32, #tpu.memory_space<vmem>>, %arg3: memref<256x128xf32, #tpu.memory_space<vmem>>, %arg4: memref<1x128xf32, #tpu.memory_space<vmem>>, %arg5: memref<1x128xf32, #tpu.memory_space<vmem>>, %arg6: memref<512x128xf32, #tpu.memory_space<vmem>>, %arg7: memref<1x128xf32, #tpu.memory_space<vmem>>, %arg8: memref<1x128xf32, #tpu.memory_space<vmem>>, %arg9: memref<1024x128xf32, #tpu.memory_space<vmem>>, %arg10: memref<1x128xf32, #tpu.memory_space<vmem>>, %arg11: memref<1x128xf32, #tpu.memory_space<vmem>>, %arg12: memref<2048x128xf32, #tpu.memory_space<vmem>>, %arg13: memref<1x128xf32, #tpu.memory_space<vmem>>, %arg14: memref<2x4x4x128xf32, #tpu.memory_space<vmem>>, %arg15: memref<2x10x10x128xf32, #tpu.memory_space<vmem>>, %arg16: memref<2x9x9x128xf32, #tpu.memory_space<vmem>>, %arg17: memref<2x8x8x128xf32, #tpu.memory_space<vmem>>, %arg18: memref<2x7x7x128xf32, #tpu.memory_space<vmem>>) attributes {dimension_semantics = [], scalar_prefetch = 0 : i64, scratch_operands = 4 : i64, tpu.core_type = #tpu.core_type<tc>} {
    %c0 = arith.constant 0 : index
    %c0_0 = arith.constant 0 : index
    %c0_1 = arith.constant 0 : index
    %c0_2 = arith.constant 0 : index
    %0 = vector.load %arg0[%c0, %c0_0, %c0_1, %c0_2] : memref<2x9x9x16xf32, #tpu.memory_space<vmem>>, vector<2x8x8x16xf32>
    %c0_3 = arith.constant 0 : index
    %c0_4 = arith.constant 0 : index
    %c1 = arith.constant 1 : index
    %c0_5 = arith.constant 0 : index
    %1 = vector.load %arg0[%c0_3, %c0_4, %c1, %c0_5] : memref<2x9x9x16xf32, #tpu.memory_space<vmem>>, vector<2x8x8x16xf32>
    %c0_6 = arith.constant 0 : index
    %c1_7 = arith.constant 1 : index
    %c0_8 = arith.constant 0 : index
    %c0_9 = arith.constant 0 : index
    %2 = vector.load %arg0[%c0_6, %c1_7, %c0_8, %c0_9] : memref<2x9x9x16xf32, #tpu.memory_space<vmem>>, vector<2x8x8x16xf32>
    %c0_10 = arith.constant 0 : index
    %c1_11 = arith.constant 1 : index
    %c1_12 = arith.constant 1 : index
    %c0_13 = arith.constant 0 : index
    %3 = vector.load %arg0[%c0_10, %c1_11, %c1_12, %c0_13] : memref<2x9x9x16xf32, #tpu.memory_space<vmem>>, vector<2x8x8x16xf32>
    %4 = tpu.concatenate %0, %1, %2, %3 in 3 : vector<2x8x8x16xf32>, vector<2x8x8x16xf32>, vector<2x8x8x16xf32>, vector<2x8x8x16xf32> -> vector<2x8x8x64xf32>
    %5 = vector.shape_cast %4 : vector<2x8x8x64xf32> to vector<128x64xf32>
    %c0_14 = arith.constant 0 : index
    %c0_15 = arith.constant 0 : index
    %6 = vector.load %arg1[%c0_14, %c0_15] : memref<64x128xf32, #tpu.memory_space<vmem>>, vector<64x128xf32>
    %cst = arith.constant dense<0.000000e+00> : vector<128x128xf32>
    %7 = tpu.matmul %5, %6, %cst {dimension_numbers = #tpu.dot_dimension_numbers<[1], [0], [0], [1], [0, 0, 1, 1], [], []>} : vector<128x64xf32>, vector<64x128xf32>, vector<128x128xf32> -> vector<128x128xf32>
    %c0_16 = arith.constant 0 : index
    %c0_17 = arith.constant 0 : index
    %8 = vector.load %arg2[%c0_16, %c0_17] : memref<1x128xf32, #tpu.memory_space<vmem>>, vector<1x128xf32>
    %9 = vector.broadcast %8 : vector<1x128xf32> to vector<128x128xf32>
    %10 = arith.addf %7, %9 : vector<128x128xf32>
    %cst_18 = arith.constant 0.000000e+00 : f32
    %11 = vector.broadcast %cst_18 : f32 to vector<128x128xf32>
    %12 = arith.cmpf oge, %10, %11 : vector<128x128xf32>
    %cst_19 = arith.constant 2.000000e-01 : f32
    %13 = vector.broadcast %cst_19 : f32 to vector<128x128xf32>
    %14 = arith.mulf %13, %10 : vector<128x128xf32>
    %15 = arith.select %12, %10, %14 : vector<128x128xi1>, vector<128x128xf32>
    %16 = vector.shape_cast %15 : vector<128x128xf32> to vector<2x8x8x128xf32>
    %cst_20 = arith.constant 0.000000e+00 : f32
    %17 = vector.broadcast %cst_20 : f32 to vector<2x1x10x128xf32>
    %cst_21 = arith.constant 0.000000e+00 : f32
    %18 = vector.broadcast %cst_21 : f32 to vector<2x8x1x128xf32>
    %c0_22 = arith.constant 0 : index
    %c0_23 = arith.constant 0 : index
    %c0_24 = arith.constant 0 : index
    %c0_25 = arith.constant 0 : index
    %19 = vector.load %arg15[%c0_22, %c0_23, %c0_24, %c0_25] : memref<2x10x10x128xf32, #tpu.memory_space<vmem>>, vector<2x1x10x128xf32>
    tpu.vector_store %arg15[%c0_22, %c0_23, %c0_24, %c0_25], %17 {strides = array<i32>} : memref<2x10x10x128xf32, #tpu.memory_space<vmem>>, vector<2x1x10x128xf32>,
    %c0_26 = arith.constant 0 : index
    %c9 = arith.constant 9 : index
    %c0_27 = arith.constant 0 : index
    %c0_28 = arith.constant 0 : index
    %20 = vector.load %arg15[%c0_26, %c9, %c0_27, %c0_28] : memref<2x10x10x128xf32, #tpu.memory_space<vmem>>, vector<2x1x10x128xf32>
    tpu.vector_store %arg15[%c0_26, %c9, %c0_27, %c0_28], %17 {strides = array<i32>} : memref<2x10x10x128xf32, #tpu.memory_space<vmem>>, vector<2x1x10x128xf32>,
    %c0_29 = arith.constant 0 : index
    %c1_30 = arith.constant 1 : index
    %c0_31 = arith.constant 0 : index
    %c0_32 = arith.constant 0 : index
    %21 = vector.load %arg15[%c0_29, %c1_30, %c0_31, %c0_32] : memref<2x10x10x128xf32, #tpu.memory_space<vmem>>, vector<2x8x1x128xf32>
    tpu.vector_store %arg15[%c0_29, %c1_30, %c0_31, %c0_32], %18 {strides = array<i32>} : memref<2x10x10x128xf32, #tpu.memory_space<vmem>>, vector<2x8x1x128xf32>,
    %c0_33 = arith.constant 0 : index
    %c1_34 = arith.constant 1 : index
    %c9_35 = arith.constant 9 : index
    %c0_36 = arith.constant 0 : index
    %22 = vector.load %arg15[%c0_33, %c1_34, %c9_35, %c0_36] : memref<2x10x10x128xf32, #tpu.memory_space<vmem>>, vector<2x8x1x128xf32>
    tpu.vector_store %arg15[%c0_33, %c1_34, %c9_35, %c0_36], %18 {strides = array<i32>} : memref<2x10x10x128xf32, #tpu.memory_space<vmem>>, vector<2x8x1x128xf32>,
    %c0_37 = arith.constant 0 : index
    %c1_38 = arith.constant 1 : index
    %c1_39 = arith.constant 1 : index
    %c0_40 = arith.constant 0 : index
    %23 = vector.load %arg15[%c0_37, %c1_38, %c1_39, %c0_40] : memref<2x10x10x128xf32, #tpu.memory_space<vmem>>, vector<2x8x8x128xf32>
    tpu.vector_store %arg15[%c0_37, %c1_38, %c1_39, %c0_40], %16 {strides = array<i32>} : memref<2x10x10x128xf32, #tpu.memory_space<vmem>>, vector<2x8x8x128xf32>,
    %c0_41 = arith.constant 0 : index
    %c0_42 = arith.constant 0 : index
    %c0_43 = arith.constant 0 : index
    %c0_44 = arith.constant 0 : index
    %24 = vector.load %arg15[%c0_41, %c0_42, %c0_43, %c0_44] : memref<2x10x10x128xf32, #tpu.memory_space<vmem>>, vector<2x7x7x16xf32>
    %c0_45 = arith.constant 0 : index
    %c0_46 = arith.constant 0 : index
    %c1_47 = arith.constant 1 : index
    %c0_48 = arith.constant 0 : index
    %25 = vector.load %arg15[%c0_45, %c0_46, %c1_47, %c0_48] : memref<2x10x10x128xf32, #tpu.memory_space<vmem>>, vector<2x7x7x16xf32>
    %c0_49 = arith.constant 0 : index
    %c0_50 = arith.constant 0 : index
    %c2 = arith.constant 2 : index
    %c0_51 = arith.constant 0 : index
    %26 = vector.load %arg15[%c0_49, %c0_50, %c2, %c0_51] : memref<2x10x10x128xf32, #tpu.memory_space<vmem>>, vector<2x7x7x16xf32>
    %c0_52 = arith.constant 0 : index
    %c0_53 = arith.constant 0 : index
    %c3 = arith.constant 3 : index
    %c0_54 = arith.constant 0 : index
    %27 = vector.load %arg15[%c0_52, %c0_53, %c3, %c0_54] : memref<2x10x10x128xf32, #tpu.memory_space<vmem>>, vector<2x7x7x16xf32>
    %c0_55 = arith.constant 0 : index
    %c1_56 = arith.constant 1 : index
    %c0_57 = arith.constant 0 : index
    %c0_58 = arith.constant 0 : index
    %28 = vector.load %arg15[%c0_55, %c1_56, %c0_57, %c0_58] : memref<2x10x10x128xf32, #tpu.memory_space<vmem>>, vector<2x7x7x16xf32>
    %c0_59 = arith.constant 0 : index
    %c1_60 = arith.constant 1 : index
    %c1_61 = arith.constant 1 : index
    %c0_62 = arith.constant 0 : index
    %29 = vector.load %arg15[%c0_59, %c1_60, %c1_61, %c0_62] : memref<2x10x10x128xf32, #tpu.memory_space<vmem>>, vector<2x7x7x16xf32>
    %c0_63 = arith.constant 0 : index
    %c1_64 = arith.constant 1 : index
    %c2_65 = arith.constant 2 : index
    %c0_66 = arith.constant 0 : index
    %30 = vector.load %arg15[%c0_63, %c1_64, %c2_65, %c0_66] : memref<2x10x10x128xf32, #tpu.memory_space<vmem>>, vector<2x7x7x16xf32>
    %c0_67 = arith.constant 0 : index
    %c1_68 = arith.constant 1 : index
    %c3_69 = arith.constant 3 : index
    %c0_70 = arith.constant 0 : index
    %31 = vector.load %arg15[%c0_67, %c1_68, %c3_69, %c0_70] : memref<2x10x10x128xf32, #tpu.memory_space<vmem>>, vector<2x7x7x16xf32>
    %c0_71 = arith.constant 0 : index
    %c2_72 = arith.constant 2 : index
    %c0_73 = arith.constant 0 : index
    %c0_74 = arith.constant 0 : index
    %32 = vector.load %arg15[%c0_71, %c2_72, %c0_73, %c0_74] : memref<2x10x10x128xf32, #tpu.memory_space<vmem>>, vector<2x7x7x16xf32>
    %c0_75 = arith.constant 0 : index
    %c2_76 = arith.constant 2 : index
    %c1_77 = arith.constant 1 : index
    %c0_78 = arith.constant 0 : index
    %33 = vector.load %arg15[%c0_75, %c2_76, %c1_77, %c0_78] : memref<2x10x10x128xf32, #tpu.memory_space<vmem>>, vector<2x7x7x16xf32>
    %c0_79 = arith.constant 0 : index
    %c2_80 = arith.constant 2 : index
    %c2_81 = arith.constant 2 : index
    %c0_82 = arith.constant 0 : index
    %34 = vector.load %arg15[%c0_79, %c2_80, %c2_81, %c0_82] : memref<2x10x10x128xf32, #tpu.memory_space<vmem>>, vector<2x7x7x16xf32>
    %c0_83 = arith.constant 0 : index
    %c2_84 = arith.constant 2 : index
    %c3_85 = arith.constant 3 : index
    %c0_86 = arith.constant 0 : index
    %35 = vector.load %arg15[%c0_83, %c2_84, %c3_85, %c0_86] : memref<2x10x10x128xf32, #tpu.memory_space<vmem>>, vector<2x7x7x16xf32>
    %c0_87 = arith.constant 0 : index
    %c3_88 = arith.constant 3 : index
    %c0_89 = arith.constant 0 : index
    %c0_90 = arith.constant 0 : index
    %36 = vector.load %arg15[%c0_87, %c3_88, %c0_89, %c0_90] : memref<2x10x10x128xf32, #tpu.memory_space<vmem>>, vector<2x7x7x16xf32>
    %c0_91 = arith.constant 0 : index
    %c3_92 = arith.constant 3 : index
    %c1_93 = arith.constant 1 : index
    %c0_94 = arith.constant 0 : index
    %37 = vector.load %arg15[%c0_91, %c3_92, %c1_93, %c0_94] : memref<2x10x10x128xf32, #tpu.memory_space<vmem>>, vector<2x7x7x16xf32>
    %c0_95 = arith.constant 0 : index
    %c3_96 = arith.constant 3 : index
    %c2_97 = arith.constant 2 : index
    %c0_98 = arith.constant 0 : index
    %38 = vector.load %arg15[%c0_95, %c3_96, %c2_97, %c0_98] : memref<2x10x10x128xf32, #tpu.memory_space<vmem>>, vector<2x7x7x16xf32>
    %c0_99 = arith.constant 0 : index
    %c3_100 = arith.constant 3 : index
    %c3_101 = arith.constant 3 : index
    %c0_102 = arith.constant 0 : index
    %39 = vector.load %arg15[%c0_99, %c3_100, %c3_101, %c0_102] : memref<2x10x10x128xf32, #tpu.memory_space<vmem>>, vector<2x7x7x16xf32>
    %40 = tpu.concatenate %24, %25, %26, %27, %28, %29, %30, %31, %32, %33, %34, %35, %36, %37, %38, %39 in 3 : vector<2x7x7x16xf32>, vector<2x7x7x16xf32>, vector<2x7x7x16xf32>, vector<2x7x7x16xf32>, vector<2x7x7x16xf32>, vector<2x7x7x16xf32>, vector<2x7x7x16xf32>, vector<2x7x7x16xf32>, vector<2x7x7x16xf32>, vector<2x7x7x16xf32>, vector<2x7x7x16xf32>, vector<2x7x7x16xf32>, vector<2x7x7x16xf32>, vector<2x7x7x16xf32>, vector<2x7x7x16xf32>, vector<2x7x7x16xf32> -> vector<2x7x7x256xf32>
    %41 = vector.shape_cast %40 : vector<2x7x7x256xf32> to vector<98x256xf32>
    %c0_103 = arith.constant 0 : index
    %c0_104 = arith.constant 0 : index
    %42 = vector.load %arg3[%c0_103, %c0_104] : memref<256x128xf32, #tpu.memory_space<vmem>>, vector<256x128xf32>
    %cst_105 = arith.constant dense<0.000000e+00> : vector<98x128xf32>
    %43 = tpu.matmul %41, %42, %cst_105 {dimension_numbers = #tpu.dot_dimension_numbers<[1], [0], [0], [1], [0, 0, 1, 1], [], []>} : vector<98x256xf32>, vector<256x128xf32>, vector<98x128xf32> -> vector<98x128xf32>
    %cst_106 = arith.constant dense<0.000000e+00> : vector<128xf32>
    %44 = vector.multi_reduction <add>, %43, %cst_106 [0] : vector<98x128xf32> to vector<128xf32>
    %45 = vector.shape_cast %44 : vector<128xf32> to vector<1x128xf32>
    %cst_107 = arith.constant 9.800000e+01 : f32
    %46 = vector.broadcast %cst_107 : f32 to vector<1x128xf32>
    %47 = arith.divf %45, %46 : vector<1x128xf32>
    %48 = vector.broadcast %47 : vector<1x128xf32> to vector<98x128xf32>
    %49 = arith.subf %43, %48 : vector<98x128xf32>
    %50 = arith.mulf %49, %49 : vector<98x128xf32>
    %cst_108 = arith.constant dense<0.000000e+00> : vector<128xf32>
    %51 = vector.multi_reduction <add>, %50, %cst_108 [0] : vector<98x128xf32> to vector<128xf32>
    %52 = vector.shape_cast %51 : vector<128xf32> to vector<1x128xf32>
    %cst_109 = arith.constant 9.800000e+01 : f32
    %53 = vector.broadcast %cst_109 : f32 to vector<1x128xf32>
    %54 = arith.divf %52, %53 : vector<1x128xf32>
    %cst_110 = arith.constant 9.99999974E-6 : f32
    %55 = vector.broadcast %cst_110 : f32 to vector<1x128xf32>
    %56 = arith.addf %54, %55 : vector<1x128xf32>
    %57 = math.rsqrt %56 : vector<1x128xf32>
    %58 = vector.broadcast %57 : vector<1x128xf32> to vector<98x128xf32>
    %59 = arith.mulf %49, %58 : vector<98x128xf32>
    %c0_111 = arith.constant 0 : index
    %c0_112 = arith.constant 0 : index
    %60 = vector.load %arg4[%c0_111, %c0_112] : memref<1x128xf32, #tpu.memory_space<vmem>>, vector<1x128xf32>
    %61 = vector.broadcast %60 : vector<1x128xf32> to vector<98x128xf32>
    %62 = arith.mulf %59, %61 : vector<98x128xf32>
    %c0_113 = arith.constant 0 : index
    %c0_114 = arith.constant 0 : index
    %63 = vector.load %arg5[%c0_113, %c0_114] : memref<1x128xf32, #tpu.memory_space<vmem>>, vector<1x128xf32>
    %64 = vector.broadcast %63 : vector<1x128xf32> to vector<98x128xf32>
    %65 = arith.addf %62, %64 : vector<98x128xf32>
    %cst_115 = arith.constant 0.000000e+00 : f32
    %66 = vector.broadcast %cst_115 : f32 to vector<98x128xf32>
    %67 = arith.cmpf oge, %65, %66 : vector<98x128xf32>
    %cst_116 = arith.constant 2.000000e-01 : f32
    %68 = vector.broadcast %cst_116 : f32 to vector<98x128xf32>
    %69 = arith.mulf %68, %65 : vector<98x128xf32>
    %70 = arith.select %67, %65, %69 : vector<98x128xi1>, vector<98x128xf32>
    %71 = vector.shape_cast %70 : vector<98x128xf32> to vector<2x7x7x128xf32>
    %cst_117 = arith.constant 0.000000e+00 : f32
    %72 = vector.broadcast %cst_117 : f32 to vector<2x1x9x128xf32>
    %cst_118 = arith.constant 0.000000e+00 : f32
    %73 = vector.broadcast %cst_118 : f32 to vector<2x7x1x128xf32>
    %c0_119 = arith.constant 0 : index
    %c0_120 = arith.constant 0 : index
    %c0_121 = arith.constant 0 : index
    %c0_122 = arith.constant 0 : index
    %74 = vector.load %arg16[%c0_119, %c0_120, %c0_121, %c0_122] : memref<2x9x9x128xf32, #tpu.memory_space<vmem>>, vector<2x1x9x128xf32>
    tpu.vector_store %arg16[%c0_119, %c0_120, %c0_121, %c0_122], %72 {strides = array<i32>} : memref<2x9x9x128xf32, #tpu.memory_space<vmem>>, vector<2x1x9x128xf32>,
    %c0_123 = arith.constant 0 : index
    %c8 = arith.constant 8 : index
    %c0_124 = arith.constant 0 : index
    %c0_125 = arith.constant 0 : index
    %75 = vector.load %arg16[%c0_123, %c8, %c0_124, %c0_125] : memref<2x9x9x128xf32, #tpu.memory_space<vmem>>, vector<2x1x9x128xf32>
    tpu.vector_store %arg16[%c0_123, %c8, %c0_124, %c0_125], %72 {strides = array<i32>} : memref<2x9x9x128xf32, #tpu.memory_space<vmem>>, vector<2x1x9x128xf32>,
    %c0_126 = arith.constant 0 : index
    %c1_127 = arith.constant 1 : index
    %c0_128 = arith.constant 0 : index
    %c0_129 = arith.constant 0 : index
    %76 = vector.load %arg16[%c0_126, %c1_127, %c0_128, %c0_129] : memref<2x9x9x128xf32, #tpu.memory_space<vmem>>, vector<2x7x1x128xf32>
    tpu.vector_store %arg16[%c0_126, %c1_127, %c0_128, %c0_129], %73 {strides = array<i32>} : memref<2x9x9x128xf32, #tpu.memory_space<vmem>>, vector<2x7x1x128xf32>,
    %c0_130 = arith.constant 0 : index
    %c1_131 = arith.constant 1 : index
    %c8_132 = arith.constant 8 : index
    %c0_133 = arith.constant 0 : index
    %77 = vector.load %arg16[%c0_130, %c1_131, %c8_132, %c0_133] : memref<2x9x9x128xf32, #tpu.memory_space<vmem>>, vector<2x7x1x128xf32>
    tpu.vector_store %arg16[%c0_130, %c1_131, %c8_132, %c0_133], %73 {strides = array<i32>} : memref<2x9x9x128xf32, #tpu.memory_space<vmem>>, vector<2x7x1x128xf32>,
    %c0_134 = arith.constant 0 : index
    %c1_135 = arith.constant 1 : index
    %c1_136 = arith.constant 1 : index
    %c0_137 = arith.constant 0 : index
    %78 = vector.load %arg16[%c0_134, %c1_135, %c1_136, %c0_137] : memref<2x9x9x128xf32, #tpu.memory_space<vmem>>, vector<2x7x7x128xf32>
    tpu.vector_store %arg16[%c0_134, %c1_135, %c1_136, %c0_137], %71 {strides = array<i32>} : memref<2x9x9x128xf32, #tpu.memory_space<vmem>>, vector<2x7x7x128xf32>,
    %c0_138 = arith.constant 0 : index
    %c0_139 = arith.constant 0 : index
    %c0_140 = arith.constant 0 : index
    %c0_141 = arith.constant 0 : index
    %79 = vector.load %arg16[%c0_138, %c0_139, %c0_140, %c0_141] : memref<2x9x9x128xf32, #tpu.memory_space<vmem>>, vector<2x6x6x32xf32>
    %c0_142 = arith.constant 0 : index
    %c0_143 = arith.constant 0 : index
    %c1_144 = arith.constant 1 : index
    %c0_145 = arith.constant 0 : index
    %80 = vector.load %arg16[%c0_142, %c0_143, %c1_144, %c0_145] : memref<2x9x9x128xf32, #tpu.memory_space<vmem>>, vector<2x6x6x32xf32>
    %c0_146 = arith.constant 0 : index
    %c0_147 = arith.constant 0 : index
    %c2_148 = arith.constant 2 : index
    %c0_149 = arith.constant 0 : index
    %81 = vector.load %arg16[%c0_146, %c0_147, %c2_148, %c0_149] : memref<2x9x9x128xf32, #tpu.memory_space<vmem>>, vector<2x6x6x32xf32>
    %c0_150 = arith.constant 0 : index
    %c0_151 = arith.constant 0 : index
    %c3_152 = arith.constant 3 : index
    %c0_153 = arith.constant 0 : index
    %82 = vector.load %arg16[%c0_150, %c0_151, %c3_152, %c0_153] : memref<2x9x9x128xf32, #tpu.memory_space<vmem>>, vector<2x6x6x32xf32>
    %c0_154 = arith.constant 0 : index
    %c1_155 = arith.constant 1 : index
    %c0_156 = arith.constant 0 : index
    %c0_157 = arith.constant 0 : index
    %83 = vector.load %arg16[%c0_154, %c1_155, %c0_156, %c0_157] : memref<2x9x9x128xf32, #tpu.memory_space<vmem>>, vector<2x6x6x32xf32>
    %c0_158 = arith.constant 0 : index
    %c1_159 = arith.constant 1 : index
    %c1_160 = arith.constant 1 : index
    %c0_161 = arith.constant 0 : index
    %84 = vector.load %arg16[%c0_158, %c1_159, %c1_160, %c0_161] : memref<2x9x9x128xf32, #tpu.memory_space<vmem>>, vector<2x6x6x32xf32>
    %c0_162 = arith.constant 0 : index
    %c1_163 = arith.constant 1 : index
    %c2_164 = arith.constant 2 : index
    %c0_165 = arith.constant 0 : index
    %85 = vector.load %arg16[%c0_162, %c1_163, %c2_164, %c0_165] : memref<2x9x9x128xf32, #tpu.memory_space<vmem>>, vector<2x6x6x32xf32>
    %c0_166 = arith.constant 0 : index
    %c1_167 = arith.constant 1 : index
    %c3_168 = arith.constant 3 : index
    %c0_169 = arith.constant 0 : index
    %86 = vector.load %arg16[%c0_166, %c1_167, %c3_168, %c0_169] : memref<2x9x9x128xf32, #tpu.memory_space<vmem>>, vector<2x6x6x32xf32>
    %c0_170 = arith.constant 0 : index
    %c2_171 = arith.constant 2 : index
    %c0_172 = arith.constant 0 : index
    %c0_173 = arith.constant 0 : index
    %87 = vector.load %arg16[%c0_170, %c2_171, %c0_172, %c0_173] : memref<2x9x9x128xf32, #tpu.memory_space<vmem>>, vector<2x6x6x32xf32>
    %c0_174 = arith.constant 0 : index
    %c2_175 = arith.constant 2 : index
    %c1_176 = arith.constant 1 : index
    %c0_177 = arith.constant 0 : index
    %88 = vector.load %arg16[%c0_174, %c2_175, %c1_176, %c0_177] : memref<2x9x9x128xf32, #tpu.memory_space<vmem>>, vector<2x6x6x32xf32>
    %c0_178 = arith.constant 0 : index
    %c2_179 = arith.constant 2 : index
    %c2_180 = arith.constant 2 : index
    %c0_181 = arith.constant 0 : index
    %89 = vector.load %arg16[%c0_178, %c2_179, %c2_180, %c0_181] : memref<2x9x9x128xf32, #tpu.memory_space<vmem>>, vector<2x6x6x32xf32>
    %c0_182 = arith.constant 0 : index
    %c2_183 = arith.constant 2 : index
    %c3_184 = arith.constant 3 : index
    %c0_185 = arith.constant 0 : index
    %90 = vector.load %arg16[%c0_182, %c2_183, %c3_184, %c0_185] : memref<2x9x9x128xf32, #tpu.memory_space<vmem>>, vector<2x6x6x32xf32>
    %c0_186 = arith.constant 0 : index
    %c3_187 = arith.constant 3 : index
    %c0_188 = arith.constant 0 : index
    %c0_189 = arith.constant 0 : index
    %91 = vector.load %arg16[%c0_186, %c3_187, %c0_188, %c0_189] : memref<2x9x9x128xf32, #tpu.memory_space<vmem>>, vector<2x6x6x32xf32>
    %c0_190 = arith.constant 0 : index
    %c3_191 = arith.constant 3 : index
    %c1_192 = arith.constant 1 : index
    %c0_193 = arith.constant 0 : index
    %92 = vector.load %arg16[%c0_190, %c3_191, %c1_192, %c0_193] : memref<2x9x9x128xf32, #tpu.memory_space<vmem>>, vector<2x6x6x32xf32>
    %c0_194 = arith.constant 0 : index
    %c3_195 = arith.constant 3 : index
    %c2_196 = arith.constant 2 : index
    %c0_197 = arith.constant 0 : index
    %93 = vector.load %arg16[%c0_194, %c3_195, %c2_196, %c0_197] : memref<2x9x9x128xf32, #tpu.memory_space<vmem>>, vector<2x6x6x32xf32>
    %c0_198 = arith.constant 0 : index
    %c3_199 = arith.constant 3 : index
    %c3_200 = arith.constant 3 : index
    %c0_201 = arith.constant 0 : index
    %94 = vector.load %arg16[%c0_198, %c3_199, %c3_200, %c0_201] : memref<2x9x9x128xf32, #tpu.memory_space<vmem>>, vector<2x6x6x32xf32>
    %95 = tpu.concatenate %79, %80, %81, %82, %83, %84, %85, %86, %87, %88, %89, %90, %91, %92, %93, %94 in 3 : vector<2x6x6x32xf32>, vector<2x6x6x32xf32>, vector<2x6x6x32xf32>, vector<2x6x6x32xf32>, vector<2x6x6x32xf32>, vector<2x6x6x32xf32>, vector<2x6x6x32xf32>, vector<2x6x6x32xf32>, vector<2x6x6x32xf32>, vector<2x6x6x32xf32>, vector<2x6x6x32xf32>, vector<2x6x6x32xf32>, vector<2x6x6x32xf32>, vector<2x6x6x32xf32>, vector<2x6x6x32xf32>, vector<2x6x6x32xf32> -> vector<2x6x6x512xf32>
    %96 = vector.shape_cast %95 : vector<2x6x6x512xf32> to vector<72x512xf32>
    %c0_202 = arith.constant 0 : index
    %c0_203 = arith.constant 0 : index
    %97 = vector.load %arg6[%c0_202, %c0_203] : memref<512x128xf32, #tpu.memory_space<vmem>>, vector<512x128xf32>
    %cst_204 = arith.constant dense<0.000000e+00> : vector<72x128xf32>
    %98 = tpu.matmul %96, %97, %cst_204 {dimension_numbers = #tpu.dot_dimension_numbers<[1], [0], [0], [1], [0, 0, 1, 1], [], []>} : vector<72x512xf32>, vector<512x128xf32>, vector<72x128xf32> -> vector<72x128xf32>
    %cst_205 = arith.constant dense<0.000000e+00> : vector<128xf32>
    %99 = vector.multi_reduction <add>, %98, %cst_205 [0] : vector<72x128xf32> to vector<128xf32>
    %100 = vector.shape_cast %99 : vector<128xf32> to vector<1x128xf32>
    %cst_206 = arith.constant 7.200000e+01 : f32
    %101 = vector.broadcast %cst_206 : f32 to vector<1x128xf32>
    %102 = arith.divf %100, %101 : vector<1x128xf32>
    %103 = vector.broadcast %102 : vector<1x128xf32> to vector<72x128xf32>
    %104 = arith.subf %98, %103 : vector<72x128xf32>
    %105 = arith.mulf %104, %104 : vector<72x128xf32>
    %cst_207 = arith.constant dense<0.000000e+00> : vector<128xf32>
    %106 = vector.multi_reduction <add>, %105, %cst_207 [0] : vector<72x128xf32> to vector<128xf32>
    %107 = vector.shape_cast %106 : vector<128xf32> to vector<1x128xf32>
    %cst_208 = arith.constant 7.200000e+01 : f32
    %108 = vector.broadcast %cst_208 : f32 to vector<1x128xf32>
    %109 = arith.divf %107, %108 : vector<1x128xf32>
    %cst_209 = arith.constant 9.99999974E-6 : f32
    %110 = vector.broadcast %cst_209 : f32 to vector<1x128xf32>
    %111 = arith.addf %109, %110 : vector<1x128xf32>
    %112 = math.rsqrt %111 : vector<1x128xf32>
    %113 = vector.broadcast %112 : vector<1x128xf32> to vector<72x128xf32>
    %114 = arith.mulf %104, %113 : vector<72x128xf32>
    %c0_210 = arith.constant 0 : index
    %c0_211 = arith.constant 0 : index
    %115 = vector.load %arg7[%c0_210, %c0_211] : memref<1x128xf32, #tpu.memory_space<vmem>>, vector<1x128xf32>
    %116 = vector.broadcast %115 : vector<1x128xf32> to vector<72x128xf32>
    %117 = arith.mulf %114, %116 : vector<72x128xf32>
    %c0_212 = arith.constant 0 : index
    %c0_213 = arith.constant 0 : index
    %118 = vector.load %arg8[%c0_212, %c0_213] : memref<1x128xf32, #tpu.memory_space<vmem>>, vector<1x128xf32>
    %119 = vector.broadcast %118 : vector<1x128xf32> to vector<72x128xf32>
    %120 = arith.addf %117, %119 : vector<72x128xf32>
    %cst_214 = arith.constant 0.000000e+00 : f32
    %121 = vector.broadcast %cst_214 : f32 to vector<72x128xf32>
    %122 = arith.cmpf oge, %120, %121 : vector<72x128xf32>
    %cst_215 = arith.constant 2.000000e-01 : f32
    %123 = vector.broadcast %cst_215 : f32 to vector<72x128xf32>
    %124 = arith.mulf %123, %120 : vector<72x128xf32>
    %125 = arith.select %122, %120, %124 : vector<72x128xi1>, vector<72x128xf32>
    %126 = vector.shape_cast %125 : vector<72x128xf32> to vector<2x6x6x128xf32>
    %cst_216 = arith.constant 0.000000e+00 : f32
    %127 = vector.broadcast %cst_216 : f32 to vector<2x1x8x128xf32>
    %cst_217 = arith.constant 0.000000e+00 : f32
    %128 = vector.broadcast %cst_217 : f32 to vector<2x6x1x128xf32>
    %c0_218 = arith.constant 0 : index
    %c0_219 = arith.constant 0 : index
    %c0_220 = arith.constant 0 : index
    %c0_221 = arith.constant 0 : index
    %129 = vector.load %arg17[%c0_218, %c0_219, %c0_220, %c0_221] : memref<2x8x8x128xf32, #tpu.memory_space<vmem>>, vector<2x1x8x128xf32>
    tpu.vector_store %arg17[%c0_218, %c0_219, %c0_220, %c0_221], %127 {strides = array<i32>} : memref<2x8x8x128xf32, #tpu.memory_space<vmem>>, vector<2x1x8x128xf32>,
    %c0_222 = arith.constant 0 : index
    %c7 = arith.constant 7 : index
    %c0_223 = arith.constant 0 : index
    %c0_224 = arith.constant 0 : index
    %130 = vector.load %arg17[%c0_222, %c7, %c0_223, %c0_224] : memref<2x8x8x128xf32, #tpu.memory_space<vmem>>, vector<2x1x8x128xf32>
    tpu.vector_store %arg17[%c0_222, %c7, %c0_223, %c0_224], %127 {strides = array<i32>} : memref<2x8x8x128xf32, #tpu.memory_space<vmem>>, vector<2x1x8x128xf32>,
    %c0_225 = arith.constant 0 : index
    %c1_226 = arith.constant 1 : index
    %c0_227 = arith.constant 0 : index
    %c0_228 = arith.constant 0 : index
    %131 = vector.load %arg17[%c0_225, %c1_226, %c0_227, %c0_228] : memref<2x8x8x128xf32, #tpu.memory_space<vmem>>, vector<2x6x1x128xf32>
    tpu.vector_store %arg17[%c0_225, %c1_226, %c0_227, %c0_228], %128 {strides = array<i32>} : memref<2x8x8x128xf32, #tpu.memory_space<vmem>>, vector<2x6x1x128xf32>,
    %c0_229 = arith.constant 0 : index
    %c1_230 = arith.constant 1 : index
    %c7_231 = arith.constant 7 : index
    %c0_232 = arith.constant 0 : index
    %132 = vector.load %arg17[%c0_229, %c1_230, %c7_231, %c0_232] : memref<2x8x8x128xf32, #tpu.memory_space<vmem>>, vector<2x6x1x128xf32>
    tpu.vector_store %arg17[%c0_229, %c1_230, %c7_231, %c0_232], %128 {strides = array<i32>} : memref<2x8x8x128xf32, #tpu.memory_space<vmem>>, vector<2x6x1x128xf32>,
    %c0_233 = arith.constant 0 : index
    %c1_234 = arith.constant 1 : index
    %c1_235 = arith.constant 1 : index
    %c0_236 = arith.constant 0 : index
    %133 = vector.load %arg17[%c0_233, %c1_234, %c1_235, %c0_236] : memref<2x8x8x128xf32, #tpu.memory_space<vmem>>, vector<2x6x6x128xf32>
    tpu.vector_store %arg17[%c0_233, %c1_234, %c1_235, %c0_236], %126 {strides = array<i32>} : memref<2x8x8x128xf32, #tpu.memory_space<vmem>>, vector<2x6x6x128xf32>,
    %c0_237 = arith.constant 0 : index
    %c0_238 = arith.constant 0 : index
    %c0_239 = arith.constant 0 : index
    %c0_240 = arith.constant 0 : index
    %134 = vector.load %arg17[%c0_237, %c0_238, %c0_239, %c0_240] : memref<2x8x8x128xf32, #tpu.memory_space<vmem>>, vector<2x5x5x64xf32>
    %c0_241 = arith.constant 0 : index
    %c0_242 = arith.constant 0 : index
    %c1_243 = arith.constant 1 : index
    %c0_244 = arith.constant 0 : index
    %135 = vector.load %arg17[%c0_241, %c0_242, %c1_243, %c0_244] : memref<2x8x8x128xf32, #tpu.memory_space<vmem>>, vector<2x5x5x64xf32>
    %c0_245 = arith.constant 0 : index
    %c0_246 = arith.constant 0 : index
    %c2_247 = arith.constant 2 : index
    %c0_248 = arith.constant 0 : index
    %136 = vector.load %arg17[%c0_245, %c0_246, %c2_247, %c0_248] : memref<2x8x8x128xf32, #tpu.memory_space<vmem>>, vector<2x5x5x64xf32>
    %c0_249 = arith.constant 0 : index
    %c0_250 = arith.constant 0 : index
    %c3_251 = arith.constant 3 : index
    %c0_252 = arith.constant 0 : index
    %137 = vector.load %arg17[%c0_249, %c0_250, %c3_251, %c0_252] : memref<2x8x8x128xf32, #tpu.memory_space<vmem>>, vector<2x5x5x64xf32>
    %c0_253 = arith.constant 0 : index
    %c1_254 = arith.constant 1 : index
    %c0_255 = arith.constant 0 : index
    %c0_256 = arith.constant 0 : index
    %138 = vector.load %arg17[%c0_253, %c1_254, %c0_255, %c0_256] : memref<2x8x8x128xf32, #tpu.memory_space<vmem>>, vector<2x5x5x64xf32>
    %c0_257 = arith.constant 0 : index
    %c1_258 = arith.constant 1 : index
    %c1_259 = arith.constant 1 : index
    %c0_260 = arith.constant 0 : index
    %139 = vector.load %arg17[%c0_257, %c1_258, %c1_259, %c0_260] : memref<2x8x8x128xf32, #tpu.memory_space<vmem>>, vector<2x5x5x64xf32>
    %c0_261 = arith.constant 0 : index
    %c1_262 = arith.constant 1 : index
    %c2_263 = arith.constant 2 : index
    %c0_264 = arith.constant 0 : index
    %140 = vector.load %arg17[%c0_261, %c1_262, %c2_263, %c0_264] : memref<2x8x8x128xf32, #tpu.memory_space<vmem>>, vector<2x5x5x64xf32>
    %c0_265 = arith.constant 0 : index
    %c1_266 = arith.constant 1 : index
    %c3_267 = arith.constant 3 : index
    %c0_268 = arith.constant 0 : index
    %141 = vector.load %arg17[%c0_265, %c1_266, %c3_267, %c0_268] : memref<2x8x8x128xf32, #tpu.memory_space<vmem>>, vector<2x5x5x64xf32>
    %c0_269 = arith.constant 0 : index
    %c2_270 = arith.constant 2 : index
    %c0_271 = arith.constant 0 : index
    %c0_272 = arith.constant 0 : index
    %142 = vector.load %arg17[%c0_269, %c2_270, %c0_271, %c0_272] : memref<2x8x8x128xf32, #tpu.memory_space<vmem>>, vector<2x5x5x64xf32>
    %c0_273 = arith.constant 0 : index
    %c2_274 = arith.constant 2 : index
    %c1_275 = arith.constant 1 : index
    %c0_276 = arith.constant 0 : index
    %143 = vector.load %arg17[%c0_273, %c2_274, %c1_275, %c0_276] : memref<2x8x8x128xf32, #tpu.memory_space<vmem>>, vector<2x5x5x64xf32>
    %c0_277 = arith.constant 0 : index
    %c2_278 = arith.constant 2 : index
    %c2_279 = arith.constant 2 : index
    %c0_280 = arith.constant 0 : index
    %144 = vector.load %arg17[%c0_277, %c2_278, %c2_279, %c0_280] : memref<2x8x8x128xf32, #tpu.memory_space<vmem>>, vector<2x5x5x64xf32>
    %c0_281 = arith.constant 0 : index
    %c2_282 = arith.constant 2 : index
    %c3_283 = arith.constant 3 : index
    %c0_284 = arith.constant 0 : index
    %145 = vector.load %arg17[%c0_281, %c2_282, %c3_283, %c0_284] : memref<2x8x8x128xf32, #tpu.memory_space<vmem>>, vector<2x5x5x64xf32>
    %c0_285 = arith.constant 0 : index
    %c3_286 = arith.constant 3 : index
    %c0_287 = arith.constant 0 : index
    %c0_288 = arith.constant 0 : index
    %146 = vector.load %arg17[%c0_285, %c3_286, %c0_287, %c0_288] : memref<2x8x8x128xf32, #tpu.memory_space<vmem>>, vector<2x5x5x64xf32>
    %c0_289 = arith.constant 0 : index
    %c3_290 = arith.constant 3 : index
    %c1_291 = arith.constant 1 : index
    %c0_292 = arith.constant 0 : index
    %147 = vector.load %arg17[%c0_289, %c3_290, %c1_291, %c0_292] : memref<2x8x8x128xf32, #tpu.memory_space<vmem>>, vector<2x5x5x64xf32>
    %c0_293 = arith.constant 0 : index
    %c3_294 = arith.constant 3 : index
    %c2_295 = arith.constant 2 : index
    %c0_296 = arith.constant 0 : index
    %148 = vector.load %arg17[%c0_293, %c3_294, %c2_295, %c0_296] : memref<2x8x8x128xf32, #tpu.memory_space<vmem>>, vector<2x5x5x64xf32>
    %c0_297 = arith.constant 0 : index
    %c3_298 = arith.constant 3 : index
    %c3_299 = arith.constant 3 : index
    %c0_300 = arith.constant 0 : index
    %149 = vector.load %arg17[%c0_297, %c3_298, %c3_299, %c0_300] : memref<2x8x8x128xf32, #tpu.memory_space<vmem>>, vector<2x5x5x64xf32>
    %150 = tpu.concatenate %134, %135, %136, %137, %138, %139, %140, %141, %142, %143, %144, %145, %146, %147, %148, %149 in 3 : vector<2x5x5x64xf32>, vector<2x5x5x64xf32>, vector<2x5x5x64xf32>, vector<2x5x5x64xf32>, vector<2x5x5x64xf32>, vector<2x5x5x64xf32>, vector<2x5x5x64xf32>, vector<2x5x5x64xf32>, vector<2x5x5x64xf32>, vector<2x5x5x64xf32>, vector<2x5x5x64xf32>, vector<2x5x5x64xf32>, vector<2x5x5x64xf32>, vector<2x5x5x64xf32>, vector<2x5x5x64xf32>, vector<2x5x5x64xf32> -> vector<2x5x5x1024xf32>
    %151 = vector.shape_cast %150 : vector<2x5x5x1024xf32> to vector<50x1024xf32>
    %c0_301 = arith.constant 0 : index
    %c0_302 = arith.constant 0 : index
    %152 = vector.load %arg9[%c0_301, %c0_302] : memref<1024x128xf32, #tpu.memory_space<vmem>>, vector<1024x128xf32>
    %cst_303 = arith.constant dense<0.000000e+00> : vector<50x128xf32>
    %153 = tpu.matmul %151, %152, %cst_303 {dimension_numbers = #tpu.dot_dimension_numbers<[1], [0], [0], [1], [0, 0, 1, 1], [], []>} : vector<50x1024xf32>, vector<1024x128xf32>, vector<50x128xf32> -> vector<50x128xf32>
    %cst_304 = arith.constant dense<0.000000e+00> : vector<128xf32>
    %154 = vector.multi_reduction <add>, %153, %cst_304 [0] : vector<50x128xf32> to vector<128xf32>
    %155 = vector.shape_cast %154 : vector<128xf32> to vector<1x128xf32>
    %cst_305 = arith.constant 5.000000e+01 : f32
    %156 = vector.broadcast %cst_305 : f32 to vector<1x128xf32>
    %157 = arith.divf %155, %156 : vector<1x128xf32>
    %158 = vector.broadcast %157 : vector<1x128xf32> to vector<50x128xf32>
    %159 = arith.subf %153, %158 : vector<50x128xf32>
    %160 = arith.mulf %159, %159 : vector<50x128xf32>
    %cst_306 = arith.constant dense<0.000000e+00> : vector<128xf32>
    %161 = vector.multi_reduction <add>, %160, %cst_306 [0] : vector<50x128xf32> to vector<128xf32>
    %162 = vector.shape_cast %161 : vector<128xf32> to vector<1x128xf32>
    %cst_307 = arith.constant 5.000000e+01 : f32
    %163 = vector.broadcast %cst_307 : f32 to vector<1x128xf32>
    %164 = arith.divf %162, %163 : vector<1x128xf32>
    %cst_308 = arith.constant 9.99999974E-6 : f32
    %165 = vector.broadcast %cst_308 : f32 to vector<1x128xf32>
    %166 = arith.addf %164, %165 : vector<1x128xf32>
    %167 = math.rsqrt %166 : vector<1x128xf32>
    %168 = vector.broadcast %167 : vector<1x128xf32> to vector<50x128xf32>
    %169 = arith.mulf %159, %168 : vector<50x128xf32>
    %c0_309 = arith.constant 0 : index
    %c0_310 = arith.constant 0 : index
    %170 = vector.load %arg10[%c0_309, %c0_310] : memref<1x128xf32, #tpu.memory_space<vmem>>, vector<1x128xf32>
    %171 = vector.broadcast %170 : vector<1x128xf32> to vector<50x128xf32>
    %172 = arith.mulf %169, %171 : vector<50x128xf32>
    %c0_311 = arith.constant 0 : index
    %c0_312 = arith.constant 0 : index
    %173 = vector.load %arg11[%c0_311, %c0_312] : memref<1x128xf32, #tpu.memory_space<vmem>>, vector<1x128xf32>
    %174 = vector.broadcast %173 : vector<1x128xf32> to vector<50x128xf32>
    %175 = arith.addf %172, %174 : vector<50x128xf32>
    %cst_313 = arith.constant 0.000000e+00 : f32
    %176 = vector.broadcast %cst_313 : f32 to vector<50x128xf32>
    %177 = arith.cmpf oge, %175, %176 : vector<50x128xf32>
    %cst_314 = arith.constant 2.000000e-01 : f32
    %178 = vector.broadcast %cst_314 : f32 to vector<50x128xf32>
    %179 = arith.mulf %178, %175 : vector<50x128xf32>
    %180 = arith.select %177, %175, %179 : vector<50x128xi1>, vector<50x128xf32>
    %181 = vector.shape_cast %180 : vector<50x128xf32> to vector<2x5x5x128xf32>
    %cst_315 = arith.constant 0.000000e+00 : f32
    %182 = vector.broadcast %cst_315 : f32 to vector<2x1x7x128xf32>
    %cst_316 = arith.constant 0.000000e+00 : f32
    %183 = vector.broadcast %cst_316 : f32 to vector<2x5x1x128xf32>
    %c0_317 = arith.constant 0 : index
    %c0_318 = arith.constant 0 : index
    %c0_319 = arith.constant 0 : index
    %c0_320 = arith.constant 0 : index
    %184 = vector.load %arg18[%c0_317, %c0_318, %c0_319, %c0_320] : memref<2x7x7x128xf32, #tpu.memory_space<vmem>>, vector<2x1x7x128xf32>
    tpu.vector_store %arg18[%c0_317, %c0_318, %c0_319, %c0_320], %182 {strides = array<i32>} : memref<2x7x7x128xf32, #tpu.memory_space<vmem>>, vector<2x1x7x128xf32>,
    %c0_321 = arith.constant 0 : index
    %c6 = arith.constant 6 : index
    %c0_322 = arith.constant 0 : index
    %c0_323 = arith.constant 0 : index
    %185 = vector.load %arg18[%c0_321, %c6, %c0_322, %c0_323] : memref<2x7x7x128xf32, #tpu.memory_space<vmem>>, vector<2x1x7x128xf32>
    tpu.vector_store %arg18[%c0_321, %c6, %c0_322, %c0_323], %182 {strides = array<i32>} : memref<2x7x7x128xf32, #tpu.memory_space<vmem>>, vector<2x1x7x128xf32>,
    %c0_324 = arith.constant 0 : index
    %c1_325 = arith.constant 1 : index
    %c0_326 = arith.constant 0 : index
    %c0_327 = arith.constant 0 : index
    %186 = vector.load %arg18[%c0_324, %c1_325, %c0_326, %c0_327] : memref<2x7x7x128xf32, #tpu.memory_space<vmem>>, vector<2x5x1x128xf32>
    tpu.vector_store %arg18[%c0_324, %c1_325, %c0_326, %c0_327], %183 {strides = array<i32>} : memref<2x7x7x128xf32, #tpu.memory_space<vmem>>, vector<2x5x1x128xf32>,
    %c0_328 = arith.constant 0 : index
    %c1_329 = arith.constant 1 : index
    %c6_330 = arith.constant 6 : index
    %c0_331 = arith.constant 0 : index
    %187 = vector.load %arg18[%c0_328, %c1_329, %c6_330, %c0_331] : memref<2x7x7x128xf32, #tpu.memory_space<vmem>>, vector<2x5x1x128xf32>
    tpu.vector_store %arg18[%c0_328, %c1_329, %c6_330, %c0_331], %183 {strides = array<i32>} : memref<2x7x7x128xf32, #tpu.memory_space<vmem>>, vector<2x5x1x128xf32>,
    %c0_332 = arith.constant 0 : index
    %c1_333 = arith.constant 1 : index
    %c1_334 = arith.constant 1 : index
    %c0_335 = arith.constant 0 : index
    %188 = vector.load %arg18[%c0_332, %c1_333, %c1_334, %c0_335] : memref<2x7x7x128xf32, #tpu.memory_space<vmem>>, vector<2x5x5x128xf32>
    tpu.vector_store %arg18[%c0_332, %c1_333, %c1_334, %c0_335], %181 {strides = array<i32>} : memref<2x7x7x128xf32, #tpu.memory_space<vmem>>, vector<2x5x5x128xf32>,
    %c0_336 = arith.constant 0 : index
    %c0_337 = arith.constant 0 : index
    %c0_338 = arith.constant 0 : index
    %c0_339 = arith.constant 0 : index
    %189 = vector.load %arg18[%c0_336, %c0_337, %c0_338, %c0_339] : memref<2x7x7x128xf32, #tpu.memory_space<vmem>>, vector<2x4x4x128xf32>
    %c0_340 = arith.constant 0 : index
    %c0_341 = arith.constant 0 : index
    %c1_342 = arith.constant 1 : index
    %c0_343 = arith.constant 0 : index
    %190 = vector.load %arg18[%c0_340, %c0_341, %c1_342, %c0_343] : memref<2x7x7x128xf32, #tpu.memory_space<vmem>>, vector<2x4x4x128xf32>
    %c0_344 = arith.constant 0 : index
    %c0_345 = arith.constant 0 : index
    %c2_346 = arith.constant 2 : index
    %c0_347 = arith.constant 0 : index
    %191 = vector.load %arg18[%c0_344, %c0_345, %c2_346, %c0_347] : memref<2x7x7x128xf32, #tpu.memory_space<vmem>>, vector<2x4x4x128xf32>
    %c0_348 = arith.constant 0 : index
    %c0_349 = arith.constant 0 : index
    %c3_350 = arith.constant 3 : index
    %c0_351 = arith.constant 0 : index
    %192 = vector.load %arg18[%c0_348, %c0_349, %c3_350, %c0_351] : memref<2x7x7x128xf32, #tpu.memory_space<vmem>>, vector<2x4x4x128xf32>
    %c0_352 = arith.constant 0 : index
    %c1_353 = arith.constant 1 : index
    %c0_354 = arith.constant 0 : index
    %c0_355 = arith.constant 0 : index
    %193 = vector.load %arg18[%c0_352, %c1_353, %c0_354, %c0_355] : memref<2x7x7x128xf32, #tpu.memory_space<vmem>>, vector<2x4x4x128xf32>
    %c0_356 = arith.constant 0 : index
    %c1_357 = arith.constant 1 : index
    %c1_358 = arith.constant 1 : index
    %c0_359 = arith.constant 0 : index
    %194 = vector.load %arg18[%c0_356, %c1_357, %c1_358, %c0_359] : memref<2x7x7x128xf32, #tpu.memory_space<vmem>>, vector<2x4x4x128xf32>
    %c0_360 = arith.constant 0 : index
    %c1_361 = arith.constant 1 : index
    %c2_362 = arith.constant 2 : index
    %c0_363 = arith.constant 0 : index
    %195 = vector.load %arg18[%c0_360, %c1_361, %c2_362, %c0_363] : memref<2x7x7x128xf32, #tpu.memory_space<vmem>>, vector<2x4x4x128xf32>
    %c0_364 = arith.constant 0 : index
    %c1_365 = arith.constant 1 : index
    %c3_366 = arith.constant 3 : index
    %c0_367 = arith.constant 0 : index
    %196 = vector.load %arg18[%c0_364, %c1_365, %c3_366, %c0_367] : memref<2x7x7x128xf32, #tpu.memory_space<vmem>>, vector<2x4x4x128xf32>
    %c0_368 = arith.constant 0 : index
    %c2_369 = arith.constant 2 : index
    %c0_370 = arith.constant 0 : index
    %c0_371 = arith.constant 0 : index
    %197 = vector.load %arg18[%c0_368, %c2_369, %c0_370, %c0_371] : memref<2x7x7x128xf32, #tpu.memory_space<vmem>>, vector<2x4x4x128xf32>
    %c0_372 = arith.constant 0 : index
    %c2_373 = arith.constant 2 : index
    %c1_374 = arith.constant 1 : index
    %c0_375 = arith.constant 0 : index
    %198 = vector.load %arg18[%c0_372, %c2_373, %c1_374, %c0_375] : memref<2x7x7x128xf32, #tpu.memory_space<vmem>>, vector<2x4x4x128xf32>
    %c0_376 = arith.constant 0 : index
    %c2_377 = arith.constant 2 : index
    %c2_378 = arith.constant 2 : index
    %c0_379 = arith.constant 0 : index
    %199 = vector.load %arg18[%c0_376, %c2_377, %c2_378, %c0_379] : memref<2x7x7x128xf32, #tpu.memory_space<vmem>>, vector<2x4x4x128xf32>
    %c0_380 = arith.constant 0 : index
    %c2_381 = arith.constant 2 : index
    %c3_382 = arith.constant 3 : index
    %c0_383 = arith.constant 0 : index
    %200 = vector.load %arg18[%c0_380, %c2_381, %c3_382, %c0_383] : memref<2x7x7x128xf32, #tpu.memory_space<vmem>>, vector<2x4x4x128xf32>
    %c0_384 = arith.constant 0 : index
    %c3_385 = arith.constant 3 : index
    %c0_386 = arith.constant 0 : index
    %c0_387 = arith.constant 0 : index
    %201 = vector.load %arg18[%c0_384, %c3_385, %c0_386, %c0_387] : memref<2x7x7x128xf32, #tpu.memory_space<vmem>>, vector<2x4x4x128xf32>
    %c0_388 = arith.constant 0 : index
    %c3_389 = arith.constant 3 : index
    %c1_390 = arith.constant 1 : index
    %c0_391 = arith.constant 0 : index
    %202 = vector.load %arg18[%c0_388, %c3_389, %c1_390, %c0_391] : memref<2x7x7x128xf32, #tpu.memory_space<vmem>>, vector<2x4x4x128xf32>
    %c0_392 = arith.constant 0 : index
    %c3_393 = arith.constant 3 : index
    %c2_394 = arith.constant 2 : index
    %c0_395 = arith.constant 0 : index
    %203 = vector.load %arg18[%c0_392, %c3_393, %c2_394, %c0_395] : memref<2x7x7x128xf32, #tpu.memory_space<vmem>>, vector<2x4x4x128xf32>
    %c0_396 = arith.constant 0 : index
    %c3_397 = arith.constant 3 : index
    %c3_398 = arith.constant 3 : index
    %c0_399 = arith.constant 0 : index
    %204 = vector.load %arg18[%c0_396, %c3_397, %c3_398, %c0_399] : memref<2x7x7x128xf32, #tpu.memory_space<vmem>>, vector<2x4x4x128xf32>
    %205 = tpu.concatenate %189, %190, %191, %192, %193, %194, %195, %196, %197, %198, %199, %200, %201, %202, %203, %204 in 3 : vector<2x4x4x128xf32>, vector<2x4x4x128xf32>, vector<2x4x4x128xf32>, vector<2x4x4x128xf32>, vector<2x4x4x128xf32>, vector<2x4x4x128xf32>, vector<2x4x4x128xf32>, vector<2x4x4x128xf32>, vector<2x4x4x128xf32>, vector<2x4x4x128xf32>, vector<2x4x4x128xf32>, vector<2x4x4x128xf32>, vector<2x4x4x128xf32>, vector<2x4x4x128xf32>, vector<2x4x4x128xf32>, vector<2x4x4x128xf32> -> vector<2x4x4x2048xf32>
    %206 = vector.shape_cast %205 : vector<2x4x4x2048xf32> to vector<32x2048xf32>
    %c0_400 = arith.constant 0 : index
    %c0_401 = arith.constant 0 : index
    %207 = vector.load %arg12[%c0_400, %c0_401] : memref<2048x128xf32, #tpu.memory_space<vmem>>, vector<2048x128xf32>
    %cst_402 = arith.constant dense<0.000000e+00> : vector<32x128xf32>
    %208 = tpu.matmul %206, %207, %cst_402 {dimension_numbers = #tpu.dot_dimension_numbers<[1], [0], [0], [1], [0, 0, 1, 1], [], []>} : vector<32x2048xf32>, vector<2048x128xf32>, vector<32x128xf32> -> vector<32x128xf32>
    %c0_403 = arith.constant 0 : index
    %c0_404 = arith.constant 0 : index
    %209 = vector.load %arg13[%c0_403, %c0_404] : memref<1x128xf32, #tpu.memory_space<vmem>>, vector<1x128xf32>
    %210 = vector.broadcast %209 : vector<1x128xf32> to vector<32x128xf32>
    %211 = arith.addf %208, %210 : vector<32x128xf32>
    %212 = vector.shape_cast %211 : vector<32x128xf32> to vector<2x4x4x128xf32>
    %c0_405 = arith.constant 0 : index
    %c0_406 = arith.constant 0 : index
    %c0_407 = arith.constant 0 : index
    %c0_408 = arith.constant 0 : index
    %213 = vector.load %arg14[%c0_405, %c0_406, %c0_407, %c0_408] : memref<2x4x4x128xf32, #tpu.memory_space<vmem>>, vector<2x4x4x128xf32>
    tpu.vector_store %arg14[%c0_405, %c0_406, %c0_407, %c0_408], %212 {strides = array<i32>} : memref<2x4x4x128xf32, #tpu.memory_space<vmem>>, vector<2x4x4x128xf32>,
    return
  }
}

</mosaic_0001>

<bundles_post_ra>
// kernel: _lambda_.1
= control target key start
LH: loop header
LB: loop body
LE: loop exit
PB: predicated region body
PF: predicated region fallthrough
CT: control target
= control target key end

     0   :  { %s8016_s17 = smov 16   ;;  %s8017_s18 = smov 48   ;;  %vm304_vm0 = vcmask 130048   ;;  %vm321_vm1 = vcmask 261120   ;;  %vm338_vm2 = vcmask 392192   ;;  %vm13028_vm3 = vcmask 523264   ;;  %s13008_s0 = inlined_call_operand.vmem [shape: f32[2,9,9,16], index: 0, kind: input, shape index: {}]   ;;  %s13009_s1 = inlined_call_operand.vmem [shape: f32[64,128], index: 1, kind: input, shape index: {}]   ;;  %s13010_s2 = inlined_call_operand.vmem [shape: f32[1,128], index: 2, kind: input, shape index: {}]   ;;  %s13011_s3 = inlined_call_operand.vmem [shape: f32[256,128], index: 3, kind: input, shape index: {}]   ;;  %s13012_s4 = inlined_call_operand.vmem [shape: f32[1,128], index: 4, kind: input, shape index: {}]   ;;  %s13013_s5 = inlined_call_operand.vmem [shape: f32[1,128], index: 5, kind: input, shape index: {}]   ;;  %s13014_s6 = inlined_call_operand.vmem [shape: f32[512,128], index: 6, kind: input, shape index: {}]   ;;  %s13015_s7 = inlined_call_operand.vmem [shape: f32[1,128], index: 7, kind: input, shape index: {}]   ;;  %s13016_s8 = inlined_call_operand.vmem [shape: f32[1,128], index: 8, kind: input, shape index: {}]   ;;  %s13017_s9 = inlined_call_operand.vmem [shape: f32[1024,128], index: 9, kind: input, shape index: {}]   ;;  %s13018_s10 = inlined_call_operand.vmem [shape: f32[1,128], index: 10, kind: input, shape index: {}]   ;;  %s13019_s11 = inlined_call_operand.vmem [shape: f32[1,128], index: 11, kind: input, shape index: {}]   ;;  %s13020_s12 = inlined_call_operand.vmem [shape: f32[2048,128], index: 12, kind: input, shape index: {}]   ;;  %s13021_s13 = inlined_call_operand.vmem [shape: f32[1,128], index: 13, kind: input, shape index: {}]   ;;  %s13022_s14 = inlined_call_operand.vmem [shape: f32[2,4,4,128], index: 14, kind: output, shape index: {}]  }
   0x1   :  { %v63_v0 = vld [vmem:[%s13008_s0 + $0x1] sm:$0xff]  ;;  %v7871_v1 = vld [vmem:[%s13008_s0 + $0x11] sm:$0xff]  ;;  %s8018_s21 = smov 32   ;;  %v8019_v63 = vmov 0.0   ;;  %s8021_s22 = smov 96  }
   0x2   :  { %128 = vrot.lane.b32.xlu0 %v63_v0, %s8016_s17  ;;  %256 = vrot.lane.b32.xlu1 %v7871_v1, %s8017_s18  ;;  %v8113_v2 = vld [vmem:[%s13008_s0 + $0x20] sm:$0xff]  ;;  %v362_v3 = vld [vmem:[%s13009_s1 + $0x38] sm:$0xff]  ;;  %529 = vst [vmem:[#allocation2] sm:$0xff] %v8019_v63  ;;  %s8022_s23 = smov 80   ;;  %s8023_s26 = smov 112  }
   0x3   :  { %194 = vrot.lane.b32.xlu2 %v8113_v2, %s8018_s21  ;;  %v361_v4 = vld [vmem:[%s13009_s1 + $0x30] sm:$0xff]  ;;  %424 = vmatpush.msra.mxu0 %v362_v3  ;;  %v360_v5 = vld [vmem:[%s13009_s1 + $0x28] sm:$0xff]  ;;  %v8150_v10 = vld [vmem:[%s13008_s0 + $0x40] sm:$0xff]  ;;  %531 = vst [vmem:[#allocation2 + $0xa0] sm:$0xff] %v8019_v63 }
   0x4   :  { %v7855_v6 = vld [vmem:[%s13008_s0 + $0x10] sm:$0xff]  ;;  %v7872_v7 = vld [vmem:[%s13008_s0 + $0x21] sm:$0xff]  ;;  %v358_v13 = vld [vmem:[%s13009_s1 + $0x18] sm:$0xff]  ;;  %530 = vst [vmem:[#allocation2 + $0x8] sm:$0x3] %v8019_v63 }
   0x5   :  { %425 = vmatpush.msra.mxu0 %v361_v4  ;;  %v8138_v8 = vld [vmem:[%s13008_s0 + $0x30] sm:$0xff]  ;;  %v7874_v11 = vld [vmem:[%s13008_s0 + $0x41] sm:$0xff]  ;;  %532 = vst [vmem:[#allocation2 + $0xa8] sm:$0x3] %v8019_v63 }
   0x6   :  { %v7873_v9 = vld [vmem:[%s13008_s0 + $0x31] sm:$0xff]  ;;  %v359_v12 = vld [vmem:[%s13009_s1 + $0x20] sm:$0xff]  ;;  %v356_v16 = vld [vmem:[%s13009_s1 + $0x8] sm:$0xff]  ;;  %534 = vst [vmem:[#allocation2 + $0x90] sm:$0xff] %v8019_v63 }
   0x7   :  { %426 = vmatpush.msra.mxu0 %v360_v5  ;;  %v8169_v14 = vld [vmem:[%s13008_s0 + $0x50] sm:$0xff]  ;;  %v355_v17 = vld [vmem:[%s13009_s1] sm:$0xff]  ;;  %535 = vst [vmem:[#allocation2 + $0x98] sm:$0x3] %v8019_v63 }
   0x8   :  { %v357_v15 = vld [vmem:[%s13009_s1 + $0x10] sm:$0xff]  ;;  %v8188_v19 = vld [vmem:[%s13008_s0 + $0x60] sm:$0xff]  ;;  %536 = vst [vmem:[#allocation2 + $0x130] sm:$0xff] %v8019_v63 }
   0x9   :  { %427 = vmatpush.msra.mxu0 %v359_v12  ;;  %v68_v18 = vld [vmem:[%s13008_s0 + $0x51] sm:$0xff]  ;;  %v7876_v20 = vld [vmem:[%s13008_s0 + $0x61] sm:$0xff]  ;;  %537 = vst [vmem:[#allocation2 + $0x138] sm:$0x3] %v8019_v63  ;;  %v601_v3 = vld [vmem:[#allocation2 + $0x1] sm:$0x7f] }
   0xa   :  { %192 = vrot.lane.b32.xlu0 %v7855_v6, %s8018_s21  ;;  %130 = vrot.lane.b32.xlu1 %v7871_v1, %s8016_s17  ;;  %v8200_v21 = vld [vmem:[%s13008_s0 + $0x70] sm:$0xff]  ;;  %v7862_v24 = vld [vmem:[%s13008_s0 + $0x80] sm:$0xff]  ;;  %539 = vst [vmem:[#allocation2 + $0x10] sm:$0x1] %v8019_v63  ;;  %v608_v4 = vld [vmem:[#allocation2 + $0xa1] sm:$0x7f] }
   0xb   :  { %258 = vrot.lane.b32.xlu2 %v7872_v7, %s8017_s18  ;;  %428 = vmatpush.msra.mxu0 %v358_v13  ;;  %v7877_v25 = vld [vmem:[%s13008_s0 + $0x71] sm:$0xff]  ;;  %v47_v27 = vld [vmem:[%s13008_s0] sm:$0xff]  ;;  %540 = vst [vmem:[#allocation2 + $0x20] sm:$0x1] %v8019_v63 }
   0xc   :  { %v71_v32 = vld [vmem:[%s13008_s0 + $0x91] sm:$0xff]  ;;  %v8226_v33 = vld [vmem:[%s13008_s0 + $0xa0] sm:$0xff]  ;;  %541 = vst [vmem:[#allocation2 + $0x30] sm:$0x1] %v8019_v63 }
   0xd   :  { %429 = vmatpush.msra.mxu0 %v357_v15  ;;  %v7878_v36 = vld [vmem:[%s13008_s0 + $0x81] sm:$0xff]  ;;  %v8243_v41 = vld [vmem:[%s13008_s0 + $0xb0] sm:$0xff]  ;;  %542 = vst [vmem:[#allocation2 + $0x40] sm:$0x1] %v8019_v63 }
   0xe   :  { %v7879_v44 = vld [vmem:[%s13008_s0 + $0xa1] sm:$0xff]  ;;  %v7880_v50 = vld [vmem:[%s13008_s0 + $0xb1] sm:$0xff]  ;;  %543 = vst [vmem:[#allocation2 + $0x50] sm:$0x1] %v8019_v63 }
   0xf   :  { %430 = vmatpush.msra.mxu0 %v356_v16  ;;  %v8260_v49 = vld [vmem:[%s13008_s0 + $0xc0] sm:$0xff]  ;;  %v8277_v56 = vld [vmem:[%s13008_s0 + $0xd0] sm:$0xff]  ;;  %544 = vst [vmem:[#allocation2 + $0x60] sm:$0x1] %v8019_v63 }
  0x10   :  { %v7881_v57 = vld [vmem:[%s13008_s0 + $0xc1] sm:$0xff]  ;;  %v7882_v59 = vld [vmem:[%s13008_s0 + $0xd1] sm:$0xff]  ;;  %545 = vst [vmem:[#allocation2 + $0x70] sm:$0x1] %v8019_v63 }
  0x11   :  { %431 = vmatpush.msra.mxu0 %v355_v17  ;;  %v8290_v58 = vld [vmem:[%s13008_s0 + $0xe0] sm:$0xff]  ;;  %v8302_v60 = vld [vmem:[%s13008_s0 + $0xf0] sm:$0xff]  ;;  %546 = vst [vmem:[#allocation2 + $0x80] sm:$0x1] %v8019_v63 }
  0x12   :  { %132 = vrot.lane.b32.xlu0 %v7872_v7, %s8016_s17  ;;  %196 = vrot.lane.b32.xlu1 %v8138_v8, %s8018_s21  ;;  %v7883_v61 = vld [vmem:[%s13008_s0 + $0xe1] sm:$0xff]  ;;  %v7884_v0 = vld [vmem:[%s13008_s0 + $0xf1] sm:$0xff]  ;;  %547 = vst [vmem:[#allocation2 + $0xb0] sm:$0x1] %v8019_v63 }
  0x13   :  { %260 = vrot.lane.b32.xlu2 %v7873_v9, %s8017_s18  ;;  %v8314_v62 = vld [vmem:[%s13008_s0 + $0x100] sm:$0xff]  ;;  %548 = vst [vmem:[#allocation2 + $0xc0] sm:$0x1] %v8019_v63 }
  0x14   :  { %v7885_v1 = vld [vmem:[%s13008_s0 + $0x101] sm:$0xff]  ;;  %549 = vst [vmem:[#allocation2 + $0xd0] sm:$0x1] %v8019_v63 }
  0x15   :  { %550 = vst [vmem:[#allocation2 + $0xe0] sm:$0x1] %v8019_v63 }
  0x16   :  { %551 = vst [vmem:[#allocation2 + $0xf0] sm:$0x1] %v8019_v63 }
  0x17   :  { %552 = vst [vmem:[#allocation2 + $0x100] sm:$0x1] %v8019_v63 }
  0x18   :  { %553 = vst [vmem:[#allocation2 + $0x110] sm:$0x1] %v8019_v63 }
  0x19   :  { %554 = vst [vmem:[#allocation2 + $0x120] sm:$0x1] %v8019_v63 }
  0x1a   :  { %134 = vrot.lane.b32.xlu0 %v7873_v9, %s8016_s17  ;;  %198 = vrot.lane.b32.xlu1 %v8150_v10, %s8018_s21  ;;  %555 = vst [vmem:[#allocation2 + $0x19] sm:$0x1] %v8019_v63 }
  0x1b   :  { %262 = vrot.lane.b32.xlu2 %v7874_v11, %s8017_s18  ;;  %556 = vst [vmem:[#allocation2 + $0x29] sm:$0x1] %v8019_v63 }
  0x1c   :  { %557 = vst [vmem:[#allocation2 + $0x39] sm:$0x1] %v8019_v63 }
  0x1d   :  { %558 = vst [vmem:[#allocation2 + $0x49] sm:$0x1] %v8019_v63 }
  0x1e   :  { %559 = vst [vmem:[#allocation2 + $0x59] sm:$0x1] %v8019_v63 }
  0x1f   :  { %560 = vst [vmem:[#allocation2 + $0x69] sm:$0x1] %v8019_v63 }
  0x20   :  { %561 = vst [vmem:[#allocation2 + $0x79] sm:$0x1] %v8019_v63 }
  0x21   :  { %562 = vst [vmem:[#allocation2 + $0x89] sm:$0x1] %v8019_v63 }
  0x22   :  { %136 = vrot.lane.b32.xlu0 %v7874_v11, %s8016_s17  ;;  %200 = vrot.lane.b32.xlu1 %v8169_v14, %s8018_s21  ;;  %563 = vst [vmem:[#allocation2 + $0xb9] sm:$0x1] %v8019_v63 }
  0x23   :  { %264 = vrot.lane.b32.xlu2 %v68_v18, %s8017_s18  ;;  %564 = vst [vmem:[#allocation2 + $0xc9] sm:$0x1] %v8019_v63 }
  0x24   :  { %565 = vst [vmem:[#allocation2 + $0xd9] sm:$0x1] %v8019_v63 }
  0x25   :  { %566 = vst [vmem:[#allocation2 + $0xe9] sm:$0x1] %v8019_v63 }
  0x26   :  { %567 = vst [vmem:[#allocation2 + $0xf9] sm:$0x1] %v8019_v63 }
  0x27   :  { %568 = vst [vmem:[#allocation2 + $0x109] sm:$0x1] %v8019_v63 }
  0x28   :  { %569 = vst [vmem:[#allocation2 + $0x119] sm:$0x1] %v8019_v63 }
  0x29   :  { %570 = vst [vmem:[#allocation2 + $0x129] sm:$0x1] %v8019_v63 }
  0x2a   :  { %138 = vrot.lane.b32.xlu0 %v68_v18, %s8016_s17  ;;  %202 = vrot.lane.b32.xlu1 %v8188_v19, %s8018_s21  ;;  %2597 = vst [vmem:[#allocation3] sm:$0xff] %v8019_v63 }
  0x2b   :  { %266 = vrot.lane.b32.xlu2 %v7876_v20, %s8017_s18  ;;  %2598 = vst [vmem:[#allocation3 + $0x8] sm:$0x1] %v8019_v63 }
  0x2c   :  { %2599 = vst [vmem:[#allocation3 + $0x90] sm:$0xff] %v8019_v63 }
  0x2d   :  { %2600 = vst [vmem:[#allocation3 + $0x98] sm:$0x1] %v8019_v63 }
  0x2e   :  { %2602 = vst [vmem:[#allocation3 + $0x80] sm:$0xff] %v8019_v63 }
  0x2f   :  { %2603 = vst [vmem:[#allocation3 + $0x88] sm:$0x1] %v8019_v63 }
  0x30   :  { %2604 = vst [vmem:[#allocation3 + $0x110] sm:$0xff] %v8019_v63 }
  0x31   :  { %2605 = vst [vmem:[#allocation3 + $0x118] sm:$0x1] %v8019_v63 }
  0x32   :  { %140 = vrot.lane.b32.xlu0 %v7876_v20, %s8016_s17  ;;  %204 = vrot.lane.b32.xlu1 %v8200_v21, %s8018_s21  ;;  %2607 = vst [vmem:[#allocation3 + $0x10] sm:$0x1] %v8019_v63 }
  0x33   :  { %268 = vrot.lane.b32.xlu2 %v7877_v25, %s8017_s18  ;;  %2608 = vst [vmem:[#allocation3 + $0x20] sm:$0x1] %v8019_v63 }
  0x34   :  { %2609 = vst [vmem:[#allocation3 + $0x30] sm:$0x1] %v8019_v63 }
  0x35   :  { %2610 = vst [vmem:[#allocation3 + $0x40] sm:$0x1] %v8019_v63 }
  0x36   :  { %2611 = vst [vmem:[#allocation3 + $0x50] sm:$0x1] %v8019_v63 }
  0x37   :  { %2612 = vst [vmem:[#allocation3 + $0x60] sm:$0x1] %v8019_v63 }
  0x38   :  { %2613 = vst [vmem:[#allocation3 + $0x70] sm:$0x1] %v8019_v63 }
  0x39   :  { %2614 = vst [vmem:[#allocation3 + $0xa0] sm:$0x1] %v8019_v63 }
  0x3a   :  { %142 = vrot.lane.b32.xlu0 %v7877_v25, %s8016_s17  ;;  %206 = vrot.lane.b32.xlu1 %v7862_v24, %s8018_s21  ;;  %2615 = vst [vmem:[#allocation3 + $0xb0] sm:$0x1] %v8019_v63  ;;  %v629_v24 = vld [vmem:[#allocation2 + $0x3] sm:$0x7f] }
  0x3b   :  { %270 = vrot.lane.b32.xlu2 %v7878_v36, %s8017_s18  ;;  %2616 = vst [vmem:[#allocation3 + $0xc0] sm:$0x1] %v8019_v63  ;;  %v636_v25 = vld [vmem:[#allocation2 + $0xa3] sm:$0x7f] }
  0x3c   :  { %2617 = vst [vmem:[#allocation3 + $0xd0] sm:$0x1] %v8019_v63 }
  0x3d   :  { %2618 = vst [vmem:[#allocation3 + $0xe0] sm:$0x1] %v8019_v63 }
  0x3e   :  { %2619 = vst [vmem:[#allocation3 + $0xf0] sm:$0x1] %v8019_v63 }
  0x3f   :  { %2620 = vst [vmem:[#allocation3 + $0x100] sm:$0x1] %v8019_v63 }
  0x40   :  { %2621 = vst [vmem:[#allocation3 + $0x18] sm:$0x1] %v8019_v63 }
  0x41   :  { %2622 = vst [vmem:[#allocation3 + $0x28] sm:$0x1] %v8019_v63 }
  0x42   :  { %144 = vrot.lane.b32.xlu0 %v71_v32, %s8016_s17  ;;  %208 = vrot.lane.b32.xlu1 %v8226_v33, %s8018_s21  ;;  %2623 = vst [vmem:[#allocation3 + $0x38] sm:$0x1] %v8019_v63 }
  0x43   :  { %272 = vrot.lane.b32.xlu2 %v7879_v44, %s8017_s18  ;;  %2624 = vst [vmem:[#allocation3 + $0x48] sm:$0x1] %v8019_v63 }
  0x44   :  { %2625 = vst [vmem:[#allocation3 + $0x58] sm:$0x1] %v8019_v63 }
  0x45   :  { %2626 = vst [vmem:[#allocation3 + $0x68] sm:$0x1] %v8019_v63 }
  0x46   :  { %2627 = vst [vmem:[#allocation3 + $0x78] sm:$0x1] %v8019_v63 }
  0x47   :  { %2628 = vst [vmem:[#allocation3 + $0xa8] sm:$0x1] %v8019_v63 }
  0x48   :  { %2629 = vst [vmem:[#allocation3 + $0xb8] sm:$0x1] %v8019_v63 }
  0x49   :  { %2630 = vst [vmem:[#allocation3 + $0xc8] sm:$0x1] %v8019_v63 }
  0x4a   :  { %146 = vrot.lane.b32.xlu0 %v7879_v44, %s8016_s17  ;;  %210 = vrot.lane.b32.xlu1 %v8243_v41, %s8018_s21  ;;  %2631 = vst [vmem:[#allocation3 + $0xd8] sm:$0x1] %v8019_v63 }
  0x4b   :  { %274 = vrot.lane.b32.xlu2 %v7880_v50, %s8017_s18  ;;  %2632 = vst [vmem:[#allocation3 + $0xe8] sm:$0x1] %v8019_v63 }
  0x4c   :  { %2633 = vst [vmem:[#allocation3 + $0xf8] sm:$0x1] %v8019_v63 }
  0x4d   :  { %2634 = vst [vmem:[#allocation3 + $0x108] sm:$0x1] %v8019_v63 }
  0x4e   :  { %4435 = vst [vmem:[#allocation4] sm:$0xff] %v8019_v63 }
  0x4f   :  { %4436 = vst [vmem:[#allocation4 + $0x40] sm:$0xff] %v8019_v63 }
  0x50   :  { %4438 = vst [vmem:[#allocation4 + $0x38] sm:$0xff] %v8019_v63 }
  0x51   :  { %4439 = vst [vmem:[#allocation4 + $0x78] sm:$0xff] %v8019_v63 }
  0x52   :  { %148 = vrot.lane.b32.xlu0 %v7880_v50, %s8016_s17  ;;  %212 = vrot.lane.b32.xlu1 %v8260_v49, %s8018_s21  ;;  %4441 = vst [vmem:[#allocation4 + $0x8] sm:$0x1] %v8019_v63 }
  0x53   :  { %276 = vrot.lane.b32.xlu2 %v7881_v57, %s8017_s18  ;;  %4442 = vst [vmem:[#allocation4 + $0x10] sm:$0x1] %v8019_v63 }
  0x54   :  { %4443 = vst [vmem:[#allocation4 + $0x18] sm:$0x1] %v8019_v63 }
  0x55   :  { %4444 = vst [vmem:[#allocation4 + $0x20] sm:$0x1] %v8019_v63 }
  0x56   :  { %4445 = vst [vmem:[#allocation4 + $0x28] sm:$0x1] %v8019_v63 }
  0x57   :  { %4446 = vst [vmem:[#allocation4 + $0x30] sm:$0x1] %v8019_v63 }
  0x58   :  { %4447 = vst [vmem:[#allocation4 + $0x48] sm:$0x1] %v8019_v63 }
  0x59   :  { %4448 = vst [vmem:[#allocation4 + $0x50] sm:$0x1] %v8019_v63 }
  0x5a   :  { %150 = vrot.lane.b32.xlu0 %v7881_v57, %s8016_s17  ;;  %214 = vrot.lane.b32.xlu1 %v8277_v56, %s8018_s21  ;;  %4449 = vst [vmem:[#allocation4 + $0x58] sm:$0x1] %v8019_v63 }
  0x5b   :  { %278 = vrot.lane.b32.xlu2 %v7882_v59, %s8017_s18  ;;  %4450 = vst [vmem:[#allocation4 + $0x60] sm:$0x1] %v8019_v63 }
  0x5c   :  { %4451 = vst [vmem:[#allocation4 + $0x68] sm:$0x1] %v8019_v63 }
  0x5d   :  { %v195_v26 = vpop.permute.xlu2 %194  ;;  %4452 = vst [vmem:[#allocation4 + $0x70] sm:$0x1] %v8019_v63 }
  0x5e   :  { %4453 = vst [vmem:[#allocation4 + $0xf] sm:$0x1] %v8019_v63 }
  0x5f   :  { %4454 = vst [vmem:[#allocation4 + $0x17] sm:$0x1] %v8019_v63 }
  0x60   :  { %4455 = vst [vmem:[#allocation4 + $0x1f] sm:$0x1] %v8019_v63 }
  0x61   :  { %4456 = vst [vmem:[#allocation4 + $0x27] sm:$0x1] %v8019_v63 }
  0x62   :  { %152 = vrot.lane.b32.xlu0 %v7882_v59, %s8016_s17  ;;  %216 = vrot.lane.b32.xlu1 %v8290_v58, %s8018_s21  ;;  %4457 = vst [vmem:[#allocation4 + $0x2f] sm:$0x1] %v8019_v63 }
  0x63   :  { %280 = vrot.lane.b32.xlu2 %v7883_v61, %s8017_s18  ;;  %4458 = vst [vmem:[#allocation4 + $0x37] sm:$0x1] %v8019_v63 }
  0x64   :  { %4459 = vst [vmem:[#allocation4 + $0x4f] sm:$0x1] %v8019_v63 }
  0x65   :  { %v259_v37 = vpop.permute.xlu2 %258  ;;  %4460 = vst [vmem:[#allocation4 + $0x57] sm:$0x1] %v8019_v63 }
  0x66   :  { %4461 = vst [vmem:[#allocation4 + $0x5f] sm:$0x1] %v8019_v63 }
  0x67   :  { %4462 = vst [vmem:[#allocation4 + $0x67] sm:$0x1] %v8019_v63 }
  0x68   :  { %4463 = vst [vmem:[#allocation4 + $0x6f] sm:$0x1] %v8019_v63 }
  0x69   :  { %4464 = vst [vmem:[#allocation4 + $0x77] sm:$0x1] %v8019_v63 }
  0x6a   :  { %154 = vrot.lane.b32.xlu0 %v7883_v61, %s8016_s17  ;;  %218 = vrot.lane.b32.xlu1 %v8302_v60, %s8018_s21  ;;  %6412 = vst [vmem:[#allocation5] sm:$0x7f] %v8019_v63 }
  0x6b   :  { %282 = vrot.lane.b32.xlu2 %v7884_v0, %s8017_s18  ;;  %6413 = vst [vmem:[#allocation5 + $0x38] sm:$0x7f] %v8019_v63 }
  0x6c   :  { %6415 = vst [vmem:[#allocation5 + $0x30] sm:$0x7f] %v8019_v63 }
  0x6d   :  { %v261_v46 = vpop.permute.xlu2 %260  ;;  %6416 = vst [vmem:[#allocation5 + $0x68] sm:$0x7f] %v8019_v63 }
  0x6e   :  { %6418 = vst [vmem:[#allocation5 + $0x8] sm:$0x1] %v8019_v63 }
  0x6f   :  { %6419 = vst [vmem:[#allocation5 + $0x10] sm:$0x1] %v8019_v63 }
  0x70   :  { %6420 = vst [vmem:[#allocation5 + $0x18] sm:$0x1] %v8019_v63 }
  0x71   :  { %6421 = vst [vmem:[#allocation5 + $0x20] sm:$0x1] %v8019_v63 }
  0x72   :  { %156 = vrot.lane.b32.xlu0 %v7884_v0, %s8016_s17  ;;  %220 = vrot.lane.b32.xlu1 %v8314_v62, %s8018_s21  ;;  %6422 = vst [vmem:[#allocation5 + $0x28] sm:$0x1] %v8019_v63 }
  0x73   :  { %284 = vrot.lane.b32.xlu2 %v7885_v1, %s8017_s18  ;;  %6423 = vst [vmem:[#allocation5 + $0x40] sm:$0x1] %v8019_v63 }
  0x74   :  { %v129_v22 = vpop.permute.xlu0 %128  ;;  %v257_v23 = vpop.permute.xlu1 %256  ;;  %6424 = vst [vmem:[#allocation5 + $0x48] sm:$0x1] %v8019_v63 }
  0x75   :  { %v305_v28 = vsel %vm304_vm0, %v47_v27, %v129_v22  ;;  %v263_v54 = vpop.permute.xlu2 %262  ;;  %v622_v22 = vld [vmem:[#allocation2 + $0xa2] sm:$0x7f]  ;;  %6425 = vst [vmem:[#allocation5 + $0x50] sm:$0x1] %v8019_v63 }
  0x76   :  { %6426 = vst [vmem:[#allocation5 + $0x58] sm:$0x1] %v8019_v63 }
  0x77   :  { %6427 = vst [vmem:[#allocation5 + $0x60] sm:$0x1] %v8019_v63 }
  0x78   :  { %6428 = vst [vmem:[#allocation5 + $0xe] sm:$0x1] %v8019_v63 }
  0x79   :  { %6429 = vst [vmem:[#allocation5 + $0x16] sm:$0x1] %v8019_v63 }
  0x7a   :  { %158 = vrot.lane.b32.xlu0 %v7885_v1, %s8016_s17  ;;  %6430 = vst [vmem:[#allocation5 + $0x1e] sm:$0x1] %v8019_v63 }
  0x7b   :  { %6431 = vst [vmem:[#allocation5 + $0x26] sm:$0x1] %v8019_v63 }
  0x7c   :  { %v193_v29 = vpop.permute.xlu0 %192  ;;  %v131_v30 = vpop.permute.xlu1 %130  ;;  %6432 = vst [vmem:[#allocation5 + $0x2e] sm:$0x1] %v8019_v63 }
  0x7d   :  { %v322_v31 = vsel %vm321_vm1, %v305_v28, %v193_v29  ;;  %v306_v35 = vsel %vm304_vm0, %v7855_v6, %v131_v30  ;;  %v7946_v6 = vpack.i.bf16 %v608_v4, %v601_v3  ;;  %v8466_v29 = vld [vmem:[%s13010_s2] ss:$0 sm:$0xff]  ;;  %6433 = vst [vmem:[#allocation5 + $0x46] sm:$0x1] %v8019_v63  ;;  %s8020_s2 = smov 64  }
  0x7e   :  { %v339_v34 = vsel %vm338_vm2, %v322_v31, %v257_v23  ;;  %v323_v38 = vsel %vm321_vm1, %v306_v35, %v195_v26  ;;  %v7956_v26 = vpack.i.bf16 %v636_v25, %v629_v24  ;;  %6434 = vst [vmem:[#allocation5 + $0x4e] sm:$0x1] %v8019_v63 }
  0x7f   :  { %7887 = vmatmul.msk.f32.vlgmr.msra.gmra.mxu0 %vm13028_vm3, %v339_v34  ;;  %v340_v39 = vsel %vm338_vm2, %v323_v38, %v259_v37  ;;  %6435 = vst [vmem:[#allocation5 + $0x56] sm:$0x1] %v8019_v63 }
  0x80   :  { %6436 = vst [vmem:[#allocation5 + $0x5e] sm:$0x1] %v8019_v63 }
  0x81   :  { %6437 = vst [vmem:[#allocation5 + $0x66] sm:$0x1] %v8019_v63 }
  0x82   :  { %7957 = vrot.lane.b32.xlu0 %v7956_v26, %s8017_s18 }
  0x84   :  { %v133_v40 = vpop.permute.xlu0 %132  ;;  %v197_v43 = vpop.permute.xlu1 %196 }
  0x85   :  { %v307_v42 = vsel %vm304_vm0, %v8113_v2, %v133_v40  ;;  %v7886_v2 = vld [vmem:[%s13008_s0 + $0x111] sm:$0xff] }
  0x86   :  { %v324_v45 = vsel %vm321_vm1, %v307_v42, %v197_v43  ;;  %286 = vrot.lane.b32.xlu2 %v7886_v2, %s8017_s18 }
  0x87   :  { %7888 = vmatmul.msk.f32.gmra.mxu0 %vm13028_vm3, %v340_v39  ;;  %v341_v47 = vsel %vm338_vm2, %v324_v45, %v261_v46 }
  0x8c   :  { %v135_v48 = vpop.permute.xlu0 %134  ;;  %v199_v52 = vpop.permute.xlu1 %198 }
  0x8d   :  { %v308_v51 = vsel %vm304_vm0, %v8138_v8, %v135_v48  ;;  %v265_v8 = vpop.permute.xlu2 %264 }
  0x8e   :  { %v325_v53 = vsel %vm321_vm1, %v308_v51, %v199_v52  ;;  %7947 = vrot.lane.b32.xlu2 %v7946_v6, %s8016_s17 }
  0x8f   :  { %7889 = vmatmul.msk.f32.gmra.mxu0 %vm13028_vm3, %v341_v47  ;;  %v342_v55 = vsel %vm338_vm2, %v325_v53, %v263_v54 }
  0x94   :  { %v137_v5 = vpop.permute.xlu0 %136  ;;  %v201_v9 = vpop.permute.xlu1 %200 }
  0x95   :  { %v309_v7 = vsel %vm304_vm0, %v8150_v10, %v137_v5  ;;  %v7870_v10 = vld [vmem:[%s13008_s0 + $0x110] sm:$0xff]  ;;  %v267_v17 = vpop.permute.xlu2 %266 }
  0x96   :  { %v326_v11 = vsel %vm321_vm1, %v309_v7, %v201_v9  ;;  %222 = vrot.lane.b32.xlu1 %v7870_v10, %s8018_s21 }
  0x97   :  { %7890 = vmatmul.msk.f32.gmra.mxu0 %vm13028_vm3, %v342_v55  ;;  %v343_v12 = vsel %vm338_vm2, %v326_v11, %v265_v8 }
  0x9c   :  { %v139_v13 = vpop.permute.xlu0 %138  ;;  %v203_v16 = vpop.permute.xlu1 %202 }
  0x9d   :  { %v310_v15 = vsel %vm304_vm0, %v8169_v14, %v139_v13  ;;  %v615_v14 = vld [vmem:[#allocation2 + $0x2] sm:$0x7f]  ;;  %v269_v28 = vpop.permute.xlu2 %268 }
  0x9e   :  { %v327_v18 = vsel %vm321_vm1, %v310_v15, %v203_v16  ;;  %v7951_v23 = vpack.i.bf16 %v622_v22, %v615_v14 }
  0x9f   :  { %7891 = vmatmul.msk.f32.gmra.mxu0 %vm13028_vm3, %v343_v12  ;;  %v344_v20 = vsel %vm338_vm2, %v327_v18, %v267_v17 }
  0xa0   :  { %7952 = vrot.lane.b32.xlu2 %v7951_v23, %s8018_s21 }
  0xa4   :  { %v141_v36 = vpop.permute.xlu0 %140  ;;  %v205_v39 = vpop.permute.xlu1 %204 }
  0xa5   :  { %v271_v32 = vpop.permute.xlu2 %270  ;;  %v311_v38 = vsel %vm304_vm0, %v8188_v19, %v141_v36 }
  0xa6   :  { %v328_v42 = vsel %vm321_vm1, %v311_v38, %v205_v39 }
  0xa7   :  { %7892 = vmatmul.msk.f32.gmra.mxu0 %vm13028_vm3, %v344_v20  ;;  %v345_v44 = vsel %vm338_vm2, %v328_v42, %v269_v28 }
  0xac   :  { %v143_v54 = vpop.permute.xlu0 %142  ;;  %v207_v57 = vpop.permute.xlu1 %206 }
  0xad   :  { %v273_v47 = vpop.permute.xlu2 %272  ;;  %v312_v55 = vsel %vm304_vm0, %v8200_v21, %v143_v54  ;;  %v55_v21 = vld [vmem:[%s13008_s0 + $0x90] sm:$0xff] }
  0xae   :  { %v329_v59 = vsel %vm321_vm1, %v312_v55, %v207_v57 }
  0xaf   :  { %7893 = vmatmul.msk.f32.gmra.mxu0 %vm13028_vm3, %v345_v44  ;;  %v346_v61 = vsel %vm338_vm2, %v329_v59, %v271_v32 }
  0xb4   :  { %v145_v2 = vpop.permute.xlu0 %144  ;;  %v209_v4 = vpop.permute.xlu1 %208 }
  0xb5   :  { %v275_v53 = vpop.permute.xlu2 %274  ;;  %v313_v3 = vsel %vm304_vm0, %v55_v21, %v145_v2 }
  0xb6   :  { %v330_v6 = vsel %vm321_vm1, %v313_v3, %v209_v4 }
  0xb7   :  { %7894 = vmatmul.msk.f32.gmra.mxu0 %vm13028_vm3, %v346_v61  ;;  %v347_v7 = vsel %vm338_vm2, %v330_v6, %v273_v47 }
  0xbc   :  { %v147_v12 = vpop.permute.xlu0 %146  ;;  %v211_v13 = vpop.permute.xlu1 %210 }
  0xbd   :  { %v277_v5 = vpop.permute.xlu2 %276  ;;  %v314_v10 = vsel %vm304_vm0, %v8226_v33, %v147_v12 }
  0xbe   :  { %v331_v15 = vsel %vm321_vm1, %v314_v10, %v211_v13 }
  0xbf   :  { %7895 = vmatmul.msk.f32.gmra.mxu0 %vm13028_vm3, %v347_v7  ;;  %v348_v16 = vsel %vm338_vm2, %v331_v15, %v275_v53 }
  0xc4   :  { %v149_v22 = vpop.permute.xlu0 %148  ;;  %v213_v23 = vpop.permute.xlu1 %212 }
  0xc5   :  { %v279_v17 = vpop.permute.xlu2 %278  ;;  %v315_v33 = vsel %vm304_vm0, %v8243_v41, %v149_v22 }
  0xc6   :  { %v332_v25 = vsel %vm321_vm1, %v315_v33, %v213_v23 }
  0xc7   :  { %7896 = vmatmul.msk.f32.gmra.mxu0 %vm13028_vm3, %v348_v16 }
  0xcd   :  { %v281_v32 = vpop.permute.xlu2 %280 }
  0xd5   :  { %v283_v44 = vpop.permute.xlu2 %282 }
  0xdd   :  { %v285_v54 = vpop.permute.xlu2 %284 }
  0xe5   :  { %v287_v2 = vpop.permute.xlu2 %286 }
  0xfc   :  { %v433_v27 = vpop.f32.mrf.mxu0 }
  0xfd   :  { %v434_v31 = vadd.f32 %v8466_v29, %v433_v27  ;;  %v349_v27 = vsel %vm338_vm2, %v332_v25, %v277_v5 }
  0xfe   :  { %7897 = vmatmul.msk.f32.gmra.mxu0 %vm13028_vm3, %v349_v27 }
  0xff   :  { %v497_v35 = vmul.f32 0.2, %v434_v31  ;;  %vm481_vm4 = vcmp.ge.f32.partialorder %v434_v31, 0.0 }
 0x101   :  { %v513_v45 = vsel %vm481_vm4, %v434_v31, %v497_v35  ;;  %v151_v35 = vpop.permute.xlu0 %150  ;;  %vm1653_vm4 = vcmask 654336  }
 0x102   :  { %571 = vst [vmem:[#allocation2 + $0x11] sm:$0xff] %v513_v45  ;;  %v316_v36 = vsel %vm304_vm0, %v8260_v49, %v151_v35 }
 0x104   :  { %v436_v30 = vpop.f32.mrf.mxu0 }
 0x105   :  { %v437_v34 = vadd.f32 %v8466_v29, %v436_v30 }
 0x107   :  { %v498_v37 = vmul.f32 0.2, %v437_v34  ;;  %vm482_vm5 = vcmp.ge.f32.partialorder %v437_v34, 0.0 }
 0x109   :  { %v514_v46 = vsel %vm482_vm5, %v437_v34, %v498_v37  ;;  %v643_v50 = vld [vmem:[#allocation2 + $0x10] sm:$0x7f]  ;;  %v215_v37 = vpop.permute.xlu1 %214  ;;  %v153_v45 = vpop.permute.xlu0 %152  ;;  %vm1668_vm5 = vcmask 785408  }
 0x10a   :  { %572 = vst [vmem:[#allocation2 + $0x21] sm:$0xff] %v514_v46  ;;  %v616_v51 = vld [vmem:[#allocation2 + $0x12] sm:$0x7f]  ;;  %995 = vrot.lane.b32.xlu1 %v643_v50, %s8020_s2  ;;  %v333_v38 = vsel %vm321_vm1, %v316_v36, %v215_v37  ;;  %v317_v49 = vsel %vm304_vm0, %v8277_v56, %v153_v45 }
 0x10b   :  { %v602_v52 = vld [vmem:[#allocation2 + $0x11] sm:$0x7f]  ;;  %885 = vrot.lane.b32.xlu0 %v616_v51, %s8018_s21  ;;  %v350_v39 = vsel %vm338_vm2, %v333_v38, %v279_v17 }
 0x10c   :  { %v439_v40 = vpop.f32.mrf.mxu0  ;;  %829 = vrot.lane.b32.xlu2 %v602_v52, %s8016_s17  ;;  %v630_v63 = vld [vmem:[#allocation2 + $0x13] sm:$0x7f]  ;;  %7898 = vmatmul.msk.f32.gmra.mxu0 %vm13028_vm3, %v350_v39 }
 0x10d   :  { %v440_v43 = vadd.f32 %v8466_v29, %v439_v40  ;;  %v671_v0 = vld [vmem:[#allocation2 + $0x12] sm:$0x7f] }
 0x10e   :  { %v657_v1 = vld [vmem:[#allocation2 + $0x11] sm:$0x7f] }
 0x10f   :  { %vm483_vm6 = vcmp.ge.f32.partialorder %v440_v43, 0.0  ;;  %v499_v19 = vmul.f32 0.2, %v440_v43  ;;  %v685_v9 = vld [vmem:[#allocation2 + $0x13] sm:$0x7f] }
 0x111   :  { %v515_v48 = vsel %vm483_vm6, %v440_v43, %v499_v19  ;;  %v728_v8 = vld [vmem:[#allocation2 + $0x22] sm:$0x7f]  ;;  %v217_v19 = vpop.permute.xlu1 %216  ;;  %v155_v52 = vpop.permute.xlu0 %154  ;;  %vm1683_vm6 = vcmask 916480  }
 0x112   :  { %573 = vst [vmem:[#allocation2 + $0x31] sm:$0xff] %v515_v48  ;;  %941 = vrot.lane.b32.xlu1 %v630_v63, %s8017_s18  ;;  %v644_v11 = vld [vmem:[#allocation2 + $0x20] sm:$0x7f]  ;;  %v334_v46 = vsel %vm321_vm1, %v317_v49, %v217_v19  ;;  %v318_v56 = vsel %vm304_vm0, %v8290_v58, %v155_v52 }
 0x113   :  { %1107 = vrot.lane.b32.xlu0 %v671_v0, %s8021_s22  ;;  %v742_v18 = vld [vmem:[#allocation2 + $0x23] sm:$0x7f]  ;;  %v351_v47 = vsel %vm338_vm2, %v334_v46, %v281_v32 }
 0x114   :  { %1051 = vrot.lane.b32.xlu2 %v657_v1, %s8022_s23  ;;  %v714_v20 = vld [vmem:[#allocation2 + $0x21] sm:$0x7f]  ;;  %v442_v24 = vpop.f32.mrf.mxu0  ;;  %7899 = vmatmul.msk.f32.gmra.mxu0 %vm13028_vm3, %v351_v47 }
 0x115   :  { %v658_v14 = vld [vmem:[#allocation2 + $0x21] sm:$0x7f]  ;;  %v443_v26 = vadd.f32 %v8466_v29, %v442_v24 }
 0x116   :  { %v631_v30 = vld [vmem:[#allocation2 + $0x23] sm:$0x7f] }
 0x117   :  { %vm484_vm7 = vcmp.ge.f32.partialorder %v443_v26, 0.0  ;;  %v500_v28 = vmul.f32 0.2, %v443_v26  ;;  %v672_v31 = vld [vmem:[#allocation2 + $0x22] sm:$0x7f] }
 0x118   :  { %v603_v41 = vld [vmem:[#allocation2 + $0x21] sm:$0x7f] }
 0x119   :  { %v516_v34 = vsel %vm484_vm7, %v443_v26, %v500_v28  ;;  %v757_v40 = vld [vmem:[#allocation2 + $0x30] sm:$0x7f]  ;;  %v686_v42 = vld [vmem:[#allocation2 + $0x23] sm:$0x7f]  ;;  %v219_v53 = vpop.permute.xlu1 %218  ;;  %v157_v0 = vpop.permute.xlu0 %156  ;;  %vm13033_vm7 = vcmask 1040384  }
 0x11a   :  { %1275 = vrot.lane.b32.xlu1 %v728_v8, %s8018_s21  ;;  %574 = vst [vmem:[#allocation2 + $0x41] sm:$0xff] %v516_v34  ;;  %v617_v43 = vld [vmem:[#allocation2 + $0x22] sm:$0x7f]  ;;  %v743_v48 = vld [vmem:[#allocation2 + $0x33] sm:$0x7f]  ;;  %v335_v55 = vsel %vm321_vm1, %v318_v56, %v219_v53  ;;  %v319_v58 = vsel %vm304_vm0, %v8302_v60, %v157_v0 }
 0x11b   :  { %1163 = vrot.lane.b32.xlu0 %v685_v9, %s8023_s26  ;;  %v715_v50 = vld [vmem:[#allocation2 + $0x31] sm:$0x7f]  ;;  %v352_v57 = vsel %vm338_vm2, %v335_v55, %v283_v44 }
 0x11c   :  { %997 = vrot.lane.b32.xlu2 %v644_v11, %s8020_s2  ;;  %v771_v51 = vld [vmem:[#allocation2 + $0x31] sm:$0x7f]  ;;  %7900 = vmatmul.msk.f32.gmra.mxu0 %vm13028_vm3, %v352_v57  ;;  %v445_v8 = vpop.f32.mrf.mxu0 }
 0x11d   :  { %v799_v59 = vld [vmem:[#allocation2 + $0x33] sm:$0x7f]  ;;  %v446_v9 = vadd.f32 %v8466_v29, %v445_v8 }
 0x11e   :  { %v729_v61 = vld [vmem:[#allocation2 + $0x32] sm:$0x7f] }
 0x11f   :  { %v659_v63 = vld [vmem:[#allocation2 + $0x31] sm:$0x7f]  ;;  %vm485_vm8 = vcmp.ge.f32.partialorder %v446_v9, 0.0  ;;  %v501_v11 = vmul.f32 0.2, %v446_v9 }
 0x120   :  { %v673_v4 = vld [vmem:[#allocation2 + $0x32] sm:$0x7f] }
 0x121   :  { %v221_v1 = vpop.permute.xlu1 %220  ;;  %v785_v5 = vld [vmem:[#allocation2 + $0x32] sm:$0x7f]  ;;  %v159_v7 = vpop.permute.xlu0 %158  ;;  %v517_v13 = vsel %vm485_vm8, %v446_v9, %v501_v11  ;;  %v758_v22 = vld [vmem:[#allocation2 + $0x40] sm:$0x7f]  ;;  %vm13026_vm8 = vcmask 1041409  }
 0x122   :  { %1331 = vrot.lane.b32.xlu1 %v742_v18, %s8017_s18  ;;  %v336_v21 = vsel %vm321_vm1, %v319_v58, %v221_v1  ;;  %v687_v6 = vld [vmem:[#allocation2 + $0x33] sm:$0x7f]  ;;  %v320_v60 = vsel %vm304_vm0, %v8314_v62, %v159_v7  ;;  %v8565_v18 = vpop.permute.xlu2 %7947  ;;  %575 = vst [vmem:[#allocation2 + $0x51] sm:$0xff] %v517_v13  ;;  %v716_v26 = vld [vmem:[#allocation2 + $0x41] sm:$0x7f] }
 0x123   :  { %1219 = vrot.lane.b32.xlu0 %v714_v20, %s8016_s17  ;;  %v353_v3 = vsel %vm338_vm2, %v336_v21, %v285_v54  ;;  %v618_v16 = vld [vmem:[#allocation2 + $0x32] sm:$0x7f]  ;;  %v786_v20 = vld [vmem:[#allocation2 + $0x42] sm:$0x7f] }
 0x124   :  { %1053 = vrot.lane.b32.xlu2 %v658_v14, %s8022_s23  ;;  %7901 = vmatmul.msk.f32.gmra.mxu0 %vm13028_vm3, %v353_v3  ;;  %v645_v17 = vld [vmem:[#allocation2 + $0x30] sm:$0x7f]  ;;  %v448_v23 = vpop.f32.mrf.mxu0  ;;  %v772_v27 = vld [vmem:[#allocation2 + $0x41] sm:$0x7f] }
 0x125   :  { %v604_v62 = vld [vmem:[#allocation2 + $0x31] sm:$0x7f]  ;;  %v449_v24 = vadd.f32 %v8466_v29, %v448_v23  ;;  %v730_v32 = vld [vmem:[#allocation2 + $0x42] sm:$0x7f] }
 0x126   :  { %v632_v14 = vld [vmem:[#allocation2 + $0x33] sm:$0x7f]  ;;  %v674_v34 = vld [vmem:[#allocation2 + $0x42] sm:$0x7f] }
 0x127   :  { %vm486_vm9 = vcmp.ge.f32.partialorder %v449_v24, 0.0  ;;  %v502_v25 = vmul.f32 0.2, %v449_v24  ;;  %v744_v36 = vld [vmem:[#allocation2 + $0x43] sm:$0x7f] }
 0x128   :  { %v619_v37 = vld [vmem:[#allocation2 + $0x42] sm:$0x7f] }
 0x129   :  { %v223_v12 = vpop.permute.xlu1 %222  ;;  %v518_v28 = vsel %vm486_vm9, %v449_v24, %v502_v25  ;;  %v633_v38 = vld [vmem:[#allocation2 + $0x43] sm:$0x7f]  ;;  %v8589_v39 = vpop.permute.xlu0 %7957  ;;  %v675_v52 = vld [vmem:[#allocation2 + $0x52] sm:$0x7f]  ;;  %vm1843_vm9 = vcmask 1042434  }
 0x12a   :  { %943 = vrot.lane.b32.xlu1 %v631_v30, %s8017_s18  ;;  %v337_v10 = vsel %vm321_vm1, %v320_v60, %v223_v12  ;;  %v8574_v33 = vpop.permute.xlu2 %7952  ;;  %v800_v30 = vld [vmem:[#allocation2 + $0x43] sm:$0x7f]  ;;  %576 = vst [vmem:[#allocation2 + $0x61] sm:$0xff] %v518_v28  ;;  %v787_v21 = vld [vmem:[#allocation2 + $0x52] sm:$0x7f] }
 0x12b   :  { %1109 = vrot.lane.b32.xlu0 %v672_v31, %s8021_s22  ;;  %v354_v15 = vsel %vm338_vm2, %v337_v10, %v287_v2  ;;  %v660_v44 = vld [vmem:[#allocation2 + $0x41] sm:$0x7f]  ;;  %v731_v10 = vld [vmem:[#allocation2 + $0x52] sm:$0x7f] }
 0x12c   :  { %831 = vrot.lane.b32.xlu2 %v603_v41, %s8016_s17  ;;  %7902 = vmatmul.msk.f32.gmra.mxu0 %vm13028_vm3, %v354_v15  ;;  %v646_v41 = vld [vmem:[#allocation2 + $0x40] sm:$0x7f]  ;;  %v451_v46 = vpop.f32.mrf.mxu0  ;;  %v661_v13 = vld [vmem:[#allocation2 + $0x51] sm:$0x7f] }
 0x12d   :  { %v452_v47 = vadd.f32 %v8466_v29, %v451_v46  ;;  %v647_v23 = vld [vmem:[#allocation2 + $0x50] sm:$0x7f] }
 0x12f   :  { %vm487_vm10 = vcmp.ge.f32.partialorder %v452_v47, 0.0 }
 0x131   :  { %v760_v57 = vld [vmem:[#allocation2 + $0x60] sm:$0x7f] }
 0x132   :  { %1387 = vrot.lane.b32.xlu1 %v757_v40, %s8020_s2  ;;  %v802_v3 = vld [vmem:[#allocation2 + $0x63] sm:$0x7f] }
 0x133   :  { %1165 = vrot.lane.b32.xlu0 %v686_v42, %s8023_s26  ;;  %v759_v42 = vld [vmem:[#allocation2 + $0x50] sm:$0x7f]  ;;  %v718_v11 = vld [vmem:[#allocation2 + $0x61] sm:$0x7f] }
 0x134   :  { %887 = vrot.lane.b32.xlu2 %v617_v43, %s8018_s21  ;;  %v773_v43 = vld [vmem:[#allocation2 + $0x51] sm:$0x7f]  ;;  %v454_v1 = vpop.f32.mrf.mxu0 }
 0x135   :  { %v455_v2 = vadd.f32 %v8466_v29, %v454_v1  ;;  %v700_v1 = vld [vmem:[#allocation2 + $0x20] sm:$0x7f] }
 0x137   :  { %vm488_vm11 = vcmp.ge.f32.partialorder %v455_v2, 0.0 }
 0x13a   :  { %1333 = vrot.lane.b32.xlu1 %v743_v48, %s8017_s18  ;;  %v503_v48 = vmul.f32 0.2, %v452_v47 }
 0x13b   :  { %1221 = vrot.lane.b32.xlu0 %v715_v50, %s8016_s17  ;;  %v688_v50 = vld [vmem:[#allocation2 + $0x43] sm:$0x7f] }
 0x13c   :  { %1443 = vrot.lane.b32.xlu2 %v771_v51, %s8022_s23  ;;  %v801_v51 = vld [vmem:[#allocation2 + $0x53] sm:$0x7f]  ;;  %v519_v56 = vsel %vm487_vm10, %v452_v47, %v503_v48  ;;  %v457_v9 = vpop.f32.mrf.mxu0  ;;  %vm13025_vm10 = vcmask 1043459  }
 0x13d   :  { %577 = vst [vmem:[#allocation2 + $0x71] sm:$0xff] %v519_v56  ;;  %v458_v12 = vadd.f32 %v8466_v29, %v457_v9 }
 0x13f   :  { %vm489_vm12 = vcmp.ge.f32.partialorder %v458_v12, 0.0  ;;  %v505_v15 = vmul.f32 0.2, %v458_v12 }
 0x142   :  { %1555 = vrot.lane.b32.xlu1 %v799_v59, %s8023_s26  ;;  %v605_v59 = vld [vmem:[#allocation2 + $0x41] sm:$0x7f] }
 0x143   :  { %1277 = vrot.lane.b32.xlu0 %v729_v61, %s8018_s21  ;;  %v717_v61 = vld [vmem:[#allocation2 + $0x51] sm:$0x7f] }
 0x144   :  { %1055 = vrot.lane.b32.xlu2 %v659_v63, %s8022_s23  ;;  %v460_v24 = vpop.f32.mrf.mxu0 }
 0x14a   :  { %1111 = vrot.lane.b32.xlu1 %v673_v4, %s8021_s22  ;;  %v745_v4 = vld [vmem:[#allocation2 + $0x53] sm:$0x7f] }
 0x14b   :  { %1499 = vrot.lane.b32.xlu0 %v785_v5, %s8021_s22  ;;  %v504_v5 = vmul.f32 0.2, %v455_v2 }
 0x14c   :  { %1167 = vrot.lane.b32.xlu2 %v687_v6, %s8023_s26 }
 0x14d   :  { %v520_v6 = vsel %vm488_vm11, %v455_v2, %v504_v5  ;;  %v2038_v5 = vld [vmem:[%s13011_s3 + $0x58] sm:$0xff]  ;;  %vm1849_vm11 = vcmask 1044484  }
 0x14e   :  { %578 = vst [vmem:[#allocation2 + $0x81] sm:$0xff] %v520_v6  ;;  %v7954_v6 = vunpack.i.l.bf16 %v8574_v33 }
 0x152   :  { %889 = vrot.lane.b32.xlu1 %v618_v16, %s8018_s21 }
 0x153   :  { %999 = vrot.lane.b32.xlu0 %v645_v17, %s8020_s2 }
 0x154   :  { %833 = vrot.lane.b32.xlu2 %v604_v62, %s8016_s17  ;;  %v521_v62 = vsel %vm489_vm12, %v458_v12, %v505_v15  ;;  %v2054_v12 = vld [vmem:[%s13011_s3 + $0xd8] sm:$0xff]  ;;  %v2037_v15 = vld [vmem:[%s13011_s3 + $0x50] sm:$0xff] }
 0x155   :  { %579 = vst [vmem:[#allocation2 + $0xb1] sm:$0xff] %v521_v62 }
 0x15a   :  { %1501 = vrot.lane.b32.xlu1 %v786_v20, %s8021_s22 }
 0x15b   :  { %945 = vrot.lane.b32.xlu0 %v632_v14, %s8017_s18  ;;  %v788_v14 = vld [vmem:[#allocation2 + $0x62] sm:$0x7f] }
 0x15c   :  { %1389 = vrot.lane.b32.xlu2 %v758_v22, %s8020_s2  ;;  %v746_v22 = vld [vmem:[#allocation2 + $0x63] sm:$0x7f] }
 0x162   :  { %1223 = vrot.lane.b32.xlu1 %v716_v26, %s8016_s17 }
 0x163   :  { %1445 = vrot.lane.b32.xlu0 %v772_v27, %s8022_s23  ;;  %v461_v27 = vadd.f32 %v8466_v29, %v460_v24 }
 0x164   :  { %1557 = vrot.lane.b32.xlu2 %v800_v30, %s8023_s26 }
 0x165   :  { %v506_v30 = vmul.f32 0.2, %v461_v27  ;;  %vm490_vm13 = vcmp.ge.f32.partialorder %v461_v27, 0.0 }
 0x166   :  { %v8580_v31 = vpop.permute.xlu2 %829 }
 0x16a   :  { %1279 = vrot.lane.b32.xlu1 %v730_v32, %s8018_s21  ;;  %v774_v32 = vld [vmem:[#allocation2 + $0x61] sm:$0x7f] }
 0x16b   :  { %1113 = vrot.lane.b32.xlu0 %v674_v34, %s8021_s22  ;;  %v789_v34 = vld [vmem:[#allocation2 + $0x72] sm:$0x7f] }
 0x16c   :  { %1001 = vrot.lane.b32.xlu2 %v646_v41, %s8020_s2  ;;  %v522_v41 = vsel %vm490_vm13, %v461_v27, %v506_v30  ;;  %v2036_v30 = vld [vmem:[%s13011_s3 + $0x48] sm:$0xff]  ;;  %vm1852_vm13 = vcmask 1045509  }
 0x16d   :  { %580 = vst [vmem:[#allocation2 + $0xc1] sm:$0xff] %v522_v41  ;;  %v2052_v41 = vld [vmem:[%s13011_s3 + $0xc8] sm:$0xff] }
 0x16e   :  { %v8585_v35 = vpop.permute.xlu2 %1051 }
 0x172   :  { %1335 = vrot.lane.b32.xlu1 %v744_v36, %s8017_s18  ;;  %v732_v36 = vld [vmem:[#allocation2 + $0x62] sm:$0x7f] }
 0x173   :  { %891 = vrot.lane.b32.xlu0 %v619_v37, %s8018_s21  ;;  %v2042_v37 = vld [vmem:[%s13011_s3 + $0x78] sm:$0xff] }
 0x174   :  { %947 = vrot.lane.b32.xlu2 %v633_v38, %s8017_s18  ;;  %v2058_v38 = vld [vmem:[%s13011_s3 + $0xf8] sm:$0xff]  ;;  %2216 = vmatpush.msra.mxu1 %v2042_v37  ;;  %v2035_v37 = vld [vmem:[%s13011_s3 + $0x40] sm:$0xff] }
 0x175   :  { %2272 = vmatpush.msra.mxu2 %v2058_v38 }
 0x176   :  { %v8592_v40 = vpop.permute.xlu2 %997 }
 0x17a   :  { %1057 = vrot.lane.b32.xlu1 %v660_v44, %s8022_s23  ;;  %v2057_v44 = vld [vmem:[%s13011_s3 + $0xf0] sm:$0xff] }
 0x17b   :  { %1391 = vrot.lane.b32.xlu0 %v759_v42, %s8020_s2  ;;  %v2041_v42 = vld [vmem:[%s13011_s3 + $0x70] sm:$0xff]  ;;  %2273 = vmatpush.msra.mxu2 %v2057_v44  ;;  %v689_v44 = vld [vmem:[#allocation2 + $0x53] sm:$0x7f] }
 0x17c   :  { %1447 = vrot.lane.b32.xlu2 %v773_v43, %s8022_s23  ;;  %v8597_v45 = vpop.permute.xlu1 %995  ;;  %v463_v43 = vpop.f32.mrf.mxu0  ;;  %2217 = vmatpush.msra.mxu1 %v2041_v42 }
 0x17d   :  { %v8599_v49 = vpop.permute.xlu0 %885  ;;  %v464_v48 = vadd.f32 %v8466_v29, %v463_v43  ;;  %v803_v43 = vld [vmem:[#allocation2 + $0x73] sm:$0x7f] }
 0x17e   :  { %v8601_v19 = vpop.permute.xlu2 %1053 }
 0x17f   :  { %vm491_vm14 = vcmp.ge.f32.partialorder %v464_v48, 0.0  ;;  %v507_v56 = vmul.f32 0.2, %v464_v48 }
 0x181   :  { %v523_v2 = vsel %vm491_vm14, %v464_v48, %v507_v56  ;;  %v2051_v48 = vld [vmem:[%s13011_s3 + $0xc0] sm:$0xff]  ;;  %vm1855_vm14 = vcmask 1046534  }
 0x182   :  { %1169 = vrot.lane.b32.xlu1 %v688_v50, %s8023_s26  ;;  %v2040_v50 = vld [vmem:[%s13011_s3 + $0x68] sm:$0xff]  ;;  %581 = vst [vmem:[#allocation2 + $0xd1] sm:$0xff] %v523_v2 }
 0x183   :  { %1559 = vrot.lane.b32.xlu0 %v801_v51, %s8023_s26  ;;  %2218 = vmatpush.msra.mxu1 %v2040_v50  ;;  %v620_v50 = vld [vmem:[#allocation2 + $0x52] sm:$0x7f] }
 0x184   :  { %1115 = vrot.lane.b32.xlu2 %v675_v52, %s8021_s22  ;;  %v8607_v53 = vpop.permute.xlu1 %941  ;;  %v2056_v52 = vld [vmem:[%s13011_s3 + $0xe8] sm:$0xff] }
 0x185   :  { %v8609_v54 = vpop.permute.xlu0 %1107  ;;  %2274 = vmatpush.msra.mxu2 %v2056_v52  ;;  %v2050_v52 = vld [vmem:[%s13011_s3 + $0xb8] sm:$0xff] }
 0x186   :  { %v8611_v55 = vpop.permute.xlu2 %831 }
 0x18a   :  { %835 = vrot.lane.b32.xlu1 %v605_v59, %s8016_s17  ;;  %v7949_v59 = vunpack.i.l.bf16 %v8565_v18 }
 0x18b   :  { %1225 = vrot.lane.b32.xlu0 %v717_v61, %s8016_s17  ;;  %v587_v61 = vld [vmem:[#allocation2] sm:$0x7f] }
 0x18c   :  { %1393 = vrot.lane.b32.xlu2 %v760_v57, %s8020_s2  ;;  %v8616_v63 = vpop.permute.xlu1 %1275  ;;  %v2039_v57 = vld [vmem:[%s13011_s3 + $0x60] sm:$0xff] }
 0x18d   :  { %v8618_v0 = vpop.permute.xlu0 %1163  ;;  %2219 = vmatpush.msra.mxu1 %v2039_v57 }
 0x18e   :  { %v8620_v58 = vpop.permute.xlu2 %887 }
 0x18f   :  { %2220 = vmatpush.msra.mxu1 %v2038_v5 }
 0x191   :  { %2221 = vmatpush.msra.mxu1 %v2037_v15 }
 0x192   :  { %1503 = vrot.lane.b32.xlu1 %v787_v21, %s8021_s22  ;;  %v2055_v21 = vld [vmem:[%s13011_s3 + $0xe0] sm:$0xff] }
 0x193   :  { %1337 = vrot.lane.b32.xlu0 %v745_v4, %s8017_s18  ;;  %v775_v4 = vld [vmem:[#allocation2 + $0x71] sm:$0x7f]  ;;  %2275 = vmatpush.msra.mxu2 %v2055_v21 }
 0x194   :  { %1561 = vrot.lane.b32.xlu2 %v802_v3, %s8023_s26  ;;  %v8626_v7 = vpop.permute.xlu1 %1331  ;;  %v761_v3 = vld [vmem:[#allocation2 + $0x70] sm:$0x7f]  ;;  %2222 = vmatpush.msra.mxu1 %v2036_v30 }
 0x195   :  { %v8628_v8 = vpop.permute.xlu0 %1219  ;;  %2276 = vmatpush.msra.mxu2 %v2054_v12 }
 0x196   :  { %v8630_v60 = vpop.permute.xlu2 %1443  ;;  %v1698_v9 = vsel %vm304_vm0, %v700_v1, %v8628_v8  ;;  %2223 = vmatpush.msra.mxu1 %v2035_v37  ;;  %v2033_v1 = vld [vmem:[%s13011_s3 + $0x30] sm:$0xff]  ;;  %v2047_v37 = vld [vmem:[%s13011_s3 + $0xa0] sm:$0xff] }
 0x197   :  { %v1712_v24 = vsel %vm321_vm1, %v1698_v9, %v8616_v63 }
 0x198   :  { %v1726_v63 = vsel %vm338_vm2, %v1712_v24, %v8626_v7 }
 0x19a   :  { %1281 = vrot.lane.b32.xlu1 %v731_v10, %s8018_s21  ;;  %v1597_v10 = vsel %vm304_vm0, %v587_v61, %v7949_v59 }
 0x19b   :  { %1059 = vrot.lane.b32.xlu0 %v661_v13, %s8022_s23  ;;  %v466_v13 = vpop.f32.mrf.mxu0 }
 0x19c   :  { %1227 = vrot.lane.b32.xlu2 %v718_v11, %s8016_s17  ;;  %v8636_v16 = vpop.permute.xlu1 %943  ;;  %v733_v11 = vld [vmem:[#allocation2 + $0x72] sm:$0x7f] }
 0x19d   :  { %v8638_v17 = vpop.permute.xlu0 %1109 }
 0x19e   :  { %v8640_v20 = vpop.permute.xlu2 %1055 }
 0x1a2   :  { %1003 = vrot.lane.b32.xlu1 %v647_v23, %s8020_s2  ;;  %v7959_v23 = vunpack.i.l.bf16 %v8589_v39 }
 0x1a3   :  { %1505 = vrot.lane.b32.xlu0 %v788_v14, %s8021_s22  ;;  %v467_v14 = vadd.f32 %v8466_v29, %v466_v13  ;;  %v469_v56 = vpop.f32.mrf.mxu0 }
 0x1a4   :  { %1339 = vrot.lane.b32.xlu2 %v746_v22, %s8017_s18  ;;  %v8645_v25 = vpop.permute.xlu1 %1387  ;;  %v2053_v22 = vld [vmem:[%s13011_s3 + $0xd0] sm:$0xff]  ;;  %v470_v61 = vadd.f32 %v8466_v29, %v469_v56 }
 0x1a5   :  { %v8647_v26 = vpop.permute.xlu0 %1165  ;;  %vm492_vm15 = vcmp.ge.f32.partialorder %v467_v14, 0.0  ;;  %2277 = vmatpush.msra.mxu2 %v2053_v22  ;;  %v1740_v42 = vsel %vm13028_vm3, %v1726_v63, %v8645_v25  ;;  %v2034_v25 = vld [vmem:[%s13011_s3 + $0x38] sm:$0xff]  ;;  %v776_v22 = vld [vmem:[#allocation2 + $0x81] sm:$0x7f] }
 0x1a6   :  { %v8650_v28 = vpop.permute.xlu2 %1167  ;;  %v1754_v59 = vsel %vm1653_vm4, %v1740_v42, %v8630_v60  ;;  %2224 = vmatpush.msra.mxu1 %v2034_v25  ;;  %v2049_v60 = vld [vmem:[%s13011_s3 + $0xb0] sm:$0xff]  ;;  %v509_v5 = vmul.f32 0.2, %v470_v61  ;;  %vm493_vm12 = vcmp.ge.f32.partialorder %v470_v61, 0.0 }
 0x1a7   :  { %2278 = vmatpush.msra.mxu2 %v2052_v41 }
 0x1a8   :  { %2225 = vmatpush.msra.mxu1 %v2033_v1  ;;  %v525_v12 = vsel %vm493_vm12, %v470_v61, %v509_v5  ;;  %v2045_v1 = vld [vmem:[%s13011_s3 + $0x90] sm:$0xff]  ;;  %v2027_v5 = vld [vmem:[%s13011_s3] sm:$0xff] }
 0x1a9   :  { %2279 = vmatpush.msra.mxu2 %v2051_v48  ;;  %583 = vst [vmem:[#allocation2 + $0xf1] sm:$0xff] %v525_v12  ;;  %v2030_v48 = vld [vmem:[%s13011_s3 + $0x18] sm:$0xff]  ;;  %v2043_v12 = vld [vmem:[%s13011_s3 + $0x80] sm:$0xff] }
 0x1aa   :  { %1449 = vrot.lane.b32.xlu1 %v774_v32, %s8022_s23  ;;  %v1611_v32 = vsel %vm321_vm1, %v1597_v10, %v7954_v6  ;;  %v2032_v10 = vld [vmem:[%s13011_s3 + $0x28] sm:$0xff] }
 0x1ab   :  { %1283 = vrot.lane.b32.xlu0 %v732_v36, %s8018_s21  ;;  %v1625_v38 = vsel %vm338_vm2, %v1611_v32, %v7959_v23  ;;  %2280 = vmatpush.msra.mxu2 %v2050_v52  ;;  %v2046_v52 = vld [vmem:[%s13011_s3 + $0x98] sm:$0xff] }
 0x1ac   :  { %1507 = vrot.lane.b32.xlu2 %v789_v34, %s8021_s22  ;;  %v8667_v46 = vpop.permute.xlu1 %1333  ;;  %v508_v34 = vmul.f32 0.2, %v467_v14  ;;  %v1639_v7 = vsel %vm13028_vm3, %v1625_v38, %v8597_v45  ;;  %2226 = vmatpush.msra.mxu1 %v2032_v10  ;;  %v472_v38 = vpop.f32.mrf.mxu0 }
 0x1ad   :  { %v8669_v47 = vpop.permute.xlu0 %1221  ;;  %v1654_v2 = vsel %vm1653_vm4, %v1639_v7, %v8585_v35  ;;  %2281 = vmatpush.msra.mxu2 %v2049_v60  ;;  %v473_v7 = vadd.f32 %v8466_v29, %v472_v38  ;;  %v662_v60 = vld [vmem:[#allocation2 + $0x61] sm:$0x7f] }
 0x1ae   :  { %v8675_v51 = vpop.permute.xlu2 %833  ;;  %v524_v36 = vsel %vm492_vm15, %v467_v14, %v508_v34  ;;  %v1669_v35 = vsel %vm1668_vm5, %v1654_v2, %v8609_v54  ;;  %v719_v14 = vld [vmem:[#allocation2 + $0x71] sm:$0x7f]  ;;  %v2031_v34 = vld [vmem:[%s13011_s3 + $0x20] sm:$0xff]  ;;  %v762_v2 = vld [vmem:[#allocation2 + $0x80] sm:$0x7f] }
 0x1af   :  { %582 = vst [vmem:[#allocation2 + $0xe1] sm:$0xff] %v524_v36  ;;  %v1684_v9 = vsel %vm1683_vm6, %v1669_v35, %v8618_v0  ;;  %v2048_v0 = vld [vmem:[%s13011_s3 + $0xa8] sm:$0xff]  ;;  %2227 = vmatpush.msra.mxu1 %v2031_v34  ;;  %v510_v56 = vmul.f32 0.2, %v473_v7  ;;  %vm494_vm15 = vcmp.ge.f32.partialorder %v473_v7, 0.0 }
 0x1b0   :  { %2282 = vmatpush.msra.mxu2 %v2048_v0 }
 0x1b1   :  { %2228 = vmatpush.msra.mxu1 %v2030_v48  ;;  %v526_v61 = vsel %vm494_vm15, %v473_v7, %v510_v56  ;;  %v804_v56 = vld [vmem:[#allocation2 + $0x83] sm:$0x7f] }
 0x1b2   :  { %1395 = vrot.lane.b32.xlu1 %v761_v3, %s8020_s2  ;;  %2283 = vmatpush.msra.mxu2 %v2047_v37  ;;  %584 = vst [vmem:[#allocation2 + $0x101] sm:$0xff] %v526_v61 }
 0x1b3   :  { %1451 = vrot.lane.b32.xlu0 %v775_v4, %s8022_s23 }
 0x1b4   :  { %1285 = vrot.lane.b32.xlu2 %v733_v11, %s8018_s21  ;;  %v1556_v8 = vpop.permute.xlu1 %1555  ;;  %v606_v11 = vld [vmem:[#allocation2 + $0x51] sm:$0x7f]  ;;  %2284 = vmatpush.msra.mxu2 %v2046_v52  ;;  %v475_v35 = vpop.f32.mrf.mxu0 }
 0x1b5   :  { %v8703_v62 = vpop.permute.xlu0 %1277  ;;  %v476_v10 = vadd.f32 %v8466_v29, %v475_v35 }
 0x1b6   :  { %v8712_v27 = vpop.permute.xlu2 %1389  ;;  %2285 = vmatpush.msra.mxu2 %v2045_v1  ;;  %v763_v1 = vld [vmem:[#allocation2 + $0x90] sm:$0x7f] }
 0x1b7   :  { %vm495_vm12 = vcmp.ge.f32.partialorder %v476_v10, 0.0 }
 0x1ba   :  { %1563 = vrot.lane.b32.xlu1 %v803_v43, %s8023_s26 }
 0x1bb   :  { %1171 = vrot.lane.b32.xlu0 %v689_v44, %s8023_s26 }
 0x1bc   :  { %893 = vrot.lane.b32.xlu2 %v620_v50, %s8018_s21  ;;  %v8743_v45 = vpop.permute.xlu1 %1111 }
 0x1bd   :  { %v1500_v57 = vpop.permute.xlu0 %1499 }
 0x1be   :  { %v1768_v21 = vsel %vm1668_vm5, %v1754_v59, %v1500_v57  ;;  %v8754_v3 = vpop.permute.xlu2 %1557  ;;  %v2029_v57 = vld [vmem:[%s13011_s3 + $0x10] sm:$0xff]  ;;  %v747_v59 = vld [vmem:[#allocation2 + $0x73] sm:$0x7f] }
 0x1bf   :  { %v1782_v4 = vsel %vm1683_vm6, %v1768_v21, %v1556_v8  ;;  %2229 = vmatpush.msra.mxu1 %v2029_v57  ;;  %v2028_v21 = vld [vmem:[%s13011_s3 + $0x8] sm:$0xff] }
 0x1c0   :  { %v1824_v6 = vrot.slane %v1782_v4, 7  ;;  %v2044_v4 = vld [vmem:[%s13011_s3 + $0x88] sm:$0xff] }
 0x1c1   :  { %2230 = vmatpush.msra.mxu1 %v2028_v21  ;;  %2286 = vmatpush.msra.mxu2 %v2044_v4  ;;  %v607_v57 = vld [vmem:[#allocation2 + $0x61] sm:$0x7f] }
 0x1c2   :  { %v1839_v13 = vsel %vm13033_vm7, %v1684_v9, %v1824_v6  ;;  %v1841_v54 = vsel %vm13026_vm8, %v1684_v9, %v1824_v6  ;;  %v1844_v15 = vsel %vm1843_vm9, %v1684_v9, %v1824_v6  ;;  %v1847_v8 = vsel %vm13025_vm10, %v1684_v9, %v1824_v6  ;;  %1229 = vrot.lane.b32.xlu1 %v719_v14, %s8016_s17 }
 0x1c3   :  { %v1842_v23 = vrot.slane %v1841_v54, 1  ;;  %v1845_v24 = vrot.slane %v1844_v15, 2  ;;  %v1848_v30 = vrot.slane %v1847_v8, 3  ;;  %v1850_v32 = vsel %vm1849_vm11, %v1684_v9, %v1824_v6  ;;  %2059 = vst [vmem:[#allocation1] ss:$9 sm:$0xff] %v1839_v13  ;;  %837 = vrot.lane.b32.xlu0 %v606_v11, %s8016_s17  ;;  %2231 = vmatpush.msra.mxu1 %v2027_v5 }
 0x1c4   :  { %v1851_v41 = vrot.slane %v1850_v32, 4  ;;  %v1853_v63 = vsel %vm1852_vm13, %v1684_v9, %v1824_v6  ;;  %v1856_v36 = vsel %vm1855_vm14, %v1684_v9, %v1824_v6  ;;  %1453 = vrot.lane.b32.xlu2 %v776_v22, %s8022_s23  ;;  %v8786_v43 = vpop.permute.xlu1 %889  ;;  %v701_v6 = vld [vmem:[#allocation2 + $0x30] sm:$0x7f]  ;;  %v511_v14 = vmul.f32 0.2, %v476_v10  ;;  %2287 = vmatpush.msra.mxu2 %v2043_v12 }
 0x1c5   :  { %v1854_v42 = vrot.slane %v1853_v63, 5  ;;  %2061 = vst [vmem:[#allocation1 + $0x1] ss:$9 sm:$0xff] %v1842_v23  ;;  %v8788_v44 = vpop.permute.xlu0 %999  ;;  %v1857_v50 = vrot.slane %v1856_v36, 6  ;;  %v1699_v13 = vsel %vm304_vm0, %v701_v6, %v8669_v47  ;;  %v588_v15 = vld [vmem:[#allocation2 + $0x10] sm:$0x7f] }
 0x1c6   :  { %2063 = vst [vmem:[#allocation1 + $0x2] ss:$9 sm:$0xff] %v1845_v24  ;;  %v8794_v25 = vpop.permute.xlu2 %1001  ;;  %v1713_v8 = vsel %vm321_vm1, %v1699_v13, %v8703_v62  ;;  %v1598_v22 = vsel %vm304_vm0, %v588_v15, %v8580_v31  ;;  %v527_v23 = vsel %vm495_vm12, %v476_v10, %v511_v14  ;;  %v648_v32 = vld [vmem:[#allocation2 + $0x60] sm:$0x7f]  ;;  %v478_v31 = vpop.f32.mrf.mxu0 }
 0x1c7   :  { %2065 = vst [vmem:[#allocation1 + $0x3] ss:$9 sm:$0xff] %v1848_v30  ;;  %v1612_v0 = vsel %vm321_vm1, %v1598_v22, %v8599_v49  ;;  %v1727_v24 = vsel %vm338_vm2, %v1713_v8, %v8667_v46  ;;  %v634_v30 = vld [vmem:[#allocation2 + $0x53] sm:$0x7f]  ;;  %v690_v62 = vld [vmem:[#allocation2 + $0x63] sm:$0x7f] }
 0x1c8   :  { %2067 = vst [vmem:[#allocation1 + $0x4] ss:$9 sm:$0xff] %v1851_v41  ;;  %v1626_v47 = vsel %vm338_vm2, %v1612_v0, %v8607_v53  ;;  %v1741_v53 = vsel %vm13028_vm3, %v1727_v24, %v8712_v27  ;;  %v479_v41 = vadd.f32 %v8466_v29, %v478_v31  ;;  %v649_v24 = vld [vmem:[#allocation2 + $0x70] sm:$0x7f] }
 0x1c9   :  { %2069 = vst [vmem:[#allocation1 + $0x5] ss:$9 sm:$0xff] %v1854_v42  ;;  %v1640_v49 = vsel %vm13028_vm3, %v1626_v47, %v8592_v40  ;;  %v748_v47 = vld [vmem:[#allocation2 + $0x83] sm:$0x7f]  ;;  %v805_v31 = vld [vmem:[#allocation2 + $0x93] sm:$0x7f] }
 0x1ca   :  { %2071 = vst [vmem:[#allocation1 + $0x6] ss:$9 sm:$0xff] %v1857_v50  ;;  %1341 = vrot.lane.b32.xlu1 %v747_v59, %s8017_s18  ;;  %vm496_vm15 = vcmp.ge.f32.partialorder %v479_v41, 0.0  ;;  %v512_v38 = vmul.f32 0.2, %v479_v41  ;;  %v1655_v42 = vsel %vm1653_vm4, %v1640_v49, %v8601_v19 }
 0x1cb   :  { %1397 = vrot.lane.b32.xlu0 %v762_v2, %s8020_s2  ;;  %585 = vst [vmem:[#allocation2 + $0x111] sm:$0xff] %v527_v23  ;;  %v1670_v27 = vsel %vm1668_vm5, %v1655_v42, %v8638_v17  ;;  %v790_v50 = vld [vmem:[#allocation2 + $0x82] sm:$0x7f] }
 0x1cc   :  { %1061 = vrot.lane.b32.xlu2 %v662_v60, %s8022_s23  ;;  %v1502_v9 = vpop.permute.xlu1 %1501  ;;  %v528_v7 = vsel %vm496_vm15, %v479_v41, %v512_v38  ;;  %v1685_v29 = vsel %vm1683_vm6, %v1670_v27, %v8647_v26  ;;  %v676_v60 = vld [vmem:[#allocation2 + $0x62] sm:$0x7f]  ;;  %v791_v38 = vld [vmem:[#allocation2 + $0x92] sm:$0x7f] }
 0x1cd   :  { %v8817_v11 = vpop.permute.xlu0 %945  ;;  %586 = vst [vmem:[#allocation2 + $0x121] sm:$0xff] %v528_v7  ;;  %v734_v23 = vld [vmem:[#allocation2 + $0x82] sm:$0x7f] }
 0x1ce   :  { %v8825_v54 = vpop.permute.xlu2 %947  ;;  %v621_v49 = vld [vmem:[#allocation2 + $0x62] sm:$0x7f] }
 0x1cf   :  { %v721_v42 = vld [vmem:[#allocation2 + $0xc1] sm:$0x7f] }
 0x1d2   :  { %949 = vrot.lane.b32.xlu1 %v634_v30, %s8017_s18 }
 0x1d3   :  { %1005 = vrot.lane.b32.xlu0 %v648_v32, %s8020_s2 }
 0x1d4   :  { %1173 = vrot.lane.b32.xlu2 %v690_v62, %s8023_s26  ;;  %v8844_v34 = vpop.permute.xlu1 %1223 }
 0x1d5   :  { %v1446_v46 = vpop.permute.xlu0 %1445 }
 0x1d6   :  { %v1755_v63 = vsel %vm1653_vm4, %v1741_v53, %v1446_v46  ;;  %v8848_v36 = vpop.permute.xlu2 %1447  ;;  %v635_v53 = vld [vmem:[#allocation2 + $0x63] sm:$0x7f] }
 0x1d7   :  { %v1769_v37 = vsel %vm1668_vm5, %v1755_v63, %v1502_v9  ;;  %v720_v9 = vld [vmem:[#allocation2 + $0x81] sm:$0x7f] }
 0x1d8   :  { %v1783_v40 = vsel %vm1683_vm6, %v1769_v37, %v8754_v3  ;;  %v777_v37 = vld [vmem:[#allocation2 + $0x91] sm:$0x7f] }
 0x1d9   :  { %v1825_v48 = vrot.slane %v1783_v40, 7  ;;  %v589_v40 = vld [vmem:[#allocation2 + $0x20] sm:$0x7f] }
 0x1da   :  { %1509 = vrot.lane.b32.xlu1 %v790_v50, %s8021_s22  ;;  %v1599_v27 = vsel %vm304_vm0, %v589_v40, %v8611_v55  ;;  %v702_v50 = vld [vmem:[#allocation2 + $0x40] sm:$0x7f] }
 0x1db   :  { %v1858_v52 = vsel %vm13033_vm7, %v1685_v29, %v1825_v48  ;;  %1565 = vrot.lane.b32.xlu0 %v804_v56, %s8023_s26  ;;  %v1859_v26 = vsel %vm13026_vm8, %v1685_v29, %v1825_v48  ;;  %v1861_v59 = vsel %vm1843_vm9, %v1685_v29, %v1825_v48  ;;  %v1863_v61 = vsel %vm13025_vm10, %v1685_v29, %v1825_v48 }
 0x1dc   :  { %2073 = vst [vmem:[#allocation1 + $0x7] ss:$9 sm:$0xff] %v1858_v52  ;;  %839 = vrot.lane.b32.xlu2 %v607_v57, %s8016_s17  ;;  %v8863_v19 = vpop.permute.xlu1 %1279  ;;  %v1860_v2 = vrot.slane %v1859_v26, 1  ;;  %v1865_v21 = vsel %vm1849_vm11, %v1685_v29, %v1825_v48  ;;  %v1862_v4 = vrot.slane %v1861_v59, 2  ;;  %v1867_v5 = vsel %vm1852_vm13, %v1685_v29, %v1825_v48 }
 0x1dd   :  { %v8865_v17 = vpop.permute.xlu0 %1113  ;;  %v1864_v12 = vrot.slane %v1863_v61, 3  ;;  %v1869_v10 = vsel %vm1855_vm14, %v1685_v29, %v1825_v48  ;;  %v1866_v13 = vrot.slane %v1865_v21, 4  ;;  %v1868_v14 = vrot.slane %v1867_v5, 5 }
 0x1de   :  { %v8867_v3 = vpop.permute.xlu2 %1115  ;;  %v1870_v0 = vrot.slane %v1869_v10, 6  ;;  %v1613_v29 = vsel %vm321_vm1, %v1599_v27, %v8620_v58  ;;  %v1700_v57 = vsel %vm304_vm0, %v702_v50, %v8844_v34  ;;  %v663_v58 = vld [vmem:[#allocation2 + $0x71] sm:$0x7f] }
 0x1df   :  { %v1627_v56 = vsel %vm338_vm2, %v1613_v29, %v8636_v16  ;;  %v1714_v55 = vsel %vm321_vm1, %v1700_v57, %v8863_v19  ;;  %v677_v16 = vld [vmem:[#allocation2 + $0x72] sm:$0x7f] }
 0x1e0   :  { %v1641_v26 = vsel %vm13028_vm3, %v1627_v56, %v8788_v44 }
 0x1e2   :  { %1117 = vrot.lane.b32.xlu1 %v676_v60, %s8021_s22 }
 0x1e3   :  { %v2074_v35 = vld [vmem:[#allocation1] sm:$0xff]  ;;  %v2075_v6 = vld [vmem:[#allocation1 + $0x9] sm:$0xff]  ;;  %1231 = vrot.lane.b32.xlu0 %v720_v9, %s8016_s17 }
 0x1e4   :  { %2076 = vst [vmem:[#allocation1] ss:$9 sm:$0xff] %v1860_v2  ;;  %1399 = vrot.lane.b32.xlu2 %v763_v1, %s8020_s2  ;;  %2232 = vmatmul.f32.vlgmr.msra.gmra.mxu1 %v2074_v35  ;;  %v1336_v15 = vpop.permute.xlu1 %1335  ;;  %v1656_v1 = vsel %vm1653_vm4, %v1641_v26, %v8640_v20  ;;  %v764_v2 = vld [vmem:[#allocation2 + $0xd0] sm:$0x7f] }
 0x1e5   :  { %2077 = vst [vmem:[#allocation1 + $0x1] ss:$9 sm:$0xff] %v1862_v4  ;;  %2288 = vmatmul.f32.vlgmr.msra.gmra.mxu2 %v2075_v6  ;;  %v8878_v8 = vpop.permute.xlu0 %891  ;;  %v1728_v59 = vsel %vm338_vm2, %v1714_v55, %v1336_v15  ;;  %v1671_v21 = vsel %vm1668_vm5, %v1656_v1, %v8743_v45  ;;  %v792_v45 = vld [vmem:[#allocation2 + $0xd2] sm:$0x7f] }
 0x1e6   :  { %2078 = vst [vmem:[#allocation1 + $0x2] ss:$9 sm:$0xff] %v1864_v12  ;;  %v8880_v22 = vpop.permute.xlu2 %1393  ;;  %v1686_v35 = vsel %vm1683_vm6, %v1671_v21, %v8650_v28  ;;  %v691_v12 = vld [vmem:[#allocation2 + $0x73] sm:$0x7f] }
 0x1e7   :  { %2079 = vst [vmem:[#allocation1 + $0x3] ss:$9 sm:$0xff] %v1866_v13  ;;  %v590_v26 = vld [vmem:[#allocation2 + $0x30] sm:$0x7f] }
 0x1e8   :  { %2080 = vst [vmem:[#allocation1 + $0x4] ss:$9 sm:$0xff] %v1868_v14 }
 0x1e9   :  { %2081 = vst [vmem:[#allocation1 + $0x5] ss:$9 sm:$0xff] %v1870_v0 }
 0x1ea   :  { %1287 = vrot.lane.b32.xlu1 %v734_v23, %s8018_s21 }
 0x1eb   :  { %1343 = vrot.lane.b32.xlu0 %v748_v47, %s8017_s18  ;;  %v749_v47 = vld [vmem:[#allocation2 + $0xc3] sm:$0x7f] }
 0x1ec   :  { %1007 = vrot.lane.b32.xlu2 %v649_v24, %s8020_s2  ;;  %v8885_v30 = vpop.permute.xlu1 %1057 }
 0x1ed   :  { %v1392_v32 = vpop.permute.xlu0 %1391 }
 0x1ee   :  { %v8887_v62 = vpop.permute.xlu2 %1561  ;;  %v1742_v61 = vsel %vm13028_vm3, %v1728_v59, %v1392_v32 }
 0x1ef   :  { %v1756_v34 = vsel %vm1653_vm4, %v1742_v61, %v8848_v36  ;;  %v735_v36 = vld [vmem:[#allocation2 + $0xc2] sm:$0x7f]  ;;  %v1600_v61 = vsel %vm304_vm0, %v590_v26, %v8675_v51 }
 0x1f2   :  { %895 = vrot.lane.b32.xlu1 %v621_v49, %s8018_s21  ;;  %v678_v49 = vld [vmem:[#allocation2 + $0xb2] sm:$0x7f] }
 0x1f3   :  { %951 = vrot.lane.b32.xlu0 %v635_v53, %s8017_s18 }
 0x1f4   :  { %1567 = vrot.lane.b32.xlu2 %v805_v31, %s8023_s26  ;;  %v8892_v46 = vpop.permute.xlu1 %1169  ;;  %v778_v31 = vld [vmem:[#allocation2 + $0xd1] sm:$0x7f] }
 0x1f5   :  { %v1560_v41 = vpop.permute.xlu0 %1559 }
 0x1f6   :  { %v8894_v63 = vpop.permute.xlu2 %1227 }
 0x1fa   :  { %1455 = vrot.lane.b32.xlu1 %v777_v37, %s8022_s23 }
 0x1fb   :  { %1511 = vrot.lane.b32.xlu0 %v791_v38, %s8021_s22 }
 0x1fc   :  { %1233 = vrot.lane.b32.xlu2 %v721_v42, %s8016_s17  ;;  %v8901_v48 = vpop.permute.xlu1 %835  ;;  %v703_v42 = vld [vmem:[#allocation2 + $0x50] sm:$0x7f] }
 0x1fd   :  { %v8903_v7 = vpop.permute.xlu0 %1225 }
 0x1fe   :  { %v8907_v52 = vpop.permute.xlu2 %1339  ;;  %v1701_v50 = vsel %vm304_vm0, %v703_v42, %v8903_v7 }
 0x202   :  { %1063 = vrot.lane.b32.xlu1 %v663_v58, %s8022_s23  ;;  %v1614_v58 = vsel %vm321_vm1, %v1600_v61, %v8786_v43 }
 0x203   :  { %1119 = vrot.lane.b32.xlu0 %v677_v16, %s8021_s22  ;;  %v1628_v7 = vsel %vm338_vm2, %v1614_v58, %v8817_v11  ;;  %v650_v16 = vld [vmem:[#allocation2 + $0xb0] sm:$0x7f] }
 0x204   :  { %1401 = vrot.lane.b32.xlu2 %v764_v2, %s8020_s2  ;;  %v1504_v44 = vpop.permute.xlu1 %1503  ;;  %v664_v2 = vld [vmem:[#allocation2 + $0xb1] sm:$0x7f]  ;;  %v1642_v51 = vsel %vm13028_vm3, %v1628_v7, %v8794_v25 }
 0x205   :  { %v1338_v19 = vpop.permute.xlu0 %1337  ;;  %v1770_v60 = vsel %vm1668_vm5, %v1756_v34, %v1504_v44  ;;  %v736_v44 = vld [vmem:[#allocation2 + $0xd2] sm:$0x7f]  ;;  %v1657_v11 = vsel %vm1653_vm4, %v1642_v51, %v8885_v30 }
 0x206   :  { %v8929_v4 = vpop.permute.xlu2 %1507  ;;  %v1784_v20 = vsel %vm1683_vm6, %v1770_v60, %v1560_v41  ;;  %v1672_v25 = vsel %vm1668_vm5, %v1657_v11, %v8865_v17 }
 0x207   :  { %v1826_v5 = vrot.slane %v1784_v20, 7 }
 0x209   :  { %v1871_v6 = vsel %vm13033_vm7, %v1686_v35, %v1826_v5  ;;  %v1872_v9 = vsel %vm13026_vm8, %v1686_v35, %v1826_v5  ;;  %v1874_v14 = vsel %vm1843_vm9, %v1686_v35, %v1826_v5  ;;  %v1876_v0 = vsel %vm13025_vm10, %v1686_v35, %v1826_v5 }
 0x20a   :  { %v1873_v10 = vrot.slane %v1872_v9, 1  ;;  %2082 = vst [vmem:[#allocation1 + $0x6] ss:$9 sm:$0xff] %v1871_v6  ;;  %1175 = vrot.lane.b32.xlu1 %v691_v12, %s8023_s26  ;;  %v1878_v23 = vsel %vm1849_vm11, %v1686_v35, %v1826_v5  ;;  %v1875_v24 = vrot.slane %v1874_v14, 2  ;;  %v1880_v32 = vsel %vm1852_vm13, %v1686_v35, %v1826_v5  ;;  %v591_v6 = vld [vmem:[#allocation2 + $0x40] sm:$0x7f] }
 0x20b   :  { %1289 = vrot.lane.b32.xlu0 %v735_v36, %s8018_s21  ;;  %v1877_v53 = vrot.slane %v1876_v0, 3  ;;  %v1882_v41 = vsel %vm1855_vm14, %v1686_v35, %v1826_v5  ;;  %v1879_v40 = vrot.slane %v1878_v23, 4  ;;  %v1881_v56 = vrot.slane %v1880_v32, 5  ;;  %v704_v35 = vld [vmem:[#allocation2 + $0x60] sm:$0x7f] }
 0x20c   :  { %1513 = vrot.lane.b32.xlu2 %v792_v45, %s8021_s22  ;;  %2083 = vst [vmem:[#allocation1 + $0x7] ss:$9 sm:$0xff] %v1873_v10  ;;  %v1282_v13 = vpop.permute.xlu1 %1281  ;;  %v1883_v55 = vrot.slane %v1882_v41, 6  ;;  %v1702_v30 = vsel %vm304_vm0, %v704_v35, %v8894_v63  ;;  %v1601_v12 = vsel %vm304_vm0, %v591_v6, %v8901_v48  ;;  %v806_v36 = vld [vmem:[#allocation2 + $0xd3] sm:$0x7f] }
 0x20d   :  { %v8939_v15 = vpop.permute.xlu0 %1059  ;;  %v1715_v59 = vsel %vm321_vm1, %v1701_v50, %v1282_v13  ;;  %v692_v13 = vld [vmem:[#allocation2 + $0xb3] sm:$0x7f]  ;;  %v1615_v63 = vsel %vm321_vm1, %v1601_v12, %v8878_v8  ;;  %v610_v12 = vld [vmem:[#allocation2 + $0xc1] sm:$0x7f] }
 0x20e   :  { %v8941_v28 = vpop.permute.xlu2 %1285  ;;  %v1729_v1 = vsel %vm338_vm2, %v1715_v59, %v1338_v19  ;;  %v750_v14 = vld [vmem:[#allocation2 + $0xd3] sm:$0x7f] }
 0x20f   :  { %v1743_v43 = vsel %vm13028_vm3, %v1729_v1, %v8880_v22  ;;  %v1687_v22 = vsel %vm1683_vm6, %v1672_v25, %v8892_v46  ;;  %v722_v41 = vld [vmem:[#allocation2 + $0xd1] sm:$0x7f] }
 0x212   :  { %1345 = vrot.lane.b32.xlu1 %v749_v47, %s8017_s18 }
 0x213   :  { %v2084_v37 = vld [vmem:[#allocation1] sm:$0xff]  ;;  %v2085_v38 = vld [vmem:[#allocation1 + $0x9] sm:$0xff]  ;;  %1457 = vrot.lane.b32.xlu0 %v778_v31, %s8022_s23  ;;  %v1629_v31 = vsel %vm338_vm2, %v1615_v63, %v8825_v54 }
 0x214   :  { %1121 = vrot.lane.b32.xlu2 %v678_v49, %s8021_s22  ;;  %2086 = vst [vmem:[#allocation1] ss:$9 sm:$0xff] %v1875_v24  ;;  %v8951_v27 = vpop.permute.xlu1 %1003  ;;  %2235 = vmatmul.f32.gmra.mxu1 %v2084_v37  ;;  %v637_v63 = vld [vmem:[#allocation2 + $0xb3] sm:$0x7f] }
 0x215   :  { %v1506_v29 = vpop.permute.xlu0 %1505  ;;  %2291 = vmatmul.f32.gmra.mxu2 %v2085_v38  ;;  %2087 = vst [vmem:[#allocation1 + $0x1] ss:$9 sm:$0xff] %v1877_v53  ;;  %v1643_v49 = vsel %vm13028_vm3, %v1629_v31, %v8951_v27  ;;  %v765_v38 = vld [vmem:[#allocation2 + $0xe0] sm:$0x7f] }
 0x216   :  { %v8955_v57 = vpop.permute.xlu2 %893  ;;  %2088 = vst [vmem:[#allocation1 + $0x2] ss:$9 sm:$0xff] %v1879_v40  ;;  %v1658_v42 = vsel %vm1653_vm4, %v1643_v49, %v8939_v15 }
 0x217   :  { %2089 = vst [vmem:[#allocation1 + $0x3] ss:$9 sm:$0xff] %v1881_v56  ;;  %v1673_v1 = vsel %vm1668_vm5, %v1658_v42, %v8867_v3  ;;  %v766_v42 = vld [vmem:[#allocation2 + $0xf0] sm:$0x7f] }
 0x218   :  { %2090 = vst [vmem:[#allocation1 + $0x4] ss:$9 sm:$0xff] %v1883_v55 }
 0x21a   :  { %1009 = vrot.lane.b32.xlu1 %v650_v16, %s8020_s2 }
 0x21b   :  { %1065 = vrot.lane.b32.xlu0 %v664_v2, %s8022_s23 }
 0x21c   :  { %1291 = vrot.lane.b32.xlu2 %v736_v44, %s8018_s21  ;;  %v1450_v34 = vpop.permute.xlu1 %1449 }
 0x21d   :  { %v1284_v21 = vpop.permute.xlu0 %1283  ;;  %v1757_v19 = vsel %vm1653_vm4, %v1743_v43, %v1450_v34  ;;  %v723_v43 = vld [vmem:[#allocation2 + $0xe1] sm:$0x7f] }
 0x21e   :  { %v8975_v60 = vpop.permute.xlu2 %1453  ;;  %v1771_v20 = vsel %vm1668_vm5, %v1757_v19, %v1506_v29  ;;  %v1716_v17 = vsel %vm321_vm1, %v1702_v30, %v1284_v21  ;;  %v623_v19 = vld [vmem:[#allocation2 + $0xb2] sm:$0x7f] }
 0x21f   :  { %v1785_v5 = vsel %vm1683_vm6, %v1771_v20, %v8887_v62  ;;  %v1730_v47 = vsel %vm338_vm2, %v1716_v17, %v8907_v52  ;;  %v609_v52 = vld [vmem:[#allocation2 + $0xb1] sm:$0x7f]  ;;  %v751_v20 = vld [vmem:[#allocation2 + $0xe3] sm:$0x7f] }
 0x220   :  { %v1827_v9 = vrot.slane %v1785_v5, 7 }
 0x222   :  { %v1884_v10 = vsel %vm13033_vm7, %v1687_v22, %v1827_v9  ;;  %v1885_v62 = vsel %vm13026_vm8, %v1687_v22, %v1827_v9  ;;  %v1887_v45 = vsel %vm1843_vm9, %v1687_v22, %v1827_v9  ;;  %1569 = vrot.lane.b32.xlu1 %v806_v36, %s8023_s26  ;;  %v1889_v53 = vsel %vm13025_vm10, %v1687_v22, %v1827_v9  ;;  %v651_v36 = vld [vmem:[#allocation2 + $0xc0] sm:$0x7f] }
 0x223   :  { %v1886_v46 = vrot.slane %v1885_v62, 1  ;;  %v1888_v0 = vrot.slane %v1887_v45, 2  ;;  %2091 = vst [vmem:[#allocation1 + $0x5] ss:$9 sm:$0xff] %v1884_v10  ;;  %1177 = vrot.lane.b32.xlu0 %v692_v13, %s8023_s26  ;;  %v1891_v37 = vsel %vm1849_vm11, %v1687_v22, %v1827_v9  ;;  %v1893_v40 = vsel %vm1852_vm13, %v1687_v22, %v1827_v9 }
 0x224   :  { %1347 = vrot.lane.b32.xlu2 %v750_v14, %s8017_s18  ;;  %v1396_v48 = vpop.permute.xlu1 %1395  ;;  %v1890_v54 = vrot.slane %v1889_v53, 3  ;;  %v1895_v27 = vsel %vm1855_vm14, %v1687_v22, %v1827_v9  ;;  %v1892_v26 = vrot.slane %v1891_v37, 4  ;;  %v1894_v58 = vrot.slane %v1893_v40, 5  ;;  %v737_v22 = vld [vmem:[#allocation2 + $0xe2] sm:$0x7f] }
 0x225   :  { %v1452_v23 = vpop.permute.xlu0 %1451  ;;  %2092 = vst [vmem:[#allocation1 + $0x6] ss:$9 sm:$0xff] %v1886_v46  ;;  %v1744_v32 = vsel %vm13028_vm3, %v1730_v47, %v1396_v48  ;;  %v1896_v16 = vrot.slane %v1895_v27, 6  ;;  %v779_v48 = vld [vmem:[#allocation2 + $0xe1] sm:$0x7f] }
 0x226   :  { %v8999_v24 = vpop.permute.xlu2 %1061  ;;  %2093 = vst [vmem:[#allocation1 + $0x7] ss:$9 sm:$0xff] %v1888_v0  ;;  %v1758_v8 = vsel %vm1653_vm4, %v1744_v32, %v1452_v23  ;;  %v638_v23 = vld [vmem:[#allocation2 + $0xc3] sm:$0x7f]  ;;  %v705_v47 = vld [vmem:[#allocation2 + $0x70] sm:$0x7f] }
 0x227   :  { %v1772_v50 = vsel %vm1668_vm5, %v1758_v8, %v8929_v4  ;;  %v592_v37 = vld [vmem:[#allocation2 + $0x50] sm:$0x7f]  ;;  %v807_v40 = vld [vmem:[#allocation2 + $0xe3] sm:$0x7f] }
 0x22a   :  { %1235 = vrot.lane.b32.xlu1 %v722_v41, %s8016_s17 }
 0x22b   :  { %843 = vrot.lane.b32.xlu0 %v609_v52, %s8016_s17  ;;  %v624_v52 = vld [vmem:[#allocation2 + $0xc2] sm:$0x7f] }
 0x22c   :  { %1403 = vrot.lane.b32.xlu2 %v765_v38, %s8020_s2  ;;  %v1564_v29 = vpop.permute.xlu1 %1563 }
 0x22d   :  { %v1172_v56 = vpop.permute.xlu0 %1171  ;;  %v2094_v55 = vld [vmem:[#allocation1] sm:$0xff]  ;;  %v2095_v59 = vld [vmem:[#allocation1 + $0x9] sm:$0xff]  ;;  %v1786_v61 = vsel %vm1683_vm6, %v1772_v50, %v1564_v29 }
 0x22e   :  { %v9019_v15 = vpop.permute.xlu2 %1173  ;;  %2096 = vst [vmem:[#allocation1] ss:$9 sm:$0xff] %v1890_v54  ;;  %v1828_v7 = vrot.slane %v1786_v61, 7  ;;  %2238 = vmatmul.f32.gmra.mxu1 %v2094_v55  ;;  %2294 = vmatmul.f32.gmra.mxu2 %v2095_v59  ;;  %v1688_v4 = vsel %vm1683_vm6, %v1673_v1, %v1172_v56  ;;  %v793_v61 = vld [vmem:[#allocation2 + $0xe2] sm:$0x7f] }
 0x22f   :  { %2097 = vst [vmem:[#allocation1 + $0x1] ss:$9 sm:$0xff] %v1892_v26  ;;  %v794_v1 = vld [vmem:[#allocation2 + $0xf2] sm:$0x7f] }
 0x230   :  { %2098 = vst [vmem:[#allocation1 + $0x2] ss:$9 sm:$0xff] %v1894_v58  ;;  %v1897_v2 = vsel %vm13033_vm7, %v1688_v4, %v1828_v7  ;;  %v1898_v44 = vsel %vm13026_vm8, %v1688_v4, %v1828_v7  ;;  %v1900_v51 = vsel %vm1843_vm9, %v1688_v4, %v1828_v7  ;;  %v1902_v34 = vsel %vm13025_vm10, %v1688_v4, %v1828_v7 }
 0x231   :  { %2099 = vst [vmem:[#allocation1 + $0x3] ss:$9 sm:$0xff] %v1896_v16  ;;  %v1899_v21 = vrot.slane %v1898_v44, 1  ;;  %v1901_v11 = vrot.slane %v1900_v51, 2  ;;  %v1903_v3 = vrot.slane %v1902_v34, 3  ;;  %v1904_v6 = vsel %vm1849_vm11, %v1688_v4, %v1828_v7 }
 0x232   :  { %2100 = vst [vmem:[#allocation1 + $0x4] ss:$9 sm:$0xff] %v1897_v2  ;;  %1237 = vrot.lane.b32.xlu1 %v723_v43, %s8016_s17  ;;  %v1906_v9 = vsel %vm1852_vm13, %v1688_v4, %v1828_v7  ;;  %v1908_v30 = vsel %vm1855_vm14, %v1688_v4, %v1828_v7  ;;  %v1905_v10 = vrot.slane %v1904_v6, 4  ;;  %v665_v7 = vld [vmem:[#allocation2 + $0xc1] sm:$0x7f] }
 0x233   :  { %2101 = vst [vmem:[#allocation1 + $0x5] ss:$9 sm:$0xff] %v1899_v21  ;;  %899 = vrot.lane.b32.xlu0 %v623_v19, %s8018_s21  ;;  %v1907_v62 = vrot.slane %v1906_v9, 5  ;;  %v1909_v46 = vrot.slane %v1908_v30, 6  ;;  %v724_v6 = vld [vmem:[#allocation2 + $0xf1] sm:$0x7f] }
 0x234   :  { %1349 = vrot.lane.b32.xlu2 %v751_v20, %s8017_s18  ;;  %2102 = vst [vmem:[#allocation1 + $0x6] ss:$9 sm:$0xff] %v1901_v11  ;;  %v1230_v5 = vpop.permute.xlu1 %1229 }
 0x235   :  { %v838_v25 = vpop.permute.xlu0 %837  ;;  %2103 = vst [vmem:[#allocation1 + $0x7] ss:$9 sm:$0xff] %v1903_v3  ;;  %v1703_v32 = vsel %vm304_vm0, %v705_v47, %v1230_v5  ;;  %v693_v47 = vld [vmem:[#allocation2 + $0xc3] sm:$0x7f] }
 0x236   :  { %v9031_v35 = vpop.permute.xlu2 %839  ;;  %v1717_v8 = vsel %vm321_vm1, %v1703_v32, %v8941_v28  ;;  %v1602_v38 = vsel %vm304_vm0, %v592_v37, %v838_v25  ;;  %v780_v25 = vld [vmem:[#allocation2 + $0xf1] sm:$0x7f]  ;;  %v706_v32 = vld [vmem:[#allocation2 + $0x80] sm:$0x7f] }
 0x237   :  { %v1616_v28 = vsel %vm321_vm1, %v1602_v38, %v8955_v57 }
 0x23a   :  { %1293 = vrot.lane.b32.xlu1 %v737_v22, %s8018_s21 }
 0x23b   :  { %845 = vrot.lane.b32.xlu0 %v610_v12, %s8016_s17 }
 0x23c   :  { %1011 = vrot.lane.b32.xlu2 %v651_v36, %s8020_s2  ;;  %v2104_v45 = vld [vmem:[#allocation1] sm:$0xff]  ;;  %v2105_v17 = vld [vmem:[#allocation1 + $0x9] sm:$0xff]  ;;  %v1342_v13 = vpop.permute.xlu1 %1341 }
 0x23d   :  { %v1398_v14 = vpop.permute.xlu0 %1397  ;;  %2106 = vst [vmem:[#allocation1] ss:$9 sm:$0xff] %v1905_v10  ;;  %2241 = vmatmul.f32.gmra.mxu1 %v2104_v45  ;;  %2297 = vmatmul.f32.gmra.mxu2 %v2105_v17  ;;  %v1731_v41 = vsel %vm338_vm2, %v1717_v8, %v1342_v13  ;;  %v679_v10 = vld [vmem:[#allocation2 + $0xc2] sm:$0x7f]  ;;  %v738_v45 = vld [vmem:[#allocation2 + $0xf2] sm:$0x7f] }
 0x23e   :  { %v9039_v0 = vpop.permute.xlu2 %1399  ;;  %2107 = vst [vmem:[#allocation1 + $0x1] ss:$9 sm:$0xff] %v1907_v62  ;;  %v1745_v54 = vsel %vm13028_vm3, %v1731_v41, %v1398_v14  ;;  %v666_v62 = vld [vmem:[#allocation2 + $0xd1] sm:$0x7f] }
 0x23f   :  { %2108 = vst [vmem:[#allocation1 + $0x2] ss:$9 sm:$0xff] %v1909_v46  ;;  %v1759_v26 = vsel %vm1653_vm4, %v1745_v54, %v8975_v60 }
 0x242   :  { %955 = vrot.lane.b32.xlu1 %v637_v63, %s8017_s18 }
 0x243   :  { %1459 = vrot.lane.b32.xlu0 %v779_v48, %s8022_s23 }
 0x244   :  { %957 = vrot.lane.b32.xlu2 %v638_v23, %s8017_s18  ;;  %v950_v31 = vpop.permute.xlu1 %949 }
 0x245   :  { %v1006_v49 = vpop.permute.xlu0 %1005  ;;  %v1630_v56 = vsel %vm338_vm2, %v1616_v28, %v950_v31  ;;  %v808_v31 = vld [vmem:[#allocation2 + $0xf3] sm:$0x7f] }
 0x246   :  { %v9045_v53 = vpop.permute.xlu2 %1007  ;;  %v1644_v59 = vsel %vm13028_vm3, %v1630_v56, %v1006_v49  ;;  %v752_v49 = vld [vmem:[#allocation2 + $0xf3] sm:$0x7f] }
 0x247   :  { %v1659_v16 = vsel %vm1653_vm4, %v1644_v59, %v8999_v24  ;;  %v611_v56 = vld [vmem:[#allocation2 + $0xd1] sm:$0x7f] }
 0x24a   :  { %901 = vrot.lane.b32.xlu1 %v624_v52, %s8018_s21 }
 0x24b   :  { %1405 = vrot.lane.b32.xlu0 %v766_v42, %s8020_s2 }
 0x24c   :  { %1571 = vrot.lane.b32.xlu2 %v807_v40, %s8023_s26  ;;  %v1510_v27 = vpop.permute.xlu1 %1509  ;;  %v593_v40 = vld [vmem:[#allocation2 + $0x60] sm:$0x7f] }
 0x24d   :  { %v1566_v29 = vpop.permute.xlu0 %1565  ;;  %v1773_v55 = vsel %vm1668_vm5, %v1759_v26, %v1510_v27  ;;  %v1603_v54 = vsel %vm304_vm0, %v593_v40, %v9031_v35  ;;  %v680_v27 = vld [vmem:[#allocation2 + $0xd2] sm:$0x7f] }
 0x24e   :  { %v9057_v50 = vpop.permute.xlu2 %1567  ;;  %v1787_v58 = vsel %vm1683_vm6, %v1773_v55, %v1566_v29  ;;  %v639_v26 = vld [vmem:[#allocation2 + $0xd3] sm:$0x7f] }
 0x24f   :  { %v1829_v60 = vrot.slane %v1787_v58, 7 }
 0x252   :  { %1515 = vrot.lane.b32.xlu1 %v793_v61, %s8021_s22 }
 0x253   :  { %1067 = vrot.lane.b32.xlu0 %v665_v7, %s8022_s23 }
 0x254   :  { %1517 = vrot.lane.b32.xlu2 %v794_v1, %s8021_s22  ;;  %v1118_v57 = vpop.permute.xlu1 %1117 }
 0x255   :  { %v1674_v4 = vsel %vm1668_vm5, %v1659_v16, %v1118_v57  ;;  %v1232_v2 = vpop.permute.xlu0 %1231  ;;  %v694_v16 = vld [vmem:[#allocation2 + $0xd3] sm:$0x7f] }
 0x256   :  { %v9071_v44 = vpop.permute.xlu2 %1233  ;;  %v1689_v51 = vsel %vm1683_vm6, %v1674_v4, %v9019_v15  ;;  %v652_v15 = vld [vmem:[#allocation2 + $0xd0] sm:$0x7f]  ;;  %v1704_v8 = vsel %vm304_vm0, %v706_v32, %v1232_v2  ;;  %v795_v4 = vld [vmem:[#allocation2 + $0x102] sm:$0x7f] }
 0x257   :  { %v1910_v34 = vsel %vm13033_vm7, %v1689_v51, %v1829_v60  ;;  %v1911_v43 = vsel %vm13026_vm8, %v1689_v51, %v1829_v60  ;;  %v1913_v21 = vsel %vm1843_vm9, %v1689_v51, %v1829_v60  ;;  %v1915_v11 = vsel %vm13025_vm10, %v1689_v51, %v1829_v60  ;;  %v653_v32 = vld [vmem:[#allocation2 + $0xe0] sm:$0x7f] }
 0x258   :  { %v1912_v3 = vrot.slane %v1911_v43, 1  ;;  %v1914_v19 = vrot.slane %v1913_v21, 2  ;;  %v1916_v24 = vrot.slane %v1915_v11, 3  ;;  %v1917_v20 = vsel %vm1849_vm11, %v1689_v51, %v1829_v60  ;;  %2109 = vst [vmem:[#allocation1 + $0x3] ss:$9 sm:$0xff] %v1910_v34 }
 0x259   :  { %v1918_v5 = vrot.slane %v1917_v20, 4  ;;  %v1919_v12 = vsel %vm1852_vm13, %v1689_v51, %v1829_v60  ;;  %v1921_v36 = vsel %vm1855_vm14, %v1689_v51, %v1829_v60  ;;  %v625_v60 = vld [vmem:[#allocation2 + $0xd2] sm:$0x7f] }
 0x25a   :  { %2110 = vst [vmem:[#allocation1 + $0x4] ss:$9 sm:$0xff] %v1912_v3  ;;  %1461 = vrot.lane.b32.xlu1 %v780_v25, %s8022_s23  ;;  %v1920_v17 = vrot.slane %v1919_v12, 5  ;;  %v1922_v13 = vrot.slane %v1921_v36, 6  ;;  %v781_v12 = vld [vmem:[#allocation2 + $0x101] sm:$0x7f] }
 0x25b   :  { %2111 = vst [vmem:[#allocation1 + $0x5] ss:$9 sm:$0xff] %v1914_v19  ;;  %1013 = vrot.lane.b32.xlu0 %v652_v15, %s8020_s2  ;;  %v681_v36 = vld [vmem:[#allocation2 + $0xe2] sm:$0x7f] }
 0x25c   :  { %1239 = vrot.lane.b32.xlu2 %v724_v6, %s8016_s17  ;;  %2112 = vst [vmem:[#allocation1 + $0x6] ss:$9 sm:$0xff] %v1916_v24  ;;  %v1288_v9 = vpop.permute.xlu1 %1287 }
 0x25d   :  { %2113 = vst [vmem:[#allocation1 + $0x7] ss:$9 sm:$0xff] %v1918_v5  ;;  %v1344_v22 = vpop.permute.xlu0 %1343  ;;  %v1718_v41 = vsel %vm321_vm1, %v1704_v8, %v1288_v9  ;;  %v7960_v8 = vunpack.i.h.bf16 %v8589_v39 }
 0x25e   :  { %v9083_v30 = vpop.permute.xlu2 %1401  ;;  %v1732_v42 = vsel %vm338_vm2, %v1718_v41, %v1344_v22  ;;  %v767_v22 = vld [vmem:[#allocation2 + $0x100] sm:$0x7f] }
 0x25f   :  { %v1746_v29 = vsel %vm13028_vm3, %v1732_v42, %v9039_v0 }
 0x262   :  { %1123 = vrot.lane.b32.xlu1 %v679_v10, %s8021_s22 }
 0x263   :  { %1069 = vrot.lane.b32.xlu0 %v666_v62, %s8022_s23  ;;  %v7950_v62 = vunpack.i.h.bf16 %v8565_v18  ;;  %v667_v18 = vld [vmem:[#allocation2 + $0xe1] sm:$0x7f] }
 0x264   :  { %1295 = vrot.lane.b32.xlu2 %v738_v45, %s8018_s21  ;;  %v2114_v14 = vld [vmem:[#allocation1] sm:$0xff]  ;;  %v2115_v46 = vld [vmem:[#allocation1 + $0x9] sm:$0xff]  ;;  %v896_v63 = vpop.permute.xlu1 %895 }
 0x265   :  { %2116 = vst [vmem:[#allocation1] ss:$9 sm:$0xff] %v1920_v17  ;;  %2244 = vmatmul.f32.gmra.mxu1 %v2114_v14  ;;  %2300 = vmatmul.f32.gmra.mxu2 %v2115_v46  ;;  %v952_v48 = vpop.permute.xlu0 %951  ;;  %v1617_v28 = vsel %vm321_vm1, %v1603_v54, %v896_v63  ;;  %v7955_v14 = vunpack.i.h.bf16 %v8574_v33  ;;  %v707_v46 = vld [vmem:[#allocation2 + $0xc0] sm:$0x7f] }
 0x266   :  { %v9090_v23 = vpop.permute.xlu2 %1513  ;;  %2117 = vst [vmem:[#allocation1 + $0x1] ss:$9 sm:$0xff] %v1922_v13  ;;  %v1631_v61 = vsel %vm338_vm2, %v1617_v28, %v952_v48  ;;  %v594_v13 = vld [vmem:[#allocation2 + $0xa0] sm:$0x7f] }
 0x267   :  { %v1645_v0 = vsel %vm13028_vm3, %v1631_v61, %v9045_v53  ;;  %v1604_v48 = vsel %vm304_vm0, %v594_v13, %v7950_v62 }
 0x26a   :  { %1179 = vrot.lane.b32.xlu1 %v693_v47, %s8023_s26  ;;  %v1705_v47 = vsel %vm304_vm0, %v707_v46, %v9071_v44  ;;  %v1618_v44 = vsel %vm321_vm1, %v1604_v48, %v7955_v14  ;;  %v640_v14 = vld [vmem:[#allocation2 + $0xe3] sm:$0x7f]  ;;  %v654_v46 = vld [vmem:[#allocation2 + $0xf0] sm:$0x7f] }
 0x26b   :  { %1573 = vrot.lane.b32.xlu0 %v808_v31, %s8023_s26 }
 0x26c   :  { %1351 = vrot.lane.b32.xlu2 %v752_v49, %s8017_s18  ;;  %v1456_v37 = vpop.permute.xlu1 %1455  ;;  %v739_v49 = vld [vmem:[#allocation2 + $0x102] sm:$0x7f] }
 0x26d   :  { %v1512_v52 = vpop.permute.xlu0 %1511  ;;  %v1760_v55 = vsel %vm1653_vm4, %v1746_v29, %v1456_v37 }
 0x26e   :  { %v9097_v38 = vpop.permute.xlu2 %1121  ;;  %v1774_v7 = vsel %vm1668_vm5, %v1760_v55, %v1512_v52  ;;  %v626_v55 = vld [vmem:[#allocation2 + $0xe2] sm:$0x7f] }
 0x26f   :  { %v1788_v1 = vsel %vm1683_vm6, %v1774_v7, %v9057_v50 }
 0x270   :  { %v1830_v2 = vrot.slane %v1788_v1, 7 }
 0x272   :  { %1125 = vrot.lane.b32.xlu1 %v680_v27, %s8021_s22  ;;  %v1632_v27 = vsel %vm338_vm2, %v1618_v44, %v7960_v8  ;;  %v769_v44 = vld [vmem:[#allocation2 + $0x120] sm:$0x7f] }
 0x273   :  { %847 = vrot.lane.b32.xlu0 %v611_v56, %s8016_s17  ;;  %v809_v56 = vld [vmem:[#allocation2 + $0x103] sm:$0x7f] }
 0x274   :  { %959 = vrot.lane.b32.xlu2 %v639_v26, %s8017_s18  ;;  %v1064_v59 = vpop.permute.xlu1 %1063  ;;  %v695_v26 = vld [vmem:[#allocation2 + $0xe3] sm:$0x7f] }
 0x275   :  { %v1120_v35 = vpop.permute.xlu0 %1119  ;;  %v1660_v57 = vsel %vm1653_vm4, %v1645_v0, %v1064_v59 }
 0x276   :  { %v9110_v58 = vpop.permute.xlu2 %1291  ;;  %v1675_v51 = vsel %vm1668_vm5, %v1660_v57, %v1120_v35 }
 0x27a   :  { %1181 = vrot.lane.b32.xlu1 %v694_v16, %s8023_s26 }
 0x27b   :  { %903 = vrot.lane.b32.xlu0 %v625_v60, %s8018_s21 }
 0x27c   :  { %1519 = vrot.lane.b32.xlu2 %v795_v4, %s8021_s22  ;;  %v1176_v34 = vpop.permute.xlu1 %1175 }
 0x27d   :  { %v1690_v53 = vsel %vm1683_vm6, %v1675_v51, %v1176_v34  ;;  %v1290_v43 = vpop.permute.xlu0 %1289 }
 0x27e   :  { %v9123_v21 = vpop.permute.xlu2 %1347  ;;  %v1923_v50 = vsel %vm13033_vm7, %v1690_v53, %v1830_v2  ;;  %v1924_v11 = vsel %vm13026_vm8, %v1690_v53, %v1830_v2  ;;  %v1926_v3 = vsel %vm1843_vm9, %v1690_v53, %v1830_v2  ;;  %v1928_v19 = vsel %vm13025_vm10, %v1690_v53, %v1830_v2 }
 0x27f   :  { %v1925_v24 = vrot.slane %v1924_v11, 1  ;;  %v1927_v20 = vrot.slane %v1926_v3, 2  ;;  %v1929_v5 = vrot.slane %v1928_v19, 3  ;;  %v1930_v25 = vsel %vm1849_vm11, %v1690_v53, %v1830_v2  ;;  %2118 = vst [vmem:[#allocation1 + $0x2] ss:$9 sm:$0xff] %v1923_v50 }
 0x280   :  { %v1931_v15 = vrot.slane %v1930_v25, 4  ;;  %v1932_v6 = vsel %vm1852_vm13, %v1690_v53, %v1830_v2  ;;  %v1934_v63 = vsel %vm1855_vm14, %v1690_v53, %v1830_v2  ;;  %v1719_v31 = vsel %vm321_vm1, %v1705_v47, %v1290_v43  ;;  %v612_v19 = vld [vmem:[#allocation2 + $0xe1] sm:$0x7f] }
 0x281   :  { %v1933_v9 = vrot.slane %v1932_v6, 5  ;;  %2119 = vst [vmem:[#allocation1 + $0x3] ss:$9 sm:$0xff] %v1925_v24  ;;  %v1935_v41 = vrot.slane %v1934_v63, 6  ;;  %v782_v24 = vld [vmem:[#allocation2 + $0x111] sm:$0x7f] }
 0x282   :  { %2120 = vst [vmem:[#allocation1 + $0x4] ss:$9 sm:$0xff] %v1927_v20  ;;  %1407 = vrot.lane.b32.xlu1 %v767_v22, %s8020_s2  ;;  %v768_v22 = vld [vmem:[#allocation2 + $0x110] sm:$0x7f] }
 0x283   :  { %2121 = vst [vmem:[#allocation1 + $0x5] ss:$9 sm:$0xff] %v1929_v5  ;;  %1463 = vrot.lane.b32.xlu0 %v781_v12, %s8022_s23  ;;  %v668_v12 = vld [vmem:[#allocation2 + $0xf1] sm:$0x7f] }
 0x284   :  { %1127 = vrot.lane.b32.xlu2 %v681_v36, %s8021_s22  ;;  %2122 = vst [vmem:[#allocation1 + $0x6] ss:$9 sm:$0xff] %v1931_v15  ;;  %v1346_v10 = vpop.permute.xlu1 %1345  ;;  %v696_v63 = vld [vmem:[#allocation2 + $0xf3] sm:$0x7f] }
 0x285   :  { %2123 = vst [vmem:[#allocation1 + $0x7] ss:$9 sm:$0xff] %v1933_v9  ;;  %v1458_v45 = vpop.permute.xlu0 %1457  ;;  %v1733_v33 = vsel %vm338_vm2, %v1719_v31, %v1346_v10  ;;  %v753_v9 = vld [vmem:[#allocation2 + $0x103] sm:$0x7f]  ;;  %v796_v31 = vld [vmem:[#allocation2 + $0x112] sm:$0x7f] }
 0x286   :  { %v9135_v17 = vpop.permute.xlu2 %1403  ;;  %v1747_v39 = vsel %vm13028_vm3, %v1733_v33, %v9083_v30 }
 0x287   :  { %v1761_v29 = vsel %vm1653_vm4, %v1747_v39, %v1458_v45 }
 0x288   :  { %v1775_v30 = vsel %vm1668_vm5, %v1761_v29, %v9090_v23  ;;  %v725_v23 = vld [vmem:[#allocation2 + $0x101] sm:$0x7f] }
 0x289   :  { %v655_v29 = vld [vmem:[#allocation2 + $0x100] sm:$0x7f] }
 0x28a   :  { %1015 = vrot.lane.b32.xlu1 %v653_v32, %s8020_s2 }
 0x28b   :  { %1071 = vrot.lane.b32.xlu0 %v667_v18, %s8022_s23  ;;  %v810_v18 = vld [vmem:[#allocation2 + $0x113] sm:$0x7f] }
 0x28c   :  { %1297 = vrot.lane.b32.xlu2 %v739_v49, %s8018_s21  ;;  %v2124_v37 = vld [vmem:[#allocation1] sm:$0xff]  ;;  %v2125_v52 = vld [vmem:[#allocation1 + $0x9] sm:$0xff]  ;;  %v1010_v42 = vpop.permute.xlu1 %1009  ;;  %v613_v49 = vld [vmem:[#allocation2 + $0xf1] sm:$0x7f] }
 0x28d   :  { %2126 = vst [vmem:[#allocation1] ss:$9 sm:$0xff] %v1935_v41  ;;  %2247 = vmatmul.f32.gmra.mxu1 %v2124_v37  ;;  %2303 = vmatmul.f32.gmra.mxu2 %v2125_v52  ;;  %v1066_v40 = vpop.permute.xlu0 %1065  ;;  %v1646_v28 = vsel %vm13028_vm3, %v1632_v27, %v1010_v42  ;;  %v682_v37 = vld [vmem:[#allocation2 + $0xf2] sm:$0x7f] }
 0x28e   :  { %v9149_v54 = vpop.permute.xlu2 %1349  ;;  %v1661_v59 = vsel %vm1653_vm4, %v1646_v28, %v1066_v40  ;;  %v726_v52 = vld [vmem:[#allocation2 + $0x111] sm:$0x7f] }
 0x28f   :  { %v1676_v57 = vsel %vm1668_vm5, %v1661_v59, %v9097_v38  ;;  %v740_v27 = vld [vmem:[#allocation2 + $0x112] sm:$0x7f] }
 0x290   :  { %v754_v28 = vld [vmem:[#allocation2 + $0x113] sm:$0x7f] }
 0x291   :  { %v708_v59 = vld [vmem:[#allocation2 + $0xd0] sm:$0x7f] }
 0x292   :  { %1575 = vrot.lane.b32.xlu1 %v809_v56, %s8023_s26 }
 0x293   :  { %1183 = vrot.lane.b32.xlu0 %v695_v26, %s8023_s26 }
 0x294   :  { %905 = vrot.lane.b32.xlu2 %v626_v55, %s8018_s21  ;;  %v1570_v61 = vpop.permute.xlu1 %1569  ;;  %v627_v55 = vld [vmem:[#allocation2 + $0xf2] sm:$0x7f] }
 0x295   :  { %v1789_v35 = vsel %vm1683_vm6, %v1775_v30, %v1570_v61  ;;  %v1178_v7 = vpop.permute.xlu0 %1177  ;;  %v641_v61 = vld [vmem:[#allocation2 + $0xf3] sm:$0x7f]  ;;  %v811_v30 = vld [vmem:[#allocation2 + $0x123] sm:$0x7f] }
 0x296   :  { %v9163_v0 = vpop.permute.xlu2 %1011  ;;  %v1831_v1 = vrot.slane %v1789_v35, 7  ;;  %v1691_v16 = vsel %vm1683_vm6, %v1676_v57, %v1178_v7 }
 0x298   :  { %v1936_v60 = vsel %vm13033_vm7, %v1691_v16, %v1831_v1  ;;  %v1937_v4 = vsel %vm13026_vm8, %v1691_v16, %v1831_v1  ;;  %v1939_v2 = vsel %vm1843_vm9, %v1691_v16, %v1831_v1  ;;  %v1941_v51 = vsel %vm13025_vm10, %v1691_v16, %v1831_v1 }
 0x299   :  { %v1938_v34 = vrot.slane %v1937_v4, 1  ;;  %v1940_v53 = vrot.slane %v1939_v2, 2  ;;  %v1942_v43 = vrot.slane %v1941_v51, 3  ;;  %v1943_v50 = vsel %vm1849_vm11, %v1691_v16, %v1831_v1  ;;  %2127 = vst [vmem:[#allocation1 + $0x1] ss:$9 sm:$0xff] %v1936_v60 }
 0x29a   :  { %v1944_v11 = vrot.slane %v1943_v50, 4  ;;  %v1945_v38 = vsel %vm1852_vm13, %v1691_v16, %v1831_v1  ;;  %v1947_v3 = vsel %vm1855_vm14, %v1691_v16, %v1831_v1  ;;  %1241 = vrot.lane.b32.xlu1 %v725_v23, %s8016_s17  ;;  %v783_v4 = vld [vmem:[#allocation2 + $0x121] sm:$0x7f]  ;;  %v595_v23 = vld [vmem:[#allocation2 + $0xb0] sm:$0x7f] }
 0x29b   :  { %v1946_v20 = vrot.slane %v1945_v38, 5  ;;  %2128 = vst [vmem:[#allocation1 + $0x2] ss:$9 sm:$0xff] %v1938_v34  ;;  %849 = vrot.lane.b32.xlu0 %v612_v19, %s8016_s17  ;;  %v1948_v5 = vrot.slane %v1947_v3, 6  ;;  %v797_v2 = vld [vmem:[#allocation2 + $0x122] sm:$0x7f] }
 0x29c   :  { %1465 = vrot.lane.b32.xlu2 %v782_v24, %s8022_s23  ;;  %2129 = vst [vmem:[#allocation1 + $0x3] ss:$9 sm:$0xff] %v1940_v53  ;;  %v1236_v25 = vpop.permute.xlu1 %1235  ;;  %v727_v51 = vld [vmem:[#allocation2 + $0x121] sm:$0x7f] }
 0x29d   :  { %2130 = vst [vmem:[#allocation1 + $0x4] ss:$9 sm:$0xff] %v1942_v43  ;;  %v9178_v15 = vpop.permute.xlu0 %843  ;;  %v1706_v35 = vsel %vm304_vm0, %v708_v59, %v1236_v25  ;;  %v669_v19 = vld [vmem:[#allocation2 + $0x101] sm:$0x7f] }
 0x29e   :  { %v9180_v6 = vpop.permute.xlu2 %957  ;;  %2131 = vst [vmem:[#allocation1 + $0x5] ss:$9 sm:$0xff] %v1944_v11  ;;  %v1720_v16 = vsel %vm321_vm1, %v1706_v35, %v9110_v58  ;;  %v1605_v58 = vsel %vm304_vm0, %v595_v23, %v9178_v15  ;;  %v709_v15 = vld [vmem:[#allocation2 + $0xe0] sm:$0x7f] }
 0x29f   :  { %2132 = vst [vmem:[#allocation1 + $0x6] ss:$9 sm:$0xff] %v1946_v20  ;;  %v1734_v60 = vsel %vm338_vm2, %v1720_v16, %v9123_v21  ;;  %v683_v20 = vld [vmem:[#allocation2 + $0x102] sm:$0x7f] }
 0x2a0   :  { %2133 = vst [vmem:[#allocation1 + $0x7] ss:$9 sm:$0xff] %v1948_v5  ;;  %v1748_v34 = vsel %vm13028_vm3, %v1734_v60, %v9135_v17  ;;  %v755_v5 = vld [vmem:[#allocation2 + $0x123] sm:$0x7f]  ;;  %v798_v60 = vld [vmem:[#allocation2 + $0x132] sm:$0x7f] }
 0x2a2   :  { %1353 = vrot.lane.b32.xlu1 %v753_v9, %s8017_s18 }
 0x2a3   :  { %1409 = vrot.lane.b32.xlu0 %v768_v22, %s8020_s2 }
 0x2a4   :  { %1073 = vrot.lane.b32.xlu2 %v668_v12, %s8022_s23  ;;  %v9185_v36 = vpop.permute.xlu1 %1237 }
 0x2a5   :  { %v9187_v10 = vpop.permute.xlu0 %899 }
 0x2a6   :  { %v9189_v62 = vpop.permute.xlu2 %1571  ;;  %v1619_v11 = vsel %vm321_vm1, %v1605_v58, %v9187_v10  ;;  %v1707_v10 = vsel %vm304_vm0, %v709_v15, %v9185_v36 }
 0x2a7   :  { %v2134_v45 = vld [vmem:[#allocation1] sm:$0xff]  ;;  %v2135_v13 = vld [vmem:[#allocation1 + $0x9] sm:$0xff] }
 0x2a8   :  { %2250 = vmatmul.f32.gmra.mxu1 %v2134_v45  ;;  %2306 = vmatmul.f32.gmra.mxu2 %v2135_v13 }
 0x2aa   :  { %961 = vrot.lane.b32.xlu1 %v640_v14, %s8017_s18 }
 0x2ab   :  { %1017 = vrot.lane.b32.xlu0 %v654_v46, %s8020_s2 }
 0x2ac   :  { %1185 = vrot.lane.b32.xlu2 %v696_v63, %s8023_s26  ;;  %v9194_v48 = vpop.permute.xlu1 %1293 }
 0x2ad   :  { %v9196_v47 = vpop.permute.xlu0 %845  ;;  %v1721_v36 = vsel %vm321_vm1, %v1707_v10, %v9194_v48  ;;  %v596_v48 = vld [vmem:[#allocation2 + $0xc0] sm:$0x7f] }
 0x2ae   :  { %v9198_v32 = vpop.permute.xlu2 %1517 }
 0x2b2   :  { %1521 = vrot.lane.b32.xlu1 %v796_v31, %s8021_s22 }
 0x2b3   :  { %1577 = vrot.lane.b32.xlu0 %v810_v18, %s8023_s26 }
 0x2b4   :  { %851 = vrot.lane.b32.xlu2 %v613_v49, %s8016_s17  ;;  %v956_v8 = vpop.permute.xlu1 %955 }
 0x2b5   :  { %v1460_v41 = vpop.permute.xlu0 %1459  ;;  %v1633_v3 = vsel %vm338_vm2, %v1619_v11, %v956_v8 }
 0x2b6   :  { %v9203_v33 = vpop.permute.xlu2 %1239  ;;  %v1762_v43 = vsel %vm1653_vm4, %v1748_v34, %v1460_v41  ;;  %v1647_v24 = vsel %vm13028_vm3, %v1633_v3, %v9163_v0 }
 0x2ba   :  { %1129 = vrot.lane.b32.xlu1 %v682_v37, %s8021_s22 }
 0x2bb   :  { %1243 = vrot.lane.b32.xlu0 %v726_v52, %s8016_s17 }
 0x2bc   :  { %1411 = vrot.lane.b32.xlu2 %v769_v44, %s8020_s2  ;;  %v9208_v42 = vpop.permute.xlu1 %901  ;;  %v697_v44 = vld [vmem:[#allocation2 + $0x103] sm:$0x7f] }
 0x2bd   :  { %v9210_v40 = vpop.permute.xlu0 %1405 }
 0x2be   :  { %v9212_v39 = vpop.permute.xlu2 %1295 }
 0x2c2   :  { %1299 = vrot.lane.b32.xlu1 %v740_v27, %s8018_s21 }
 0x2c3   :  { %1355 = vrot.lane.b32.xlu0 %v754_v28, %s8017_s18  ;;  %v642_v28 = vld [vmem:[#allocation2 + $0x103] sm:$0x7f] }
 0x2c4   :  { %1019 = vrot.lane.b32.xlu2 %v655_v29, %s8020_s2  ;;  %v1516_v56 = vpop.permute.xlu1 %1515 }
 0x2c5   :  { %v1068_v26 = vpop.permute.xlu0 %1067  ;;  %v1776_v38 = vsel %vm1668_vm5, %v1762_v43, %v1516_v56  ;;  %v741_v56 = vld [vmem:[#allocation2 + $0x122] sm:$0x7f]  ;;  %v784_v43 = vld [vmem:[#allocation2 + $0x131] sm:$0x7f] }
 0x2c6   :  { %v9219_v7 = vpop.permute.xlu2 %1351  ;;  %v1790_v17 = vsel %vm1683_vm6, %v1776_v38, %v9189_v62  ;;  %v1662_v25 = vsel %vm1653_vm4, %v1647_v24, %v1068_v26  ;;  %v1735_v26 = vsel %vm338_vm2, %v1721_v36, %v9149_v54 }
 0x2c7   :  { %v1832_v9 = vrot.slane %v1790_v17, 7 }
 0x2ca   :  { %907 = vrot.lane.b32.xlu1 %v627_v55, %s8018_s21  ;;  %v1749_v55 = vsel %vm13028_vm3, %v1735_v26, %v9210_v40 }
 0x2cb   :  { %963 = vrot.lane.b32.xlu0 %v641_v61, %s8017_s18  ;;  %v1606_v61 = vsel %vm304_vm0, %v596_v48, %v9196_v47  ;;  %v614_v47 = vld [vmem:[#allocation2 + $0x101] sm:$0x7f] }
 0x2cc   :  { %1579 = vrot.lane.b32.xlu2 %v811_v30, %s8023_s26  ;;  %v9223_v1 = vpop.permute.xlu1 %1461  ;;  %v1620_v54 = vsel %vm321_vm1, %v1606_v61, %v9208_v42 }
 0x2cd   :  { %v9225_v57 = vpop.permute.xlu0 %1013  ;;  %v1763_v30 = vsel %vm1653_vm4, %v1749_v55, %v9223_v1  ;;  %v1634_v40 = vsel %vm338_vm2, %v1620_v54, %v9180_v6 }
 0x2ce   :  { %v9239_v21 = vpop.permute.xlu2 %959  ;;  %v1777_v16 = vsel %vm1668_vm5, %v1763_v30, %v9198_v32  ;;  %v1648_v1 = vsel %vm13028_vm3, %v1634_v40, %v9225_v57  ;;  %v770_v57 = vld [vmem:[#allocation2 + $0x130] sm:$0x7f] }
 0x2d2   :  { %1467 = vrot.lane.b32.xlu1 %v783_v4, %s8022_s23 }
 0x2d3   :  { %1523 = vrot.lane.b32.xlu0 %v797_v2, %s8021_s22 }
 0x2d4   :  { %1245 = vrot.lane.b32.xlu2 %v727_v51, %s8016_s17  ;;  %v1124_v53 = vpop.permute.xlu1 %1123  ;;  %v628_v51 = vld [vmem:[#allocation2 + $0x102] sm:$0x7f] }
 0x2d5   :  { %v9241_v50 = vpop.permute.xlu0 %1069  ;;  %v1677_v22 = vsel %vm1668_vm5, %v1662_v25, %v1124_v53 }
 0x2d6   :  { %v9263_v63 = vpop.permute.xlu2 %1519  ;;  %v1663_v42 = vsel %vm1653_vm4, %v1648_v1, %v9241_v50  ;;  %v684_v50 = vld [vmem:[#allocation2 + $0x112] sm:$0x7f] }
 0x2da   :  { %1075 = vrot.lane.b32.xlu1 %v669_v19, %s8022_s23 }
 0x2db   :  { %1131 = vrot.lane.b32.xlu0 %v683_v20, %s8021_s22 }
 0x2dc   :  { %1357 = vrot.lane.b32.xlu2 %v755_v5, %s8017_s18  ;;  %v1180_v12 = vpop.permute.xlu1 %1179 }
 0x2dd   :  { %v1692_v0 = vsel %vm1683_vm6, %v1677_v22, %v1180_v12  ;;  %v1574_v62 = vpop.permute.xlu0 %1573 }
 0x2de   :  { %v1949_v45 = vsel %vm13033_vm7, %v1692_v0, %v1832_v9  ;;  %v1950_v13 = vsel %vm13026_vm8, %v1692_v0, %v1832_v9  ;;  %v1952_v14 = vsel %vm1843_vm9, %v1692_v0, %v1832_v9  ;;  %v1954_v46 = vsel %vm13025_vm10, %v1692_v0, %v1832_v9  ;;  %v9288_v2 = vpop.permute.xlu2 %1127 }
 0x2df   :  { %v1951_v31 = vrot.slane %v1950_v13, 1  ;;  %v1953_v18 = vrot.slane %v1952_v14, 2  ;;  %v1955_v49 = vrot.slane %v1954_v46, 3  ;;  %v1956_v8 = vsel %vm1849_vm11, %v1692_v0, %v1832_v9  ;;  %2136 = vst [vmem:[#allocation1] ss:$9 sm:$0xff] %v1949_v45 }
 0x2e0   :  { %v1957_v41 = vrot.slane %v1956_v8, 4  ;;  %v1958_v37 = vsel %vm1852_vm13, %v1692_v0, %v1832_v9  ;;  %v1960_v52 = vsel %vm1855_vm14, %v1692_v0, %v1832_v9  ;;  %v1791_v4 = vsel %vm1683_vm6, %v1777_v16, %v1574_v62  ;;  %v710_v0 = vld [vmem:[#allocation2 + $0xf0] sm:$0x7f] }
 0x2e1   :  { %v1959_v27 = vrot.slane %v1958_v37, 5  ;;  %2137 = vst [vmem:[#allocation1 + $0x1] ss:$9 sm:$0xff] %v1951_v31  ;;  %v1961_v29 = vrot.slane %v1960_v52, 6  ;;  %v1833_v32 = vrot.slane %v1791_v4, 7 }
 0x2e2   :  { %2138 = vst [vmem:[#allocation1 + $0x2] ss:$9 sm:$0xff] %v1953_v18  ;;  %1187 = vrot.lane.b32.xlu1 %v697_v44, %s8023_s26  ;;  %v597_v62 = vld [vmem:[#allocation2 + $0xd0] sm:$0x7f]  ;;  %v1708_v18 = vsel %vm304_vm0, %v710_v0, %v9203_v33 }
 0x2e3   :  { %2139 = vst [vmem:[#allocation1 + $0x3] ss:$9 sm:$0xff] %v1955_v49  ;;  %1301 = vrot.lane.b32.xlu0 %v741_v56, %s8018_s21  ;;  %v656_v14 = vld [vmem:[#allocation2 + $0x110] sm:$0x7f]  ;;  %v1722_v8 = vsel %vm321_vm1, %v1708_v18, %v9212_v39 }
 0x2e4   :  { %965 = vrot.lane.b32.xlu2 %v642_v28, %s8017_s18  ;;  %2140 = vst [vmem:[#allocation1 + $0x4] ss:$9 sm:$0xff] %v1957_v41  ;;  %v1126_v59 = vpop.permute.xlu1 %1125  ;;  %v670_v31 = vld [vmem:[#allocation2 + $0x111] sm:$0x7f]  ;;  %v1736_v37 = vsel %vm338_vm2, %v1722_v8, %v9219_v7 }
 0x2e5   :  { %2141 = vst [vmem:[#allocation1 + $0x5] ss:$9 sm:$0xff] %v1959_v27  ;;  %v848_v35 = vpop.permute.xlu0 %847  ;;  %v1678_v6 = vsel %vm1668_vm5, %v1663_v42, %v1126_v59  ;;  %v812_v28 = vld [vmem:[#allocation2 + $0x133] sm:$0x7f] }
 0x2e6   :  { %2142 = vst [vmem:[#allocation1 + $0x6] ss:$9 sm:$0xff] %v1961_v29  ;;  %v9302_v38 = vpop.permute.xlu2 %1297  ;;  %v1607_v49 = vsel %vm304_vm0, %v597_v62, %v848_v35  ;;  %v698_v39 = vld [vmem:[#allocation2 + $0x113] sm:$0x7f] }
 0x2ea   :  { %853 = vrot.lane.b32.xlu1 %v614_v47, %s8016_s17 }
 0x2eb   :  { %909 = vrot.lane.b32.xlu0 %v628_v51, %s8018_s21 }
 0x2ec   :  { %1525 = vrot.lane.b32.xlu2 %v798_v60, %s8021_s22  ;;  %v1182_v23 = vpop.permute.xlu1 %1181 }
 0x2ed   :  { %v1693_v34 = vsel %vm1683_vm6, %v1678_v6, %v1182_v23  ;;  %v904_v53 = vpop.permute.xlu0 %903 }
 0x2ee   :  { %v1962_v58 = vsel %vm13033_vm7, %v1693_v34, %v1833_v32  ;;  %v1963_v11 = vsel %vm13026_vm8, %v1693_v34, %v1833_v32  ;;  %v1965_v3 = vsel %vm1843_vm9, %v1693_v34, %v1833_v32  ;;  %v1967_v17 = vsel %vm13025_vm10, %v1693_v34, %v1833_v32  ;;  %v906_v52 = vpop.permute.xlu2 %905 }
 0x2ef   :  { %2143 = vst [vmem:[#allocation1 + $0x7] ss:$9 sm:$0xff] %v1962_v58  ;;  %v1964_v24 = vrot.slane %v1963_v11, 1  ;;  %v1969_v20 = vsel %vm1849_vm11, %v1693_v34, %v1833_v32  ;;  %v1966_v25 = vrot.slane %v1965_v3, 2  ;;  %v1971_v15 = vsel %vm1852_vm13, %v1693_v34, %v1833_v32  ;;  %v711_v3 = vld [vmem:[#allocation2 + $0x100] sm:$0x7f] }
 0x2f0   :  { %v1968_v12 = vrot.slane %v1967_v17, 3  ;;  %v1973_v10 = vsel %vm1855_vm14, %v1693_v34, %v1833_v32  ;;  %v1970_v45 = vrot.slane %v1969_v20, 4  ;;  %v1972_v13 = vrot.slane %v1971_v15, 5 }
 0x2f1   :  { %v1974_v46 = vrot.slane %v1973_v10, 6  ;;  %v1621_v36 = vsel %vm321_vm1, %v1607_v49, %v904_v53 }
 0x2f2   :  { %1413 = vrot.lane.b32.xlu1 %v770_v57, %s8020_s2  ;;  %v1635_v33 = vsel %vm338_vm2, %v1621_v36, %v9239_v21 }
 0x2f3   :  { %1469 = vrot.lane.b32.xlu0 %v784_v43, %s8022_s23 }
 0x2f4   :  { %1133 = vrot.lane.b32.xlu2 %v684_v50, %s8021_s22  ;;  %v1408_v19 = vpop.permute.xlu1 %1407 }
 0x2f5   :  { %v1464_v5 = vpop.permute.xlu0 %1463  ;;  %v1750_v27 = vsel %vm13028_vm3, %v1736_v37, %v1408_v19 }
 0x2f6   :  { %v2144_v9 = vld [vmem:[#allocation1] sm:$0xff]  ;;  %v2145_v22 = vld [vmem:[#allocation1 + $0x9] sm:$0xff]  ;;  %v1764_v56 = vsel %vm1653_vm4, %v1750_v27, %v1464_v5  ;;  %v1466_v30 = vpop.permute.xlu2 %1465 }
 0x2f7   :  { %2146 = vst [vmem:[#allocation1] ss:$9 sm:$0xff] %v1964_v24  ;;  %2253 = vmatmul.f32.gmra.mxu1 %v2144_v9  ;;  %2309 = vmatmul.f32.gmra.mxu2 %v2145_v22  ;;  %v1778_v48 = vsel %vm1668_vm5, %v1764_v56, %v9263_v63 }
 0x2f8   :  { %2147 = vst [vmem:[#allocation1 + $0x1] ss:$9 sm:$0xff] %v1966_v25  ;;  %v598_v25 = vld [vmem:[#allocation2 + $0xe0] sm:$0x7f] }
 0x2f9   :  { %2148 = vst [vmem:[#allocation1 + $0x2] ss:$9 sm:$0xff] %v1968_v12 }
 0x2fa   :  { %2149 = vst [vmem:[#allocation1 + $0x3] ss:$9 sm:$0xff] %v1970_v45  ;;  %1021 = vrot.lane.b32.xlu1 %v656_v14, %s8020_s2 }
 0x2fb   :  { %2150 = vst [vmem:[#allocation1 + $0x4] ss:$9 sm:$0xff] %v1972_v13  ;;  %1077 = vrot.lane.b32.xlu0 %v670_v31, %s8022_s23 }
 0x2fc   :  { %2151 = vst [vmem:[#allocation1 + $0x5] ss:$9 sm:$0xff] %v1974_v46  ;;  %v1016_v41 = vpop.permute.xlu1 %1015 }
 0x2fd   :  { %v1072_v44 = vpop.permute.xlu0 %1071  ;;  %v1649_v29 = vsel %vm13028_vm3, %v1635_v33, %v1016_v41 }
 0x2fe   :  { %v1664_v26 = vsel %vm1653_vm4, %v1649_v29, %v1072_v44  ;;  %v1074_v51 = vpop.permute.xlu2 %1073 }
 0x2ff   :  { %v1679_v61 = vsel %vm1668_vm5, %v1664_v26, %v9288_v2 }
 0x302   :  { %1581 = vrot.lane.b32.xlu1 %v812_v28, %s8023_s26 }
 0x303   :  { %1189 = vrot.lane.b32.xlu0 %v698_v39, %s8023_s26 }
 0x304   :  { %v1576_v7 = vpop.permute.xlu1 %1575 }
 0x305   :  { %v1792_v55 = vsel %vm1683_vm6, %v1778_v48, %v1576_v7  ;;  %v1184_v59 = vpop.permute.xlu0 %1183 }
 0x306   :  { %v1834_v21 = vrot.slane %v1792_v55, 7  ;;  %v1694_v35 = vsel %vm1683_vm6, %v1679_v61, %v1184_v59  ;;  %v1186_v50 = vpop.permute.xlu2 %1185 }
 0x308   :  { %v1975_v54 = vsel %vm13033_vm7, %v1694_v35, %v1834_v21  ;;  %v1976_v16 = vsel %vm13026_vm8, %v1694_v35, %v1834_v21  ;;  %v1978_v63 = vsel %vm1843_vm9, %v1694_v35, %v1834_v21  ;;  %v1980_v47 = vsel %vm13025_vm10, %v1694_v35, %v1834_v21 }
 0x309   :  { %v1977_v60 = vrot.slane %v1976_v16, 1  ;;  %2152 = vst [vmem:[#allocation1 + $0x6] ss:$9 sm:$0xff] %v1975_v54  ;;  %v1982_v1 = vsel %vm1849_vm11, %v1694_v35, %v1834_v21  ;;  %v1979_v2 = vrot.slane %v1978_v63, 2  ;;  %v1984_v42 = vsel %vm1852_vm13, %v1694_v35, %v1834_v21 }
 0x30a   :  { %v1981_v32 = vrot.slane %v1980_v47, 3  ;;  %v1986_v6 = vsel %vm1855_vm14, %v1694_v35, %v1834_v21  ;;  %v1983_v53 = vrot.slane %v1982_v1, 4  ;;  %v1985_v58 = vrot.slane %v1984_v42, 5 }
 0x30b   :  { %2153 = vst [vmem:[#allocation1 + $0x7] ss:$9 sm:$0xff] %v1977_v60  ;;  %v1987_v43 = vrot.slane %v1986_v6, 6  ;;  %v712_v60 = vld [vmem:[#allocation2 + $0x110] sm:$0x7f] }
 0x30c   :  { %v1242_v40 = vpop.permute.xlu1 %1241 }
 0x30d   :  { %v850_v4 = vpop.permute.xlu0 %849  ;;  %v1709_v17 = vsel %vm304_vm0, %v711_v3, %v1242_v40 }
 0x30e   :  { %v1723_v20 = vsel %vm321_vm1, %v1709_v17, %v9302_v38  ;;  %v1608_v15 = vsel %vm304_vm0, %v598_v25, %v850_v4  ;;  %v852_v12 = vpop.permute.xlu2 %851 }
 0x30f   :  { %v1622_v10 = vsel %vm321_vm1, %v1608_v15, %v906_v52 }
 0x312   :  { %v2154_v23 = vld [vmem:[#allocation1] sm:$0xff]  ;;  %v2155_v34 = vld [vmem:[#allocation1 + $0x9] sm:$0xff] }
 0x313   :  { %2156 = vst [vmem:[#allocation1] ss:$9 sm:$0xff] %v1979_v2  ;;  %2256 = vmatmul.f32.gmra.mxu1 %v2154_v23  ;;  %2312 = vmatmul.f32.gmra.mxu2 %v2155_v34  ;;  %v599_v2 = vld [vmem:[#allocation2 + $0xf0] sm:$0x7f] }
 0x314   :  { %2157 = vst [vmem:[#allocation1 + $0x1] ss:$9 sm:$0xff] %v1981_v32  ;;  %v1354_v57 = vpop.permute.xlu1 %1353  ;;  %v1609_v42 = vsel %vm304_vm0, %v599_v2, %v852_v12 }
 0x315   :  { %2158 = vst [vmem:[#allocation1 + $0x2] ss:$9 sm:$0xff] %v1983_v53  ;;  %v1410_v11 = vpop.permute.xlu0 %1409  ;;  %v1737_v5 = vsel %vm338_vm2, %v1723_v20, %v1354_v57 }
 0x316   :  { %2159 = vst [vmem:[#allocation1 + $0x3] ss:$9 sm:$0xff] %v1985_v58  ;;  %v1751_v9 = vsel %vm13028_vm3, %v1737_v5, %v1410_v11  ;;  %v1412_v41 = vpop.permute.xlu2 %1411 }
 0x317   :  { %2160 = vst [vmem:[#allocation1 + $0x4] ss:$9 sm:$0xff] %v1987_v43  ;;  %v1765_v45 = vsel %vm1653_vm4, %v1751_v9, %v1466_v30 }
 0x31c   :  { %v962_v19 = vpop.permute.xlu1 %961 }
 0x31d   :  { %v1018_v24 = vpop.permute.xlu0 %1017  ;;  %v1636_v62 = vsel %vm338_vm2, %v1622_v10, %v962_v19 }
 0x31e   :  { %v1650_v38 = vsel %vm13028_vm3, %v1636_v62, %v1018_v24  ;;  %v1020_v7 = vpop.permute.xlu2 %1019 }
 0x31f   :  { %v1665_v31 = vsel %vm1653_vm4, %v1650_v38, %v1074_v51 }
 0x324   :  { %v1522_v22 = vpop.permute.xlu1 %1521 }
 0x325   :  { %v1578_v0 = vpop.permute.xlu0 %1577  ;;  %v1779_v13 = vsel %vm1668_vm5, %v1765_v45, %v1522_v22 }
 0x326   :  { %v1793_v14 = vsel %vm1683_vm6, %v1779_v13, %v1578_v0  ;;  %v1580_v40 = vpop.permute.xlu2 %1579 }
 0x327   :  { %v1835_v18 = vrot.slane %v1793_v14, 7 }
 0x32c   :  { %v1130_v46 = vpop.permute.xlu1 %1129 }
 0x32d   :  { %v1680_v49 = vsel %vm1668_vm5, %v1665_v31, %v1130_v46  ;;  %v1244_v8 = vpop.permute.xlu0 %1243 }
 0x32e   :  { %v1695_v36 = vsel %vm1683_vm6, %v1680_v49, %v1186_v50  ;;  %v1710_v4 = vsel %vm304_vm0, %v712_v60, %v1244_v8  ;;  %v1246_v53 = vpop.permute.xlu2 %1245 }
 0x32f   :  { %v1988_v37 = vsel %vm13033_vm7, %v1695_v36, %v1835_v18  ;;  %v1989_v52 = vsel %vm13026_vm8, %v1695_v36, %v1835_v18  ;;  %v1991_v44 = vsel %vm1843_vm9, %v1695_v36, %v1835_v18  ;;  %v1993_v56 = vsel %vm13025_vm10, %v1695_v36, %v1835_v18 }
 0x330   :  { %v1990_v27 = vrot.slane %v1989_v52, 1  ;;  %v1992_v33 = vrot.slane %v1991_v44, 2  ;;  %2161 = vst [vmem:[#allocation1 + $0x5] ss:$9 sm:$0xff] %v1988_v37  ;;  %v1995_v39 = vsel %vm1849_vm11, %v1695_v36, %v1835_v18  ;;  %v1997_v26 = vsel %vm1852_vm13, %v1695_v36, %v1835_v18  ;;  %v713_v44 = vld [vmem:[#allocation2 + $0x120] sm:$0x7f] }
 0x331   :  { %v1994_v48 = vrot.slane %v1993_v56, 3  ;;  %v1999_v55 = vsel %vm1855_vm14, %v1695_v36, %v1835_v18  ;;  %v1996_v59 = vrot.slane %v1995_v39, 4  ;;  %v1998_v30 = vrot.slane %v1997_v26, 5 }
 0x332   :  { %2162 = vst [vmem:[#allocation1 + $0x6] ss:$9 sm:$0xff] %v1990_v27  ;;  %v2000_v35 = vrot.slane %v1999_v55, 6  ;;  %v600_v27 = vld [vmem:[#allocation2 + $0x100] sm:$0x7f] }
 0x333   :  { %2163 = vst [vmem:[#allocation1 + $0x7] ss:$9 sm:$0xff] %v1992_v33  ;;  %v1711_v33 = vsel %vm304_vm0, %v713_v44, %v1246_v53 }
 0x334   :  { %v1300_v28 = vpop.permute.xlu1 %1299 }
 0x335   :  { %v1356_v29 = vpop.permute.xlu0 %1355  ;;  %v1724_v63 = vsel %vm321_vm1, %v1710_v4, %v1300_v28 }
 0x336   :  { %v1738_v51 = vsel %vm338_vm2, %v1724_v63, %v1356_v29  ;;  %v1358_v12 = vpop.permute.xlu2 %1357 }
 0x337   :  { %v1752_v6 = vsel %vm13028_vm3, %v1738_v51, %v1412_v41 }
 0x33a   :  { %v2164_v21 = vld [vmem:[#allocation1] sm:$0xff]  ;;  %v2165_v61 = vld [vmem:[#allocation1 + $0x9] sm:$0xff] }
 0x33b   :  { %2166 = vst [vmem:[#allocation1] ss:$9 sm:$0xff] %v1994_v48  ;;  %2259 = vmatmul.f32.gmra.mxu1 %v2164_v21  ;;  %2315 = vmatmul.f32.gmra.mxu2 %v2165_v61 }
 0x33c   :  { %2167 = vst [vmem:[#allocation1 + $0x1] ss:$9 sm:$0xff] %v1996_v59  ;;  %v908_v54 = vpop.permute.xlu1 %907 }
 0x33d   :  { %2168 = vst [vmem:[#allocation1 + $0x2] ss:$9 sm:$0xff] %v1998_v30  ;;  %v964_v16 = vpop.permute.xlu0 %963  ;;  %v1623_v32 = vsel %vm321_vm1, %v1609_v42, %v908_v54 }
 0x33e   :  { %2169 = vst [vmem:[#allocation1 + $0x3] ss:$9 sm:$0xff] %v2000_v35  ;;  %v1637_v58 = vsel %vm338_vm2, %v1623_v32, %v964_v16  ;;  %v966_v31 = vpop.permute.xlu2 %965 }
 0x33f   :  { %v1651_v11 = vsel %vm13028_vm3, %v1637_v58, %v1020_v7 }
 0x344   :  { %v1468_v47 = vpop.permute.xlu1 %1467 }
 0x345   :  { %v1524_v1 = vpop.permute.xlu0 %1523  ;;  %v1766_v23 = vsel %vm1653_vm4, %v1752_v6, %v1468_v47 }
 0x346   :  { %v1780_v43 = vsel %vm1668_vm5, %v1766_v23, %v1524_v1  ;;  %v1526_v56 = vpop.permute.xlu2 %1525 }
 0x347   :  { %v1794_v50 = vsel %vm1683_vm6, %v1780_v43, %v1580_v40 }
 0x348   :  { %v1836_v17 = vrot.slane %v1794_v50, 7 }
 0x34c   :  { %v1076_v34 = vpop.permute.xlu1 %1075 }
 0x34d   :  { %v1132_v57 = vpop.permute.xlu0 %1131  ;;  %v1666_v3 = vsel %vm1653_vm4, %v1651_v11, %v1076_v34 }
 0x34e   :  { %v1681_v19 = vsel %vm1668_vm5, %v1666_v3, %v1132_v57  ;;  %v1134_v16 = vpop.permute.xlu2 %1133 }
 0x354   :  { %v1188_v24 = vpop.permute.xlu1 %1187 }
 0x355   :  { %v1696_v20 = vsel %vm1683_vm6, %v1681_v19, %v1188_v24  ;;  %v1302_v5 = vpop.permute.xlu0 %1301  ;;  %v2233_v24 = vpop.f32.mrf.mxu1 }
 0x356   :  { %v2001_v25 = vsel %vm13033_vm7, %v1696_v20, %v1836_v17  ;;  %v2002_v15 = vsel %vm13026_vm8, %v1696_v20, %v1836_v17  ;;  %v2004_v9 = vsel %vm1843_vm9, %v1696_v20, %v1836_v17  ;;  %v2006_v22 = vsel %vm13025_vm10, %v1696_v20, %v1836_v17 }
 0x357   :  { %v2003_v10 = vrot.slane %v2002_v15, 1  ;;  %v2005_v0 = vrot.slane %v2004_v9, 2  ;;  %v2007_v62 = vrot.slane %v2006_v22, 3  ;;  %2170 = vst [vmem:[#allocation1 + $0x4] ss:$9 sm:$0xff] %v2001_v25  ;;  %v2008_v38 = vsel %vm1849_vm11, %v1696_v20, %v1836_v17 }
 0x358   :  { %v2010_v14 = vsel %vm1852_vm13, %v1696_v20, %v1836_v17  ;;  %v2012_v46 = vsel %vm1855_vm14, %v1696_v20, %v1836_v17  ;;  %v2009_v18 = vrot.slane %v2008_v38, 4  ;;  %v1725_v29 = vsel %vm321_vm1, %v1711_v33, %v1302_v5  ;;  %v2289_v20 = vpop.f32.mrf.mxu2 }
 0x359   :  { %2171 = vst [vmem:[#allocation1 + $0x5] ss:$9 sm:$0xff] %v2003_v10  ;;  %v2011_v49 = vrot.slane %v2010_v14, 5  ;;  %v2013_v41 = vrot.slane %v2012_v46, 6  ;;  %v1739_v7 = vsel %vm338_vm2, %v1725_v29, %v1358_v12 }
 0x35a   :  { %2172 = vst [vmem:[#allocation1 + $0x6] ss:$9 sm:$0xff] %v2005_v0 }
 0x35b   :  { %2173 = vst [vmem:[#allocation1 + $0x7] ss:$9 sm:$0xff] %v2007_v62 }
 0x35c   :  { %v854_v45 = vpop.permute.xlu1 %853 }
 0x35d   :  { %v910_v13 = vpop.permute.xlu0 %909  ;;  %v1610_v28 = vsel %vm304_vm0, %v600_v27, %v854_v45  ;;  %v2236_v5 = vpop.f32.mrf.mxu1  ;;  %vm2339_vm0 = vcmask 1041408  }
 0x35e   :  { %v1624_v39 = vsel %vm321_vm1, %v1610_v28, %v910_v13 }
 0x35f   :  { %v1638_v59 = vsel %vm338_vm2, %v1624_v39, %v966_v31 }
 0x360   :  { %v2292_v25 = vpop.f32.mrf.mxu2 }
 0x362   :  { %v2174_v8 = vld [vmem:[#allocation1] sm:$0xff]  ;;  %v2175_v36 = vld [vmem:[#allocation1 + $0x9] sm:$0xff] }
 0x363   :  { %2176 = vst [vmem:[#allocation1] ss:$9 sm:$0xff] %v2009_v18  ;;  %2262 = vmatmul.f32.gmra.mxu1 %v2174_v8  ;;  %2318 = vmatmul.f32.gmra.mxu2 %v2175_v36  ;;  %v2293_v36 = vadd.f32 %v2292_v25, %v2236_v5 }
 0x364   :  { %2177 = vst [vmem:[#allocation1 + $0x1] ss:$9 sm:$0xff] %v2011_v49  ;;  %v1414_v37 = vpop.permute.xlu1 %1413 }
 0x365   :  { %2178 = vst [vmem:[#allocation1 + $0x2] ss:$9 sm:$0xff] %v2013_v41  ;;  %v1470_v52 = vpop.permute.xlu0 %1469  ;;  %v1753_v55 = vsel %vm13028_vm3, %v1739_v7, %v1414_v37  ;;  %v2239_v15 = vpop.f32.mrf.mxu1  ;;  %v2290_v41 = vadd.f32 %v2289_v20, %v2233_v24 }
 0x366   :  { %v1767_v61 = vsel %vm1653_vm4, %v1753_v55, %v1470_v52 }
 0x367   :  { %v1781_v54 = vsel %vm1668_vm5, %v1767_v61, %v1526_v56  ;;  %v2328_v52 = vadd.f32 %v2293_v36, %v2290_v41 }
 0x368   :  { %v2295_v9 = vpop.f32.mrf.mxu2 }
 0x369   :  { %v2296_v37 = vadd.f32 %v2295_v9, %v2239_v15 }
 0x36b   :  { %v2329_v28 = vadd.f32 %v2328_v52, %v2296_v37 }
 0x36c   :  { %v1022_v26 = vpop.permute.xlu1 %1021 }
 0x36d   :  { %v1078_v48 = vpop.permute.xlu0 %1077  ;;  %v1652_v21 = vsel %vm13028_vm3, %v1638_v59, %v1022_v26  ;;  %v2242_v22 = vpop.f32.mrf.mxu1 }
 0x36e   :  { %v1667_v30 = vsel %vm1653_vm4, %v1652_v21, %v1078_v48  ;;  %v8024_v21 = vmov 98.0  }
 0x36f   :  { %v1682_v63 = vsel %vm1668_vm5, %v1667_v30, %v1134_v16  ;;  %8004 = vrcp.f32 %v8024_v21 }
 0x370   :  { %v2298_v12 = vpop.f32.mrf.mxu2 }
 0x371   :  { %v2299_v44 = vadd.f32 %v2298_v12, %v2242_v22 }
 0x373   :  { %v2330_v56 = vadd.f32 %v2329_v28, %v2299_v44 }
 0x374   :  { %v1582_v35 = vpop.permute.xlu1 %1581 }
 0x375   :  { %v1795_v60 = vsel %vm1683_vm6, %v1781_v54, %v1582_v35  ;;  %v1190_v40 = vpop.permute.xlu0 %1189  ;;  %v2245_v10 = vpop.f32.mrf.mxu1 }
 0x376   :  { %v1837_v4 = vrot.slane %v1795_v60, 7  ;;  %v1697_v47 = vsel %vm1683_vm6, %v1682_v63, %v1190_v40  ;;  %v8005_v60 = vpop.eup %8004 }
 0x377   :  { %vm2353_vm2 = vweird.f32 %v8005_v60 }
 0x378   :  { %v2014_v1 = vsel %vm13033_vm7, %v1697_v47, %v1837_v4  ;;  %v2015_v51 = vsel %vm13026_vm8, %v1697_v47, %v1837_v4  ;;  %v2017_v2 = vsel %vm1843_vm9, %v1697_v47, %v1837_v4  ;;  %v2019_v42 = vsel %vm13025_vm10, %v1697_v47, %v1837_v4  ;;  %v2301_v0 = vpop.f32.mrf.mxu2 }
 0x379   :  { %v2016_v32 = vrot.slane %v2015_v51, 1  ;;  %v2018_v6 = vrot.slane %v2017_v2, 2  ;;  %v2020_v23 = vrot.slane %v2019_v42, 3  ;;  %v2021_v34 = vsel %vm1849_vm11, %v1697_v47, %v1837_v4  ;;  %2179 = vst [vmem:[#allocation1 + $0x3] ss:$9 sm:$0xff] %v2014_v1 }
 0x37a   :  { %v2022_v53 = vrot.slane %v2021_v34, 4  ;;  %v2023_v58 = vsel %vm1852_vm13, %v1697_v47, %v1837_v4  ;;  %v2025_v57 = vsel %vm1855_vm14, %v1697_v47, %v1837_v4  ;;  %v2302_v29 = vadd.f32 %v2301_v0, %v2245_v10 }
 0x37b   :  { %2180 = vst [vmem:[#allocation1 + $0x4] ss:$9 sm:$0xff] %v2016_v32  ;;  %v2024_v43 = vrot.slane %v2023_v58, 5  ;;  %v2026_v11 = vrot.slane %v2025_v57, 6  ;;  %v2349_v1 = vmul.f32 98.0, %v8005_v60 }
 0x37c   :  { %2181 = vst [vmem:[#allocation1 + $0x5] ss:$9 sm:$0xff] %v2018_v6  ;;  %v2331_v26 = vadd.f32 %v2330_v56, %v2302_v29 }
 0x37d   :  { %2182 = vst [vmem:[#allocation1 + $0x6] ss:$9 sm:$0xff] %v2020_v23  ;;  %v2248_v62 = vpop.f32.mrf.mxu1  ;;  %v2350_v34 = vsub.f32 1.0, %v2349_v1 }
 0x37e   :  { %2183 = vst [vmem:[#allocation1 + $0x7] ss:$9 sm:$0xff] %v2022_v53 }
 0x37f   :  { %v2351_v57 = vmul.f32 %v8005_v60, %v2350_v34 }
 0x380   :  { %v2304_v45 = vpop.f32.mrf.mxu2 }
 0x381   :  { %v2305_v39 = vadd.f32 %v2304_v45, %v2248_v62 }
 0x383   :  { %v2332_v48 = vadd.f32 %v2331_v26, %v2305_v39 }
 0x385   :  { %v2184_v50 = vld [vmem:[#allocation1] sm:$0xff]  ;;  %v2185_v3 = vld [vmem:[#allocation1 + $0x9] sm:$0xff]  ;;  %v2251_v13 = vpop.f32.mrf.mxu1 }
 0x386   :  { %2186 = vst [vmem:[#allocation1] ss:$9 sm:$0xff] %v2024_v43  ;;  %2265 = vmatmul.f32.gmra.mxu1 %v2184_v50  ;;  %2321 = vmatmul.f32.gmra.mxu2 %v2185_v3  ;;  %v2352_v50 = vadd.f32 %v8005_v60, %v2351_v57 }
 0x387   :  { %2187 = vst [vmem:[#allocation1 + $0x1] ss:$9 sm:$0xff] %v2026_v11 }
 0x388   :  { %v2307_v38 = vpop.f32.mrf.mxu2 }
 0x389   :  { %v2308_v7 = vadd.f32 %v2307_v38, %v2251_v13 }
 0x38b   :  { %v2333_v30 = vadd.f32 %v2332_v48, %v2308_v7 }
 0x38d   :  { %v2254_v14 = vpop.f32.mrf.mxu1 }
 0x38e   :  { %v2188_v17 = vld [vmem:[#allocation1] sm:$0xff]  ;;  %v2189_v19 = vld [vmem:[#allocation1 + $0x9] sm:$0xff] }
 0x38f   :  { %2268 = vmatmul.f32.gmra.mxu1 %v2188_v17  ;;  %2324 = vmatmul.f32.gmra.mxu2 %v2189_v19  ;;  %v2354_v19 = vsel %vm2353_vm2, %v8005_v60, %v2352_v50 }
 0x390   :  { %v2310_v46 = vpop.f32.mrf.mxu2 }
 0x391   :  { %v2311_v55 = vadd.f32 %v2310_v46, %v2254_v14 }
 0x393   :  { %v2334_v54 = vadd.f32 %v2333_v30, %v2311_v55 }
 0x395   :  { %v2257_v31 = vpop.f32.mrf.mxu1 }
 0x398   :  { %v2313_v18 = vpop.f32.mrf.mxu2 }
 0x399   :  { %v2314_v35 = vadd.f32 %v2313_v18, %v2257_v31 }
 0x39b   :  { %v2335_v40 = vadd.f32 %v2334_v54, %v2314_v35 }
 0x3b8   :  { %v2260_v49 = vpop.f32.mrf.mxu1 }
 0x3be   :  { %v2316_v8 = vpop.f32.mrf.mxu2 }
 0x3bf   :  { %v2317_v16 = vadd.f32 %v2316_v8, %v2260_v49 }
 0x3c1   :  { %v2336_v63 = vadd.f32 %v2335_v40, %v2317_v16 }
 0x3e0   :  { %v2263_v27 = vpop.f32.mrf.mxu1 }
 0x3e6   :  { %v2319_v33 = vpop.f32.mrf.mxu2 }
 0x3e7   :  { %v2320_v4 = vadd.f32 %v2319_v33, %v2263_v27 }
 0x3e9   :  { %v2337_v51 = vadd.f32 %v2336_v63, %v2320_v4 }
 0x403   :  { %v2266_v59 = vpop.f32.mrf.mxu1 }
 0x409   :  { %v2322_v61 = vpop.f32.mrf.mxu2 }
 0x40a   :  { %v2323_v47 = vadd.f32 %v2322_v61, %v2266_v59 }
 0x40c   :  { %v2269_v2 = vpop.f32.mrf.mxu1  ;;  %v2338_v6 = vadd.f32 %v2337_v51, %v2323_v47 }
 0x412   :  { %v2325_v42 = vpop.f32.mrf.mxu2 }
 0x413   :  { %v2326_v32 = vadd.f32 %v2325_v42, %v2269_v2 }
 0x415   :  { %v2340_v23 = vsel %vm2339_vm0, %v2326_v32, 0.0 }
 0x416   :  { %v2341_v53 = vadd.f32 %v2340_v23, %v2338_v6 }
 0x418   :  { %v2342_v58 = vrot.slane %v2341_v53, 4 }
 0x41a   :  { %v2343_v43 = vadd.f32 %v2342_v58, %v2341_v53  ;;  %v9425_v58 = vld [vmem:[%s13012_s4] ss:$0 sm:$0xff] }
 0x41c   :  { %v2344_v11 = vrot.slane %v2343_v43, 2 }
 0x41e   :  { %v2345_v3 = vadd.f32 %v2344_v11, %v2343_v43 }
 0x420   :  { %v2346_v17 = vrot.slane %v2345_v3, 1 }
 0x422   :  { %v2347_v24 = vadd.f32 %v2346_v17, %v2345_v3 }
 0x424   :  { %v2355_v20 = vmul.f32 %v2354_v19, %v2347_v24 }
 0x426   :  { %v2356_v5 = vsub.f32 %v2290_v41, %v2355_v20  ;;  %v9407_v25 = vsub.f32 %v2293_v36, %v2355_v20  ;;  %v9409_v15 = vsub.f32 %v2296_v37, %v2355_v20  ;;  %v9413_v12 = vsub.f32 %v2299_v44, %v2355_v20 }
 0x427   :  { %v2360_v10 = vsub.f32 %v2302_v29, %v2355_v20  ;;  %v2361_v45 = vsub.f32 %v2305_v39, %v2355_v20  ;;  %v2362_v14 = vsub.f32 %v2308_v7, %v2355_v20  ;;  %v2363_v18 = vsub.f32 %v2311_v55, %v2355_v20 }
 0x428   :  { %v2369_v9 = vmul.f32 %v2356_v5, %v2356_v5  ;;  %v2370_v22 = vmul.f32 %v9407_v25, %v9407_v25  ;;  %v2371_v0 = vmul.f32 %v9409_v15, %v9409_v15  ;;  %v2372_v13 = vmul.f32 %v9413_v12, %v9413_v12 }
 0x429   :  { %v2373_v46 = vmul.f32 %v2360_v10, %v2360_v10  ;;  %v2374_v49 = vmul.f32 %v2361_v45, %v2361_v45  ;;  %v2364_v36 = vsub.f32 %v2314_v35, %v2355_v20  ;;  %v2375_v41 = vmul.f32 %v2362_v14, %v2362_v14 }
 0x42a   :  { %v2382_v62 = vadd.f32 %v2370_v22, %v2369_v9  ;;  %v2365_v52 = vsub.f32 %v2317_v16, %v2355_v20  ;;  %v2376_v44 = vmul.f32 %v2363_v18, %v2363_v18  ;;  %v2366_v33 = vsub.f32 %v2320_v4, %v2355_v20  ;;  %v9441_v22 = vld [vmem:[%s13013_s5] ss:$0 sm:$0xff] }
 0x42b   :  { %v2377_v28 = vmul.f32 %v2364_v36, %v2364_v36  ;;  %v2368_v56 = vsub.f32 %v2326_v32, %v2355_v20  ;;  %v2367_v39 = vsub.f32 %v2323_v47, %v2355_v20 }
 0x42c   :  { %v2383_v38 = vadd.f32 %v2382_v62, %v2371_v0  ;;  %v2378_v26 = vmul.f32 %v2365_v52, %v2365_v52  ;;  %v2379_v59 = vmul.f32 %v2366_v33, %v2366_v33 }
 0x42d   :  { %v2381_v21 = vmul.f32 %v2368_v56, %v2368_v56  ;;  %v2380_v61 = vmul.f32 %v2367_v39, %v2367_v39 }
 0x42e   :  { %v2384_v31 = vadd.f32 %v2383_v38, %v2372_v13 }
 0x42f   :  { %v2393_v35 = vsel %vm2339_vm0, %v2381_v21, 0.0 }
 0x430   :  { %v2385_v8 = vadd.f32 %v2384_v31, %v2373_v46 }
 0x432   :  { %v2386_v37 = vadd.f32 %v2385_v8, %v2374_v49 }
 0x434   :  { %v2387_v27 = vadd.f32 %v2386_v37, %v2375_v41 }
 0x436   :  { %v2388_v29 = vadd.f32 %v2387_v27, %v2376_v44 }
 0x438   :  { %v2389_v48 = vadd.f32 %v2388_v29, %v2377_v28 }
 0x43a   :  { %v2390_v7 = vadd.f32 %v2389_v48, %v2378_v26 }
 0x43c   :  { %v2391_v55 = vadd.f32 %v2390_v7, %v2379_v59 }
 0x43e   :  { %v2392_v30 = vadd.f32 %v2391_v55, %v2380_v61 }
 0x440   :  { %v2394_v54 = vadd.f32 %v2393_v35, %v2392_v30 }
 0x442   :  { %v2395_v60 = vrot.slane %v2394_v54, 4 }
 0x444   :  { %v2396_v16 = vadd.f32 %v2395_v60, %v2394_v54 }
 0x446   :  { %v2397_v40 = vrot.slane %v2396_v16, 2 }
 0x448   :  { %v2398_v63 = vadd.f32 %v2397_v40, %v2396_v16 }
 0x44a   :  { %v2399_v4 = vrot.slane %v2398_v63, 1 }
 0x44c   :  { %v2400_v1 = vadd.f32 %v2399_v4, %v2398_v63 }
 0x44e   :  { %v2401_v51 = vmul.f32 %v2400_v1, %v2354_v19 }
 0x450   :  { %v2402_v2 = vadd.f32 1e-05, %v2401_v51 }
 0x452   :  { %8006 = vrsqrt.f32 %v2402_v2  ;;  %vm2409_vm6 = vweird.f32 %v2402_v2 }
 0x458   :  { %v8007_v47 = vpop.eup %8006 }
 0x459   :  { %v2404_v42 = vmul.f32 %v8007_v47, %v2402_v2  ;;  %vm2410_vm4 = vweird.f32 %v8007_v47 }
 0x45a   :  { %vm2411_vm12 = vmor %vm2409_vm6, %vm2410_vm4 }
 0x45b   :  { %v2405_v32 = vmul.f32 %v8007_v47, %v2404_v42 }
 0x45d   :  { %v2406_v6 = vmul.f32 0.5, %v2405_v32 }
 0x45f   :  { %v2407_v23 = vsub.f32 1.5, %v2406_v6 }
 0x461   :  { %v2408_v34 = vmul.f32 %v8007_v47, %v2407_v23 }
 0x463   :  { %v9420_v53 = vsel %vm2411_vm12, %v8007_v47, %v2408_v34 }
 0x464   :  { %v2413_v57 = vmul.f32 %v9420_v53, %v2356_v5  ;;  %v2417_v43 = vmul.f32 %v9420_v53, %v2360_v10  ;;  %v2418_v11 = vmul.f32 %v9420_v53, %v2361_v45  ;;  %v2419_v50 = vmul.f32 %v9420_v53, %v2362_v14 }
 0x465   :  { %v2420_v3 = vmul.f32 %v9420_v53, %v2363_v18  ;;  %v2421_v17 = vmul.f32 %v9420_v53, %v2364_v36  ;;  %v2422_v19 = vmul.f32 %v9420_v53, %v2365_v52  ;;  %v2423_v24 = vmul.f32 %v9420_v53, %v2366_v33 }
 0x466   :  { %v2424_v20 = vmul.f32 %v9420_v53, %v2367_v39  ;;  %v2425_v9 = vmul.f32 %v9420_v53, %v2368_v56  ;;  %v2430_v5 = vmul.f32 %v9425_v58, %v2413_v57  ;;  %v2434_v10 = vmul.f32 %v9425_v58, %v2417_v43 }
 0x467   :  { %v2435_v0 = vmul.f32 %v9425_v58, %v2418_v11  ;;  %v2436_v62 = vmul.f32 %v9425_v58, %v2419_v50  ;;  %v2437_v45 = vmul.f32 %v9425_v58, %v2420_v3  ;;  %v2438_v13 = vmul.f32 %v9425_v58, %v2421_v17 }
 0x468   :  { %v2439_v38 = vmul.f32 %v9425_v58, %v2422_v19  ;;  %v2440_v14 = vmul.f32 %v9425_v58, %v2423_v24  ;;  %v2441_v46 = vmul.f32 %v9425_v58, %v2424_v20  ;;  %v2442_v31 = vmul.f32 %v9425_v58, %v2425_v9 }
 0x469   :  { %v2447_v18 = vadd.f32 %v9441_v22, %v2430_v5  ;;  %v9454_v49 = vadd.f32 %v9441_v22, %v2434_v10  ;;  %v9457_v8 = vadd.f32 %v9441_v22, %v2435_v0  ;;  %v9460_v36 = vadd.f32 %v9441_v22, %v2436_v62  ;;  %v2793_v10 = vld [vmem:[#allocation3 + $0x1] sm:$0x3f] }
 0x46a   :  { %v9463_v41 = vadd.f32 %v9441_v22, %v2437_v45  ;;  %v9466_v37 = vadd.f32 %v9441_v22, %v2438_v13  ;;  %v9469_v52 = vadd.f32 %v9441_v22, %v2439_v38  ;;  %v9472_v44 = vadd.f32 %v9441_v22, %v2440_v14  ;;  %v2944_v0 = vld [vmem:[#allocation3 + $0x81] sm:$0x3f] }
 0x46b   :  { %v9475_v27 = vadd.f32 %v9441_v22, %v2441_v46  ;;  %v9478_v33 = vadd.f32 %v9441_v22, %v2442_v31  ;;  %vm2460_vm15 = vcmp.ge.f32.partialorder %v2447_v18, 0.0  ;;  %v2473_v28 = vmul.f32 0.2, %v2447_v18 }
 0x46c   :  { %v2414_v56 = vmul.f32 %v9420_v53, %v9407_v25  ;;  %v2415_v25 = vmul.f32 %v9420_v53, %v9409_v15  ;;  %v2416_v47 = vmul.f32 %v9420_v53, %v9413_v12  ;;  %vm2464_vm12 = vcmp.ge.f32.partialorder %v9454_v49, 0.0 }
 0x46d   :  { %v2486_v29 = vsel %vm2460_vm15, %v2447_v18, %v2473_v28  ;;  %v7961_v62 = vpack.i.bf16 %v2944_v0, %v2793_v10  ;;  %v2817_v28 = vld [vmem:[#allocation3 + $0x3] sm:$0x3f]  ;;  %vm2465_vm15 = vcmp.ge.f32.partialorder %v9457_v8, 0.0  ;;  %v2480_v10 = vmul.f32 0.2, %v9463_v41 }
 0x46e   :  { %2635 = vst [vmem:[#allocation1] ss:$9 sm:$0xff] %v2486_v29  ;;  %v2431_v39 = vmul.f32 %v9425_v58, %v2414_v56  ;;  %v2512_v26 = vrot.slane %v2486_v29, 1  ;;  %v2513_v48 = vrot.slane %v2486_v29, 2  ;;  %v2514_v59 = vrot.slane %v2486_v29, 3 }
 0x46f   :  { %v2515_v7 = vrot.slane %v2486_v29, 4  ;;  %v2516_v21 = vrot.slane %v2486_v29, 5  ;;  %v2517_v61 = vrot.slane %v2486_v29, 6  ;;  %v2518_v54 = vrot.slane %v2486_v29, 7  ;;  %7962 = vrot.lane.b32.xlu1 %v7961_v62, %s8018_s21  ;;  %v2968_v29 = vld [vmem:[#allocation3 + $0x83] sm:$0x3f] }
 0x470   :  { %2637 = vst [vmem:[#allocation1 + $0x1] ss:$9 sm:$0xff] %v2512_v26  ;;  %v2448_v55 = vadd.f32 %v9441_v22, %v2431_v39  ;;  %v2432_v16 = vmul.f32 %v9425_v58, %v2415_v25  ;;  %v2433_v34 = vmul.f32 %v9425_v58, %v2416_v47  ;;  %v7971_v56 = vpack.i.bf16 %v2968_v29, %v2817_v28  ;;  %v2805_v39 = vld [vmem:[#allocation3 + $0x2] sm:$0x3f] }
 0x471   :  { %2639 = vst [vmem:[#allocation1 + $0x2] ss:$9 sm:$0xff] %v2513_v48  ;;  %v2956_v26 = vld [vmem:[#allocation3 + $0x82] sm:$0x3f] }
 0x472   :  { %2641 = vst [vmem:[#allocation1 + $0x3] ss:$9 sm:$0xff] %v2514_v59  ;;  %v2474_v30 = vmul.f32 0.2, %v2448_v55  ;;  %vm2461_vm2 = vcmp.ge.f32.partialorder %v2448_v55, 0.0  ;;  %v2449_v51 = vadd.f32 %v9441_v22, %v2432_v16  ;;  %v2450_v3 = vadd.f32 %v9441_v22, %v2433_v34 }
 0x473   :  { %2643 = vst [vmem:[#allocation1 + $0x4] ss:$9 sm:$0xff] %v2515_v7  ;;  %v2477_v22 = vmul.f32 0.2, %v9454_v49  ;;  %v7966_v59 = vpack.i.bf16 %v2956_v26, %v2805_v39  ;;  %v2481_v26 = vmul.f32 0.2, %v9466_v37 }
 0x474   :  { %2645 = vst [vmem:[#allocation1 + $0x5] ss:$9 sm:$0xff] %v2516_v21  ;;  %v2487_v35 = vsel %vm2461_vm2, %v2448_v55, %v2474_v30  ;;  %v2475_v15 = vmul.f32 0.2, %v2449_v51  ;;  %vm2462_vm4 = vcmp.ge.f32.partialorder %v2449_v51, 0.0  ;;  %vm2463_vm6 = vcmp.ge.f32.partialorder %v2450_v3, 0.0 }
 0x475   :  { %2647 = vst [vmem:[#allocation1 + $0x6] ss:$9 sm:$0xff] %v2517_v61  ;;  %v2519_v40 = vrot.slane %v2487_v35, 1  ;;  %v2520_v63 = vrot.slane %v2487_v35, 2  ;;  %v2521_v4 = vrot.slane %v2487_v35, 3  ;;  %v2522_v1 = vrot.slane %v2487_v35, 4  ;;  %7967 = vrot.lane.b32.xlu2 %v7966_v59, %s8020_s2 }
 0x476   :  { %v2523_v2 = vrot.slane %v2487_v35, 5  ;;  %v2488_v42 = vsel %vm2462_vm4, %v2449_v51, %v2475_v15  ;;  %v2524_v32 = vrot.slane %v2487_v35, 6  ;;  %v2525_v6 = vrot.slane %v2487_v35, 7 }
 0x477   :  { %v2526_v57 = vrot.slane %v2488_v42, 1  ;;  %v2527_v43 = vrot.slane %v2488_v42, 2  ;;  %v2528_v11 = vrot.slane %v2488_v42, 3  ;;  %v2529_v50 = vrot.slane %v2488_v42, 4  ;;  %7972 = vrot.lane.b32.xlu1 %v7971_v56, %s8021_s22 }
 0x478   :  { %v2476_v12 = vmul.f32 0.2, %v2450_v3  ;;  %v2530_v53 = vrot.slane %v2488_v42, 5  ;;  %v2531_v19 = vrot.slane %v2488_v42, 6  ;;  %v2532_v58 = vrot.slane %v2488_v42, 7 }
 0x479   :  { %v2490_v45 = vsel %vm2464_vm12, %v9454_v49, %v2477_v22  ;;  %v2478_v49 = vmul.f32 0.2, %v9457_v8  ;;  %v2479_v51 = vmul.f32 0.2, %v9460_v36  ;;  %vm2466_vm2 = vcmp.ge.f32.partialorder %v9460_v36, 0.0 }
 0x47a   :  { %v2489_v17 = vsel %vm2463_vm6, %v2450_v3, %v2476_v12  ;;  %v2540_v18 = vrot.slane %v2490_v45, 1  ;;  %v2541_v48 = vrot.slane %v2490_v45, 2  ;;  %v2542_v7 = vrot.slane %v2490_v45, 3 }
 0x47b   :  { %v2533_v20 = vrot.slane %v2489_v17, 1  ;;  %v2534_v9 = vrot.slane %v2489_v17, 2  ;;  %v2535_v5 = vrot.slane %v2489_v17, 3  ;;  %v2536_v13 = vrot.slane %v2489_v17, 4 }
 0x47c   :  { %v2648_v60 = vld [vmem:[#allocation1] sm:$0xff]  ;;  %v2537_v38 = vrot.slane %v2489_v17, 5  ;;  %v2538_v46 = vrot.slane %v2489_v17, 6  ;;  %v2539_v31 = vrot.slane %v2489_v17, 7  ;;  %v2543_v30 = vrot.slane %v2490_v45, 4 }
 0x47d   :  { %2649 = vst [vmem:[#allocation1] ss:$9 sm:$0xff] %v2518_v54  ;;  %v2491_v54 = vsel %vm2465_vm15, %v9457_v8, %v2478_v49  ;;  %v2546_v16 = vrot.slane %v2490_v45, 7  ;;  %vm2467_vm4 = vcmp.ge.f32.partialorder %v9463_v41, 0.0  ;;  %vm2468_vm6 = vcmp.ge.f32.partialorder %v9466_v37, 0.0 }
 0x47e   :  { %2650 = vst [vmem:[#allocation1 + $0x1] ss:$9 sm:$0xff] %v2487_v35  ;;  %v2544_v35 = vrot.slane %v2490_v45, 5  ;;  %v2548_v8 = vrot.slane %v2491_v54, 2  ;;  %v2550_v15 = vrot.slane %v2491_v54, 4  ;;  %v2552_v34 = vrot.slane %v2491_v54, 6 }
 0x47f   :  { %2651 = vst [vmem:[#allocation1 + $0x2] ss:$9 sm:$0xff] %v2519_v40  ;;  %v2547_v40 = vrot.slane %v2491_v54, 1  ;;  %v2493_v0 = vsel %vm2467_vm4, %v9463_v41, %v2480_v10  ;;  %vm2469_vm12 = vcmp.ge.f32.partialorder %v9469_v52, 0.0  ;;  %vm2470_vm15 = vcmp.ge.f32.partialorder %v9472_v44, 0.0 }
 0x480   :  { %2652 = vst [vmem:[#allocation1 + $0x3] ss:$9 sm:$0xff] %v2520_v63  ;;  %v2565_v28 = vrot.slane %v2493_v0, 5  ;;  %v2566_v29 = vrot.slane %v2493_v0, 6  ;;  %v2567_v59 = vrot.slane %v2493_v0, 7  ;;  %vm2472_vm4 = vcmp.ge.f32.partialorder %v9478_v33, 0.0 }
 0x481   :  { %2653 = vst [vmem:[#allocation1 + $0x4] ss:$9 sm:$0xff] %v2521_v4 }
 0x482   :  { %2654 = vst [vmem:[#allocation1 + $0x5] ss:$9 sm:$0xff] %v2522_v1 }
 0x483   :  { %2655 = vst [vmem:[#allocation1 + $0x6] ss:$9 sm:$0xff] %v2523_v2  ;;  %v2549_v2 = vrot.slane %v2491_v54, 3 }
 0x484   :  { %2767 = vst [vmem:[#allocation3 + $0x11] sm:$0x7f] %v2648_v60  ;;  %v2545_v60 = vrot.slane %v2490_v45, 6 }
 0x48a   :  { %v2656_v23 = vld [vmem:[#allocation1] sm:$0xff] }
 0x48b   :  { %2657 = vst [vmem:[#allocation1] ss:$9 sm:$0xff] %v2524_v32  ;;  %v2865_v21 = vld [vmem:[#allocation3 + $0x13] sm:$0x3f] }
 0x48c   :  { %2658 = vst [vmem:[#allocation1 + $0x1] ss:$9 sm:$0xff] %v2525_v6  ;;  %v2841_v61 = vld [vmem:[#allocation3 + $0x11] sm:$0x3f]  ;;  %3227 = vrot.lane.b32.xlu0 %v2865_v21, %s8021_s22  ;;  %v2551_v6 = vrot.slane %v2491_v54, 5 }
 0x48d   :  { %2659 = vst [vmem:[#allocation1 + $0x2] ss:$9 sm:$0xff] %v2488_v42  ;;  %v2806_v55 = vld [vmem:[#allocation3 + $0x12] sm:$0x3f]  ;;  %3131 = vrot.lane.b32.xlu1 %v2841_v61, %s8018_s21 }
 0x48e   :  { %2660 = vst [vmem:[#allocation1 + $0x3] ss:$9 sm:$0xff] %v2526_v57  ;;  %3037 = vrot.lane.b32.xlu2 %v2806_v55, %s8020_s2  ;;  %v2853_v63 = vld [vmem:[#allocation3 + $0x12] sm:$0x3f]  ;;  %v2553_v57 = vrot.slane %v2491_v54, 7 }
 0x48f   :  { %2661 = vst [vmem:[#allocation1 + $0x4] ss:$9 sm:$0xff] %v2527_v43  ;;  %v2794_v4 = vld [vmem:[#allocation3 + $0x11] sm:$0x3f]  ;;  %v2492_v43 = vsel %vm2466_vm2, %v9460_v36, %v2479_v51  ;;  %vm2471_vm2 = vcmp.ge.f32.partialorder %v9475_v27, 0.0 }
 0x490   :  { %2662 = vst [vmem:[#allocation1 + $0x5] ss:$9 sm:$0xff] %v2528_v11  ;;  %v2818_v42 = vld [vmem:[#allocation3 + $0x13] sm:$0x3f]  ;;  %v2554_v12 = vrot.slane %v2492_v43, 1  ;;  %v2560_v22 = vrot.slane %v2492_v43, 7 }
 0x491   :  { %2663 = vst [vmem:[#allocation1 + $0x6] ss:$9 sm:$0xff] %v2529_v50 }
 0x492   :  { %2768 = vst [vmem:[#allocation3 + $0x21] sm:$0x7f] %v2656_v23 }
 0x494   :  { %2989 = vrot.lane.b32.xlu0 %v2794_v4, %s8018_s21 }
 0x495   :  { %3179 = vrot.lane.b32.xlu1 %v2853_v63, %s8020_s2 }
 0x498   :  { %v2664_v24 = vld [vmem:[#allocation1] sm:$0xff] }
 0x499   :  { %2665 = vst [vmem:[#allocation1] ss:$9 sm:$0xff] %v2530_v53  ;;  %v2890_v1 = vld [vmem:[#allocation3 + $0x21] sm:$0x3f]  ;;  %v2555_v53 = vrot.slane %v2492_v43, 2 }
 0x49a   :  { %2666 = vst [vmem:[#allocation1 + $0x1] ss:$9 sm:$0xff] %v2531_v19  ;;  %3275 = vrot.lane.b32.xlu2 %v2890_v1, %s8018_s21  ;;  %v2795_v32 = vld [vmem:[#allocation3 + $0x21] sm:$0x3f]  ;;  %v2556_v19 = vrot.slane %v2492_v43, 3 }
 0x49b   :  { %2667 = vst [vmem:[#allocation1 + $0x2] ss:$9 sm:$0xff] %v2532_v58  ;;  %v2902_v23 = vld [vmem:[#allocation3 + $0x22] sm:$0x3f]  ;;  %v2558_v58 = vrot.slane %v2492_v43, 5 }
 0x49c   :  { %2668 = vst [vmem:[#allocation1 + $0x3] ss:$9 sm:$0xff] %v2489_v17  ;;  %3085 = vrot.lane.b32.xlu0 %v2818_v42, %s8021_s22  ;;  %v2854_v11 = vld [vmem:[#allocation3 + $0x22] sm:$0x3f] }
 0x49d   :  { %2669 = vst [vmem:[#allocation1 + $0x4] ss:$9 sm:$0xff] %v2533_v20  ;;  %2991 = vrot.lane.b32.xlu1 %v2795_v32, %s8018_s21  ;;  %v2842_v3 = vld [vmem:[#allocation3 + $0x21] sm:$0x3f] }
 0x49e   :  { %2670 = vst [vmem:[#allocation1 + $0x5] ss:$9 sm:$0xff] %v2534_v9  ;;  %v2819_v36 = vld [vmem:[#allocation3 + $0x23] sm:$0x3f]  ;;  %v2559_v9 = vrot.slane %v2492_v43, 6 }
 0x49f   :  { %2671 = vst [vmem:[#allocation1 + $0x6] ss:$9 sm:$0xff] %v2535_v5  ;;  %v2914_v5 = vld [vmem:[#allocation3 + $0x23] sm:$0x3f] }
 0x4a0   :  { %2769 = vst [vmem:[#allocation3 + $0x31] sm:$0x7f] %v2664_v24  ;;  %v2557_v24 = vrot.slane %v2492_v43, 4  ;;  %v2807_v39 = vld [vmem:[#allocation3 + $0x22] sm:$0x3f] }
 0x4a2   :  { %3323 = vrot.lane.b32.xlu2 %v2902_v23, %s8020_s2 }
 0x4a4   :  { %3181 = vrot.lane.b32.xlu0 %v2854_v11, %s8020_s2 }
 0x4a6   :  { %v2672_v14 = vld [vmem:[#allocation1] sm:$0xff] }
 0x4a7   :  { %2673 = vst [vmem:[#allocation1] ss:$9 sm:$0xff] %v2536_v13  ;;  %v2891_v50 = vld [vmem:[#allocation3 + $0x31] sm:$0x3f]  ;;  %v2866_v13 = vld [vmem:[#allocation3 + $0x23] sm:$0x3f] }
 0x4a8   :  { %2674 = vst [vmem:[#allocation1 + $0x1] ss:$9 sm:$0xff] %v2537_v38  ;;  %3277 = vrot.lane.b32.xlu1 %v2891_v50, %s8018_s21  ;;  %v2963_v20 = vld [vmem:[#allocation3 + $0x33] sm:$0x3f]  ;;  %v2561_v38 = vrot.slane %v2493_v0, 1 }
 0x4a9   :  { %2675 = vst [vmem:[#allocation1 + $0x2] ss:$9 sm:$0xff] %v2538_v46  ;;  %v2939_v62 = vld [vmem:[#allocation3 + $0x31] sm:$0x3f]  ;;  %v2562_v46 = vrot.slane %v2493_v0, 2 }
 0x4aa   :  { %2676 = vst [vmem:[#allocation1 + $0x3] ss:$9 sm:$0xff] %v2539_v31  ;;  %3133 = vrot.lane.b32.xlu2 %v2842_v3, %s8018_s21  ;;  %v2563_v31 = vrot.slane %v2493_v0, 3  ;;  %v2951_v41 = vld [vmem:[#allocation3 + $0x32] sm:$0x3f] }
 0x4ab   :  { %2677 = vst [vmem:[#allocation1 + $0x4] ss:$9 sm:$0xff] %v2490_v45  ;;  %v2903_v45 = vld [vmem:[#allocation3 + $0x32] sm:$0x3f] }
 0x4ac   :  { %2678 = vst [vmem:[#allocation1 + $0x5] ss:$9 sm:$0xff] %v2540_v18  ;;  %3087 = vrot.lane.b32.xlu0 %v2819_v36, %s8021_s22  ;;  %v2564_v18 = vrot.slane %v2493_v0, 4  ;;  %v2843_v56 = vld [vmem:[#allocation3 + $0x31] sm:$0x3f] }
 0x4ad   :  { %2679 = vst [vmem:[#allocation1 + $0x6] ss:$9 sm:$0xff] %v2541_v48  ;;  %v2494_v48 = vsel %vm2468_vm6, %v9466_v37, %v2481_v26  ;;  %v2915_v49 = vld [vmem:[#allocation3 + $0x33] sm:$0x3f]  ;;  %v2485_v26 = vmul.f32 0.2, %v9478_v33 }
 0x4ae   :  { %2770 = vst [vmem:[#allocation3 + $0x41] sm:$0x7f] %v2672_v14  ;;  %v2867_v61 = vld [vmem:[#allocation3 + $0x33] sm:$0x3f]  ;;  %v2568_v55 = vrot.slane %v2494_v48, 1  ;;  %v2572_v37 = vrot.slane %v2494_v48, 5 }
 0x4af   :  { %v2573_v4 = vrot.slane %v2494_v48, 6  ;;  %v2574_v1 = vrot.slane %v2494_v48, 7  ;;  %vm13029_vm6 = vcmask 1043458  }
 0x4b0   :  { %3515 = vrot.lane.b32.xlu1 %v2963_v20, %s8021_s22 }
 0x4b2   :  { %3371 = vrot.lane.b32.xlu2 %v2914_v5, %s8021_s22 }
 0x4b4   :  { %v2680_v25 = vld [vmem:[#allocation1] sm:$0xff]  ;;  %3419 = vrot.lane.b32.xlu0 %v2939_v62, %s8018_s21 }
 0x4b5   :  { %2681 = vst [vmem:[#allocation1] ss:$9 sm:$0xff] %v2542_v7  ;;  %v2855_v7 = vld [vmem:[#allocation3 + $0x32] sm:$0x3f]  ;;  %v2964_v51 = vld [vmem:[#allocation3 + $0x43] sm:$0x3f] }
 0x4b6   :  { %2682 = vst [vmem:[#allocation1 + $0x1] ss:$9 sm:$0xff] %v2543_v30  ;;  %v2569_v30 = vrot.slane %v2494_v48, 2  ;;  %v2916_v23 = vld [vmem:[#allocation3 + $0x43] sm:$0x3f] }
 0x4b7   :  { %2683 = vst [vmem:[#allocation1 + $0x2] ss:$9 sm:$0xff] %v2544_v35  ;;  %v2571_v35 = vrot.slane %v2494_v48, 4  ;;  %v2904_v36 = vld [vmem:[#allocation3 + $0x42] sm:$0x3f] }
 0x4b8   :  { %2684 = vst [vmem:[#allocation1 + $0x3] ss:$9 sm:$0xff] %v2545_v60  ;;  %3325 = vrot.lane.b32.xlu1 %v2903_v45, %s8020_s2  ;;  %v2796_v60 = vld [vmem:[#allocation3 + $0x31] sm:$0x3f]  ;;  %v2797_v5 = vld [vmem:[#allocation3 + $0x41] sm:$0x3f] }
 0x4b9   :  { %2685 = vst [vmem:[#allocation1 + $0x4] ss:$9 sm:$0xff] %v2546_v16  ;;  %v2808_v16 = vld [vmem:[#allocation3 + $0x32] sm:$0x3f]  ;;  %v2868_v10 = vld [vmem:[#allocation3 + $0x43] sm:$0x3f] }
 0x4ba   :  { %2686 = vst [vmem:[#allocation1 + $0x5] ss:$9 sm:$0xff] %v2491_v54  ;;  %3229 = vrot.lane.b32.xlu2 %v2866_v13, %s8021_s22  ;;  %v2820_v54 = vld [vmem:[#allocation3 + $0x33] sm:$0x3f] }
 0x4bb   :  { %2687 = vst [vmem:[#allocation1 + $0x6] ss:$9 sm:$0xff] %v2547_v40  ;;  %v2482_v40 = vmul.f32 0.2, %v9469_v52 }
 0x4bc   :  { %2771 = vst [vmem:[#allocation3 + $0x51] sm:$0x7f] %v2680_v25  ;;  %3467 = vrot.lane.b32.xlu0 %v2951_v41, %s8020_s2  ;;  %v2570_v25 = vrot.slane %v2494_v48, 3 }
 0x4bd   :  { %v2495_v63 = vsel %vm2469_vm12, %v9469_v52, %v2482_v40  ;;  %vm3780_vm12 = vcmask 1045508  }
 0x4be   :  { %v2576_v42 = vrot.slane %v2495_v63, 2  ;;  %v2577_v32 = vrot.slane %v2495_v63, 3  ;;  %v2578_v52 = vrot.slane %v2495_v63, 4  ;;  %v2579_v11 = vrot.slane %v2495_v63, 5 }
 0x4bf   :  { %v2580_v3 = vrot.slane %v2495_v63, 6 }
 0x4c0   :  { %3135 = vrot.lane.b32.xlu1 %v2843_v56, %s8018_s21 }
 0x4c2   :  { %v2688_v47 = vld [vmem:[#allocation1] sm:$0xff]  ;;  %3039 = vrot.lane.b32.xlu2 %v2807_v39, %s8020_s2 }
 0x4c3   :  { %2689 = vst [vmem:[#allocation1] ss:$9 sm:$0xff] %v2548_v8  ;;  %v2917_v41 = vld [vmem:[#allocation3 + $0x53] sm:$0x3f] }
 0x4c4   :  { %2690 = vst [vmem:[#allocation1 + $0x1] ss:$9 sm:$0xff] %v2549_v2  ;;  %3373 = vrot.lane.b32.xlu0 %v2915_v49, %s8021_s22  ;;  %v2940_v2 = vld [vmem:[#allocation3 + $0x41] sm:$0x3f]  ;;  %v2893_v56 = vld [vmem:[#allocation3 + $0x51] sm:$0x3f] }
 0x4c5   :  { %2691 = vst [vmem:[#allocation1 + $0x2] ss:$9 sm:$0xff] %v2550_v15  ;;  %v2575_v15 = vrot.slane %v2495_v63, 1  ;;  %v2869_v49 = vld [vmem:[#allocation3 + $0x53] sm:$0x3f] }
 0x4c6   :  { %2692 = vst [vmem:[#allocation1 + $0x3] ss:$9 sm:$0xff] %v2551_v6  ;;  %v2483_v6 = vmul.f32 0.2, %v9472_v44  ;;  %v2845_v40 = vld [vmem:[#allocation3 + $0x51] sm:$0x3f] }
 0x4c7   :  { %2693 = vst [vmem:[#allocation1 + $0x4] ss:$9 sm:$0xff] %v2552_v34  ;;  %v2844_v34 = vld [vmem:[#allocation3 + $0x41] sm:$0x3f] }
 0x4c8   :  { %2694 = vst [vmem:[#allocation1 + $0x5] ss:$9 sm:$0xff] %v2553_v57  ;;  %3183 = vrot.lane.b32.xlu1 %v2855_v7, %s8020_s2  ;;  %v2892_v57 = vld [vmem:[#allocation3 + $0x41] sm:$0x3f] }
 0x4c9   :  { %2695 = vst [vmem:[#allocation1 + $0x6] ss:$9 sm:$0xff] %v2492_v43  ;;  %v2496_v43 = vsel %vm2470_vm15, %v9472_v44, %v2483_v6  ;;  %v2798_v6 = vld [vmem:[#allocation3 + $0x51] sm:$0x3f]  ;;  %vm13030_vm15 = vcmask 1045504  }
 0x4ca   :  { %2772 = vst [vmem:[#allocation3 + $0x61] sm:$0x7f] %v2688_v47  ;;  %3231 = vrot.lane.b32.xlu2 %v2867_v61, %s8021_s22  ;;  %v2952_v47 = vld [vmem:[#allocation3 + $0x42] sm:$0x3f]  ;;  %v2584_v44 = vrot.slane %v2496_v43, 3  ;;  %v2586_v62 = vrot.slane %v2496_v43, 5 }
 0x4cb   :  { %v2905_v61 = vld [vmem:[#allocation3 + $0x52] sm:$0x3f] }
 0x4cc   :  { %3089 = vrot.lane.b32.xlu0 %v2820_v54, %s8021_s22 }
 0x4cf   :  { %v9549_v50 = vpop.permute.xlu2 %7967 }
 0x4d0   :  { %v2696_v17 = vld [vmem:[#allocation1] sm:$0xff]  ;;  %2993 = vrot.lane.b32.xlu1 %v2796_v60, %s8018_s21 }
 0x4d1   :  { %2697 = vst [vmem:[#allocation1] ss:$9 sm:$0xff] %v2554_v12 }
 0x4d2   :  { %2698 = vst [vmem:[#allocation1 + $0x1] ss:$9 sm:$0xff] %v2555_v53  ;;  %3041 = vrot.lane.b32.xlu2 %v2808_v16, %s8020_s2  ;;  %v2581_v53 = vrot.slane %v2495_v63, 7 }
 0x4d3   :  { %2699 = vst [vmem:[#allocation1 + $0x2] ss:$9 sm:$0xff] %v2556_v19  ;;  %v2856_v19 = vld [vmem:[#allocation3 + $0x42] sm:$0x3f] }
 0x4d4   :  { %2700 = vst [vmem:[#allocation1 + $0x3] ss:$9 sm:$0xff] %v2557_v24  ;;  %3421 = vrot.lane.b32.xlu0 %v2940_v2, %s8018_s21  ;;  %v2941_v24 = vld [vmem:[#allocation3 + $0x51] sm:$0x3f] }
 0x4d5   :  { %2701 = vst [vmem:[#allocation1 + $0x4] ss:$9 sm:$0xff] %v2558_v58  ;;  %v2583_v58 = vrot.slane %v2496_v43, 2  ;;  %v2857_v2 = vld [vmem:[#allocation3 + $0x52] sm:$0x3f] }
 0x4d6   :  { %2702 = vst [vmem:[#allocation1 + $0x5] ss:$9 sm:$0xff] %v2559_v9  ;;  %v2484_v9 = vmul.f32 0.2, %v9475_v27 }
 0x4d7   :  { %2703 = vst [vmem:[#allocation1 + $0x6] ss:$9 sm:$0xff] %v2560_v22  ;;  %v2953_v22 = vld [vmem:[#allocation3 + $0x52] sm:$0x3f] }
 0x4d8   :  { %2773 = vst [vmem:[#allocation3 + $0x71] sm:$0x7f] %v2696_v17  ;;  %3517 = vrot.lane.b32.xlu1 %v2964_v51, %s8021_s22  ;;  %v2582_v17 = vrot.slane %v2496_v43, 1 }
 0x4da   :  { %3469 = vrot.lane.b32.xlu2 %v2952_v47, %s8020_s2  ;;  %v2906_v47 = vld [vmem:[#allocation3 + $0x62] sm:$0x3f] }
 0x4dc   :  { %3375 = vrot.lane.b32.xlu0 %v2916_v23, %s8021_s22 }
 0x4de   :  { %v2704_v14 = vld [vmem:[#allocation1] sm:$0xff] }
 0x4df   :  { %2705 = vst [vmem:[#allocation1] ss:$9 sm:$0xff] %v2493_v0  ;;  %v2585_v0 = vrot.slane %v2496_v43, 4  ;;  %v2943_v23 = vld [vmem:[#allocation3 + $0x71] sm:$0x3f] }
 0x4e0   :  { %2706 = vst [vmem:[#allocation1 + $0x1] ss:$9 sm:$0xff] %v2561_v38  ;;  %3137 = vrot.lane.b32.xlu1 %v2844_v34, %s8018_s21  ;;  %v2497_v38 = vsel %vm2471_vm2, %v9475_v27, %v2484_v9  ;;  %v2846_v34 = vld [vmem:[#allocation3 + $0x61] sm:$0x3f]  ;;  %vm13024_vm2 = vcmask 1043456  }
 0x4e1   :  { %2707 = vst [vmem:[#allocation1 + $0x2] ss:$9 sm:$0xff] %v2562_v46  ;;  %v9561_v13 = vpop.permute.xlu1 %7962  ;;  %v2592_v7 = vrot.slane %v2497_v38, 4  ;;  %v2595_v54 = vrot.slane %v2497_v38, 7 }
 0x4e2   :  { %2708 = vst [vmem:[#allocation1 + $0x3] ss:$9 sm:$0xff] %v2563_v31  ;;  %3279 = vrot.lane.b32.xlu2 %v2892_v57, %s8018_s21  ;;  %v2588_v31 = vrot.slane %v2496_v43, 7 }
 0x4e3   :  { %2709 = vst [vmem:[#allocation1 + $0x4] ss:$9 sm:$0xff] %v2564_v18  ;;  %v2589_v18 = vrot.slane %v2497_v38, 1 }
 0x4e4   :  { %2710 = vst [vmem:[#allocation1 + $0x5] ss:$9 sm:$0xff] %v2565_v28  ;;  %3423 = vrot.lane.b32.xlu0 %v2941_v24, %s8018_s21  ;;  %v2590_v28 = vrot.slane %v2497_v38, 2  ;;  %v2918_v24 = vld [vmem:[#allocation3 + $0x63] sm:$0x3f] }
 0x4e5   :  { %2711 = vst [vmem:[#allocation1 + $0x6] ss:$9 sm:$0xff] %v2566_v29  ;;  %v2809_v29 = vld [vmem:[#allocation3 + $0x42] sm:$0x3f] }
 0x4e6   :  { %2774 = vst [vmem:[#allocation3 + $0xa1] sm:$0x7f] %v2704_v14  ;;  %v2587_v14 = vrot.slane %v2496_v43, 6 }
 0x4e8   :  { %3185 = vrot.lane.b32.xlu1 %v2856_v19, %s8020_s2  ;;  %v9554_v20 = vpop.permute.xlu2 %3037  ;;  %v3979_v19 = vld [vmem:[%s13014_s6 + $0x1f8] sm:$0xff] }
 0x4e9   :  { %v9569_v27 = vpop.permute.xlu1 %7972  ;;  %4227 = vmatpush.msrb.mxu2 %v3979_v19 }
 0x4ea   :  { %3327 = vrot.lane.b32.xlu2 %v2904_v36, %s8020_s2  ;;  %v3962_v36 = vld [vmem:[%s13014_s6 + $0x170] sm:$0xff] }
 0x4ec   :  { %v2712_v21 = vld [vmem:[#allocation1] sm:$0xff]  ;;  %3471 = vrot.lane.b32.xlu0 %v2953_v22, %s8020_s2  ;;  %v3929_v22 = vld [vmem:[%s13014_s6 + $0x68] sm:$0xff] }
 0x4ed   :  { %2713 = vst [vmem:[#allocation1] ss:$9 sm:$0xff] %v2567_v59  ;;  %v2965_v59 = vld [vmem:[#allocation3 + $0x53] sm:$0x3f] }
 0x4ee   :  { %2714 = vst [vmem:[#allocation1 + $0x1] ss:$9 sm:$0xff] %v2494_v48  ;;  %v2591_v48 = vrot.slane %v2497_v38, 3 }
 0x4ef   :  { %2715 = vst [vmem:[#allocation1 + $0x2] ss:$9 sm:$0xff] %v2568_v55  ;;  %v2593_v55 = vrot.slane %v2497_v38, 5 }
 0x4f0   :  { %2716 = vst [vmem:[#allocation1 + $0x3] ss:$9 sm:$0xff] %v2569_v30  ;;  %2995 = vrot.lane.b32.xlu1 %v2797_v5, %s8018_s21  ;;  %v2498_v30 = vsel %vm2472_vm4, %v9478_v33, %v2485_v26  ;;  %v2894_v33 = vld [vmem:[#allocation3 + $0x61] sm:$0x3f]  ;;  %v3926_v26 = vld [vmem:[%s13014_s6 + $0x50] sm:$0xff]  ;;  %vm13023_vm4 = vcmask 1045506  }
 0x4f1   :  { %2717 = vst [vmem:[#allocation1 + $0x4] ss:$9 sm:$0xff] %v2570_v25  ;;  %v2594_v25 = vrot.slane %v2497_v38, 6  ;;  %v2596_v16 = vrot.slane %v2498_v30, 1 }
 0x4f2   :  { %2718 = vst [vmem:[#allocation1 + $0x5] ss:$9 sm:$0xff] %v2571_v35  ;;  %3233 = vrot.lane.b32.xlu2 %v2868_v10, %s8021_s22 }
 0x4f3   :  { %2719 = vst [vmem:[#allocation1 + $0x6] ss:$9 sm:$0xff] %v2572_v37 }
 0x4f4   :  { %2775 = vst [vmem:[#allocation3 + $0xb1] sm:$0x7f] %v2712_v21  ;;  %v9564_v46 = vpop.permute.xlu2 %3275  ;;  %3377 = vrot.lane.b32.xlu0 %v2917_v41, %s8021_s22  ;;  %v3959_v41 = vld [vmem:[%s13014_s6 + $0x158] sm:$0xff] }
 0x4f8   :  { %3043 = vrot.lane.b32.xlu1 %v2809_v29, %s8020_s2  ;;  %v2858_v29 = vld [vmem:[#allocation3 + $0x62] sm:$0x3f] }
 0x4fa   :  { %v2720_v8 = vld [vmem:[#allocation1] sm:$0xff]  ;;  %3281 = vrot.lane.b32.xlu2 %v2893_v56, %s8018_s21  ;;  %v3975_v56 = vld [vmem:[%s13014_s6 + $0x1d8] sm:$0xff] }
 0x4fb   :  { %2721 = vst [vmem:[#allocation1] ss:$9 sm:$0xff] %v2573_v4 }
 0x4fc   :  { %2722 = vst [vmem:[#allocation1 + $0x1] ss:$9 sm:$0xff] %v2574_v1  ;;  %v9571_v39 = vpop.permute.xlu2 %3323  ;;  %3235 = vrot.lane.b32.xlu0 %v2869_v49, %s8021_s22 }
 0x4fd   :  { %2723 = vst [vmem:[#allocation1 + $0x2] ss:$9 sm:$0xff] %v2495_v63  ;;  %v2942_v63 = vld [vmem:[#allocation3 + $0x61] sm:$0x3f] }
 0x4fe   :  { %2724 = vst [vmem:[#allocation1 + $0x3] ss:$9 sm:$0xff] %v2575_v15  ;;  %v9579_v35 = vpop.permute.xlu0 %3227  ;;  %v2954_v15 = vld [vmem:[#allocation3 + $0x62] sm:$0x3f] }
 0x4ff   :  { %2725 = vst [vmem:[#allocation1 + $0x4] ss:$9 sm:$0xff] %v2576_v42  ;;  %v9581_v37 = vpop.permute.xlu1 %3131 }
 0x500   :  { %2726 = vst [vmem:[#allocation1 + $0x5] ss:$9 sm:$0xff] %v2577_v32  ;;  %3519 = vrot.lane.b32.xlu1 %v2965_v59, %s8021_s22  ;;  %v2829_v59 = vld [vmem:[#allocation3 + $0x10] sm:$0x3f] }
 0x501   :  { %2727 = vst [vmem:[#allocation1 + $0x6] ss:$9 sm:$0xff] %v2578_v52 }
 0x502   :  { %2776 = vst [vmem:[#allocation3 + $0xc1] sm:$0x7f] %v2720_v8  ;;  %3329 = vrot.lane.b32.xlu2 %v2905_v61, %s8020_s2  ;;  %v2781_v61 = vld [vmem:[#allocation3] sm:$0x3f] }
 0x504   :  { %v9583_v60 = vpop.permute.xlu2 %3133  ;;  %3425 = vrot.lane.b32.xlu0 %v2942_v63, %s8018_s21 }
 0x506   :  { %v9590_v1 = vpop.permute.xlu0 %2989 }
 0x507   :  { %v9588_v4 = vpop.permute.xlu1 %3179 }
 0x508   :  { %v2728_v12 = vld [vmem:[#allocation1] sm:$0xff]  ;;  %3139 = vrot.lane.b32.xlu1 %v2845_v40, %s8018_s21  ;;  %v7969_v40 = vunpack.i.l.bf16 %v9549_v50 }
 0x509   :  { %2729 = vst [vmem:[#allocation1] ss:$9 sm:$0xff] %v2579_v11 }
 0x50a   :  { %2730 = vst [vmem:[#allocation1 + $0x1] ss:$9 sm:$0xff] %v2580_v3  ;;  %3283 = vrot.lane.b32.xlu2 %v2894_v33, %s8018_s21  ;;  %v2966_v3 = vld [vmem:[#allocation3 + $0x63] sm:$0x3f] }
 0x50b   :  { %2731 = vst [vmem:[#allocation1 + $0x2] ss:$9 sm:$0xff] %v2581_v53  ;;  %v3931_v53 = vld [vmem:[%s13014_s6 + $0x78] sm:$0xff]  ;;  %v2878_v33 = vld [vmem:[#allocation3 + $0x20] sm:$0x3f] }
 0x50c   :  { %2732 = vst [vmem:[#allocation1 + $0x3] ss:$9 sm:$0xff] %v2496_v43  ;;  %v9592_v8 = vpop.permute.xlu2 %3371  ;;  %3473 = vrot.lane.b32.xlu0 %v2954_v15, %s8020_s2  ;;  %4095 = vmatpush.msra.mxu3 %v3931_v53  ;;  %v2919_v15 = vld [vmem:[#allocation3 + $0x73] sm:$0x3f] }
 0x50d   :  { %2733 = vst [vmem:[#allocation1 + $0x4] ss:$9 sm:$0xff] %v2582_v17  ;;  %v3963_v17 = vld [vmem:[%s13014_s6 + $0x178] sm:$0xff] }
 0x50e   :  { %2734 = vst [vmem:[#allocation1 + $0x5] ss:$9 sm:$0xff] %v2583_v58  ;;  %v9597_v42 = vpop.permute.xlu0 %3085  ;;  %v3930_v58 = vld [vmem:[%s13014_s6 + $0x70] sm:$0xff]  ;;  %4183 = vmatpush.msrb.mxu1 %v3963_v17  ;;  %v2927_v17 = vld [vmem:[#allocation3 + $0x30] sm:$0x3f] }
 0x50f   :  { %2735 = vst [vmem:[#allocation1 + $0x6] ss:$9 sm:$0xff] %v2584_v44  ;;  %v9599_v32 = vpop.permute.xlu1 %2991  ;;  %v3978_v44 = vld [vmem:[%s13014_s6 + $0x1f0] sm:$0xff]  ;;  %4096 = vmatpush.msra.mxu3 %v3930_v58 }
 0x510   :  { %2777 = vst [vmem:[#allocation3 + $0xd1] sm:$0x7f] %v2728_v12  ;;  %3187 = vrot.lane.b32.xlu1 %v2857_v2, %s8020_s2  ;;  %v2955_v12 = vld [vmem:[#allocation3 + $0x72] sm:$0x3f]  ;;  %4184 = vmatpush.msrb.mxu1 %v3962_v36  ;;  %v3973_v2 = vld [vmem:[%s13014_s6 + $0x1c8] sm:$0xff] }
 0x511   :  { %4228 = vmatpush.msrb.mxu2 %v3978_v44  ;;  %4097 = vmatpush.msra.mxu3 %v3929_v22 }
 0x512   :  { %3331 = vrot.lane.b32.xlu2 %v2906_v47, %s8020_s2  ;;  %v3924_v47 = vld [vmem:[%s13014_s6 + $0x40] sm:$0xff] }
 0x514   :  { %v9601_v52 = vpop.permute.xlu2 %3229  ;;  %3427 = vrot.lane.b32.xlu0 %v2943_v23, %s8018_s21  ;;  %v3623_v23 = vsel %vm321_vm1, %v2878_v33, %v9564_v46  ;;  %v3921_v33 = vld [vmem:[%s13014_s6 + $0x28] sm:$0xff] }
 0x515   :  { %v3635_v53 = vsel %vm13028_vm3, %v3623_v23, %v9571_v39  ;;  %v2896_v23 = vld [vmem:[#allocation3 + $0xb1] sm:$0x3f] }
 0x516   :  { %v2736_v45 = vld [vmem:[#allocation1] sm:$0xff]  ;;  %v9606_v57 = vpop.permute.xlu0 %3181  ;;  %v3647_v19 = vsel %vm1668_vm5, %v3635_v53, %v9592_v8 }
 0x517   :  { %2737 = vst [vmem:[#allocation1] ss:$9 sm:$0xff] %v2585_v0  ;;  %v3961_v0 = vld [vmem:[%s13014_s6 + $0x168] sm:$0xff] }
 0x518   :  { %2738 = vst [vmem:[#allocation1 + $0x1] ss:$9 sm:$0xff] %v2586_v62  ;;  %2997 = vrot.lane.b32.xlu1 %v2798_v6, %s8018_s21  ;;  %v3977_v62 = vld [vmem:[%s13014_s6 + $0x1e8] sm:$0xff]  ;;  %4185 = vmatpush.msrb.mxu1 %v3961_v0  ;;  %v3956_v6 = vld [vmem:[%s13014_s6 + $0x140] sm:$0xff]  ;;  %v3744_v0 = vrot.slane %v3647_v19, 4 }
 0x519   :  { %2739 = vst [vmem:[#allocation1 + $0x2] ss:$9 sm:$0xff] %v2587_v14  ;;  %4229 = vmatpush.msrb.mxu2 %v3977_v62  ;;  %v3960_v14 = vld [vmem:[%s13014_s6 + $0x160] sm:$0xff] }
 0x51a   :  { %2740 = vst [vmem:[#allocation1 + $0x3] ss:$9 sm:$0xff] %v2588_v31  ;;  %3141 = vrot.lane.b32.xlu2 %v2846_v34, %s8018_s21  ;;  %v9608_v43 = vpop.permute.xlu1 %3277  ;;  %v2895_v31 = vld [vmem:[#allocation3 + $0x71] sm:$0x3f]  ;;  %4186 = vmatpush.msrb.mxu1 %v3960_v14  ;;  %v7974_v34 = vunpack.i.l.bf16 %v9569_v27 }
 0x51b   :  { %2741 = vst [vmem:[#allocation1 + $0x4] ss:$9 sm:$0xff] %v2497_v38  ;;  %v2967_v38 = vld [vmem:[#allocation3 + $0x73] sm:$0x3f] }
 0x51c   :  { %2742 = vst [vmem:[#allocation1 + $0x5] ss:$9 sm:$0xff] %v2589_v18  ;;  %v9610_v11 = vpop.permute.xlu2 %3039  ;;  %3475 = vrot.lane.b32.xlu0 %v2955_v12, %s8020_s2  ;;  %v3976_v18 = vld [vmem:[%s13014_s6 + $0x1e0] sm:$0xff]  ;;  %4187 = vmatpush.msrb.mxu1 %v3959_v41  ;;  %v2847_v41 = vld [vmem:[#allocation3 + $0xa1] sm:$0x3f] }
 0x51d   :  { %2743 = vst [vmem:[#allocation1 + $0x6] ss:$9 sm:$0xff] %v2590_v28  ;;  %v3927_v28 = vld [vmem:[%s13014_s6 + $0x58] sm:$0xff]  ;;  %4230 = vmatpush.msrb.mxu2 %v3976_v18 }
 0x51e   :  { %2778 = vst [vmem:[#allocation3 + $0xe1] sm:$0x7f] %v2736_v45  ;;  %v9633_v9 = vpop.permute.xlu0 %3087  ;;  %v3928_v45 = vld [vmem:[%s13014_s6 + $0x60] sm:$0xff] }
 0x51f   :  { %4098 = vmatpush.msra.mxu3 %v3928_v45  ;;  %4231 = vmatpush.msrb.mxu2 %v3975_v56 }
 0x520   :  { %3521 = vrot.lane.b32.xlu1 %v2966_v3, %s8021_s22  ;;  %v2821_v3 = vld [vmem:[#allocation3 + $0x43] sm:$0x3f] }
 0x521   :  { %4099 = vmatpush.msra.mxu3 %v3927_v28 }
 0x522   :  { %3379 = vrot.lane.b32.xlu2 %v2918_v24, %s8021_s22  ;;  %v9635_v5 = vpop.permute.xlu1 %3515 }
 0x523   :  { %4100 = vmatpush.msra.mxu3 %v3926_v26 }
 0x524   :  { %v2744_v21 = vld [vmem:[#allocation1] sm:$0xff]  ;;  %v9640_v10 = vpop.permute.xlu2 %3231  ;;  %3523 = vrot.lane.b32.xlu0 %v2967_v38, %s8021_s22 }
 0x525   :  { %2745 = vst [vmem:[#allocation1] ss:$9 sm:$0xff] %v2591_v48  ;;  %v7964_v48 = vunpack.i.l.bf16 %v9561_v13 }
 0x526   :  { %2746 = vst [vmem:[#allocation1 + $0x1] ss:$9 sm:$0xff] %v2592_v7  ;;  %v3420_v49 = vpop.permute.xlu0 %3419 }
 0x527   :  { %2747 = vst [vmem:[#allocation1 + $0x2] ss:$9 sm:$0xff] %v2593_v55  ;;  %v3587_v55 = vsel %vm321_vm1, %v2829_v59, %v9581_v37  ;;  %v3957_v37 = vld [vmem:[%s13014_s6 + $0x148] sm:$0xff]  ;;  %v3551_v63 = vsel %vm321_vm1, %v2781_v61, %v7964_v48  ;;  %v3659_v24 = vsel %vm321_vm1, %v2927_v17, %v3420_v49  ;;  %v2810_v48 = vld [vmem:[#allocation3 + $0x52] sm:$0x3f] }
 0x528   :  { %2748 = vst [vmem:[#allocation1 + $0x3] ss:$9 sm:$0xff] %v2594_v25  ;;  %3285 = vrot.lane.b32.xlu1 %v2895_v31, %s8018_s21  ;;  %v3974_v25 = vld [vmem:[%s13014_s6 + $0x1d0] sm:$0xff]  ;;  %v3563_v12 = vsel %vm13028_vm3, %v3551_v63, %v7969_v40  ;;  %v3967_v17 = vld [vmem:[%s13014_s6 + $0x198] sm:$0xff] }
 0x529   :  { %2749 = vst [vmem:[#allocation1 + $0x4] ss:$9 sm:$0xff] %v2595_v54  ;;  %v3925_v54 = vld [vmem:[%s13014_s6 + $0x48] sm:$0xff]  ;;  %4232 = vmatpush.msrb.mxu2 %v3974_v25  ;;  %v3575_v39 = vsel %vm1668_vm5, %v3563_v12, %v7974_v34  ;;  %v3955_v25 = vld [vmem:[%s13014_s6 + $0x138] sm:$0xff]  ;;  %v3954_v40 = vld [vmem:[%s13014_s6 + $0x130] sm:$0xff] }
 0x52a   :  { %2750 = vst [vmem:[#allocation1 + $0x5] ss:$9 sm:$0xff] %v2498_v30  ;;  %3189 = vrot.lane.b32.xlu2 %v2858_v29, %s8020_s2  ;;  %v9673_v7 = vpop.permute.xlu1 %3325  ;;  %4101 = vmatpush.msra.mxu3 %v3925_v54  ;;  %v2870_v29 = vld [vmem:[#allocation3 + $0x63] sm:$0x3f]  ;;  %v3971_v54 = vld [vmem:[%s13014_s6 + $0x1b8] sm:$0xff]  ;;  %v3968_v34 = vld [vmem:[%s13014_s6 + $0x1a0] sm:$0xff] }
 0x52b   :  { %2751 = vst [vmem:[#allocation1 + $0x6] ss:$9 sm:$0xff] %v2596_v16  ;;  %v3599_v16 = vsel %vm13028_vm3, %v3587_v55, %v9588_v4  ;;  %4233 = vmatpush.msrb.mxu2 %v3973_v2  ;;  %v3923_v55 = vld [vmem:[%s13014_s6 + $0x38] sm:$0xff]  ;;  %v3970_v63 = vld [vmem:[%s13014_s6 + $0x1b0] sm:$0xff] }
 0x52c   :  { %2779 = vst [vmem:[#allocation3 + $0xf1] sm:$0x7f] %v2744_v21  ;;  %v3958_v21 = vld [vmem:[%s13014_s6 + $0x150] sm:$0xff]  ;;  %v9680_v30 = vpop.permute.xlu2 %3041  ;;  %v3611_v4 = vsel %vm1668_vm5, %v3599_v16, %v9579_v35  ;;  %v3972_v35 = vld [vmem:[%s13014_s6 + $0x1c0] sm:$0xff]  ;;  %4102 = vmatpush.msra.mxu3 %v3924_v47 }
 0x52d   :  { %4188 = vmatpush.msrb.mxu1 %v3958_v21  ;;  %v3743_v46 = vrot.slane %v3611_v4, 6  ;;  %4234 = vmatpush.msrb.mxu2 %v3972_v35  ;;  %v2822_v2 = vld [vmem:[#allocation3 + $0x53] sm:$0x3f]  ;;  %v3969_v4 = vld [vmem:[%s13014_s6 + $0x1a8] sm:$0xff] }
 0x52e   :  { %v3468_v58 = vpop.permute.xlu0 %3467  ;;  %4103 = vmatpush.msra.mxu3 %v3923_v55  ;;  %v3920_v47 = vld [vmem:[%s13014_s6 + $0x20] sm:$0xff]  ;;  %v3951_v35 = vld [vmem:[%s13014_s6 + $0x118] sm:$0xff] }
 0x52f   :  { %4189 = vmatpush.msrb.mxu1 %v3957_v37  ;;  %v3671_v44 = vsel %vm13028_vm3, %v3659_v24, %v3468_v58  ;;  %v3779_v45 = vsel %vm2339_vm0, %v3575_v39, %v3743_v46  ;;  %v3785_v38 = vsel %vm13029_vm6, %v3575_v39, %v3743_v46  ;;  %v3791_v14 = vsel %vm3780_vm12, %v3575_v39, %v3743_v46  ;;  %v3922_v37 = vld [vmem:[%s13014_s6 + $0x30] sm:$0xff]  ;;  %v2830_v46 = vld [vmem:[#allocation3 + $0x20] sm:$0x3f] }
 0x530   :  { %3381 = vrot.lane.b32.xlu1 %v2919_v15, %s8021_s22  ;;  %v3683_v8 = vsel %vm1668_vm5, %v3671_v44, %v9635_v5  ;;  %4235 = vmatpush.msrb.mxu2 %v3971_v54  ;;  %v2859_v15 = vld [vmem:[#allocation3 + $0xa2] sm:$0x3f]  ;;  %v3918_v24 = vld [vmem:[%s13014_s6 + $0x10] sm:$0xff]  ;;  %v3588_v44 = vsel %vm321_vm1, %v2830_v46, %v9583_v60 }
 0x531   :  { %4190 = vmatpush.msrb.mxu1 %v3956_v6  ;;  %v3745_v62 = vrot.slane %v3683_v8, 2  ;;  %4104 = vmatpush.msra.mxu3 %v3922_v37  ;;  %v3952_v6 = vld [vmem:[%s13014_s6 + $0x120] sm:$0xff]  ;;  %v3950_v58 = vld [vmem:[%s13014_s6 + $0x110] sm:$0xff]  ;;  %v3600_v8 = vsel %vm13028_vm3, %v3588_v44, %v9606_v57  ;;  %v3949_v60 = vld [vmem:[%s13014_s6 + $0x108] sm:$0xff] }
 0x532   :  { %v2752_v51 = vld [vmem:[#allocation1] sm:$0xff]  ;;  %3091 = vrot.lane.b32.xlu2 %v2821_v3, %s8021_s22  ;;  %v9721_v36 = vpop.permute.xlu1 %3135  ;;  %4236 = vmatpush.msrb.mxu2 %v3970_v63  ;;  %v3919_v3 = vld [vmem:[%s13014_s6 + $0x18] sm:$0xff]  ;;  %v3966_v39 = vld [vmem:[%s13014_s6 + $0x190] sm:$0xff]  ;;  %v3612_v57 = vsel %vm1668_vm5, %v3600_v8, %v9601_v52 }
 0x533   :  { %2780 = vst [vmem:[#allocation3 + $0x101] sm:$0x7f] %v2752_v51  ;;  %v2907_v51 = vld [vmem:[#allocation3 + $0x72] sm:$0x3f]  ;;  %v3781_v31 = vsel %vm3780_vm12, %v3744_v0, %v3745_v62  ;;  %v3787_v18 = vsel %vm13030_vm15, %v3745_v62, %v3744_v0  ;;  %v3792_v28 = vsel %vm2339_vm0, %v3744_v0, %v3745_v62  ;;  %4191 = vmatpush.msrb.mxu1 %v3955_v25  ;;  %v3917_v62 = vld [vmem:[%s13014_s6 + $0x8] sm:$0xff]  ;;  %v3948_v52 = vld [vmem:[%s13014_s6 + $0x100] sm:$0xff] }
 0x534   :  { %3333 = vrot.lane.b32.xlu0 %v2907_v51, %s8020_s2  ;;  %v9724_v22 = vpop.permute.xlu2 %3469  ;;  %v3783_v5 = vsel %vm13024_vm2, %v3779_v45, %v3781_v31  ;;  %v3789_v56 = vsel %vm13023_vm4, %v3785_v38, %v3787_v18  ;;  %v3793_v26 = vsel %vm13024_vm2, %v3792_v28, %v3791_v14  ;;  %v3953_v51 = vld [vmem:[%s13014_s6 + $0x128] sm:$0xff]  ;;  %4105 = vmatpush.msra.mxu3 %v3921_v33  ;;  %v2799_v0 = vld [vmem:[#allocation3 + $0x91] sm:$0x3f]  ;;  %v3916_v18 = vld [vmem:[%s13014_s6] sm:$0xff] }
 0x535   :  { %v3790_v59 = vrot.slane %v3789_v56, 2  ;;  %v3794_v49 = vrot.slane %v3793_v26, 4  ;;  %3980 = vst [vmem:[#allocation1] ss:$4 sm:$0xff] %v3783_v5  ;;  %4192 = vmatpush.msrb.mxu1 %v3954_v40  ;;  %4237 = vmatpush.msrb.mxu2 %v3969_v4  ;;  %v2945_v45 = vld [vmem:[#allocation3 + $0xc1] sm:$0x3f] }
 0x536   :  { %v9741_v21 = vpop.permute.xlu0 %3373  ;;  %4106 = vmatpush.msra.mxu3 %v3920_v47  ;;  %v3965_v38 = vld [vmem:[%s13014_s6 + $0x188] sm:$0xff]  ;;  %v2879_v14 = vld [vmem:[#allocation3 + $0x30] sm:$0x3f] }
 0x537   :  { %3982 = vst [vmem:[#allocation1 + $0x1] ss:$4 sm:$0xff] %v3790_v59  ;;  %4193 = vmatpush.msrb.mxu1 %v3953_v51  ;;  %4238 = vmatpush.msrb.mxu2 %v3968_v34  ;;  %v2908_v31 = vld [vmem:[#allocation3 + $0xb2] sm:$0x3f]  ;;  %v3746_v59 = vrot.slane %v3612_v57, 6 }
 0x538   :  { %3143 = vrot.lane.b32.xlu1 %v2847_v41, %s8018_s21  ;;  %3984 = vst [vmem:[#allocation1 + $0x2] ss:$4 sm:$0xff] %v3794_v49  ;;  %4107 = vmatpush.msra.mxu3 %v3919_v3  ;;  %v2782_v28 = vld [vmem:[#allocation3 + $0x10] sm:$0x3f]  ;;  %v3964_v41 = vld [vmem:[%s13014_s6 + $0x180] sm:$0xff] }
 0x539   :  { %4194 = vmatpush.msrb.mxu1 %v3952_v6  ;;  %4239 = vmatpush.msrb.mxu2 %v3967_v17  ;;  %v3552_v5 = vsel %vm321_vm1, %v2782_v28, %v9590_v1  ;;  %v2871_v47 = vld [vmem:[#allocation3 + $0xa3] sm:$0x3f]  ;;  %v2920_v44 = vld [vmem:[#allocation3 + $0xb3] sm:$0x3f] }
 0x53a   :  { %3045 = vrot.lane.b32.xlu2 %v2810_v48, %s8020_s2  ;;  %v9743_v61 = vpop.permute.xlu1 %3183  ;;  %4108 = vmatpush.msra.mxu3 %v3918_v24  ;;  %v2811_v24 = vld [vmem:[#allocation3 + $0x92] sm:$0x3f] }
 0x53b   :  { %4195 = vmatpush.msrb.mxu1 %v3951_v35  ;;  %4240 = vmatpush.msrb.mxu2 %v3966_v39  ;;  %v2860_v57 = vld [vmem:[#allocation3 + $0xb2] sm:$0x3f] }
 0x53c   :  { %3237 = vrot.lane.b32.xlu0 %v2870_v29, %s8021_s22  ;;  %v9754_v16 = vpop.permute.xlu2 %3279  ;;  %v3624_v29 = vsel %vm321_vm1, %v2879_v14, %v9608_v43  ;;  %4109 = vmatpush.msra.mxu3 %v3917_v62  ;;  %v2928_v43 = vld [vmem:[#allocation3 + $0x40] sm:$0x3f] }
 0x53d   :  { %4196 = vmatpush.msrb.mxu1 %v3950_v58  ;;  %v3636_v56 = vsel %vm13028_vm3, %v3624_v29, %v9673_v7  ;;  %4241 = vmatpush.msrb.mxu2 %v3965_v38  ;;  %v3564_v7 = vsel %vm13028_vm3, %v3552_v5, %v9554_v20  ;;  %v2848_v58 = vld [vmem:[#allocation3 + $0xb1] sm:$0x3f]  ;;  %v2897_v14 = vld [vmem:[#allocation3 + $0xc1] sm:$0x3f] }
 0x53e   :  { %v9792_v12 = vpop.permute.xlu0 %3089  ;;  %v3648_v49 = vsel %vm1668_vm5, %v3636_v56, %v9741_v21  ;;  %4110 = vmatpush.msra.mxu3 %v3916_v18  ;;  %v3576_v37 = vsel %vm1668_vm5, %v3564_v7, %v9597_v42  ;;  %v2823_v38 = vld [vmem:[#allocation3 + $0x93] sm:$0x3f]  ;;  %v2800_v29 = vld [vmem:[#allocation3 + $0xa1] sm:$0x3f] }
 0x53f   :  { %4197 = vmatpush.msrb.mxu1 %v3949_v60  ;;  %4242 = vmatpush.msrb.mxu2 %v3964_v41  ;;  %v3747_v40 = vrot.slane %v3648_v49, 4  ;;  %v3795_v63 = vsel %vm2339_vm0, %v3576_v37, %v3746_v59  ;;  %v3798_v33 = vsel %vm13029_vm6, %v3576_v37, %v3746_v59  ;;  %v3802_v51 = vsel %vm3780_vm12, %v3576_v37, %v3746_v59  ;;  %v2909_v41 = vld [vmem:[#allocation3 + $0xc2] sm:$0x3f]  ;;  %v2831_v5 = vld [vmem:[#allocation3 + $0x30] sm:$0x3f] }
 0x540   :  { %3191 = vrot.lane.b32.xlu1 %v2859_v15, %s8020_s2  ;;  %v3589_v56 = vsel %vm321_vm1, %v2831_v5, %v9721_v36  ;;  %v2970_v7 = vld [vmem:[#allocation3 + $0xd3] sm:$0x3f] }
 0x541   :  { %4198 = vmatpush.msrb.mxu1 %v3948_v52  ;;  %v2946_v52 = vld [vmem:[#allocation3 + $0xd1] sm:$0x3f] }
 0x542   :  { %3287 = vrot.lane.b32.xlu2 %v2896_v23, %s8018_s21  ;;  %v9794_v53 = vpop.permute.xlu1 %2993  ;;  %v2929_v37 = vld [vmem:[#allocation3 + $0x50] sm:$0x3f] }
 0x544   :  { %3093 = vrot.lane.b32.xlu0 %v2822_v2, %s8021_s22  ;;  %v9799_v19 = vpop.permute.xlu2 %3327  ;;  %v2969_v2 = vld [vmem:[#allocation3 + $0xc3] sm:$0x3f] }
 0x546   :  { %v3422_v48 = vpop.permute.xlu0 %3421 }
 0x547   :  { %v3660_v55 = vsel %vm321_vm1, %v2928_v43, %v3422_v48  ;;  %v3601_v43 = vsel %vm13028_vm3, %v3589_v56, %v9743_v61  ;;  %v2783_v61 = vld [vmem:[#allocation3 + $0x20] sm:$0x3f] }
 0x548   :  { %2999 = vrot.lane.b32.xlu1 %v2799_v0, %s8018_s21  ;;  %v3672_v1 = vsel %vm13028_vm3, %v3660_v55, %v9724_v22  ;;  %v2957_v22 = vld [vmem:[#allocation3 + $0xc2] sm:$0x3f]  ;;  %v3613_v49 = vsel %vm1668_vm5, %v3601_v43, %v9640_v10 }
 0x549   :  { %v2880_v55 = vld [vmem:[#allocation3 + $0x40] sm:$0x3f] }
 0x54a   :  { %3335 = vrot.lane.b32.xlu2 %v2908_v31, %s8020_s2  ;;  %v3518_v26 = vpop.permute.xlu1 %3517 }
 0x54b   :  { %v3684_v54 = vsel %vm1668_vm5, %v3672_v1, %v3518_v26  ;;  %v3625_v1 = vsel %vm321_vm1, %v2880_v55, %v9754_v16  ;;  %v3553_v16 = vsel %vm321_vm1, %v2783_v61, %v9599_v32  ;;  %v2801_v55 = vld [vmem:[#allocation3 + $0xb1] sm:$0x3f] }
 0x54c   :  { %3431 = vrot.lane.b32.xlu0 %v2945_v45, %s8018_s21  ;;  %v9846_v25 = vpop.permute.xlu2 %3233  ;;  %v3748_v21 = vrot.slane %v3684_v54, 2  ;;  %v2958_v54 = vld [vmem:[#allocation3 + $0xd2] sm:$0x3f]  ;;  %v3637_v36 = vsel %vm13028_vm3, %v3625_v1, %v9799_v19  ;;  %v2947_v1 = vld [vmem:[#allocation3 + $0xe1] sm:$0x3f] }
 0x54e   :  { %v3796_v4 = vsel %vm3780_vm12, %v3747_v40, %v3748_v21  ;;  %v3799_v15 = vsel %vm13030_vm15, %v3748_v21, %v3747_v40  ;;  %v3803_v20 = vsel %vm2339_vm0, %v3747_v40, %v3748_v21  ;;  %v3376_v35 = vpop.permute.xlu0 %3375  ;;  %v2872_v40 = vld [vmem:[#allocation3 + $0xb3] sm:$0x3f]  ;;  %v3749_v21 = vrot.slane %v3613_v49, 6 }
 0x54f   :  { %v3797_v42 = vsel %vm13024_vm2, %v3795_v63, %v3796_v4  ;;  %v3800_v6 = vsel %vm13023_vm4, %v3798_v33, %v3799_v15  ;;  %v3804_v23 = vsel %vm13024_vm2, %v3803_v20, %v3802_v51  ;;  %v3649_v63 = vsel %vm1668_vm5, %v3637_v36, %v3376_v35 }
 0x550   :  { %3527 = vrot.lane.b32.xlu1 %v2969_v2, %s8021_s22  ;;  %v3801_v34 = vrot.slane %v3800_v6, 2  ;;  %v3805_v3 = vrot.slane %v3804_v23, 4  ;;  %3986 = vst [vmem:[#allocation1 + $0x3] ss:$4 sm:$0xff] %v3797_v42  ;;  %v3565_v2 = vsel %vm13028_vm3, %v3553_v16, %v9610_v11  ;;  %v3750_v20 = vrot.slane %v3649_v63, 4 }
 0x551   :  { %v3577_v15 = vsel %vm1668_vm5, %v3565_v2, %v9633_v9  ;;  %v2784_v63 = vld [vmem:[#allocation3 + $0x30] sm:$0x3f]  ;;  %v2959_v2 = vld [vmem:[#allocation3 + $0xe2] sm:$0x3f] }
 0x552   :  { %3239 = vrot.lane.b32.xlu2 %v2871_v47, %s8021_s22  ;;  %v9867_v17 = vpop.permute.xlu1 %3137  ;;  %3988 = vst [vmem:[#allocation1 + $0x20] ss:$4 sm:$0xff] %v3801_v34  ;;  %v3806_v42 = vsel %vm2339_vm0, %v3577_v15, %v3749_v21  ;;  %v3809_v32 = vsel %vm13029_vm6, %v3577_v15, %v3749_v21  ;;  %v3813_v6 = vsel %vm3780_vm12, %v3577_v15, %v3749_v21  ;;  %v2881_v16 = vld [vmem:[#allocation3 + $0x50] sm:$0x3f]  ;;  %v2930_v15 = vld [vmem:[#allocation3 + $0x60] sm:$0x3f] }
 0x553   :  { %3990 = vst [vmem:[#allocation1 + $0x21] ss:$4 sm:$0xff] %v3805_v3 }
 0x554   :  { %3479 = vrot.lane.b32.xlu0 %v2957_v22, %s8020_s2  ;;  %v9869_v46 = vpop.permute.xlu2 %3281 }
 0x556   :  { %v3424_v45 = vpop.permute.xlu0 %3423 }
 0x557   :  { %v3995_v39 = vld.sshfl [vmem:[#allocation1] sm:$0xff pattern:$0x73625140]  ;;  %v3997_v8 = vld.sshfl [vmem:[#allocation1 + $0x10] sm:$0xff pattern:$0x73625140]  ;;  %v3661_v10 = vsel %vm321_vm1, %v2929_v37, %v3424_v45 }
 0x558   :  { %3145 = vrot.lane.b32.xlu1 %v2848_v58, %s8018_s21  ;;  %v3998_v0 = vld.sshfl [vmem:[#allocation1 + $0x18] sm:$0xff pattern:$0x73625140]  ;;  %4111 = vmatmul.f32.vlgmr.msra.gmra.mxu3 %v3995_v39  ;;  %v2921_v58 = vld [vmem:[#allocation3 + $0xc3] sm:$0x3f] }
 0x559   :  { %4199 = vmatmul.f32.vlgmr.msrb.gmra.mxu1 %v3997_v8  ;;  %4243 = vmatmul.f32.vlgmr.msrb.gmra.mxu2 %v3998_v0  ;;  %v2812_v8 = vld [vmem:[#allocation3 + $0xa2] sm:$0x3f] }
 0x55a   :  { %3047 = vrot.lane.b32.xlu2 %v2811_v24, %s8020_s2  ;;  %v9874_v62 = vpop.permute.xlu1 %3185  ;;  %v2849_v24 = vld [vmem:[#allocation3 + $0xc1] sm:$0x3f] }
 0x55b   :  { %v9933_v0 = vld.sshfl [vmem:[#allocation1 + $0x8] sm:$0xff pattern:$0x73625140] }
 0x55c   :  { %3383 = vrot.lane.b32.xlu0 %v2920_v44, %s8021_s22  ;;  %v9876_v60 = vpop.permute.xlu2 %3329 }
 0x55e   :  { %v3472_v18 = vpop.permute.xlu0 %3471 }
 0x55f   :  { %v3673_v33 = vsel %vm13028_vm3, %v3661_v10, %v3472_v18  ;;  %v2824_v18 = vld [vmem:[#allocation3 + $0xa3] sm:$0x3f]  ;;  %v3554_v10 = vsel %vm321_vm1, %v2784_v63, %v9794_v53 }
 0x560   :  { %3193 = vrot.lane.b32.xlu1 %v2860_v57, %s8020_s2  ;;  %v3566_v53 = vsel %vm13028_vm3, %v3554_v10, %v9680_v30 }
 0x561   :  { %v3578_v30 = vsel %vm1668_vm5, %v3566_v53, %v9792_v12 }
 0x562   :  { %3289 = vrot.lane.b32.xlu2 %v2897_v14, %s8018_s21  ;;  %v9881_v31 = vpop.permute.xlu1 %2995  ;;  %v2861_v14 = vld [vmem:[#allocation3 + $0xc2] sm:$0x3f] }
 0x564   :  { %3095 = vrot.lane.b32.xlu0 %v2823_v38, %s8021_s22  ;;  %v9883_v28 = vpop.permute.xlu2 %3283 }
 0x566   :  { %v9892_v48 = vpop.permute.xlu0 %3377 }
 0x568   :  { %3001 = vrot.lane.b32.xlu1 %v2800_v29, %s8018_s21  ;;  %v2898_v29 = vld [vmem:[#allocation3 + $0xd1] sm:$0x3f] }
 0x56a   :  { %3337 = vrot.lane.b32.xlu2 %v2909_v41, %s8020_s2  ;;  %v9890_v26 = vpop.permute.xlu1 %3043 }
 0x56c   :  { %3433 = vrot.lane.b32.xlu0 %v2946_v52, %s8018_s21  ;;  %v9896_v59 = vpop.permute.xlu2 %3331 }
 0x56e   :  { %v9912_v51 = vpop.permute.xlu0 %3235 }
 0x570   :  { %3529 = vrot.lane.b32.xlu1 %v2970_v7, %s8021_s22  ;;  %v2910_v7 = vld [vmem:[#allocation3 + $0xd2] sm:$0x3f] }
 0x572   :  { %3241 = vrot.lane.b32.xlu2 %v2872_v40, %s8021_s22  ;;  %v3520_v19 = vpop.permute.xlu1 %3519 }
 0x573   :  { %v3685_v22 = vsel %vm1668_vm5, %v3673_v33, %v3520_v19  ;;  %v3626_v19 = vsel %vm321_vm1, %v2881_v16, %v9869_v46 }
 0x574   :  { %3481 = vrot.lane.b32.xlu0 %v2958_v54, %s8020_s2  ;;  %v9917_v4 = vpop.permute.xlu2 %3141  ;;  %v3751_v47 = vrot.slane %v3685_v22, 2  ;;  %v2832_v54 = vld [vmem:[#allocation3 + $0x40] sm:$0x3f]  ;;  %v3638_v22 = vsel %vm13028_vm3, %v3626_v19, %v9876_v60 }
 0x575   :  { %v3590_v36 = vsel %vm321_vm1, %v2832_v54, %v9867_v17  ;;  %v2899_v17 = vld [vmem:[#allocation3 + $0xe1] sm:$0x3f] }
 0x576   :  { %v3807_v23 = vsel %vm3780_vm12, %v3750_v20, %v3751_v47  ;;  %v3810_v34 = vsel %vm13030_vm15, %v3751_v47, %v3750_v20  ;;  %v3814_v11 = vsel %vm2339_vm0, %v3750_v20, %v3751_v47  ;;  %v3426_v38 = vpop.permute.xlu0 %3425  ;;  %v3602_v61 = vsel %vm13028_vm3, %v3590_v36, %v9874_v62  ;;  %v2850_v20 = vld [vmem:[#allocation3 + $0xd1] sm:$0x3f] }
 0x577   :  { %v3808_v3 = vsel %vm13024_vm2, %v3806_v42, %v3807_v23  ;;  %v3811_v35 = vsel %vm13023_vm4, %v3809_v32, %v3810_v34  ;;  %v3815_v9 = vsel %vm13024_vm2, %v3814_v11, %v3813_v6  ;;  %v3614_v33 = vsel %vm1668_vm5, %v3602_v61, %v9846_v25  ;;  %v2833_v32 = vld [vmem:[#allocation3 + $0x50] sm:$0x3f] }
 0x578   :  { %v3812_v44 = vrot.slane %v3811_v35, 2  ;;  %v3816_v39 = vrot.slane %v3815_v9, 4  ;;  %3992 = vst [vmem:[#allocation1 + $0x22] ss:$4 sm:$0xff] %v3808_v3  ;;  %3147 = vrot.lane.b32.xlu1 %v2849_v24, %s8018_s21  ;;  %v3752_v62 = vrot.slane %v3614_v33, 6  ;;  %v3650_v25 = vsel %vm1668_vm5, %v3638_v22, %v9892_v48 }
 0x579   :  { %v3662_v46 = vsel %vm321_vm1, %v2930_v15, %v3426_v38  ;;  %v3753_v34 = vrot.slane %v3650_v25, 4  ;;  %v2785_v24 = vld [vmem:[#allocation3 + $0x40] sm:$0x3f]  ;;  %v2948_v25 = vld [vmem:[#allocation3 + $0xf1] sm:$0x3f] }
 0x57a   :  { %3049 = vrot.lane.b32.xlu2 %v2812_v8, %s8020_s2  ;;  %3994 = vst [vmem:[#allocation1 + $0x23] ss:$4 sm:$0xff] %v3812_v44  ;;  %v3140_v45 = vpop.permute.xlu1 %3139  ;;  %v3817_v3 = vsel %vm2339_vm0, %v3578_v30, %v3752_v62  ;;  %v3820_v35 = vsel %vm13029_vm6, %v3578_v30, %v3752_v62  ;;  %v3824_v9 = vsel %vm3780_vm12, %v3578_v30, %v3752_v62  ;;  %v2911_v22 = vld [vmem:[#allocation3 + $0xe2] sm:$0x3f] }
 0x57b   :  { %4003 = vst [vmem:[#allocation1] ss:$4 sm:$0xff] %v3816_v39  ;;  %v3591_v11 = vsel %vm321_vm1, %v2833_v32, %v3140_v45  ;;  %v3555_v44 = vsel %vm321_vm1, %v2785_v24, %v9881_v31  ;;  %v2882_v39 = vld [vmem:[#allocation3 + $0x60] sm:$0x3f]  ;;  %v2825_v24 = vld [vmem:[#allocation3 + $0xb3] sm:$0x3f] }
 0x57c   :  { %3385 = vrot.lane.b32.xlu0 %v2921_v58, %s8021_s22  ;;  %v9935_v57 = vpop.permute.xlu2 %3379  ;;  %v3627_v38 = vsel %vm321_vm1, %v2882_v39, %v9883_v28  ;;  %v3567_v28 = vsel %vm13028_vm3, %v3555_v44, %v9890_v26 }
 0x57d   :  { %v3639_v31 = vsel %vm13028_vm3, %v3627_v38, %v9896_v59 }
 0x57e   :  { %v3474_v43 = vpop.permute.xlu0 %3473 }
 0x57f   :  { %v3674_v47 = vsel %vm13028_vm3, %v3662_v46, %v3474_v43 }
 0x580   :  { %3195 = vrot.lane.b32.xlu1 %v2861_v14, %s8020_s2  ;;  %v2931_v14 = vld [vmem:[#allocation3 + $0x70] sm:$0x3f] }
 0x581   :  { %v3999_v52 = vld.sshfl [vmem:[#allocation1 + $0x20] sm:$0xff pattern:$0x73625140]  ;;  %v4001_v41 = vld.sshfl [vmem:[#allocation1 + $0x30] sm:$0xff pattern:$0x73625140] }
 0x582   :  { %3291 = vrot.lane.b32.xlu2 %v2898_v29, %s8018_s21  ;;  %v4002_v5 = vld.sshfl [vmem:[#allocation1 + $0x38] sm:$0xff pattern:$0x73625140]  ;;  %v3188_v56 = vpop.permute.xlu1 %3187  ;;  %4114 = vmatmul.f32.gmra.mxu3 %v3999_v52  ;;  %v10011_v15 = vld.sshfl [vmem:[#allocation1 + $0x28] sm:$0xff pattern:$0x73625140] }
 0x583   :  { %4202 = vmatmul.f32.gmra.mxu1 %v4001_v41  ;;  %4246 = vmatmul.f32.gmra.mxu2 %v4002_v5  ;;  %v3603_v58 = vsel %vm13028_vm3, %v3591_v11, %v3188_v56  ;;  %v2873_v41 = vld [vmem:[#allocation3 + $0xc3] sm:$0x3f] }
 0x584   :  { %3097 = vrot.lane.b32.xlu0 %v2824_v18, %s8021_s22  ;;  %v9940_v49 = vpop.permute.xlu2 %3189  ;;  %v2971_v5 = vld [vmem:[#allocation3 + $0xe3] sm:$0x3f]  ;;  %v3615_v56 = vsel %vm1668_vm5, %v3603_v58, %v9912_v51  ;;  %v2862_v58 = vld [vmem:[#allocation3 + $0xd2] sm:$0x3f] }
 0x585   :  { %v3755_v63 = vrot.slane %v3615_v56, 6  ;;  %v2972_v56 = vld [vmem:[#allocation3 + $0xf3] sm:$0x3f] }
 0x586   :  { %v3428_v40 = vpop.permute.xlu0 %3427 }
 0x587   :  { %v3663_v54 = vsel %vm321_vm1, %v2931_v14, %v3428_v40 }
 0x588   :  { %3003 = vrot.lane.b32.xlu1 %v2801_v55, %s8018_s21 }
 0x58a   :  { %3339 = vrot.lane.b32.xlu2 %v2910_v7, %s8020_s2  ;;  %v9947_v37 = vpop.permute.xlu1 %2997  ;;  %v3651_v7 = vsel %vm1668_vm5, %v3639_v31, %v9935_v57 }
 0x58b   :  { %v3756_v26 = vrot.slane %v3651_v7, 4 }
 0x58c   :  { %3435 = vrot.lane.b32.xlu0 %v2947_v1, %s8018_s21  ;;  %v3092_v21 = vpop.permute.xlu2 %3091  ;;  %v2922_v1 = vld [vmem:[#allocation3 + $0xd3] sm:$0x3f] }
 0x58d   :  { %v3579_v59 = vsel %vm1668_vm5, %v3567_v28, %v3092_v21 }
 0x58e   :  { %v3476_v42 = vpop.permute.xlu0 %3475  ;;  %v3828_v57 = vsel %vm2339_vm0, %v3579_v59, %v3755_v63  ;;  %v3831_v40 = vsel %vm13029_vm6, %v3579_v59, %v3755_v63  ;;  %v3835_v19 = vsel %vm3780_vm12, %v3579_v59, %v3755_v63 }
 0x58f   :  { %v3675_v51 = vsel %vm13028_vm3, %v3663_v54, %v3476_v42 }
 0x590   :  { %3293 = vrot.lane.b32.xlu1 %v2899_v17, %s8018_s21 }
 0x592   :  { %3149 = vrot.lane.b32.xlu2 %v2850_v20, %s8018_s21  ;;  %v3522_v60 = vpop.permute.xlu1 %3521 }
 0x593   :  { %v3686_v6 = vsel %vm1668_vm5, %v3674_v47, %v3522_v60  ;;  %v2813_v47 = vld [vmem:[#allocation3 + $0xb2] sm:$0x3f] }
 0x594   :  { %3483 = vrot.lane.b32.xlu0 %v2959_v2, %s8020_s2  ;;  %v9969_v23 = vpop.permute.xlu2 %3045  ;;  %v3754_v48 = vrot.slane %v3686_v6, 2 }
 0x596   :  { %v3818_v8 = vsel %vm3780_vm12, %v3753_v34, %v3754_v48  ;;  %v3821_v12 = vsel %vm13030_vm15, %v3754_v48, %v3753_v34  ;;  %v3825_v45 = vsel %vm2339_vm0, %v3753_v34, %v3754_v48  ;;  %v3524_v36 = vpop.permute.xlu0 %3523  ;;  %v7965_v48 = vunpack.i.h.bf16 %v9561_v13 }
 0x597   :  { %v3819_v18 = vsel %vm13024_vm2, %v3817_v3, %v3818_v8  ;;  %v3822_v29 = vsel %vm13023_vm4, %v3820_v35, %v3821_v12  ;;  %v3826_v52 = vsel %vm13024_vm2, %v3825_v45, %v3824_v9  ;;  %v3687_v10 = vsel %vm1668_vm5, %v3675_v51, %v3524_v36  ;;  %v2932_v3 = vld [vmem:[#allocation3 + $0x80] sm:$0x3f]  ;;  %v2883_v9 = vld [vmem:[#allocation3 + $0x70] sm:$0x3f] }
 0x598   :  { %v3823_v43 = vrot.slane %v3822_v29, 2  ;;  %v3827_v55 = vrot.slane %v3826_v52, 4  ;;  %4004 = vst [vmem:[#allocation1 + $0x1] ss:$4 sm:$0xff] %v3819_v18  ;;  %3531 = vrot.lane.b32.xlu1 %v2971_v5, %s8021_s22  ;;  %v3757_v33 = vrot.slane %v3687_v10, 2  ;;  %v7970_v35 = vunpack.i.h.bf16 %v9549_v50 }
 0x599   :  { %v3664_v44 = vsel %vm321_vm1, %v2932_v3, %v7965_v48  ;;  %v2960_v8 = vld [vmem:[#allocation3 + $0xf2] sm:$0x3f]  ;;  %v7975_v12 = vunpack.i.h.bf16 %v9569_v27  ;;  %v2834_v18 = vld [vmem:[#allocation3 + $0x60] sm:$0x3f] }
 0x59a   :  { %3387 = vrot.lane.b32.xlu2 %v2922_v1, %s8021_s22  ;;  %4005 = vst [vmem:[#allocation1 + $0x2] ss:$4 sm:$0xff] %v3823_v43  ;;  %v3286_v61 = vpop.permute.xlu1 %3285  ;;  %v3829_v21 = vsel %vm3780_vm12, %v3756_v26, %v3757_v33  ;;  %v3832_v2 = vsel %vm13030_vm15, %v3757_v33, %v3756_v26  ;;  %v3836_v17 = vsel %vm2339_vm0, %v3756_v26, %v3757_v33  ;;  %v2802_v43 = vld [vmem:[#allocation3 + $0xc1] sm:$0x3f]  ;;  %v2874_v1 = vld [vmem:[#allocation3 + $0xd3] sm:$0x3f] }
 0x59b   :  { %4006 = vst [vmem:[#allocation1 + $0x3] ss:$4 sm:$0xff] %v3827_v55  ;;  %v3830_v20 = vsel %vm13024_vm2, %v3828_v57, %v3829_v21  ;;  %v3833_v53 = vsel %vm13023_vm4, %v3831_v40, %v3832_v2  ;;  %v3837_v62 = vsel %vm13024_vm2, %v3836_v17, %v3835_v19  ;;  %v3628_v39 = vsel %vm321_vm1, %v2883_v9, %v3286_v61  ;;  %v2786_v55 = vld [vmem:[#allocation3 + $0x50] sm:$0x3f]  ;;  %v2851_v2 = vld [vmem:[#allocation3 + $0xe1] sm:$0x3f] }
 0x59c   :  { %3243 = vrot.lane.b32.xlu0 %v2873_v41, %s8021_s22  ;;  %v10003_v16 = vpop.permute.xlu2 %3287  ;;  %v3834_v46 = vrot.slane %v3833_v53, 2  ;;  %4007 = vst [vmem:[#allocation1 + $0x20] ss:$4 sm:$0xff] %v3830_v20  ;;  %v3838_v60 = vrot.slane %v3837_v62, 4  ;;  %v3676_v38 = vsel %vm13028_vm3, %v3664_v44, %v7970_v35  ;;  %v3592_v52 = vsel %vm321_vm1, %v2834_v18, %v9917_v4  ;;  %v2814_v20 = vld [vmem:[#allocation3 + $0xc2] sm:$0x3f] }
 0x59d   :  { %v3688_v41 = vsel %vm1668_vm5, %v3676_v38, %v7975_v12  ;;  %v3604_v5 = vsel %vm13028_vm3, %v3592_v52, %v9940_v49  ;;  %v3556_v4 = vsel %vm321_vm1, %v2786_v55, %v9947_v37  ;;  %v2803_v3 = vld [vmem:[#allocation3 + $0xd1] sm:$0x3f]  ;;  %v2949_v35 = vld [vmem:[#allocation3 + $0x101] sm:$0x3f] }
 0x59e   :  { %4008 = vst [vmem:[#allocation1 + $0x21] ss:$4 sm:$0xff] %v3834_v46  ;;  %v3760_v28 = vrot.slane %v3688_v41, 2  ;;  %v3568_v49 = vsel %vm13028_vm3, %v3556_v4, %v9969_v23  ;;  %v2912_v9 = vld [vmem:[#allocation3 + $0xf2] sm:$0x3f] }
 0x59f   :  { %4009 = vst [vmem:[#allocation1 + $0x22] ss:$4 sm:$0xff] %v3838_v60  ;;  %v2787_v41 = vld [vmem:[#allocation3 + $0x90] sm:$0x3f] }
 0x5a0   :  { %3341 = vrot.lane.b32.xlu1 %v2911_v22, %s8020_s2  ;;  %v2923_v22 = vld [vmem:[#allocation3 + $0xe3] sm:$0x3f] }
 0x5a2   :  { %3051 = vrot.lane.b32.xlu2 %v2813_v47, %s8020_s2  ;;  %v4011_v42 = vld.sshfl [vmem:[#allocation1] sm:$0xff pattern:$0x73625140]  ;;  %v3382_v6 = vpop.permute.xlu1 %3381  ;;  %v4013_v30 = vld.sshfl [vmem:[#allocation1 + $0x10] sm:$0xff pattern:$0x73625140] }
 0x5a3   :  { %v4014_v34 = vld.sshfl [vmem:[#allocation1 + $0x18] sm:$0xff pattern:$0x73625140]  ;;  %4117 = vmatmul.f32.gmra.mxu3 %v4011_v42  ;;  %4205 = vmatmul.f32.gmra.mxu1 %v4013_v30  ;;  %v10061_v17 = vld.sshfl [vmem:[#allocation1 + $0x8] sm:$0xff pattern:$0x73625140] }
 0x5a4   :  { %3437 = vrot.lane.b32.xlu0 %v2948_v25, %s8018_s21  ;;  %v10019_v11 = vpop.permute.xlu2 %3335  ;;  %4249 = vmatmul.f32.gmra.mxu2 %v4014_v34  ;;  %v2863_v42 = vld [vmem:[#allocation3 + $0xe2] sm:$0x3f] }
 0x5a6   :  { %v3334_v32 = vpop.permute.xlu0 %3333 }
 0x5a7   :  { %v3640_v13 = vsel %vm13028_vm3, %v3628_v39, %v3334_v32  ;;  %v2826_v32 = vld [vmem:[#allocation3 + $0xc3] sm:$0x3f] }
 0x5a8   :  { %3099 = vrot.lane.b32.xlu1 %v2825_v24, %s8021_s22  ;;  %v3652_v29 = vsel %vm1668_vm5, %v3640_v13, %v3382_v6  ;;  %v2900_v6 = vld [vmem:[#allocation3 + $0xf1] sm:$0x3f]  ;;  %v2835_v39 = vld [vmem:[#allocation3 + $0xa0] sm:$0x3f] }
 0x5a9   :  { %v3759_v31 = vrot.slane %v3652_v29, 4  ;;  %v2884_v24 = vld [vmem:[#allocation3 + $0xb0] sm:$0x3f] }
 0x5aa   :  { %3485 = vrot.lane.b32.xlu2 %v2960_v8, %s8020_s2  ;;  %v10030_v50 = vpop.permute.xlu1 %3143  ;;  %v3629_v44 = vsel %vm321_vm1, %v2884_v24, %v10003_v16  ;;  %v2913_v24 = vld [vmem:[#allocation3 + $0x102] sm:$0x3f] }
 0x5ab   :  { %v3840_v51 = vsel %vm3780_vm12, %v3759_v31, %v3760_v28  ;;  %v3843_v36 = vsel %vm13030_vm15, %v3760_v28, %v3759_v31  ;;  %v3847_v10 = vsel %vm2339_vm0, %v3759_v31, %v3760_v28  ;;  %v3593_v38 = vsel %vm321_vm1, %v2835_v39, %v10030_v50  ;;  %v2875_v50 = vld [vmem:[#allocation3 + $0xe3] sm:$0x3f] }
 0x5ac   :  { %3197 = vrot.lane.b32.xlu0 %v2862_v58, %s8020_s2  ;;  %v10033_v14 = vpop.permute.xlu2 %3239  ;;  %v2933_v58 = vld [vmem:[#allocation3 + $0xc0] sm:$0x3f] }
 0x5ae   :  { %v3238_v45 = vpop.permute.xlu0 %3237 }
 0x5af   :  { %v3616_v27 = vsel %vm1668_vm5, %v3604_v5, %v3238_v45  ;;  %v3641_v45 = vsel %vm13028_vm3, %v3629_v44, %v10019_v11  ;;  %v2836_v44 = vld [vmem:[#allocation3 + $0xb0] sm:$0x3f] }
 0x5b0   :  { %3533 = vrot.lane.b32.xlu1 %v2972_v56, %s8021_s22  ;;  %v3758_v7 = vrot.slane %v3616_v27, 6  ;;  %v2973_v56 = vld [vmem:[#allocation3 + $0x103] sm:$0x3f] }
 0x5b2   :  { %3245 = vrot.lane.b32.xlu2 %v2874_v1, %s8021_s22  ;;  %v3192_v59 = vpop.permute.xlu1 %3191 }
 0x5b3   :  { %v3605_v52 = vsel %vm13028_vm3, %v3593_v38, %v3192_v59 }
 0x5b4   :  { %3005 = vrot.lane.b32.xlu0 %v2802_v43, %s8018_s21  ;;  %v10052_v63 = vpop.permute.xlu2 %3047  ;;  %v3617_v31 = vsel %vm1668_vm5, %v3605_v52, %v10033_v14  ;;  %v2961_v43 = vld [vmem:[#allocation3 + $0x102] sm:$0x3f] }
 0x5b5   :  { %v3761_v1 = vrot.slane %v3617_v31, 6 }
 0x5b6   :  { %v3094_v54 = vpop.permute.xlu0 %3093 }
 0x5b7   :  { %v3580_v61 = vsel %vm1668_vm5, %v3568_v49, %v3094_v54 }
 0x5b8   :  { %v3839_v37 = vsel %vm2339_vm0, %v3580_v61, %v3758_v7  ;;  %v3842_v26 = vsel %vm13029_vm6, %v3580_v61, %v3758_v7  ;;  %v3846_v33 = vsel %vm3780_vm12, %v3580_v61, %v3758_v7  ;;  %3151 = vrot.lane.b32.xlu1 %v2851_v2, %s8018_s21 }
 0x5b9   :  { %v3841_v23 = vsel %vm13024_vm2, %v3839_v37, %v3840_v51  ;;  %v3844_v57 = vsel %vm13023_vm4, %v3842_v26, %v3843_v36  ;;  %v3848_v40 = vsel %vm13024_vm2, %v3847_v10, %v3846_v33 }
 0x5ba   :  { %v3845_v19 = vrot.slane %v3844_v57, 2  ;;  %v3849_v21 = vrot.slane %v3848_v40, 4  ;;  %4010 = vst [vmem:[#allocation1 + $0x23] ss:$4 sm:$0xff] %v3841_v23  ;;  %3053 = vrot.lane.b32.xlu2 %v2814_v20, %s8020_s2  ;;  %v3000_v53 = vpop.permute.xlu1 %2999  ;;  %v2815_v57 = vld [vmem:[#allocation3 + $0xd2] sm:$0x3f] }
 0x5bb   :  { %v3557_v27 = vsel %vm321_vm1, %v2787_v41, %v3000_v53  ;;  %v2852_v40 = vld [vmem:[#allocation3 + $0xf1] sm:$0x3f] }
 0x5bc   :  { %4019 = vst [vmem:[#allocation1] ss:$4 sm:$0xff] %v3845_v19  ;;  %3389 = vrot.lane.b32.xlu0 %v2923_v22, %s8021_s22  ;;  %v10066_v25 = vpop.permute.xlu2 %3289  ;;  %v3569_v4 = vsel %vm13028_vm3, %v3557_v27, %v10052_v63  ;;  %v2924_v19 = vld [vmem:[#allocation3 + $0xf3] sm:$0x3f] }
 0x5bd   :  { %4020 = vst [vmem:[#allocation1 + $0x1] ss:$4 sm:$0xff] %v3849_v21  ;;  %v2974_v41 = vld [vmem:[#allocation3 + $0x113] sm:$0x3f] }
 0x5be   :  { %v3432_v62 = vpop.permute.xlu0 %3431 }
 0x5bf   :  { %v3665_v8 = vsel %vm321_vm1, %v2933_v58, %v3432_v62  ;;  %v2864_v62 = vld [vmem:[#allocation3 + $0xf2] sm:$0x3f] }
 0x5c0   :  { %3199 = vrot.lane.b32.xlu1 %v2863_v42, %s8020_s2  ;;  %v2901_v42 = vld [vmem:[#allocation3 + $0x101] sm:$0x3f] }
 0x5c1   :  { %v4015_v46 = vld.sshfl [vmem:[#allocation1 + $0x20] sm:$0xff pattern:$0x73625140]  ;;  %v4017_v47 = vld.sshfl [vmem:[#allocation1 + $0x30] sm:$0xff pattern:$0x73625140] }
 0x5c2   :  { %v4018_v60 = vld.sshfl [vmem:[#allocation1 + $0x38] sm:$0xff pattern:$0x73625140]  ;;  %4120 = vmatmul.f32.gmra.mxu3 %v4015_v46  ;;  %4208 = vmatmul.f32.gmra.mxu1 %v4017_v47  ;;  %v3528_v30 = vpop.permute.xlu1 %3527  ;;  %v10111_v21 = vld.sshfl [vmem:[#allocation1 + $0x28] sm:$0xff pattern:$0x73625140] }
 0x5c3   :  { %4252 = vmatmul.f32.gmra.mxu2 %v4018_v60  ;;  %3295 = vrot.lane.b32.xlu2 %v2900_v6, %s8018_s21  ;;  %v2827_v60 = vld [vmem:[#allocation3 + $0xd3] sm:$0x3f] }
 0x5c4   :  { %3101 = vrot.lane.b32.xlu0 %v2826_v32, %s8021_s22  ;;  %v10071_v48 = vpop.permute.xlu2 %3337 }
 0x5c6   :  { %v3480_v34 = vpop.permute.xlu0 %3479 }
 0x5c7   :  { %v3677_v18 = vsel %vm13028_vm3, %v3665_v8, %v3480_v34  ;;  %v2804_v34 = vld [vmem:[#allocation3 + $0xe1] sm:$0x3f] }
 0x5c8   :  { %3007 = vrot.lane.b32.xlu1 %v2803_v3, %s8018_s21  ;;  %v3689_v5 = vsel %vm1668_vm5, %v3677_v18, %v3528_v30  ;;  %v2950_v3 = vld [vmem:[#allocation3 + $0x111] sm:$0x3f] }
 0x5c9   :  { %v3763_v55 = vrot.slane %v3689_v5, 2 }
 0x5ca   :  { %v10079_v13 = vpop.permute.xlu1 %3145 }
 0x5cb   :  { %3343 = vrot.lane.b32.xlu2 %v2912_v9, %s8020_s2  ;;  %v2934_v9 = vld [vmem:[#allocation3 + $0xd0] sm:$0x3f]  ;;  %v3594_v38 = vsel %vm321_vm1, %v2836_v44, %v10079_v13 }
 0x5cc   :  { %3439 = vrot.lane.b32.xlu0 %v2949_v35, %s8018_s21  ;;  %v10086_v29 = vpop.permute.xlu2 %3241  ;;  %v2885_v35 = vld [vmem:[#allocation3 + $0xc0] sm:$0x3f] }
 0x5cd   :  { %v3630_v58 = vsel %vm321_vm1, %v2885_v35, %v10066_v25  ;;  %v2886_v35 = vld [vmem:[#allocation3 + $0xd0] sm:$0x3f] }
 0x5ce   :  { %v3384_v12 = vpop.permute.xlu0 %3383 }
 0x5cf   :  { %v3653_v16 = vsel %vm1668_vm5, %v3641_v45, %v3384_v12  ;;  %v3642_v45 = vsel %vm13028_vm3, %v3630_v58, %v10071_v48  ;;  %v2962_v48 = vld [vmem:[#allocation3 + $0x112] sm:$0x3f]  ;;  %v2837_v58 = vld [vmem:[#allocation3 + $0xc0] sm:$0x3f] }
 0x5d0   :  { %v3762_v11 = vrot.slane %v3653_v16, 4  ;;  %3535 = vrot.lane.b32.xlu1 %v2973_v56, %s8021_s22  ;;  %v2788_v16 = vld [vmem:[#allocation3 + $0xa0] sm:$0x3f] }
 0x5d2   :  { %v3194_v28 = vpop.permute.xlu1 %3193  ;;  %v3851_v14 = vsel %vm3780_vm12, %v3762_v11, %v3763_v55  ;;  %v3854_v7 = vsel %vm13030_vm15, %v3763_v55, %v3762_v11  ;;  %v3858_v51 = vsel %vm2339_vm0, %v3762_v11, %v3763_v55 }
 0x5d3   :  { %3247 = vrot.lane.b32.xlu2 %v2875_v50, %s8021_s22  ;;  %v3606_v25 = vsel %vm13028_vm3, %v3594_v38, %v3194_v28 }
 0x5d4   :  { %3487 = vrot.lane.b32.xlu0 %v2961_v43, %s8020_s2  ;;  %v10102_v59 = vpop.permute.xlu2 %3049  ;;  %v3618_v31 = vsel %vm1668_vm5, %v3606_v25, %v10086_v29  ;;  %v2876_v43 = vld [vmem:[#allocation3 + $0xf3] sm:$0x3f] }
 0x5d5   :  { %v3764_v50 = vrot.slane %v3618_v31, 6 }
 0x5d6   :  { %v3096_v49 = vpop.permute.xlu0 %3095 }
 0x5d7   :  { %v3581_v54 = vsel %vm1668_vm5, %v3569_v4, %v3096_v49 }
 0x5d8   :  { %v3850_v36 = vsel %vm2339_vm0, %v3581_v54, %v3761_v1  ;;  %v3853_v61 = vsel %vm13029_vm6, %v3581_v54, %v3761_v1  ;;  %v3857_v10 = vsel %vm3780_vm12, %v3581_v54, %v3761_v1  ;;  %3153 = vrot.lane.b32.xlu1 %v2852_v40, %s8018_s21 }
 0x5d9   :  { %v3852_v37 = vsel %vm13024_vm2, %v3850_v36, %v3851_v14  ;;  %v3855_v63 = vsel %vm13023_vm4, %v3853_v61, %v3854_v7  ;;  %v3859_v26 = vsel %vm13024_vm2, %v3858_v51, %v3857_v10 }
 0x5da   :  { %v3856_v33 = vrot.slane %v3855_v63, 2  ;;  %v3860_v23 = vrot.slane %v3859_v26, 4  ;;  %4021 = vst [vmem:[#allocation1 + $0x2] ss:$4 sm:$0xff] %v3852_v37  ;;  %v3002_v2 = vpop.permute.xlu1 %3001  ;;  %v2925_v63 = vld [vmem:[#allocation3 + $0x103] sm:$0x3f] }
 0x5db   :  { %3055 = vrot.lane.b32.xlu2 %v2815_v57, %s8020_s2  ;;  %v3558_v27 = vsel %vm321_vm1, %v2788_v16, %v3002_v2  ;;  %v2816_v26 = vld [vmem:[#allocation3 + $0xe2] sm:$0x3f] }
 0x5dc   :  { %4022 = vst [vmem:[#allocation1 + $0x3] ss:$4 sm:$0xff] %v3856_v33  ;;  %3391 = vrot.lane.b32.xlu0 %v2924_v19, %s8021_s22  ;;  %v10116_v20 = vpop.permute.xlu2 %3291  ;;  %v3570_v1 = vsel %vm13028_vm3, %v3558_v27, %v10102_v59 }
 0x5dd   :  { %4023 = vst [vmem:[#allocation1 + $0x20] ss:$4 sm:$0xff] %v3860_v23 }
 0x5de   :  { %v3434_v22 = vpop.permute.xlu0 %3433 }
 0x5df   :  { %v3666_v39 = vsel %vm321_vm1, %v2934_v9, %v3434_v22  ;;  %v2828_v22 = vld [vmem:[#allocation3 + $0xe3] sm:$0x3f] }
 0x5e0   :  { %3201 = vrot.lane.b32.xlu1 %v2864_v62, %s8020_s2 }
 0x5e2   :  { %v3530_v32 = vpop.permute.xlu1 %3529 }
 0x5e3   :  { %v4027_v53 = vld.sshfl [vmem:[#allocation1] sm:$0xff pattern:$0x73625140]  ;;  %v4029_v46 = vld.sshfl [vmem:[#allocation1 + $0x10] sm:$0xff pattern:$0x73625140]  ;;  %3297 = vrot.lane.b32.xlu2 %v2901_v42, %s8018_s21 }
 0x5e4   :  { %v4030_v47 = vld.sshfl [vmem:[#allocation1 + $0x18] sm:$0xff pattern:$0x73625140]  ;;  %4123 = vmatmul.f32.gmra.mxu3 %v4027_v53  ;;  %4211 = vmatmul.f32.gmra.mxu1 %v4029_v46  ;;  %v10121_v30 = vpop.permute.xlu2 %3339 }
 0x5e5   :  { %4255 = vmatmul.f32.gmra.mxu2 %v4030_v47  ;;  %3103 = vrot.lane.b32.xlu0 %v2827_v60, %s8021_s22 }
 0x5e6   :  { %v3482_v6 = vpop.permute.xlu0 %3481 }
 0x5e7   :  { %v3678_v18 = vsel %vm13028_vm3, %v3666_v39, %v3482_v6 }
 0x5e8   :  { %3009 = vrot.lane.b32.xlu1 %v2804_v34, %s8018_s21  ;;  %v3690_v5 = vsel %vm1668_vm5, %v3678_v18, %v3530_v32  ;;  %v2935_v32 = vld [vmem:[#allocation3 + $0xe0] sm:$0x3f]  ;;  %v2789_v18 = vld [vmem:[#allocation3 + $0xb0] sm:$0x3f] }
 0x5e9   :  { %v3766_v13 = vrot.slane %v3690_v5, 2 }
 0x5ea   :  { %v10129_v8 = vpop.permute.xlu1 %3147 }
 0x5eb   :  { %3345 = vrot.lane.b32.xlu2 %v2913_v24, %s8020_s2  ;;  %v3631_v24 = vsel %vm321_vm1, %v2886_v35, %v10116_v20 }
 0x5ec   :  { %v10143_v56 = vpop.permute.xlu2 %3149  ;;  %v3643_v39 = vsel %vm13028_vm3, %v3631_v24, %v10121_v30 }
 0x5ed   :  { %3441 = vrot.lane.b32.xlu0 %v2950_v3, %s8018_s21 }
 0x5ee   :  { %v3386_v12 = vpop.permute.xlu0 %3385 }
 0x5ef   :  { %v3654_v52 = vsel %vm1668_vm5, %v3642_v45, %v3386_v12  ;;  %v3595_v12 = vsel %vm321_vm1, %v2837_v58, %v10129_v8 }
 0x5f0   :  { %v3765_v11 = vrot.slane %v3654_v52, 4  ;;  %3537 = vrot.lane.b32.xlu1 %v2974_v41, %s8021_s22 }
 0x5f2   :  { %v3196_v55 = vpop.permute.xlu1 %3195  ;;  %v3862_v28 = vsel %vm3780_vm12, %v3765_v11, %v3766_v13  ;;  %v3865_v4 = vsel %vm13030_vm15, %v3766_v13, %v3765_v11  ;;  %v3869_v14 = vsel %vm2339_vm0, %v3765_v11, %v3766_v13 }
 0x5f3   :  { %3249 = vrot.lane.b32.xlu2 %v2876_v43, %s8021_s22  ;;  %v3607_v45 = vsel %vm13028_vm3, %v3595_v12, %v3196_v55 }
 0x5f4   :  { %v3388_v57 = vpop.permute.xlu2 %3387 }
 0x5f5   :  { %3489 = vrot.lane.b32.xlu0 %v2962_v48, %s8020_s2  ;;  %v3655_v38 = vsel %vm1668_vm5, %v3643_v39, %v3388_v57 }
 0x5f6   :  { %v3098_v29 = vpop.permute.xlu0 %3097  ;;  %v3768_v20 = vrot.slane %v3655_v38, 4 }
 0x5f7   :  { %v3582_v49 = vsel %vm1668_vm5, %v3570_v1, %v3098_v29  ;;  %v10183_v1 = vld.sshfl [vmem:[#allocation1 + $0x8] sm:$0xff pattern:$0x73625140] }
 0x5f8   :  { %v3861_v7 = vsel %vm2339_vm0, %v3582_v49, %v3764_v50  ;;  %v3864_v54 = vsel %vm13029_vm6, %v3582_v49, %v3764_v50  ;;  %v3868_v51 = vsel %vm3780_vm12, %v3582_v49, %v3764_v50 }
 0x5f9   :  { %v3863_v36 = vsel %vm13024_vm2, %v3861_v7, %v3862_v28  ;;  %v3866_v61 = vsel %vm13023_vm4, %v3864_v54, %v3865_v4  ;;  %v3870_v59 = vsel %vm13024_vm2, %v3869_v14, %v3868_v51  ;;  %v3947_v7 = vld [vmem:[%s13014_s6 + $0xf8] sm:$0xff] }
 0x5fa   :  { %v3867_v10 = vrot.slane %v3866_v61, 2  ;;  %v3871_v37 = vrot.slane %v3870_v59, 4  ;;  %4024 = vst [vmem:[#allocation1 + $0x21] ss:$4 sm:$0xff] %v3863_v36  ;;  %v3004_v33 = vpop.permute.xlu1 %3003  ;;  %4139 = vmatpush.msrb.mxu3 %v3947_v7  ;;  %v3946_v61 = vld [vmem:[%s13014_s6 + $0xf0] sm:$0xff]  ;;  %v3945_v59 = vld [vmem:[%s13014_s6 + $0xe8] sm:$0xff] }
 0x5fb   :  { %3057 = vrot.lane.b32.xlu2 %v2816_v26, %s8020_s2  ;;  %v3559_v25 = vsel %vm321_vm1, %v2789_v18, %v3004_v33  ;;  %v2937_v7 = vld [vmem:[#allocation3 + $0x100] sm:$0x3f] }
 0x5fc   :  { %4025 = vst [vmem:[#allocation1 + $0x22] ss:$4 sm:$0xff] %v3867_v10  ;;  %v3052_v46 = vpop.permute.xlu2 %3051  ;;  %4140 = vmatpush.msrb.mxu3 %v3946_v61  ;;  %v2887_v10 = vld [vmem:[#allocation3 + $0xe0] sm:$0x3f] }
 0x5fd   :  { %4026 = vst [vmem:[#allocation1 + $0x23] ss:$4 sm:$0xff] %v3871_v37  ;;  %3393 = vrot.lane.b32.xlu0 %v2925_v63, %s8021_s22  ;;  %v3571_v5 = vsel %vm13028_vm3, %v3559_v25, %v3052_v46  ;;  %v2936_v37 = vld [vmem:[#allocation3 + $0xf0] sm:$0x3f] }
 0x5fe   :  { %v3436_v23 = vpop.permute.xlu0 %3435  ;;  %4141 = vmatpush.msrb.mxu3 %v3945_v59  ;;  %v2838_v63 = vld [vmem:[#allocation3 + $0xd0] sm:$0x3f] }
 0x5ff   :  { %v3667_v6 = vsel %vm321_vm1, %v2935_v32, %v3436_v23 }
 0x602   :  { %v3294_v62 = vpop.permute.xlu1 %3293 }
 0x603   :  { %v3632_v26 = vsel %vm321_vm1, %v2887_v10, %v3294_v62  ;;  %v2790_v62 = vld [vmem:[#allocation3 + $0xc0] sm:$0x3f] }
 0x604   :  { %v4031_v40 = vld.sshfl [vmem:[#allocation1 + $0x20] sm:$0xff pattern:$0x73625140]  ;;  %v4033_v19 = vld.sshfl [vmem:[#allocation1 + $0x30] sm:$0xff pattern:$0x73625140]  ;;  %v3486_v42 = vpop.permute.xlu2 %3485 }
 0x605   :  { %v4034_v2 = vld.sshfl [vmem:[#allocation1 + $0x38] sm:$0xff pattern:$0x73625140]  ;;  %4126 = vmatmul.f32.gmra.mxu3 %v4031_v40  ;;  %4214 = vmatmul.f32.gmra.mxu1 %v4033_v19  ;;  %v3596_v40 = vsel %vm321_vm1, %v2838_v63, %v10143_v56  ;;  %v3944_v56 = vld [vmem:[%s13014_s6 + $0xe0] sm:$0xff] }
 0x606   :  { %4258 = vmatmul.f32.gmra.mxu2 %v4034_v2  ;;  %v3484_v53 = vpop.permute.xlu0 %3483  ;;  %3105 = vrot.lane.b32.xlu0 %v2828_v22, %s8021_s22 }
 0x607   :  { %v3679_v9 = vsel %vm13028_vm3, %v3667_v6, %v3484_v53  ;;  %4142 = vmatpush.msrb.mxu3 %v3944_v56 }
 0x60a   :  { %v3532_v60 = vpop.permute.xlu1 %3531 }
 0x60b   :  { %v3691_v44 = vsel %vm1668_vm5, %v3679_v9, %v3532_v60 }
 0x60c   :  { %v3769_v41 = vrot.slane %v3691_v44, 2  ;;  %v3246_v16 = vpop.permute.xlu2 %3245 }
 0x60e   :  { %v3244_v47 = vpop.permute.xlu0 %3243  ;;  %v3873_v11 = vsel %vm3780_vm12, %v3768_v20, %v3769_v41  ;;  %v3876_v8 = vsel %vm13030_vm15, %v3769_v41, %v3768_v20  ;;  %v3880_v13 = vsel %vm2339_vm0, %v3768_v20, %v3769_v41 }
 0x60f   :  { %v3619_v52 = vsel %vm1668_vm5, %v3607_v45, %v3244_v47 }
 0x610   :  { %v3767_v31 = vrot.slane %v3619_v52, 6 }
 0x612   :  { %v3342_v34 = vpop.permute.xlu1 %3341 }
 0x613   :  { %v3644_v19 = vsel %vm13028_vm3, %v3632_v26, %v3342_v34  ;;  %v3943_v34 = vld [vmem:[%s13014_s6 + $0xd8] sm:$0xff] }
 0x614   :  { %v3054_v36 = vpop.permute.xlu2 %3053  ;;  %4143 = vmatpush.msrb.mxu3 %v3943_v34 }
 0x616   :  { %v3438_v3 = vpop.permute.xlu0 %3437 }
 0x617   :  { %v3668_v33 = vsel %vm321_vm1, %v2936_v37, %v3438_v3 }
 0x618   :  { %v3680_v53 = vsel %vm13028_vm3, %v3668_v33, %v3486_v42 }
 0x61a   :  { %v3100_v27 = vpop.permute.xlu1 %3099 }
 0x61b   :  { %v3583_v48 = vsel %vm1668_vm5, %v3571_v5, %v3100_v27  ;;  %v10227_v5 = vld.sshfl [vmem:[#allocation1 + $0x28] sm:$0xff pattern:$0x73625140] }
 0x61c   :  { %v3872_v43 = vsel %vm2339_vm0, %v3583_v48, %v3767_v31  ;;  %v3875_v50 = vsel %vm13029_vm6, %v3583_v48, %v3767_v31  ;;  %v3879_v55 = vsel %vm3780_vm12, %v3583_v48, %v3767_v31 }
 0x61d   :  { %v3874_v29 = vsel %vm13024_vm2, %v3872_v43, %v3873_v11  ;;  %v3877_v28 = vsel %vm13023_vm4, %v3875_v50, %v3876_v8  ;;  %v3881_v4 = vsel %vm13024_vm2, %v3880_v13, %v3879_v55  ;;  %v3296_v46 = vpop.permute.xlu2 %3295  ;;  %v3942_v43 = vld [vmem:[%s13014_s6 + $0xd0] sm:$0xff]  ;;  %v3941_v50 = vld [vmem:[%s13014_s6 + $0xc8] sm:$0xff] }
 0x61e   :  { %v3198_v30 = vpop.permute.xlu0 %3197  ;;  %v3878_v49 = vrot.slane %v3877_v28, 2  ;;  %v3882_v14 = vrot.slane %v3881_v4, 4  ;;  %4035 = vst [vmem:[#allocation1] ss:$4 sm:$0xff] %v3874_v29  ;;  %4144 = vmatpush.msrb.mxu3 %v3942_v43  ;;  %v3940_v29 = vld [vmem:[%s13014_s6 + $0xc0] sm:$0xff]  ;;  %v3939_v4 = vld [vmem:[%s13014_s6 + $0xb8] sm:$0xff] }
 0x61f   :  { %v3608_v2 = vsel %vm13028_vm3, %v3596_v40, %v3198_v30  ;;  %v2938_v43 = vld [vmem:[#allocation3 + $0x110] sm:$0x3f] }
 0x620   :  { %4036 = vst [vmem:[#allocation1 + $0x1] ss:$4 sm:$0xff] %v3878_v49  ;;  %v3620_v60 = vsel %vm1668_vm5, %v3608_v2, %v3246_v16  ;;  %4145 = vmatpush.msrb.mxu3 %v3941_v50  ;;  %v3938_v49 = vld [vmem:[%s13014_s6 + $0xb0] sm:$0xff]  ;;  %v3937_v2 = vld [vmem:[%s13014_s6 + $0xa8] sm:$0xff] }
 0x621   :  { %4037 = vst [vmem:[#allocation1 + $0x2] ss:$4 sm:$0xff] %v3882_v14  ;;  %v3770_v42 = vrot.slane %v3620_v60, 6  ;;  %v2888_v14 = vld [vmem:[#allocation3 + $0xf0] sm:$0x3f] }
 0x622   :  { %v3534_v54 = vpop.permute.xlu1 %3533  ;;  %4146 = vmatpush.msrb.mxu3 %v3940_v29  ;;  %v2889_v50 = vld [vmem:[#allocation3 + $0x100] sm:$0x3f] }
 0x623   :  { %v3692_v47 = vsel %vm1668_vm5, %v3680_v53, %v3534_v54 }
 0x624   :  { %v3772_v3 = vrot.slane %v3692_v47, 2  ;;  %4147 = vmatpush.msrb.mxu3 %v3939_v4 }
 0x625   :  { %v3344_v31 = vpop.permute.xlu2 %3343 }
 0x626   :  { %v3006_v51 = vpop.permute.xlu0 %3005  ;;  %4148 = vmatpush.msrb.mxu3 %v3938_v49 }
 0x627   :  { %v3560_v32 = vsel %vm321_vm1, %v2790_v62, %v3006_v51  ;;  %v3633_v51 = vsel %vm321_vm1, %v2888_v14, %v3296_v46 }
 0x628   :  { %v3572_v9 = vsel %vm13028_vm3, %v3560_v32, %v3054_v36  ;;  %v2839_v36 = vld [vmem:[#allocation3 + $0xe0] sm:$0x3f]  ;;  %v3645_v10 = vsel %vm13028_vm3, %v3633_v51, %v3344_v31  ;;  %4149 = vmatpush.msrb.mxu3 %v3937_v2 }
 0x62a   :  { %v10199_v23 = vpop.permute.xlu1 %3151 }
 0x62b   :  { %v3597_v37 = vsel %vm321_vm1, %v2839_v36, %v10199_v23 }
 0x62d   :  { %v3248_v13 = vpop.permute.xlu2 %3247 }
 0x62e   :  { %v3390_v57 = vpop.permute.xlu0 %3389 }
 0x62f   :  { %v3656_v22 = vsel %vm1668_vm5, %v3644_v19, %v3390_v57  ;;  %v2791_v57 = vld [vmem:[#allocation3 + $0xd0] sm:$0x3f] }
 0x630   :  { %v3771_v6 = vrot.slane %v3656_v22, 4  ;;  %v3936_v22 = vld [vmem:[%s13014_s6 + $0xa0] sm:$0xff] }
 0x631   :  { %4150 = vmatpush.msrb.mxu3 %v3936_v22 }
 0x632   :  { %v3200_v35 = vpop.permute.xlu1 %3199  ;;  %v3884_v58 = vsel %vm3780_vm12, %v3771_v6, %v3772_v3  ;;  %v3887_v44 = vsel %vm13030_vm15, %v3772_v3, %v3771_v6  ;;  %v3891_v12 = vsel %vm2339_vm0, %v3771_v6, %v3772_v3 }
 0x633   :  { %v3609_v26 = vsel %vm13028_vm3, %v3597_v37, %v3200_v35 }
 0x634   :  { %v3621_v23 = vsel %vm1668_vm5, %v3609_v26, %v3248_v13 }
 0x635   :  { %v3056_v61 = vpop.permute.xlu2 %3055  ;;  %v3773_v62 = vrot.slane %v3621_v23, 6 }
 0x636   :  { %v3102_v24 = vpop.permute.xlu0 %3101 }
 0x637   :  { %v3584_v39 = vsel %vm1668_vm5, %v3572_v9, %v3102_v24 }
 0x638   :  { %v3883_v45 = vsel %vm2339_vm0, %v3584_v39, %v3770_v42  ;;  %v3886_v38 = vsel %vm13029_vm6, %v3584_v39, %v3770_v42  ;;  %v3890_v18 = vsel %vm3780_vm12, %v3584_v39, %v3770_v42 }
 0x639   :  { %v3885_v25 = vsel %vm13024_vm2, %v3883_v45, %v3884_v58  ;;  %v3888_v52 = vsel %vm13023_vm4, %v3886_v38, %v3887_v44  ;;  %v3892_v41 = vsel %vm13024_vm2, %v3891_v12, %v3890_v18 }
 0x63a   :  { %v3889_v20 = vrot.slane %v3888_v52, 2  ;;  %v3893_v16 = vrot.slane %v3892_v41, 4  ;;  %4038 = vst [vmem:[#allocation1 + $0x3] ss:$4 sm:$0xff] %v3885_v25  ;;  %v3008_v30 = vpop.permute.xlu1 %3007 }
 0x63b   :  { %v3561_v53 = vsel %vm321_vm1, %v2791_v57, %v3008_v30  ;;  %v3935_v30 = vld [vmem:[%s13014_s6 + $0x98] sm:$0xff] }
 0x63c   :  { %4039 = vst [vmem:[#allocation1 + $0x20] ss:$4 sm:$0xff] %v3889_v20  ;;  %v3573_v60 = vsel %vm13028_vm3, %v3561_v53, %v3056_v61  ;;  %4151 = vmatpush.msrb.mxu3 %v3935_v30  ;;  %v2792_v61 = vld [vmem:[#allocation3 + $0xe0] sm:$0x3f] }
 0x63d   :  { %4040 = vst [vmem:[#allocation1 + $0x21] ss:$4 sm:$0xff] %v3893_v16  ;;  %v3298_v3 = vpop.permute.xlu2 %3297 }
 0x63e   :  { %v3440_v27 = vpop.permute.xlu0 %3439  ;;  %v3634_v29 = vsel %vm321_vm1, %v2889_v50, %v3298_v3 }
 0x63f   :  { %v3669_v59 = vsel %vm321_vm1, %v2937_v7, %v3440_v27 }
 0x641   :  { %v4043_v11 = vld.sshfl [vmem:[#allocation1] sm:$0xff pattern:$0x73625140]  ;;  %v4045_v8 = vld.sshfl [vmem:[#allocation1 + $0x10] sm:$0xff pattern:$0x73625140] }
 0x642   :  { %v4046_v48 = vld.sshfl [vmem:[#allocation1 + $0x18] sm:$0xff pattern:$0x73625140]  ;;  %4129 = vmatmul.f32.gmra.mxu3 %v4043_v11  ;;  %4217 = vmatmul.f32.gmra.mxu1 %v4045_v8  ;;  %v3536_v28 = vpop.permute.xlu1 %3535  ;;  %v10272_v38 = vld.sshfl [vmem:[#allocation1 + $0x8] sm:$0xff pattern:$0x73625140] }
 0x643   :  { %4261 = vmatmul.f32.gmra.mxu2 %v4046_v48  ;;  %v3934_v11 = vld [vmem:[%s13014_s6 + $0x90] sm:$0xff]  ;;  %v3933_v8 = vld [vmem:[%s13014_s6 + $0x88] sm:$0xff]  ;;  %v3932_v48 = vld [vmem:[%s13014_s6 + $0x80] sm:$0xff] }
 0x644   :  { %4152 = vmatpush.msrb.mxu3 %v3934_v11 }
 0x645   :  { %v3346_v52 = vpop.permute.xlu2 %3345 }
 0x646   :  { %v3488_v55 = vpop.permute.xlu0 %3487  ;;  %4153 = vmatpush.msrb.mxu3 %v3933_v8  ;;  %v3646_v49 = vsel %vm13028_vm3, %v3634_v29, %v3346_v52 }
 0x647   :  { %v3681_v63 = vsel %vm13028_vm3, %v3669_v59, %v3488_v55 }
 0x648   :  { %v3693_v40 = vsel %vm1668_vm5, %v3681_v63, %v3536_v28  ;;  %4154 = vmatpush.msrb.mxu3 %v3932_v48  ;;  %v2840_v28 = vld [vmem:[#allocation3 + $0xf0] sm:$0x3f] }
 0x649   :  { %v3775_v47 = vrot.slane %v3693_v40, 2 }
 0x64a   :  { %v3154_v19 = vpop.permute.xlu1 %3153 }
 0x64b   :  { %v3598_v14 = vsel %vm321_vm1, %v2840_v28, %v3154_v19 }
 0x64d   :  { %v3250_v13 = vpop.permute.xlu2 %3249 }
 0x64e   :  { %v3392_v54 = vpop.permute.xlu0 %3391 }
 0x64f   :  { %v3657_v33 = vsel %vm1668_vm5, %v3645_v10, %v3392_v54 }
 0x650   :  { %v3774_v46 = vrot.slane %v3657_v33, 4 }
 0x652   :  { %v3895_v6 = vsel %vm3780_vm12, %v3774_v46, %v3775_v47  ;;  %v3898_v56 = vsel %vm13030_vm15, %v3775_v47, %v3774_v46  ;;  %v3902_v42 = vsel %vm2339_vm0, %v3774_v46, %v3775_v47  ;;  %v3202_v18 = vpop.permute.xlu1 %3201 }
 0x653   :  { %v3610_v51 = vsel %vm13028_vm3, %v3598_v14, %v3202_v18 }
 0x654   :  { %v3622_v10 = vsel %vm1668_vm5, %v3610_v51, %v3250_v13 }
 0x655   :  { %v3058_v26 = vpop.permute.xlu2 %3057  ;;  %v3776_v57 = vrot.slane %v3622_v10, 6 }
 0x657   :  { %v3104_v32 = vpop.permute.xlu0 %3103 }
 0x658   :  { %v3585_v34 = vsel %vm1668_vm5, %v3573_v60, %v3104_v32 }
 0x659   :  { %v3894_v35 = vsel %vm2339_vm0, %v3585_v34, %v3773_v62  ;;  %v3897_v9 = vsel %vm13029_vm6, %v3585_v34, %v3773_v62  ;;  %v3901_v24 = vsel %vm3780_vm12, %v3585_v34, %v3773_v62 }
 0x65a   :  { %v3896_v58 = vsel %vm13024_vm2, %v3894_v35, %v3895_v6  ;;  %v3899_v44 = vsel %vm13023_vm4, %v3897_v9, %v3898_v56  ;;  %v3903_v39 = vsel %vm13024_vm2, %v3902_v42, %v3901_v24  ;;  %v3010_v31 = vpop.permute.xlu1 %3009  ;;  %v4112_v24 = vpop.f32.mrf.mxu3 }
 0x65b   :  { %v3900_v12 = vrot.slane %v3899_v44, 2  ;;  %v3904_v45 = vrot.slane %v3903_v39, 4  ;;  %4041 = vst [vmem:[#allocation1 + $0x22] ss:$4 sm:$0xff] %v3896_v58  ;;  %v3562_v37 = vsel %vm321_vm1, %v2792_v61, %v3010_v31 }
 0x65c   :  { %v3574_v19 = vsel %vm13028_vm3, %v3562_v37, %v3058_v26 }
 0x65d   :  { %4042 = vst [vmem:[#allocation1 + $0x23] ss:$4 sm:$0xff] %v3900_v12 }
 0x65e   :  { %4051 = vst [vmem:[#allocation1] ss:$4 sm:$0xff] %v3904_v45 }
 0x65f   :  { %v3442_v25 = vpop.permute.xlu0 %3441 }
 0x660   :  { %v3670_v4 = vsel %vm321_vm1, %v2938_v43, %v3442_v25  ;;  %v4200_v25 = vpop.f32.mrf.mxu1 }
 0x662   :  { %v3538_v54 = vpop.permute.xlu1 %3537  ;;  %v4115_v44 = vpop.f32.mrf.mxu3 }
 0x664   :  { %v4047_v41 = vld.sshfl [vmem:[#allocation1 + $0x20] sm:$0xff pattern:$0x73625140]  ;;  %v4049_v20 = vld.sshfl [vmem:[#allocation1 + $0x30] sm:$0xff pattern:$0x73625140] }
 0x665   :  { %v4050_v16 = vld.sshfl [vmem:[#allocation1 + $0x38] sm:$0xff pattern:$0x73625140]  ;;  %4132 = vmatmul.f32.gmra.mxu3 %v4047_v41  ;;  %4220 = vmatmul.f32.gmra.mxu1 %v4049_v20  ;;  %v4048_v9 = vld.sshfl [vmem:[#allocation1 + $0x28] sm:$0xff pattern:$0x73625140] }
 0x666   :  { %4264 = vmatmul.f32.gmra.mxu2 %v4050_v16 }
 0x667   :  { %v3490_v27 = vpop.permute.xlu0 %3489 }
 0x668   :  { %v3682_v7 = vsel %vm13028_vm3, %v3670_v4, %v3490_v27 }
 0x669   :  { %v3694_v59 = vsel %vm1668_vm5, %v3682_v7, %v3538_v54 }
 0x66a   :  { %v3778_v33 = vrot.slane %v3694_v59, 2  ;;  %v4118_v39 = vpop.f32.mrf.mxu3 }
 0x66f   :  { %v3394_v55 = vpop.permute.xlu0 %3393 }
 0x670   :  { %v3658_v36 = vsel %vm1668_vm5, %v3646_v49, %v3394_v55 }
 0x671   :  { %v3777_v63 = vrot.slane %v3658_v36, 4 }
 0x673   :  { %v3906_v2 = vsel %vm3780_vm12, %v3777_v63, %v3778_v33  ;;  %v3909_v22 = vsel %vm13030_vm15, %v3778_v33, %v3777_v63  ;;  %v3913_v53 = vsel %vm2339_vm0, %v3777_v63, %v3778_v33 }
 0x678   :  { %v3106_v40 = vpop.permute.xlu0 %3105 }
 0x679   :  { %v3586_v23 = vsel %vm1668_vm5, %v3574_v19, %v3106_v40 }
 0x67a   :  { %v3905_v46 = vsel %vm2339_vm0, %v3586_v23, %v3776_v57  ;;  %v3908_v47 = vsel %vm13029_vm6, %v3586_v23, %v3776_v57  ;;  %v3912_v62 = vsel %vm3780_vm12, %v3586_v23, %v3776_v57 }
 0x67b   :  { %v3907_v60 = vsel %vm13024_vm2, %v3905_v46, %v3906_v2  ;;  %v3910_v32 = vsel %vm13023_vm4, %v3908_v47, %v3909_v22  ;;  %v3914_v6 = vsel %vm13024_vm2, %v3913_v53, %v3912_v62  ;;  %v8025_v53 = vmov 72.0  }
 0x67c   :  { %v3911_v56 = vrot.slane %v3910_v32, 2  ;;  %v3915_v34 = vrot.slane %v3914_v6, 4  ;;  %4052 = vst [vmem:[#allocation1 + $0x1] ss:$4 sm:$0xff] %v3907_v60  ;;  %8008 = vrcp.f32 %v8025_v53  ;;  %vm13034_vm2 = vcmask 1044481  }
 0x67e   :  { %4053 = vst [vmem:[#allocation1 + $0x2] ss:$4 sm:$0xff] %v3911_v56 }
 0x67f   :  { %4054 = vst [vmem:[#allocation1 + $0x3] ss:$4 sm:$0xff] %v3915_v34 }
 0x686   :  { %v4055_v3 = vld.sshfl [vmem:[#allocation1] sm:$0xff pattern:$0x73625140]  ;;  %v4057_v42 = vld.sshfl [vmem:[#allocation1 + $0x10] sm:$0xff pattern:$0x73625140] }
 0x687   :  { %v4058_v35 = vld.sshfl [vmem:[#allocation1 + $0x18] sm:$0xff pattern:$0x73625140]  ;;  %4135 = vmatmul.f32.gmra.mxu3 %v4055_v3  ;;  %4223 = vmatmul.f32.gmra.mxu1 %v4057_v42  ;;  %v4056_v58 = vld.sshfl [vmem:[#allocation1 + $0x8] sm:$0xff pattern:$0x73625140]  ;;  %v8009_v3 = vpop.eup %8008 }
 0x688   :  { %4267 = vmatmul.f32.gmra.mxu2 %v4058_v35  ;;  %vm4290_vm1 = vweird.f32 %v8009_v3 }
 0x68f   :  { %4155 = vmatmul.f32.vlgmr.msrb.gmra.mxu3 %v9933_v0  ;;  %v4121_v0 = vpop.f32.mrf.mxu3 }
 0x697   :  { %4158 = vmatmul.f32.gmra.mxu3 %v10011_v15  ;;  %v4124_v12 = vpop.f32.mrf.mxu3 }
 0x69f   :  { %4161 = vmatmul.f32.gmra.mxu3 %v10061_v17  ;;  %v4127_v15 = vpop.f32.mrf.mxu3 }
 0x6a7   :  { %4164 = vmatmul.f32.gmra.mxu3 %v10111_v21 }
 0x6af   :  { %4167 = vmatmul.f32.gmra.mxu3 %v10183_v1  ;;  %v4244_v1 = vpop.f32.mrf.mxu2 }
 0x6b7   :  { %4170 = vmatmul.f32.gmra.mxu3 %v10227_v5  ;;  %v4203_v5 = vpop.f32.mrf.mxu1  ;;  %v4247_v41 = vpop.f32.mrf.mxu2 }
 0x6bf   :  { %4173 = vmatmul.f32.gmra.mxu3 %v10272_v38  ;;  %v4206_v20 = vpop.f32.mrf.mxu1  ;;  %v4250_v16 = vpop.f32.mrf.mxu2 }
 0x6c5   :  { %v4130_v45 = vpop.f32.mrf.mxu3 }
 0x6c7   :  { %4176 = vmatmul.f32.gmra.mxu3 %v4048_v9  ;;  %v4209_v27 = vpop.f32.mrf.mxu1  ;;  %v4253_v30 = vpop.f32.mrf.mxu2 }
 0x6cf   :  { %4179 = vmatmul.f32.gmra.mxu3 %v4056_v58  ;;  %v4212_v8 = vpop.f32.mrf.mxu1  ;;  %v4256_v48 = vpop.f32.mrf.mxu2 }
 0x6d7   :  { %v4215_v43 = vpop.f32.mrf.mxu1  ;;  %v4259_v50 = vpop.f32.mrf.mxu2 }
 0x6df   :  { %v4218_v7 = vpop.f32.mrf.mxu1  ;;  %v4262_v61 = vpop.f32.mrf.mxu2 }
 0x6e7   :  { %v4221_v46 = vpop.f32.mrf.mxu1 }
 0x6e8   :  { %v4133_v17 = vpop.f32.mrf.mxu3 }
 0x6e9   :  { %v4265_v32 = vpop.f32.mrf.mxu2 }
 0x70a   :  { %v4136_v18 = vpop.f32.mrf.mxu3 }
 0x712   :  { %v4156_v21 = vpop.f32.mrf.mxu3 }
 0x713   :  { %v4157_v29 = vadd.f32 %v4156_v21, %v4112_v24 }
 0x715   :  { %v4201_v54 = vadd.f32 %v4200_v25, %v4157_v29 }
 0x717   :  { %v4245_v63 = vadd.f32 %v4244_v1, %v4201_v54 }
 0x71a   :  { %v4159_v52 = vpop.f32.mrf.mxu3 }
 0x71b   :  { %v4160_v55 = vadd.f32 %v4159_v52, %v4115_v44 }
 0x71d   :  { %v4204_v4 = vadd.f32 %v4203_v5, %v4160_v55 }
 0x71f   :  { %v4248_v59 = vadd.f32 %v4247_v41, %v4204_v4 }
 0x721   :  { %v4271_v40 = vadd.f32 %v4248_v59, %v4245_v63 }
 0x722   :  { %v4162_v38 = vpop.f32.mrf.mxu3 }
 0x723   :  { %v4163_v28 = vadd.f32 %v4162_v38, %v4118_v39  ;;  %v4224_v39 = vpop.f32.mrf.mxu1 }
 0x725   :  { %v4207_v51 = vadd.f32 %v4206_v20, %v4163_v28 }
 0x727   :  { %v4251_v26 = vadd.f32 %v4250_v16, %v4207_v51 }
 0x729   :  { %v4272_v47 = vadd.f32 %v4271_v40, %v4251_v26 }
 0x72a   :  { %v4165_v31 = vpop.f32.mrf.mxu3 }
 0x72b   :  { %v4166_v14 = vadd.f32 %v4165_v31, %v4121_v0  ;;  %v4286_v0 = vmul.f32 72.0, %v8009_v3 }
 0x72d   :  { %v4210_v10 = vadd.f32 %v4209_v27, %v4166_v14  ;;  %v4287_v25 = vsub.f32 1.0, %v4286_v0 }
 0x72f   :  { %v4254_v2 = vadd.f32 %v4253_v30, %v4210_v10  ;;  %v4288_v5 = vmul.f32 %v8009_v3, %v4287_v25 }
 0x731   :  { %v4273_v6 = vadd.f32 %v4272_v47, %v4254_v2  ;;  %v4289_v20 = vadd.f32 %v8009_v3, %v4288_v5 }
 0x732   :  { %v4168_v11 = vpop.f32.mrf.mxu3 }
 0x733   :  { %v4169_v36 = vadd.f32 %v4168_v11, %v4124_v12  ;;  %v4291_v27 = vsel %vm4290_vm1, %v8009_v3, %v4289_v20 }
 0x735   :  { %v4213_v33 = vadd.f32 %v4212_v8, %v4169_v36 }
 0x737   :  { %v4257_v62 = vadd.f32 %v4256_v48, %v4213_v33 }
 0x739   :  { %v4274_v42 = vadd.f32 %v4273_v6, %v4257_v62 }
 0x73a   :  { %v4171_v13 = vpop.f32.mrf.mxu3 }
 0x73b   :  { %v4172_v37 = vadd.f32 %v4171_v13, %v4127_v15 }
 0x73d   :  { %v4216_v22 = vadd.f32 %v4215_v43, %v4172_v37 }
 0x73f   :  { %v4260_v56 = vadd.f32 %v4259_v50, %v4216_v22 }
 0x741   :  { %v4275_v24 = vadd.f32 %v4274_v42, %v4260_v56 }
 0x742   :  { %v4174_v49 = vpop.f32.mrf.mxu3 }
 0x743   :  { %v4175_v57 = vadd.f32 %v4174_v49, %v4130_v45  ;;  %v4268_v45 = vpop.f32.mrf.mxu2 }
 0x745   :  { %v4219_v60 = vadd.f32 %v4218_v7, %v4175_v57 }
 0x747   :  { %v4263_v35 = vadd.f32 %v4262_v61, %v4219_v60 }
 0x749   :  { %v4276_v12 = vadd.f32 %v4275_v24, %v4263_v35 }
 0x74a   :  { %v4177_v19 = vpop.f32.mrf.mxu3 }
 0x74b   :  { %v4178_v23 = vadd.f32 %v4177_v19, %v4133_v17 }
 0x74d   :  { %v4222_v34 = vadd.f32 %v4221_v46, %v4178_v23 }
 0x74f   :  { %v4266_v58 = vadd.f32 %v4265_v32, %v4222_v34 }
 0x751   :  { %v4277_v17 = vadd.f32 %v4276_v12, %v4266_v58 }
 0x752   :  { %v4180_v9 = vpop.f32.mrf.mxu3 }
 0x753   :  { %v4181_v44 = vadd.f32 %v4180_v9, %v4136_v18 }
 0x755   :  { %v4225_v15 = vadd.f32 %v4224_v39, %v4181_v44  ;;  %v10350_v44 = vld [vmem:[%s13016_s8] ss:$0 sm:$0xff] }
 0x757   :  { %v4269_v21 = vadd.f32 %v4268_v45, %v4225_v15  ;;  %v4552_v45 = vld [vmem:[#allocation4 + $0x1] sm:$0x1f] }
 0x759   :  { %v4278_v1 = vadd.f32 %v4277_v17, %v4269_v21  ;;  %v4572_v17 = vld [vmem:[#allocation4 + $0x3] sm:$0x1f] }
 0x75b   :  { %v4279_v52 = vrot.slane %v4278_v1, 4 }
 0x75d   :  { %v4280_v41 = vadd.f32 %v4279_v52, %v4278_v1  ;;  %v7976_v52 = vpack.i.bf16 %v4552_v45, %v4572_v17 }
 0x75f   :  { %v4281_v38 = vrot.slane %v4280_v41, 2  ;;  %7977 = vrot.lane.b32.xlu1 %v7976_v52, %s8020_s2 }
 0x761   :  { %v4282_v16 = vadd.f32 %v4281_v38, %v4280_v41 }
 0x763   :  { %v4283_v31 = vrot.slane %v4282_v16, 1 }
 0x765   :  { %v4284_v30 = vadd.f32 %v4283_v31, %v4282_v16 }
 0x767   :  { %v4292_v18 = vmul.f32 %v4291_v27, %v4284_v30 }
 0x769   :  { %v4293_v11 = vsub.f32 %v4245_v63, %v4292_v18  ;;  %v4294_v8 = vsub.f32 %v4248_v59, %v4292_v18  ;;  %v4295_v48 = vsub.f32 %v4251_v26, %v4292_v18  ;;  %v10314_v13 = vsub.f32 %v4254_v2, %v4292_v18 }
 0x76a   :  { %v10316_v55 = vsub.f32 %v4257_v62, %v4292_v18  ;;  %v10318_v4 = vsub.f32 %v4260_v56, %v4292_v18  ;;  %v10322_v7 = vsub.f32 %v4263_v35, %v4292_v18  ;;  %v10326_v36 = vsub.f32 %v4266_v58, %v4292_v18  ;;  %v10341_v35 = vld [vmem:[%s13015_s7] ss:$0 sm:$0xff] }
 0x76b   :  { %v4302_v43 = vmul.f32 %v4293_v11, %v4293_v11  ;;  %v4303_v50 = vmul.f32 %v4294_v8, %v4294_v8  ;;  %v4304_v29 = vmul.f32 %v4295_v48, %v4295_v48  ;;  %v4305_v49 = vmul.f32 %v10314_v13, %v10314_v13 }
 0x76c   :  { %v4306_v54 = vmul.f32 %v10316_v55, %v10316_v55  ;;  %v4307_v61 = vmul.f32 %v10318_v4, %v10318_v4  ;;  %v10330_v10 = vsub.f32 %v4269_v21, %v4292_v18  ;;  %v4308_v37 = vmul.f32 %v10322_v7, %v10322_v7 }
 0x76d   :  { %v4311_v28 = vadd.f32 %v4303_v50, %v4302_v43  ;;  %v4309_v26 = vmul.f32 %v10326_v36, %v10326_v36  ;;  %v4557_v43 = vld [vmem:[#allocation4 + $0x41] sm:$0x1f] }
 0x76e   :  { %v4310_v57 = vmul.f32 %v10330_v10, %v10330_v10  ;;  %v4577_v50 = vld [vmem:[#allocation4 + $0x43] sm:$0x1f] }
 0x76f   :  { %v4312_v14 = vadd.f32 %v4311_v28, %v4304_v29 }
 0x771   :  { %v4313_v51 = vadd.f32 %v4312_v14, %v4305_v49 }
 0x773   :  { %v4314_v59 = vadd.f32 %v4313_v51, %v4306_v54 }
 0x775   :  { %v4315_v63 = vadd.f32 %v4314_v59, %v4307_v61  ;;  %v4703_v59 = vld [vmem:[#allocation4 + $0x7b] sm:$0x1f] }
 0x777   :  { %v4316_v33 = vadd.f32 %v4315_v63, %v4308_v37 }
 0x779   :  { %v4317_v40 = vadd.f32 %v4316_v33, %v4309_v26 }
 0x77b   :  { %v4318_v19 = vadd.f32 %v4317_v40, %v4310_v57 }
 0x77d   :  { %v4319_v2 = vrot.slane %v4318_v19, 4 }
 0x77f   :  { %v4320_v22 = vadd.f32 %v4319_v2, %v4318_v19 }
 0x781   :  { %v4321_v23 = vrot.slane %v4320_v22, 2 }
 0x783   :  { %v4322_v53 = vadd.f32 %v4321_v23, %v4320_v22 }
 0x785   :  { %v4323_v46 = vrot.slane %v4322_v53, 1 }
 0x787   :  { %v4324_v47 = vadd.f32 %v4323_v46, %v4322_v53 }
 0x789   :  { %v4325_v62 = vmul.f32 %v4324_v47, %v4291_v27 }
 0x78b   :  { %v4326_v60 = vadd.f32 1e-05, %v4325_v62 }
 0x78d   :  { %8010 = vrsqrt.f32 %v4326_v60  ;;  %vm4333_vm1 = vweird.f32 %v4326_v60 }
 0x793   :  { %v8011_v32 = vpop.eup %8010 }
 0x794   :  { %v4328_v6 = vmul.f32 %v8011_v32, %v4326_v60  ;;  %vm4334_vm5 = vweird.f32 %v8011_v32 }
 0x795   :  { %vm4335_vm4 = vmor %vm4333_vm1, %vm4334_vm5 }
 0x796   :  { %v4329_v56 = vmul.f32 %v8011_v32, %v4328_v6 }
 0x798   :  { %v4330_v34 = vmul.f32 0.5, %v4329_v56 }
 0x79a   :  { %v4331_v3 = vsub.f32 1.5, %v4330_v34 }
 0x79c   :  { %v4332_v42 = vmul.f32 %v8011_v32, %v4331_v3 }
 0x79e   :  { %v10343_v9 = vsel %vm4335_vm4, %v8011_v32, %v4332_v42 }
 0x79f   :  { %v4337_v24 = vmul.f32 %v10343_v9, %v4293_v11  ;;  %v4338_v58 = vmul.f32 %v10343_v9, %v4294_v8  ;;  %v4339_v21 = vmul.f32 %v10343_v9, %v4295_v48  ;;  %v4340_v27 = vmul.f32 %v10343_v9, %v10314_v13  ;;  %v4678_v11 = vld [vmem:[#allocation4 + $0x39] sm:$0x1f] }
 0x7a0   :  { %v4698_v8 = vld [vmem:[#allocation4 + $0x3b] sm:$0x1f]  ;;  %v4341_v48 = vmul.f32 %v10343_v9, %v10316_v55  ;;  %v7986_v13 = vpack.i.bf16 %v4557_v43, %v4577_v50  ;;  %v4342_v37 = vmul.f32 %v10343_v9, %v10318_v4  ;;  %v4343_v47 = vmul.f32 %v10343_v9, %v10322_v7 }
 0x7a1   :  { %v4350_v39 = vmul.f32 %v10341_v35, %v4337_v24  ;;  %v4351_v0 = vmul.f32 %v10341_v35, %v4338_v58  ;;  %v4352_v5 = vmul.f32 %v10341_v35, %v4339_v21  ;;  %v4353_v29 = vmul.f32 %v10341_v35, %v4340_v27  ;;  %v4683_v55 = vld [vmem:[#allocation4 + $0x79] sm:$0x1f] }
 0x7a2   :  { %v7981_v49 = vpack.i.bf16 %v4698_v8, %v4678_v11  ;;  %v4354_v14 = vmul.f32 %v10341_v35, %v4341_v48  ;;  %7987 = vrot.lane.b32.xlu0 %v7986_v13, %s8020_s2  ;;  %v7991_v19 = vpack.i.bf16 %v4703_v59, %v4683_v55  ;;  %v4355_v23 = vmul.f32 %v10341_v35, %v4342_v37 }
 0x7a3   :  { %v4363_v12 = vadd.f32 %v10350_v44, %v4350_v39  ;;  %v4364_v15 = vadd.f32 %v10350_v44, %v4351_v0  ;;  %v4365_v30 = vadd.f32 %v10350_v44, %v4352_v5  ;;  %v4366_v54 = vadd.f32 %v10350_v44, %v4353_v29 }
 0x7a4   :  { %7982 = vrot.lane.b32.xlu1 %v7981_v49, %s8020_s2  ;;  %v4367_v33 = vadd.f32 %v10350_v44, %v4354_v14  ;;  %v4368_v62 = vadd.f32 %v10350_v44, %v4355_v23  ;;  %v4356_v34 = vmul.f32 %v10341_v35, %v4343_v47  ;;  %v4344_v7 = vmul.f32 %v10343_v9, %v10326_v36 }
 0x7a5   :  { %vm4372_vm4 = vcmp.ge.f32.partialorder %v4363_v12, 0.0  ;;  %vm4373_vm5 = vcmp.ge.f32.partialorder %v4364_v15, 0.0  ;;  %v4381_v25 = vmul.f32 0.2, %v4363_v12  ;;  %v4382_v1 = vmul.f32 0.2, %v4364_v15 }
 0x7a6   :  { %v4383_v28 = vmul.f32 0.2, %v4365_v30  ;;  %vm4374_vm1 = vcmp.ge.f32.partialorder %v4365_v30, 0.0  ;;  %v4384_v2 = vmul.f32 0.2, %v4366_v54  ;;  %v4357_v17 = vmul.f32 %v10341_v35, %v4344_v7 }
 0x7a7   :  { %v4390_v41 = vsel %vm4372_vm4, %v4363_v12, %v4381_v25  ;;  %v4391_v38 = vsel %vm4373_vm5, %v4364_v15, %v4382_v1  ;;  %vm4375_vm4 = vcmp.ge.f32.partialorder %v4366_v54, 0.0  ;;  %v4385_v46 = vmul.f32 0.2, %v4367_v33 }
 0x7a8   :  { %4465 = vst [vmem:[#allocation1] ss:$4 sm:$0xff] %v4390_v41  ;;  %v4408_v20 = vrot.slane %v4390_v41, 2  ;;  %v4409_v16 = vrot.slane %v4390_v41, 4  ;;  %v4410_v31 = vrot.slane %v4390_v41, 6  ;;  %v4411_v18 = vrot.slane %v4391_v38, 2 }
 0x7a9   :  { %4474 = vst [vmem:[#allocation1 + $0x21] ss:$4 sm:$0xff] %v4391_v38  ;;  %v4392_v51 = vsel %vm4374_vm1, %v4365_v30, %v4383_v28  ;;  %v4412_v61 = vrot.slane %v4391_v38, 4  ;;  %v4413_v63 = vrot.slane %v4391_v38, 6  ;;  %vm4376_vm5 = vcmp.ge.f32.partialorder %v4367_v33, 0.0 }
 0x7aa   :  { %4467 = vst [vmem:[#allocation1 + $0x1] ss:$4 sm:$0xff] %v4408_v20  ;;  %v4414_v57 = vrot.slane %v4392_v51, 2  ;;  %v4415_v22 = vrot.slane %v4392_v51, 4  ;;  %v4416_v53 = vrot.slane %v4392_v51, 6  ;;  %v4393_v4 = vsel %vm4375_vm4, %v4366_v54, %v4384_v2 }
 0x7ab   :  { %4469 = vst [vmem:[#allocation1 + $0x2] ss:$4 sm:$0xff] %v4409_v16  ;;  %v4394_v60 = vsel %vm4376_vm5, %v4367_v33, %v4385_v46  ;;  %v4417_v32 = vrot.slane %v4393_v4, 2  ;;  %v4418_v56 = vrot.slane %v4393_v4, 4  ;;  %v4386_v3 = vmul.f32 0.2, %v4368_v62 }
 0x7ac   :  { %4472 = vst [vmem:[#allocation1 + $0x20] ss:$4 sm:$0xff] %v4410_v31  ;;  %7992 = vrot.lane.b32.xlu1 %v7991_v19, %s8020_s2  ;;  %v4419_v42 = vrot.slane %v4393_v4, 6  ;;  %v4420_v24 = vrot.slane %v4394_v60, 2  ;;  %vm4377_vm1 = vcmp.ge.f32.partialorder %v4368_v62, 0.0  ;;  %v4369_v15 = vadd.f32 %v10350_v44, %v4356_v34 }
 0x7ad   :  { %4476 = vst [vmem:[#allocation1 + $0x22] ss:$4 sm:$0xff] %v4411_v18  ;;  %v4395_v45 = vsel %vm4377_vm1, %v4368_v62, %v4386_v3  ;;  %v4421_v21 = vrot.slane %v4394_v60, 4  ;;  %v4422_v36 = vrot.slane %v4394_v60, 6  ;;  %v4345_v20 = vmul.f32 %v10343_v9, %v10330_v10 }
 0x7ae   :  { %v4387_v25 = vmul.f32 0.2, %v4369_v15  ;;  %v4423_v52 = vrot.slane %v4395_v45, 2  ;;  %v4370_v16 = vadd.f32 %v10350_v44, %v4357_v17  ;;  %v4424_v31 = vrot.slane %v4395_v45, 4 }
 0x7af   :  { %vm4378_vm4 = vcmp.ge.f32.partialorder %v4369_v15, 0.0  ;;  %v4425_v30 = vrot.slane %v4395_v45, 6  ;;  %v4358_v18 = vmul.f32 %v10341_v35, %v4345_v20 }
 0x7b0   :  { %v4388_v11 = vmul.f32 0.2, %v4370_v16  ;;  %v4396_v10 = vsel %vm4378_vm4, %v4369_v15, %v4387_v25  ;;  %vm4379_vm5 = vcmp.ge.f32.partialorder %v4370_v16, 0.0  ;;  %vm13027_vm4 = vcmask 1042433  }
 0x7b1   :  { %v4426_v8 = vrot.slane %v4396_v10, 2  ;;  %v4371_v50 = vadd.f32 %v10350_v44, %v4358_v18  ;;  %v4427_v28 = vrot.slane %v4396_v10, 4  ;;  %v4428_v35 = vrot.slane %v4396_v10, 6  ;;  %v5714_v18 = vld [vmem:[%s13017_s9 + $0x1f8] sm:$0xff] }
 0x7b2   :  { %v4470_v26 = vld.sshfl [vmem:[#allocation1] sm:$0xff pattern:$0x73625140]  ;;  %v4397_v29 = vsel %vm4379_vm5, %v4370_v16, %v4388_v11  ;;  %6062 = vmatpush.msra.mxu1 %v5714_v18  ;;  %vm5266_vm5 = vcmask 1046528  }
 0x7b3   :  { %4478 = vst [vmem:[#allocation1] ss:$4 sm:$0xff] %v4412_v61  ;;  %v4429_v14 = vrot.slane %v4397_v29, 2  ;;  %v4389_v54 = vmul.f32 0.2, %v4371_v50  ;;  %vm4380_vm1 = vcmp.ge.f32.partialorder %v4371_v50, 0.0 }
 0x7b4   :  { %v4477_v40 = vld.sshfl [vmem:[#allocation1 + $0x20] sm:$0xff pattern:$0x73625140]  ;;  %4479 = vst [vmem:[#allocation1 + $0x1] ss:$4 sm:$0xff] %v4413_v63  ;;  %v4430_v55 = vrot.slane %v4397_v29, 4 }
 0x7b5   :  { %4480 = vst [vmem:[#allocation1 + $0x2] ss:$4 sm:$0xff] %v4392_v51  ;;  %v4398_v61 = vsel %vm4380_vm1, %v4371_v50, %v4389_v54  ;;  %v4431_v37 = vrot.slane %v4397_v29, 6  ;;  %v5713_v50 = vld [vmem:[%s13017_s9 + $0x1f0] sm:$0xff]  ;;  %vm5268_vm1 = vcmask 1046533  }
 0x7b6   :  { %4482 = vst [vmem:[#allocation1 + $0x20] ss:$4 sm:$0xff] %v4414_v57  ;;  %v4433_v33 = vrot.slane %v4398_v61, 4  ;;  %6063 = vmatpush.msra.mxu1 %v5713_v50 }
 0x7b7   :  { %4483 = vst [vmem:[#allocation1 + $0x21] ss:$4 sm:$0xff] %v4415_v22 }
 0x7b8   :  { %4484 = vst [vmem:[#allocation1 + $0x22] ss:$4 sm:$0xff] %v4416_v53 }
 0x7b9   :  { %4530 = vst [vmem:[#allocation4 + $0x9] sm:$0x3f] %v4470_v26  ;;  %v4432_v26 = vrot.slane %v4398_v61, 2 }
 0x7ba   :  { %4531 = vst [vmem:[#allocation4 + $0x11] sm:$0x3f] %v4477_v40  ;;  %v4434_v40 = vrot.slane %v4398_v61, 6 }
 0x7bc   :  { %v4481_v6 = vld.sshfl [vmem:[#allocation1] sm:$0xff pattern:$0x73625140] }
 0x7bd   :  { %4486 = vst [vmem:[#allocation1] ss:$4 sm:$0xff] %v4393_v4 }
 0x7be   :  { %4487 = vst [vmem:[#allocation1 + $0x1] ss:$4 sm:$0xff] %v4417_v32 }
 0x7bf   :  { %v4485_v58 = vld.sshfl [vmem:[#allocation1 + $0x20] sm:$0xff pattern:$0x73625140]  ;;  %4488 = vst [vmem:[#allocation1 + $0x2] ss:$4 sm:$0xff] %v4418_v56 }
 0x7c0   :  { %4490 = vst [vmem:[#allocation1 + $0x20] ss:$4 sm:$0xff] %v4419_v42  ;;  %v4592_v39 = vld [vmem:[#allocation4 + $0x9] sm:$0x1f] }
 0x7c1   :  { %v4573_v0 = vld [vmem:[#allocation4 + $0xb] sm:$0x1f]  ;;  %4491 = vst [vmem:[#allocation1 + $0x21] ss:$4 sm:$0xff] %v4394_v60  ;;  %v4593_v12 = vld [vmem:[#allocation4 + $0x11] sm:$0x1f]  ;;  %4794 = vrot.lane.b32.xlu0 %v4592_v39, %s8020_s2 }
 0x7c2   :  { %4756 = vrot.lane.b32.xlu2 %v4573_v0, %s8020_s2  ;;  %4492 = vst [vmem:[#allocation1 + $0x22] ss:$4 sm:$0xff] %v4420_v24  ;;  %4796 = vrot.lane.b32.xlu1 %v4593_v12, %s8020_s2  ;;  %v4633_v5 = vld [vmem:[#allocation4 + $0x11] sm:$0x1f]  ;;  %v4612_v38 = vld [vmem:[#allocation4 + $0xb] sm:$0x1f] }
 0x7c3   :  { %4532 = vst [vmem:[#allocation4 + $0x19] sm:$0x3f] %v4481_v6  ;;  %v4613_v41 = vld [vmem:[#allocation4 + $0x13] sm:$0x1f]  ;;  %v4553_v44 = vld [vmem:[#allocation4 + $0x9] sm:$0x1f] }
 0x7c4   :  { %4533 = vst [vmem:[#allocation4 + $0x21] sm:$0x3f] %v4485_v58  ;;  %v4653_v9 = vld [vmem:[#allocation4 + $0x13] sm:$0x1f]  ;;  %v4563_v50 = vld [vmem:[#allocation4 + $0xa] sm:$0x1f] }
 0x7c5   :  { %v4554_v43 = vld [vmem:[#allocation4 + $0x11] sm:$0x1f] }
 0x7c6   :  { %v4489_v1 = vld.sshfl [vmem:[#allocation1] sm:$0xff pattern:$0x73625140]  ;;  %v4574_v49 = vld [vmem:[#allocation4 + $0x13] sm:$0x1f] }
 0x7c7   :  { %4494 = vst [vmem:[#allocation1] ss:$4 sm:$0xff] %v4421_v21 }
 0x7c8   :  { %4495 = vst [vmem:[#allocation1 + $0x1] ss:$4 sm:$0xff] %v4422_v36 }
 0x7c9   :  { %v4493_v27 = vld.sshfl [vmem:[#allocation1 + $0x20] sm:$0xff pattern:$0x73625140]  ;;  %4496 = vst [vmem:[#allocation1 + $0x2] ss:$4 sm:$0xff] %v4395_v45  ;;  %4836 = vrot.lane.b32.xlu0 %v4613_v41, %s8020_s2 }
 0x7ca   :  { %4834 = vrot.lane.b32.xlu2 %v4612_v38, %s8020_s2  ;;  %4498 = vst [vmem:[#allocation1 + $0x20] ss:$4 sm:$0xff] %v4423_v52  ;;  %4874 = vrot.lane.b32.xlu1 %v4633_v5, %s8020_s2  ;;  %v4634_v51 = vld [vmem:[#allocation4 + $0x19] sm:$0x1f] }
 0x7cb   :  { %4499 = vst [vmem:[#allocation1 + $0x21] ss:$4 sm:$0xff] %v4424_v31  ;;  %v4654_v59 = vld [vmem:[#allocation4 + $0x1b] sm:$0x1f]  ;;  %v4675_v19 = vld [vmem:[#allocation4 + $0x21] sm:$0x1f] }
 0x7cc   :  { %4500 = vst [vmem:[#allocation1 + $0x22] ss:$4 sm:$0xff] %v4425_v30  ;;  %v4674_v2 = vld [vmem:[#allocation4 + $0x19] sm:$0x1f]  ;;  %v4695_v46 = vld [vmem:[#allocation4 + $0x23] sm:$0x1f] }
 0x7cd   :  { %4534 = vst [vmem:[#allocation4 + $0x29] sm:$0x3f] %v4489_v1  ;;  %v4694_v22 = vld [vmem:[#allocation4 + $0x1b] sm:$0x1f]  ;;  %v4635_v47 = vld [vmem:[#allocation4 + $0x21] sm:$0x1f] }
 0x7ce   :  { %4535 = vst [vmem:[#allocation4 + $0x31] sm:$0x3f] %v4493_v27  ;;  %v4614_v4 = vld [vmem:[#allocation4 + $0x1b] sm:$0x1f]  ;;  %v4595_v32 = vld [vmem:[#allocation4 + $0x21] sm:$0x1f] }
 0x7cf   :  { %v4594_v62 = vld [vmem:[#allocation4 + $0x19] sm:$0x1f]  ;;  %v4655_v6 = vld [vmem:[#allocation4 + $0x23] sm:$0x1f]  ;;  %v5666_v27 = vld [vmem:[%s13017_s9 + $0x78] sm:$0xff] }
 0x7d0   :  { %v4497_v48 = vld.sshfl [vmem:[#allocation1] sm:$0xff pattern:$0x73625140]  ;;  %v4615_v3 = vld [vmem:[#allocation4 + $0x23] sm:$0x1f]  ;;  %v5682_v30 = vld [vmem:[%s13017_s9 + $0xf8] sm:$0xff]  ;;  %5948 = vmatpush.msrb.mxu0 %v5666_v27 }
 0x7d1   :  { %4502 = vst [vmem:[#allocation1] ss:$4 sm:$0xff] %v4396_v10  ;;  %4914 = vrot.lane.b32.xlu0 %v4653_v9, %s8020_s2  ;;  %v4575_v60 = vld [vmem:[#allocation4 + $0x1b] sm:$0x1f]  ;;  %v4576_v58 = vld [vmem:[#allocation4 + $0x23] sm:$0x1f]  ;;  %v10420_v21 = vpop.permute.xlu1 %7977  ;;  %5986 = vmatpush.msra.mxu3 %v5682_v30 }
 0x7d2   :  { %4718 = vrot.lane.b32.xlu2 %v4554_v43, %s8020_s2  ;;  %4503 = vst [vmem:[#allocation1 + $0x1] ss:$4 sm:$0xff] %v4426_v8  ;;  %4758 = vrot.lane.b32.xlu1 %v4574_v49, %s8020_s2  ;;  %v4555_v34 = vld [vmem:[#allocation4 + $0x19] sm:$0x1f]  ;;  %v4556_v7 = vld [vmem:[#allocation4 + $0x21] sm:$0x1f] }
 0x7d3   :  { %v4501_v13 = vld.sshfl [vmem:[#allocation1 + $0x20] sm:$0xff pattern:$0x73625140]  ;;  %4504 = vst [vmem:[#allocation1 + $0x2] ss:$4 sm:$0xff] %v4427_v28  ;;  %v5730_v10 = vld [vmem:[%s13017_s9 + $0x278] sm:$0xff] }
 0x7d4   :  { %4506 = vst [vmem:[#allocation1 + $0x20] ss:$4 sm:$0xff] %v4428_v35  ;;  %v4676_v56 = vld [vmem:[#allocation4 + $0x29] sm:$0x1f]  ;;  %6100 = vmatpush.msra.mxu2 %v5730_v10  ;;  %v5664_v28 = vld [vmem:[%s13017_s9 + $0x68] sm:$0xff] }
 0x7d5   :  { %4507 = vst [vmem:[#allocation1 + $0x21] ss:$4 sm:$0xff] %v4397_v29  ;;  %v4636_v42 = vld [vmem:[#allocation4 + $0x29] sm:$0x1f]  ;;  %v4697_v39 = vld [vmem:[#allocation4 + $0x33] sm:$0x1f] }
 0x7d6   :  { %4508 = vst [vmem:[#allocation1 + $0x22] ss:$4 sm:$0xff] %v4429_v14  ;;  %v4696_v24 = vld [vmem:[#allocation4 + $0x2b] sm:$0x1f]  ;;  %v4677_v45 = vld [vmem:[#allocation4 + $0x31] sm:$0x1f] }
 0x7d7   :  { %4536 = vst [vmem:[#allocation4 + $0x49] sm:$0x3f] %v4497_v48  ;;  %v4656_v0 = vld [vmem:[#allocation4 + $0x2b] sm:$0x1f]  ;;  %v4657_v17 = vld [vmem:[#allocation4 + $0x33] sm:$0x1f] }
 0x7d8   :  { %4537 = vst [vmem:[#allocation4 + $0x51] sm:$0x3f] %v4501_v13  ;;  %v4596_v12 = vld [vmem:[#allocation4 + $0x29] sm:$0x1f]  ;;  %v4637_v1 = vld [vmem:[#allocation4 + $0x31] sm:$0x1f] }
 0x7d9   :  { %4716 = vrot.lane.b32.xlu0 %v4553_v44, %s8020_s2  ;;  %v4616_v15 = vld [vmem:[#allocation4 + $0x2b] sm:$0x1f]  ;;  %v5680_v49 = vld [vmem:[%s13017_s9 + $0xe8] sm:$0xff]  ;;  %v5663_v14 = vld [vmem:[%s13017_s9 + $0x60] sm:$0xff] }
 0x7da   :  { %4876 = vrot.lane.b32.xlu2 %v4634_v51, %s8020_s2  ;;  %v4505_v63 = vld.sshfl [vmem:[#allocation1] sm:$0xff pattern:$0x73625140]  ;;  %4916 = vrot.lane.b32.xlu1 %v4654_v59, %s8020_s2  ;;  %v5665_v9 = vld [vmem:[%s13017_s9 + $0x70] sm:$0xff]  ;;  %v5712_v35 = vld [vmem:[%s13017_s9 + $0x1e8] sm:$0xff] }
 0x7db   :  { %4510 = vst [vmem:[#allocation1] ss:$4 sm:$0xff] %v4430_v55  ;;  %v5681_v43 = vld [vmem:[%s13017_s9 + $0xf0] sm:$0xff]  ;;  %5949 = vmatpush.msrb.mxu0 %v5665_v9  ;;  %v5728_v13 = vld [vmem:[%s13017_s9 + $0x268] sm:$0xff]  ;;  %6064 = vmatpush.msra.mxu1 %v5712_v35  ;;  %v5679_v44 = vld [vmem:[%s13017_s9 + $0xe0] sm:$0xff] }
 0x7dc   :  { %4511 = vst [vmem:[#allocation1 + $0x1] ss:$4 sm:$0xff] %v4431_v37  ;;  %v5729_v29 = vld [vmem:[%s13017_s9 + $0x270] sm:$0xff]  ;;  %5987 = vmatpush.msra.mxu3 %v5681_v43  ;;  %v5711_v51 = vld [vmem:[%s13017_s9 + $0x1e0] sm:$0xff] }
 0x7dd   :  { %v4509_v57 = vld.sshfl [vmem:[#allocation1 + $0x20] sm:$0xff pattern:$0x73625140]  ;;  %4512 = vst [vmem:[#allocation1 + $0x2] ss:$4 sm:$0xff] %v4398_v61  ;;  %6101 = vmatpush.msra.mxu2 %v5729_v29  ;;  %5950 = vmatpush.msrb.mxu0 %v5664_v28 }
 0x7de   :  { %4514 = vst [vmem:[#allocation1 + $0x20] ss:$4 sm:$0xff] %v4432_v26  ;;  %v4578_v25 = vld [vmem:[#allocation4 + $0x4b] sm:$0x1f]  ;;  %5988 = vmatpush.msra.mxu3 %v5680_v49  ;;  %v5727_v59 = vld [vmem:[%s13017_s9 + $0x260] sm:$0xff]  ;;  %6065 = vmatpush.msra.mxu1 %v5711_v51  ;;  %v5662_v26 = vld [vmem:[%s13017_s9 + $0x58] sm:$0xff] }
 0x7df   :  { %4515 = vst [vmem:[#allocation1 + $0x21] ss:$4 sm:$0xff] %v4433_v33  ;;  %v4598_v52 = vld [vmem:[#allocation4 + $0x51] sm:$0x1f]  ;;  %v4617_v5 = vld [vmem:[#allocation4 + $0x4b] sm:$0x1f]  ;;  %6102 = vmatpush.msra.mxu2 %v5728_v13  ;;  %5951 = vmatpush.msrb.mxu0 %v5663_v14 }
 0x7e0   :  { %4516 = vst [vmem:[#allocation1 + $0x22] ss:$4 sm:$0xff] %v4434_v40  ;;  %v4638_v20 = vld [vmem:[#allocation4 + $0x51] sm:$0x1f]  ;;  %v4597_v16 = vld [vmem:[#allocation4 + $0x49] sm:$0x1f]  ;;  %5989 = vmatpush.msra.mxu3 %v5679_v44 }
 0x7e1   :  { %4538 = vst [vmem:[#allocation4 + $0x59] sm:$0x3f] %v4505_v63  ;;  %4956 = vrot.lane.b32.xlu0 %v4675_v19, %s8020_s2  ;;  %v4559_v31 = vld [vmem:[#allocation4 + $0x51] sm:$0x1f]  ;;  %6103 = vmatpush.msra.mxu2 %v5727_v59  ;;  %v4602_v27 = vld [vmem:[#allocation4 + $0xa] sm:$0x1f] }
 0x7e2   :  { %4954 = vrot.lane.b32.xlu2 %v4674_v2, %s8020_s2  ;;  %4539 = vst [vmem:[#allocation4 + $0x61] sm:$0x3f] %v4509_v57  ;;  %4994 = vrot.lane.b32.xlu1 %v4694_v22, %s8020_s2  ;;  %v4579_v54 = vld [vmem:[#allocation4 + $0x53] sm:$0x1f]  ;;  %v5661_v2 = vld [vmem:[%s13017_s9 + $0x50] sm:$0xff] }
 0x7e3   :  { %v4618_v61 = vld [vmem:[#allocation4 + $0x53] sm:$0x1f]  ;;  %5952 = vmatpush.msrb.mxu0 %v5662_v26  ;;  %v5677_v22 = vld [vmem:[%s13017_s9 + $0xd0] sm:$0xff]  ;;  %v4624_v59 = vld [vmem:[#allocation4 + $0x18] sm:$0x1f] }
 0x7e4   :  { %v4513_v23 = vld.sshfl [vmem:[#allocation1] sm:$0xff pattern:$0x73625140]  ;;  %v5678_v33 = vld [vmem:[%s13017_s9 + $0xd8] sm:$0xff]  ;;  %v4543_v26 = vld [vmem:[#allocation4 + $0x8] sm:$0x1f] }
 0x7e5   :  { %4540 = vst [vmem:[#allocation4 + $0x69] sm:$0x3f] %v4513_v23  ;;  %v5710_v57 = vld [vmem:[%s13017_s9 + $0x1d8] sm:$0xff]  ;;  %5990 = vmatpush.msra.mxu3 %v5678_v33  ;;  %v5709_v23 = vld [vmem:[%s13017_s9 + $0x1d0] sm:$0xff]  ;;  %5953 = vmatpush.msrb.mxu0 %v5661_v2 }
 0x7e6   :  { %v5726_v19 = vld [vmem:[%s13017_s9 + $0x258] sm:$0xff]  ;;  %6066 = vmatpush.msra.mxu1 %v5710_v57 }
 0x7e7   :  { %v4517_v53 = vld.sshfl [vmem:[#allocation1 + $0x20] sm:$0xff pattern:$0x73625140]  ;;  %6104 = vmatpush.msra.mxu2 %v5726_v19  ;;  %5991 = vmatpush.msra.mxu3 %v5677_v22  ;;  %v4603_v14 = vld [vmem:[#allocation4 + $0x12] sm:$0x1f] }
 0x7e8   :  { %4541 = vst [vmem:[#allocation4 + $0x71] sm:$0x3f] %v4517_v53  ;;  %v4639_v55 = vld [vmem:[#allocation4 + $0x59] sm:$0x1f]  ;;  %v5725_v53 = vld [vmem:[%s13017_s9 + $0x250] sm:$0xff]  ;;  %6067 = vmatpush.msra.mxu1 %v5709_v23 }
 0x7e9   :  { %4838 = vrot.lane.b32.xlu0 %v4614_v4, %s8020_s2  ;;  %v4659_v4 = vld [vmem:[#allocation4 + $0x5b] sm:$0x1f]  ;;  %6105 = vmatpush.msra.mxu2 %v5725_v53  ;;  %v4640_v43 = vld [vmem:[#allocation4 + $0x61] sm:$0x1f]  ;;  %v5658_v53 = vld [vmem:[%s13017_s9 + $0x38] sm:$0xff] }
 0x7ea   :  { %4996 = vrot.lane.b32.xlu2 %v4695_v46, %s8020_s2  ;;  %4878 = vrot.lane.b32.xlu1 %v4635_v47, %s8020_s2  ;;  %v4658_v46 = vld [vmem:[#allocation4 + $0x53] sm:$0x1f]  ;;  %v5660_v47 = vld [vmem:[%s13017_s9 + $0x48] sm:$0xff]  ;;  %v4599_v29 = vld [vmem:[#allocation4 + $0x59] sm:$0x1f] }
 0x7eb   :  { %5954 = vmatpush.msrb.mxu0 %v5660_v47  ;;  %v4664_v23 = vld [vmem:[#allocation4 + $0x18] sm:$0x1f] }
 0x7f1   :  { %4760 = vrot.lane.b32.xlu0 %v4575_v60, %s8020_s2  ;;  %v4679_v60 = vld [vmem:[#allocation4 + $0x59] sm:$0x1f] }
 0x7f2   :  { %4798 = vrot.lane.b32.xlu2 %v4594_v62, %s8020_s2  ;;  %4800 = vrot.lane.b32.xlu1 %v4595_v32, %s8020_s2  ;;  %v5676_v62 = vld [vmem:[%s13017_s9 + $0xc8] sm:$0xff] }
 0x7f3   :  { %v5708_v32 = vld [vmem:[%s13017_s9 + $0x1c8] sm:$0xff]  ;;  %5992 = vmatpush.msra.mxu3 %v5676_v62 }
 0x7f4   :  { %6068 = vmatpush.msra.mxu1 %v5708_v32 }
 0x7f9   :  { %4958 = vrot.lane.b32.xlu0 %v4676_v56, %s8020_s2  ;;  %v5659_v56 = vld [vmem:[%s13017_s9 + $0x40] sm:$0xff] }
 0x7fa   :  { %4918 = vrot.lane.b32.xlu2 %v4655_v6, %s8020_s2  ;;  %4720 = vrot.lane.b32.xlu1 %v4555_v34, %s8020_s2  ;;  %v5724_v6 = vld [vmem:[%s13017_s9 + $0x248] sm:$0xff]  ;;  %v5675_v34 = vld [vmem:[%s13017_s9 + $0xc0] sm:$0xff] }
 0x7fb   :  { %6106 = vmatpush.msra.mxu2 %v5724_v6  ;;  %5955 = vmatpush.msrb.mxu0 %v5659_v56  ;;  %v4623_v6 = vld [vmem:[#allocation4 + $0x10] sm:$0x1f] }
 0x7fc   :  { %5993 = vmatpush.msra.mxu3 %v5675_v34  ;;  %v4643_v34 = vld [vmem:[#allocation4 + $0x12] sm:$0x1f] }
 0x7fd   :  { %5956 = vmatpush.msrb.mxu0 %v5658_v53 }
 0x801   :  { %4880 = vrot.lane.b32.xlu0 %v4636_v42, %s8020_s2 }
 0x802   :  { %4840 = vrot.lane.b32.xlu2 %v4615_v3, %s8020_s2  ;;  %4998 = vrot.lane.b32.xlu1 %v4696_v24, %s8020_s2  ;;  %v5707_v24 = vld [vmem:[%s13017_s9 + $0x1c0] sm:$0xff] }
 0x803   :  { %6069 = vmatpush.msra.mxu1 %v5707_v24  ;;  %v5657_v24 = vld [vmem:[%s13017_s9 + $0x30] sm:$0xff] }
 0x804   :  { %5957 = vmatpush.msrb.mxu0 %v5657_v24 }
 0x809   :  { %5000 = vrot.lane.b32.xlu0 %v4697_v39, %s8020_s2 }
 0x80a   :  { %4762 = vrot.lane.b32.xlu2 %v4576_v58, %s8020_s2  ;;  %4920 = vrot.lane.b32.xlu1 %v4656_v0, %s8020_s2  ;;  %v5723_v58 = vld [vmem:[%s13017_s9 + $0x240] sm:$0xff]  ;;  %v7979_v0 = vunpack.i.l.bf16 %v10420_v21 }
 0x80b   :  { %6107 = vmatpush.msra.mxu2 %v5723_v58  ;;  %v5673_v58 = vld [vmem:[%s13017_s9 + $0xb0] sm:$0xff] }
 0x811   :  { %4802 = vrot.lane.b32.xlu0 %v4596_v12, %s8020_s2  ;;  %v4562_v12 = vld [vmem:[#allocation4 + $0x2] sm:$0x1f] }
 0x812   :  { %4722 = vrot.lane.b32.xlu2 %v4556_v7, %s8020_s2  ;;  %4842 = vrot.lane.b32.xlu1 %v4616_v15, %s8020_s2  ;;  %v4699_v7 = vld [vmem:[#allocation4 + $0x5b] sm:$0x1f]  ;;  %v4558_v15 = vld [vmem:[#allocation4 + $0x49] sm:$0x1f] }
 0x814   :  { %v10454_v8 = vpop.permute.xlu0 %7987 }
 0x816   :  { %v10430_v41 = vpop.permute.xlu1 %7982 }
 0x819   :  { %4922 = vrot.lane.b32.xlu0 %v4657_v17, %s8020_s2 }
 0x81a   :  { %4960 = vrot.lane.b32.xlu2 %v4677_v45, %s8020_s2  ;;  %4766 = vrot.lane.b32.xlu1 %v4578_v25, %s8020_s2  ;;  %v4700_v45 = vld [vmem:[#allocation4 + $0x63] sm:$0x1f] }
 0x81c   :  { %v10425_v36 = vpop.permute.xlu2 %4756 }
 0x81d   :  { %v5035_v28 = vsel %vm13028_vm3, %v4563_v50, %v10425_v36  ;;  %v5672_v50 = vld [vmem:[%s13017_s9 + $0xa8] sm:$0xff] }
 0x81e   :  { %v10446_v11 = vpop.permute.xlu1 %7992  ;;  %v10590_v57 = vrot.slane %v5035_v28, 7 }
 0x821   :  { %4806 = vrot.lane.b32.xlu0 %v4598_v52, %s8020_s2  ;;  %v5034_v52 = vsel %vm13028_vm3, %v4562_v12, %v7979_v0 }
 0x822   :  { %4882 = vrot.lane.b32.xlu2 %v4637_v1, %s8020_s2  ;;  %4844 = vrot.lane.b32.xlu1 %v4617_v5, %s8020_s2  ;;  %v7980_v1 = vunpack.i.h.bf16 %v10420_v21  ;;  %v4582_v5 = vld [vmem:[#allocation4 + $0x8] sm:$0x1f]  ;;  %v5184_v30 = vrot.slane %v5034_v52, 7  ;;  %v4680_v21 = vld [vmem:[#allocation4 + $0x61] sm:$0x1f] }
 0x823   :  { %v5705_v52 = vld [vmem:[%s13017_s9 + $0x1b0] sm:$0xff] }
 0x824   :  { %v10432_v38 = vpop.permute.xlu2 %4834 }
 0x825   :  { %v5054_v18 = vsel %vm13028_vm3, %v4602_v27, %v10432_v38 }
 0x826   :  { %v5186_v49 = vrot.slane %v5054_v18, 5  ;;  %v5656_v18 = vld [vmem:[%s13017_s9 + $0x28] sm:$0xff] }
 0x827   :  { %5958 = vmatpush.msrb.mxu0 %v5656_v18 }
 0x829   :  { %4884 = vrot.lane.b32.xlu0 %v4638_v20, %s8020_s2 }
 0x82a   :  { %4804 = vrot.lane.b32.xlu2 %v4597_v16, %s8020_s2  ;;  %4728 = vrot.lane.b32.xlu1 %v4559_v31, %s8020_s2  ;;  %v4542_v16 = vld [vmem:[#allocation4] sm:$0x1f] }
 0x82b   :  { %v5024_v10 = vsel %vm13028_vm3, %v4542_v16, %v7980_v1  ;;  %v4581_v1 = vld [vmem:[#allocation4 + $0x63] sm:$0x1f] }
 0x82c   :  { %v10456_v48 = vpop.permute.xlu2 %4718  ;;  %v5254_v35 = vsel %vm13033_vm7, %v5024_v10, %v5184_v30  ;;  %v5261_v38 = vsel %vm13026_vm8, %v5024_v10, %v5184_v30  ;;  %v5273_v13 = vsel %vm1843_vm9, %v5024_v10, %v5184_v30  ;;  %v10583_v51 = vsel %vm13025_vm10, %v5024_v10, %v5184_v30 }
 0x82d   :  { %v10586_v36 = vsel %vm1849_vm11, %v5024_v10, %v5184_v30  ;;  %v5721_v30 = vld [vmem:[%s13017_s9 + $0x230] sm:$0xff] }
 0x831   :  { %4768 = vrot.lane.b32.xlu0 %v4579_v54, %s8020_s2 }
 0x832   :  { %4846 = vrot.lane.b32.xlu2 %v4618_v61, %s8020_s2  ;;  %4886 = vrot.lane.b32.xlu1 %v4639_v55, %s8020_s2  ;;  %v4583_v61 = vld [vmem:[#allocation4 + $0x10] sm:$0x1f] }
 0x833   :  { %v10494_v37 = vpop.permute.xlu0 %4794 }
 0x834   :  { %v10496_v63 = vpop.permute.xlu2 %4876  ;;  %v10507_v40 = vpop.permute.xlu1 %4796  ;;  %v5044_v31 = vsel %vm13028_vm3, %v4582_v5, %v10494_v37 }
 0x835   :  { %v5185_v9 = vrot.slane %v5044_v31, 6  ;;  %v5065_v22 = vsel %vm13028_vm3, %v4624_v59, %v10496_v63  ;;  %v5045_v47 = vsel %vm13028_vm3, %v4583_v61, %v10507_v40  ;;  %v4644_v63 = vld [vmem:[#allocation4 + $0x1a] sm:$0x1f] }
 0x836   :  { %v10634_v12 = vrot.slane %v5065_v22, 4  ;;  %v10641_v5 = vrot.slane %v5045_v47, 6 }
 0x837   :  { %v5255_v55 = vsel %vm1843_vm9, %v5185_v9, %v5186_v49  ;;  %v5262_v19 = vsel %vm13025_vm10, %v5185_v9, %v5186_v49  ;;  %v5274_v2 = vsel %vm1849_vm11, %v5185_v9, %v5186_v49  ;;  %v10608_v62 = vsel %vm1852_vm13, %v5185_v9, %v5186_v49 }
 0x838   :  { %v10614_v32 = vsel %vm2339_vm0, %v5254_v35, %v5255_v55  ;;  %v10629_v0 = vsel %vm13027_vm4, %v5261_v38, %v5262_v19  ;;  %v10644_v16 = vsel %vm1855_vm14, %v5185_v9, %v5186_v49  ;;  %v4665_v35 = vld [vmem:[#allocation4 + $0x20] sm:$0x1f]  ;;  %v5671_v19 = vld [vmem:[%s13017_s9 + $0xa0] sm:$0xff] }
 0x839   :  { %4926 = vrot.lane.b32.xlu0 %v4659_v4, %s8020_s2  ;;  %v5706_v4 = vld [vmem:[%s13017_s9 + $0x1b8] sm:$0xff] }
 0x83a   :  { %4924 = vrot.lane.b32.xlu2 %v4658_v46, %s8020_s2  ;;  %4964 = vrot.lane.b32.xlu1 %v4679_v60, %s8020_s2  ;;  %v5674_v46 = vld [vmem:[%s13017_s9 + $0xb8] sm:$0xff] }
 0x83b   :  { %v4837_v3 = vpop.permute.xlu0 %4836  ;;  %v5722_v60 = vld [vmem:[%s13017_s9 + $0x238] sm:$0xff]  ;;  %5994 = vmatpush.msra.mxu3 %v5674_v46  ;;  %6070 = vmatpush.msra.mxu1 %v5706_v4  ;;  %v5703_v46 = vld [vmem:[%s13017_s9 + $0x1a0] sm:$0xff] }
 0x83c   :  { %v10545_v42 = vpop.permute.xlu2 %4954  ;;  %v10553_v39 = vpop.permute.xlu1 %4874  ;;  %v5055_v37 = vsel %vm13028_vm3, %v4603_v14, %v4837_v3  ;;  %6108 = vmatpush.msra.mxu2 %v5722_v60  ;;  %v5720_v14 = vld [vmem:[%s13017_s9 + $0x228] sm:$0xff] }
 0x83d   :  { %v10616_v56 = vrot.slane %v5055_v37, 5  ;;  %5995 = vmatpush.msra.mxu3 %v5673_v58  ;;  %v5064_v10 = vsel %vm13028_vm3, %v4623_v6, %v10553_v39  ;;  %v5704_v39 = vld [vmem:[%s13017_s9 + $0x1a8] sm:$0xff]  ;;  %6071 = vmatpush.msra.mxu1 %v5705_v52  ;;  %v5719_v58 = vld [vmem:[%s13017_s9 + $0x220] sm:$0xff] }
 0x83e   :  { %6109 = vmatpush.msra.mxu2 %v5721_v30  ;;  %v5187_v4 = vrot.slane %v5064_v10, 4  ;;  %v4600_v10 = vld [vmem:[#allocation4 + $0x61] sm:$0x1f] }
 0x83f   :  { %v5308_v28 = vsel %vm13025_vm10, %v10641_v5, %v10616_v56  ;;  %v5316_v49 = vsel %vm1849_vm11, %v10641_v5, %v10616_v56  ;;  %vm13032_vm10 = vcmask 1044483   ;;  %5996 = vmatpush.msra.mxu3 %v5672_v50  ;;  %6072 = vmatpush.msra.mxu1 %v5704_v39 }
 0x840   :  { %6110 = vmatpush.msra.mxu2 %v5720_v14 }
 0x841   :  { %5004 = vrot.lane.b32.xlu0 %v4699_v7, %s8020_s2  ;;  %v10632_v7 = vsel %vm13029_vm6, %v5273_v13, %v5274_v2  ;;  %5997 = vmatpush.msra.mxu3 %v5671_v19 }
 0x842   :  { %4726 = vrot.lane.b32.xlu2 %v4558_v15, %s8020_s2  ;;  %5006 = vrot.lane.b32.xlu1 %v4700_v45, %s8020_s2  ;;  %v5084_v15 = vsel %vm13028_vm3, %v4664_v23, %v10545_v42  ;;  %v4685_v45 = vld [vmem:[#allocation4 + $0x22] sm:$0x1f]  ;;  %v4619_v42 = vld [vmem:[#allocation4 + $0x5b] sm:$0x1f] }
 0x843   :  { %v10559_v17 = vpop.permute.xlu0 %4914  ;;  %6073 = vmatpush.msra.mxu1 %v5703_v46  ;;  %6111 = vmatpush.msra.mxu2 %v5719_v58  ;;  %v5294_v58 = vsel %vm3780_vm12, %v10586_v36, %v10644_v16  ;;  %v4688_v16 = vld [vmem:[#allocation4 + $0x3a] sm:$0x1f] }
 0x844   :  { %v10561_v25 = vpop.permute.xlu2 %4996  ;;  %v10565_v20 = vpop.permute.xlu1 %4758  ;;  %v5074_v31 = vsel %vm13028_vm3, %v4643_v34, %v10559_v17 }
 0x845   :  { %v5095_v27 = vsel %vm13028_vm3, %v4685_v45, %v10561_v25  ;;  %v5188_v61 = vrot.slane %v5074_v31, 3  ;;  %v4620_v31 = vld [vmem:[#allocation4 + $0x63] sm:$0x1f] }
 0x846   :  { %v10694_v55 = vrot.slane %v5095_v27, 1 }
 0x847   :  { %v5257_v27 = vsel %vm1849_vm11, %v5187_v4, %v5188_v61 }
 0x849   :  { %4888 = vrot.lane.b32.xlu0 %v4640_v43, %s8020_s2  ;;  %v4660_v43 = vld [vmem:[#allocation4 + $0x63] sm:$0x1f] }
 0x84a   :  { %4966 = vrot.lane.b32.xlu2 %v4680_v21, %s8020_s2  ;;  %4808 = vrot.lane.b32.xlu1 %v4599_v29, %s8020_s2  ;;  %v10674_v21 = vrot.slane %v5084_v15, 2  ;;  %v5301_v29 = vsel %vm1843_vm9, %v10641_v5, %v10616_v56 }
 0x84b   :  { %v4717_v54 = vpop.permute.xlu0 %4716 }
 0x84c   :  { %v10580_v44 = vpop.permute.xlu2 %4798  ;;  %v4917_v33 = vpop.permute.xlu1 %4916  ;;  %v10619_v40 = vsel %vm13028_vm3, %v4543_v26, %v4717_v54  ;;  %v5655_v54 = vld [vmem:[%s13017_s9 + $0x20] sm:$0xff] }
 0x84d   :  { %v5075_v3 = vsel %vm13028_vm3, %v4644_v63, %v4917_v33  ;;  %v5300_v17 = vsel %vm13033_vm7, %v10619_v40, %v10590_v57  ;;  %v5307_v25 = vsel %vm13026_vm8, %v10619_v40, %v10590_v57  ;;  %v5315_v59 = vsel %vm1843_vm9, %v10619_v40, %v10590_v57  ;;  %v4684_v26 = vld [vmem:[#allocation4 + $0x1a] sm:$0x1f]  ;;  %5959 = vmatpush.msrb.mxu0 %v5655_v54 }
 0x84e   :  { %v10665_v9 = vrot.slane %v5075_v3, 3  ;;  %vm5287_vm8 = vcmask 1046529   ;;  %v5302_v2 = vsel %vm2339_vm0, %v5300_v17, %v5301_v29  ;;  %v5309_v22 = vsel %vm13027_vm4, %v5307_v25, %v5308_v28  ;;  %v4580_v17 = vld [vmem:[#allocation4 + $0x5b] sm:$0x1f]  ;;  %v5654_v29 = vld [vmem:[%s13017_s9 + $0x18] sm:$0xff] }
 0x84f   :  { %v5317_v15 = vsel %vm13029_vm6, %v5315_v59, %v5316_v49  ;;  %vm13035_vm4 = vcmask 1043456   ;;  %v5265_v25 = vsel %vm1852_vm13, %v5187_v4, %v5188_v61  ;;  %v5285_v28 = vsel %vm5266_vm5, %v5188_v61, %v5187_v4  ;;  %v5670_v59 = vld [vmem:[%s13017_s9 + $0x98] sm:$0xff]  ;;  %5960 = vmatpush.msrb.mxu0 %v5654_v29 }
 0x850   :  { %v5303_v47 = vsel %vm1849_vm11, %v10634_v12, %v10665_v9  ;;  %v5310_v63 = vsel %vm1852_vm13, %v10634_v12, %v10665_v9  ;;  %v5318_v60 = vsel %vm1855_vm14, %v10634_v12, %v10665_v9  ;;  %vm13037_vm6 = vcmask 1045506   ;;  %5998 = vmatpush.msra.mxu3 %v5670_v59  ;;  %v4621_v59 = vld [vmem:[#allocation4 + $0x6b] sm:$0x1f] }
 0x851   :  { %4772 = vrot.lane.b32.xlu0 %v4581_v1, %s8020_s2  ;;  %v5326_v29 = vsel %vm5266_vm5, %v10665_v9, %v10634_v12 }
 0x852   :  { %4848 = vrot.lane.b32.xlu2 %v4619_v42, %s8020_s2  ;;  %4928 = vrot.lane.b32.xlu1 %v4660_v43, %s8020_s2  ;;  %v5276_v43 = vsel %vm1855_vm14, %v5187_v4, %v5188_v61 }
 0x853   :  { %v4957_v38 = vpop.permute.xlu0 %4956 }
 0x854   :  { %v10686_v13 = vpop.permute.xlu2 %4918  ;;  %v5085_v37 = vsel %vm13028_vm3, %v4665_v35, %v4957_v38  ;;  %v4995_v33 = vpop.permute.xlu1 %4994 }
 0x855   :  { %v10705_v23 = vrot.slane %v5085_v37, 2  ;;  %v5094_v53 = vsel %vm13028_vm3, %v4684_v26, %v4995_v33  ;;  %vm13036_vm3 = vcmask 1045506   ;;  %v5702_v37 = vld [vmem:[%s13017_s9 + $0x198] sm:$0xff]  ;;  %v5295_v26 = vsel %vm13033_vm7, %v5187_v4, %v5188_v61 }
 0x856   :  { %v5190_v24 = vrot.slane %v5094_v53, 1  ;;  %v5718_v53 = vld [vmem:[%s13017_s9 + $0x218] sm:$0xff]  ;;  %6074 = vmatpush.msra.mxu1 %v5702_v37  ;;  %v5699_v37 = vld [vmem:[%s13017_s9 + $0x180] sm:$0xff] }
 0x857   :  { %v5304_v6 = vsel %vm1855_vm14, %v10705_v23, %v10694_v55  ;;  %v5311_v34 = vsel %vm5266_vm5, %v10694_v55, %v10705_v23  ;;  %v5319_v3 = vsel %vm13033_vm7, %v10705_v23, %v10694_v55  ;;  %6112 = vmatpush.msra.mxu2 %v5718_v53 }
 0x858   :  { %v5305_v45 = vsel %vm3780_vm12, %v5303_v47, %v5304_v6  ;;  %v5312_v1 = vsel %vm5268_vm1, %v5310_v63, %v5311_v34  ;;  %v5320_v52 = vsel %vm13030_vm15, %v5319_v3, %v5318_v60  ;;  %v5258_v49 = vsel %vm1855_vm14, %v10674_v21, %v5190_v24  ;;  %v5653_v47 = vld [vmem:[%s13017_s9 + $0x10] sm:$0xff] }
 0x859   :  { %v5306_v42 = vsel %vm13035_vm4, %v5302_v2, %v5305_v45  ;;  %v5313_v30 = vsel %vm13034_vm2, %v5309_v22, %v5312_v1  ;;  %v5321_v18 = vsel %vm13036_vm3, %v5317_v15, %v5320_v52  ;;  %4850 = vrot.lane.b32.xlu0 %v4620_v31, %s8020_s2  ;;  %v5267_v35 = vsel %vm5266_vm5, %v5190_v24, %v10674_v21  ;;  %v5669_v63 = vld [vmem:[%s13017_s9 + $0x90] sm:$0xff]  ;;  %v5652_v15 = vld [vmem:[%s13017_s9 + $0x8] sm:$0xff] }
 0x85a   :  { %v5314_v50 = vrot.slane %v5313_v30, 1  ;;  %v5322_v39 = vrot.slane %v5321_v18, 2  ;;  %5789 = vst [vmem:[#allocation1 + $0x5] ss:$9 sm:$0xff] %v5306_v42  ;;  %4770 = vrot.lane.b32.xlu2 %v4580_v17, %s8020_s2  ;;  %v5277_v38 = vsel %vm13033_vm7, %v10674_v21, %v5190_v24  ;;  %4810 = vrot.lane.b32.xlu1 %v4600_v10, %s8020_s2  ;;  %v5259_v33 = vsel %vm3780_vm12, %v5257_v27, %v5258_v49  ;;  %v5717_v34 = vld [vmem:[%s13017_s9 + $0x210] sm:$0xff]  ;;  %v5668_v52 = vld [vmem:[%s13017_s9 + $0x88] sm:$0xff] }
 0x85b   :  { %v10755_v14 = vpop.permute.xlu0 %4838  ;;  %v5269_v19 = vsel %vm5268_vm1, %v5265_v25, %v5267_v35  ;;  %v5278_v2 = vsel %vm13030_vm15, %v5277_v38, %v5276_v43  ;;  %vm13031_vm3 = vcmask 1046531   ;;  %v5260_v46 = vsel %vm13035_vm4, %v10614_v32, %v5259_v33  ;;  %5961 = vmatpush.msrb.mxu0 %v5653_v47  ;;  %5999 = vmatpush.msra.mxu3 %v5669_v63  ;;  %v5700_v31 = vld [vmem:[%s13017_s9 + $0x188] sm:$0xff]  ;;  %v4668_v17 = vld [vmem:[#allocation4 + $0x38] sm:$0x1f] }
 0x85c   :  { %v10757_v54 = vpop.permute.xlu2 %4840  ;;  %5791 = vst [vmem:[#allocation1 + $0x6] ss:$9 sm:$0xff] %v5314_v50  ;;  %v10769_v22 = vpop.permute.xlu1 %4878  ;;  %v5271_v61 = vsel %vm13034_vm2, %v10629_v0, %v5269_v19  ;;  %v5279_v4 = vsel %vm13037_vm6, %v10632_v7, %v5278_v2  ;;  %vm13038_vm15 = vcmask 1041409   ;;  %v5296_v0 = vsel %vm1843_vm9, %v10674_v21, %v5190_v24  ;;  %v5701_v7 = vld [vmem:[%s13017_s9 + $0x190] sm:$0xff]  ;;  %vm13039_vm6 = vmmov %vm13035_vm4  ;;  %6113 = vmatpush.msra.mxu2 %v5717_v34  ;;  %v5716_v30 = vld [vmem:[%s13017_s9 + $0x208] sm:$0xff] }
 0x85d   :  { %5793 = vst [vmem:[#allocation1 + $0x7] ss:$9 sm:$0xff] %v5322_v39  ;;  %v5272_v60 = vrot.slane %v5271_v61, 1  ;;  %v5280_v6 = vrot.slane %v5279_v4, 2  ;;  %v5286_v32 = vsel %vm13038_vm15, %v10674_v21, %v5190_v24  ;;  %v5284_v3 = vsel %vm13032_vm10, %v10583_v51, %v10608_v62  ;;  %6075 = vmatpush.msra.mxu1 %v5701_v7  ;;  %5962 = vmatpush.msrb.mxu0 %v5652_v15  ;;  %v4604_v61 = vld [vmem:[#allocation4 + $0x1a] sm:$0x1f] }
 0x85e   :  { %5779 = vst [vmem:[#allocation1] ss:$9 sm:$0xff] %v5260_v46  ;;  %v5288_v21 = vsel %vm5287_vm8, %v5286_v32, %v5285_v28  ;;  %v5297_v24 = vsel %vm2339_vm0, %v5295_v26, %v5296_v0  ;;  %v7985_v51 = vunpack.i.h.bf16 %v10430_v41  ;;  %v7984_v27 = vunpack.i.l.bf16 %v10430_v41  ;;  %v4701_v41 = vld [vmem:[#allocation4 + $0x6b] sm:$0x1f]  ;;  %6000 = vmatpush.msra.mxu3 %v5668_v52  ;;  %6114 = vmatpush.msra.mxu2 %v5716_v30  ;;  %v5715_v26 = vld [vmem:[%s13017_s9 + $0x200] sm:$0xff] }
 0x85f   :  { %v5290_v45 = vsel %vm13031_vm3, %v5284_v3, %v5288_v21  ;;  %v5298_v1 = vsel %vm13039_vm6, %v5297_v24, %v5294_v58  ;;  %5781 = vst [vmem:[#allocation1 + $0x1] ss:$9 sm:$0xff] %v5272_v60  ;;  %v5327_v42 = vsel %vm13038_vm15, %v10705_v23, %v10694_v55  ;;  %v5335_v25 = vsel %vm1843_vm9, %v10705_v23, %v10694_v55  ;;  %v4681_v28 = vld [vmem:[#allocation4 + $0x69] sm:$0x1f]  ;;  %v5651_v55 = vld [vmem:[%s13017_s9] sm:$0xff] }
 0x860   :  { %v5291_v62 = vrot.slane %v5290_v45, 3  ;;  %v5299_v36 = vrot.slane %v5298_v1, 4  ;;  %5783 = vst [vmem:[#allocation1 + $0x2] ss:$9 sm:$0xff] %v5280_v6  ;;  %vm13040_vm4 = vcmask 523264   ;;  %vm13041_vm6 = vcmask 1043459   ;;  %6076 = vmatpush.msra.mxu1 %v5700_v31  ;;  %5963 = vmatpush.msrb.mxu0 %v5651_v55 }
 0x861   :  { %v5098_v50 = vsel %vm13040_vm4, %v4688_v16, %v7985_v51  ;;  %v5323_v39 = vsel %vm13041_vm6, %v10619_v40, %v10590_v57  ;;  %v5667_v23 = vld [vmem:[%s13017_s9 + $0x80] sm:$0xff]  ;;  %v5331_v49 = vsel %vm1849_vm11, %v10619_v40, %v10590_v57  ;;  %v5334_v35 = vsel %vm13033_vm7, %v10634_v12, %v10665_v9  ;;  %5008 = vrot.lane.b32.xlu0 %v4701_v41, %s8020_s2  ;;  %vm13042_vm15 = vmmov %vm13040_vm4  ;;  %v4564_v40 = vld [vmem:[#allocation4 + $0x12] sm:$0x1f] }
 0x862   :  { %5785 = vst [vmem:[#allocation1 + $0x3] ss:$9 sm:$0xff] %v5291_v62  ;;  %v5328_v38 = vsel %vm5287_vm8, %v5327_v42, %v5326_v29  ;;  %v5088_v57 = vsel %vm13042_vm15, %v4668_v17, %v7984_v27  ;;  %v5324_v12 = vsel %vm1852_vm13, %v10641_v5, %v10616_v56  ;;  %v5336_v9 = vsel %vm2339_vm0, %v5334_v35, %v5335_v25  ;;  %v4584_v4 = vld [vmem:[#allocation4 + $0x18] sm:$0x1f]  ;;  %v4645_v63 = vld [vmem:[#allocation4 + $0x22] sm:$0x1f]  ;;  %vm13044_vm15 = vmmov %vm13040_vm4 }
 0x863   :  { %v10825_v10 = vpop.permute.xlu0 %4760  ;;  %5787 = vst [vmem:[#allocation1 + $0x4] ss:$9 sm:$0xff] %v5299_v36  ;;  %4968 = vrot.lane.b32.xlu2 %v4681_v28, %s8020_s2  ;;  %4852 = vrot.lane.b32.xlu1 %v4621_v59, %s8020_s2  ;;  %v5036_v33 = vsel %vm13040_vm4, %v4564_v40, %v10565_v20  ;;  %v5332_v19 = vsel %vm1855_vm14, %v10641_v5, %v10616_v56  ;;  %vm13043_vm6 = vcmask 1043456   ;;  %v4625_v20 = vld [vmem:[#allocation4 + $0x20] sm:$0x1f]  ;;  %v10877_v56 = vrot.slane %v5098_v50, 1 }
 0x864   :  { %v10823_v18 = vpop.permute.xlu2 %4762  ;;  %v10830_v43 = vpop.permute.xlu1 %4800  ;;  %v5325_v2 = vsel %vm13032_vm10, %v5323_v39, %v5324_v12  ;;  %6001 = vmatpush.msra.mxu3 %v5667_v23  ;;  %v5333_v53 = vsel %vm3780_vm12, %v5331_v49, %v5332_v19  ;;  %6077 = vmatpush.msra.mxu1 %v5699_v37  ;;  %v5056_v60 = vsel %vm13044_vm15, %v4604_v61, %v10755_v14  ;;  %v10879_v5 = vrot.slane %v5088_v57, 2  ;;  %v4544_v6 = vld [vmem:[#allocation4 + $0x10] sm:$0x1f]  ;;  %v4661_v51 = vld [vmem:[#allocation4 + $0x6b] sm:$0x1f]  ;;  %vm13046_vm15 = vmmov %vm13040_vm4 }
 0x865   :  { %v5329_v46 = vsel %vm13031_vm3, %v5325_v2, %v5328_v38  ;;  %6115 = vmatpush.msra.mxu2 %v5715_v26  ;;  %v5337_v47 = vsel %vm13043_vm6, %v5336_v9, %v5333_v53  ;;  %v5198_v32 = vrot.slane %v5036_v33, 7  ;;  %v5066_v3 = vsel %vm13040_vm4, %v4625_v20, %v10769_v22  ;;  %vm13045_vm6 = vmmov %vm13040_vm4  ;;  %v4601_v30 = vld [vmem:[#allocation4 + $0x69] sm:$0x1f]  ;;  %v4605_v29 = vld [vmem:[#allocation4 + $0x22] sm:$0x1f] }
 0x866   :  { %v5046_v24 = vsel %vm13045_vm6, %v4584_v4, %v10580_v44  ;;  %v5330_v14 = vrot.slane %v5329_v46, 3  ;;  %v5338_v36 = vrot.slane %v5337_v47, 4  ;;  %v5076_v52 = vsel %vm13046_vm15, %v4645_v63, %v10686_v13  ;;  %v4642_v44 = vld [vmem:[#allocation4 + $0x71] sm:$0x1f]  ;;  %v4666_v26 = vld [vmem:[#allocation4 + $0x28] sm:$0x1f] }
 0x867   :  { %v5200_v31 = vrot.slane %v5056_v60, 5  ;;  %v5026_v27 = vsel %vm13040_vm4, %v4544_v6, %v10456_v48  ;;  %v5201_v42 = vrot.slane %v5066_v3, 4  ;;  %v5199_v25 = vrot.slane %v5046_v24, 6  ;;  %v4585_v9 = vld [vmem:[#allocation4 + $0x20] sm:$0x1f] }
 0x868   :  { %v5339_v17 = vsel %vm13033_vm7, %v5026_v27, %v5198_v32  ;;  %v10908_v13 = vsel %vm1855_vm14, %v10879_v5, %v10877_v56  ;;  %vm13047_vm6 = vcmask 1041409   ;;  %v5354_v41 = vsel %vm1843_vm9, %v5026_v27, %v5198_v32  ;;  %v4565_v33 = vld [vmem:[#allocation4 + $0x1a] sm:$0x1f]  ;;  %v4667_v63 = vld [vmem:[#allocation4 + $0x30] sm:$0x1f] }
 0x869   :  { %4892 = vrot.lane.b32.xlu0 %v4642_v44, %s8020_s2  ;;  %v5346_v48 = vsel %vm13047_vm6, %v5026_v27, %v5198_v32  ;;  %vm13048_vm15 = vcmask 1043459   ;;  %v5202_v39 = vrot.slane %v5076_v52, 3  ;;  %v5370_v28 = vsel %vm1849_vm11, %v5026_v27, %v5198_v32  ;;  %v4545_v47 = vld [vmem:[#allocation4 + $0x18] sm:$0x1f]  ;;  %v4686_v60 = vld [vmem:[#allocation4 + $0x2a] sm:$0x1f] }
 0x86a   :  { %v5794_v0 = vld [vmem:[#allocation1] sm:$0xff]  ;;  %v5795_v7 = vld [vmem:[#allocation1 + $0x9] sm:$0xff]  ;;  %v10881_v34 = vld [vmem:[#allocation1 + $0x12] sm:$0xff]  ;;  %v5362_v50 = vsel %vm13048_vm15, %v5026_v27, %v5198_v32  ;;  %v5340_v55 = vsel %vm1843_vm9, %v5199_v25, %v5200_v31  ;;  %vm13050_vm3 = vcmask 523264   ;;  %v5355_v59 = vsel %vm1849_vm11, %v5199_v25, %v5200_v31 }
 0x86b   :  { %v4959_v21 = vpop.permute.xlu0 %4958  ;;  %v5797_v15 = vld [vmem:[#allocation1 + $0x1b] sm:$0xff]  ;;  %v5798_v45 = vld [vmem:[#allocation1 + $0x24] sm:$0xff]  ;;  %v10889_v1 = vld [vmem:[#allocation1 + $0x2d] sm:$0xff]  ;;  %5964 = vmatmul.f32.vlgmr.msrb.gmra.mxu0 %v5794_v0  ;;  %6002 = vmatmul.f32.vlgmr.msra.gmra.mxu3 %v5795_v7  ;;  %v5057_v49 = vsel %vm13050_vm3, %v4605_v29, %v10757_v54  ;;  %v5342_v35 = vsel %vm1849_vm11, %v5201_v42, %v5202_v39  ;;  %v5349_v38 = vsel %vm1852_vm13, %v5201_v42, %v5202_v39 }
 0x86c   :  { %v10885_v58 = vpop.permute.xlu2 %4722  ;;  %v10891_v62 = vpop.permute.xlu1 %4720  ;;  %v10893_v16 = vld [vmem:[#allocation1 + $0x36] sm:$0xff]  ;;  %v10895_v22 = vld [vmem:[#allocation1 + $0x3f] sm:$0xff]  ;;  %6078 = vmatmul.f32.vlgmr.msra.gmra.mxu1 %v5797_v15  ;;  %6116 = vmatmul.f32.vlgmr.msra.gmra.mxu2 %v5798_v45  ;;  %vm13049_vm4 = vmmov %vm13048_vm15  ;;  %v5363_v37 = vsel %vm1852_vm13, %v5199_v25, %v5200_v31  ;;  %v5357_v57 = vsel %vm1855_vm14, %v5201_v42, %v5202_v39  ;;  %v5365_v40 = vsel %vm5266_vm5, %v5202_v39, %v5201_v42  ;;  %v10933_v0 = vrot.slane %v5057_v49, 5 }
 0x86d   :  { %5802 = vst [vmem:[#allocation1] ss:$9 sm:$0xff] %v5330_v14  ;;  %4930 = vrot.lane.b32.xlu1 %v4661_v51, %s8020_s2  ;;  %4812 = vrot.lane.b32.xlu2 %v4601_v30, %s8020_s2  ;;  %v5347_v23 = vsel %vm13049_vm4, %v5199_v25, %v5200_v31  ;;  %v5371_v12 = vsel %vm1855_vm14, %v5199_v25, %v5200_v31  ;;  %vm13051_vm6 = vmmov %vm13050_vm3  ;;  %vm13052_vm3 = vcmask 1042433   ;;  %vm13054_vm4 = vcmask 1043458   ;;  %v4682_v7 = vld [vmem:[#allocation4 + $0x71] sm:$0x1f] }
 0x86e   :  { %5803 = vst [vmem:[#allocation1 + $0x1] ss:$9 sm:$0xff] %v5338_v36  ;;  %v5086_v19 = vsel %vm13051_vm6, %v4666_v26, %v4959_v21  ;;  %v5373_v53 = vsel %vm13033_vm7, %v5201_v42, %v5202_v39  ;;  %v5341_v46 = vsel %vm2339_vm0, %v5339_v17, %v5340_v55  ;;  %v5348_v61 = vsel %vm13052_vm3, %v5346_v48, %v5347_v23  ;;  %vm13053_vm15 = vmmov %vm13051_vm6  ;;  %v4561_v3 = vld [vmem:[#allocation4 + $0x61] sm:$0x1f]  ;;  %v4641_v15 = vld [vmem:[#allocation4 + $0x69] sm:$0x1f] }
 0x86f   :  { %v5047_v4 = vsel %vm13053_vm15, %v4585_v9, %v10830_v43  ;;  %v5356_v6 = vsel %vm13054_vm4, %v5354_v41, %v5355_v59  ;;  %v5364_v32 = vsel %vm13032_vm10, %v5362_v50, %v5363_v37  ;;  %v5372_v24 = vsel %vm3780_vm12, %v5370_v28, %v5371_v12  ;;  %vm13055_vm3 = vmmov %vm13051_vm6  ;;  %v4626_v51 = vld [vmem:[#allocation4 + $0x28] sm:$0x1f]  ;;  %v4566_v41 = vld [vmem:[#allocation4 + $0x22] sm:$0x1f] }
 0x870   :  { %v5037_v14 = vsel %vm13055_vm3, %v4565_v33, %v10825_v10  ;;  %v5203_v43 = vrot.slane %v5086_v19, 2  ;;  %v10940_v36 = vrot.slane %v5047_v4, 6  ;;  %vm13056_vm15 = vmmov %vm13055_vm3  ;;  %vm13063_vm10 = vcmask 1046531   ;;  %v4687_v55 = vld [vmem:[#allocation4 + $0x32] sm:$0x1f] }
 0x871   :  { %4970 = vrot.lane.b32.xlu0 %v4682_v7, %s8020_s2  ;;  %v10944_v52 = vsel %vm13056_vm15, %v4545_v47, %v10891_v62  ;;  %vm13057_vm4 = vmmov %vm13055_vm3  ;;  %vm13060_vm15 = vcmask 1045504   ;;  %v4560_v12 = vld [vmem:[#allocation4 + $0x59] sm:$0x1f]  ;;  %v4646_v33 = vld [vmem:[#allocation4 + $0x2a] sm:$0x1f] }
 0x872   :  { %v5379_v7 = vsel %vm1843_vm9, %v10940_v36, %v10933_v0 }
 0x873   :  { %v4881_v2 = vpop.permute.xlu0 %4880 }
 0x874   :  { %v4961_v54 = vpop.permute.xlu2 %4960  ;;  %v4999_v20 = vpop.permute.xlu1 %4998 }
 0x875   :  { %v5096_v21 = vsel %vm13051_vm6, %v4686_v60, %v4999_v20  ;;  %4732 = vrot.lane.b32.xlu1 %v4561_v3, %s8020_s2  ;;  %4890 = vrot.lane.b32.xlu2 %v4641_v15, %s8020_s2  ;;  %v5087_v31 = vsel %vm13057_vm4, %v4667_v63, %v4961_v54  ;;  %vm13058_vm6 = vmmov %vm13055_vm3  ;;  %vm13059_vm3 = vcmask 1041409   ;;  %vm13061_vm4 = vcmask 1043456  }
 0x876   :  { %v5204_v45 = vrot.slane %v5096_v21, 1  ;;  %v5067_v10 = vsel %vm13058_vm6, %v4626_v51, %v4881_v2  ;;  %vm13062_vm6 = vcmask 1045506   ;;  %v5210_v54 = vrot.slane %v5087_v31, 2 }
 0x877   :  { %v5208_v63 = vrot.slane %v5067_v10, 4  ;;  %v10979_v60 = vsel %vm5266_vm5, %v10877_v56, %v10879_v5 }
 0x878   :  { %v5343_v44 = vsel %vm1855_vm14, %v5203_v43, %v5204_v45  ;;  %v5350_v27 = vsel %vm5266_vm5, %v5204_v45, %v5203_v43  ;;  %v5358_v42 = vsel %vm13033_vm7, %v5203_v43, %v5204_v45  ;;  %v5366_v30 = vsel %vm13059_vm3, %v5203_v43, %v5204_v45 }
 0x879   :  { %v5344_v17 = vsel %vm3780_vm12, %v5342_v35, %v5343_v44  ;;  %v5351_v62 = vsel %vm5268_vm1, %v5349_v38, %v5350_v27  ;;  %v5359_v25 = vsel %vm13060_vm15, %v5358_v42, %v5357_v57  ;;  %v5367_v48 = vsel %vm5287_vm8, %v5366_v30, %v5365_v40  ;;  %vm13066_vm15 = vmmov %vm13061_vm4  ;;  %4730 = vrot.lane.b32.xlu0 %v4560_v12, %s8020_s2 }
 0x87a   :  { %v5345_v50 = vsel %vm13061_vm4, %v5341_v46, %v5344_v17  ;;  %v5352_v39 = vsel %vm13034_vm2, %v5348_v61, %v5351_v62  ;;  %v5360_v29 = vsel %vm13062_vm6, %v5356_v6, %v5359_v25  ;;  %v5368_v28 = vsel %vm13063_vm10, %v5364_v32, %v5367_v48  ;;  %v4662_v46 = vld [vmem:[#allocation4 + $0x73] sm:$0x1f]  ;;  %v4586_v25 = vld [vmem:[#allocation4 + $0x28] sm:$0x1f] }
 0x87b   :  { %v5353_v23 = vrot.slane %v5352_v39, 1  ;;  %v5361_v49 = vrot.slane %v5360_v29, 2  ;;  %v5369_v59 = vrot.slane %v5368_v28, 3  ;;  %v5374_v35 = vsel %vm1843_vm9, %v5203_v43, %v5204_v45  ;;  %5804 = vst [vmem:[#allocation1 + $0x2] ss:$9 sm:$0xff] %v5345_v50  ;;  %v5001_v37 = vpop.permute.xlu0 %5000 }
 0x87c   :  { %v10963_v38 = vpop.permute.xlu2 %4882  ;;  %vm13064_vm3 = vcmask 523264   ;;  %v5205_v57 = vrot.slane %v5037_v14, 7  ;;  %v5375_v40 = vsel %vm2339_vm0, %v5373_v53, %v5374_v35  ;;  %v4921_v9 = vpop.permute.xlu1 %4920  ;;  %v10984_v6 = vsel %vm13033_vm7, %v10879_v5, %v10877_v56  ;;  %v4606_v39 = vld [vmem:[#allocation4 + $0x2a] sm:$0x1f] }
 0x87d   :  { %v5038_v26 = vsel %vm13064_vm3, %v4566_v41, %v10823_v18  ;;  %vm13065_vm10 = vmmov %vm13064_vm3  ;;  %v5376_v2 = vsel %vm13066_vm15, %v5375_v40, %v5372_v24  ;;  %5805 = vst [vmem:[#allocation1 + $0x3] ss:$9 sm:$0xff] %v5353_v23  ;;  %4932 = vrot.lane.b32.xlu2 %v4662_v46, %s8020_s2  ;;  %vm13068_vm6 = vcmask 1041409   ;;  %v4546_v24 = vld [vmem:[#allocation4 + $0x20] sm:$0x1f]  ;;  %v5394_v43 = vsel %vm1849_vm11, %v10940_v36, %v10933_v0 }
 0x87e   :  { %v5097_v19 = vsel %vm13065_vm10, %v4687_v55, %v5001_v37  ;;  %vm13067_vm4 = vmmov %vm13064_vm3  ;;  %v5378_v47 = vsel %vm13033_vm7, %v10944_v52, %v5205_v57  ;;  %v5377_v18 = vrot.slane %v5376_v2, 4  ;;  %5806 = vst [vmem:[#allocation1 + $0x4] ss:$9 sm:$0xff] %v5361_v49  ;;  %v10986_v32 = vrot.slane %v5038_v26, 7  ;;  %v4702_v26 = vld [vmem:[#allocation4 + $0x73] sm:$0x1f] }
 0x87f   :  { %v5077_v61 = vsel %vm13067_vm4, %v4646_v33, %v4921_v9  ;;  %v5211_v4 = vrot.slane %v5097_v19, 1  ;;  %5807 = vst [vmem:[#allocation1 + $0x5] ss:$9 sm:$0xff] %v5369_v59  ;;  %v10995_v21 = vsel %vm13068_vm6, %v10879_v5, %v10877_v56  ;;  %vm13069_vm3 = vcmask 1043459   ;;  %vm13070_vm10 = vmmov %vm13067_vm4 }
 0x880   :  { %v5209_v53 = vrot.slane %v5077_v61, 3  ;;  %5808 = vst [vmem:[#allocation1 + $0x6] ss:$9 sm:$0xff] %v5377_v18  ;;  %v5386_v14 = vsel %vm13069_vm3, %v10940_v36, %v10933_v0  ;;  %v5380_v15 = vsel %vm2339_vm0, %v5378_v47, %v5379_v7  ;;  %v11007_v51 = vsel %vm13070_vm10, %v4546_v24, %v10885_v58  ;;  %vm13071_vm4 = vmmov %vm13068_vm6  ;;  %v4627_v18 = vld [vmem:[#allocation4 + $0x30] sm:$0x1f] }
 0x881   :  { %v5382_v20 = vsel %vm1855_vm14, %v5210_v54, %v5211_v4  ;;  %v5389_v44 = vsel %vm5266_vm5, %v5211_v4, %v5210_v54  ;;  %v5385_v27 = vsel %vm13071_vm4, %v10944_v52, %v5205_v57  ;;  %v5397_v17 = vsel %vm13033_vm7, %v5210_v54, %v5211_v4  ;;  %vm13072_vm6 = vmmov %vm13071_vm4 }
 0x882   :  { %v5381_v3 = vsel %vm1849_vm11, %v5208_v63, %v5209_v53  ;;  %v5388_v31 = vsel %vm1852_vm13, %v5208_v63, %v5209_v53  ;;  %v5396_v42 = vsel %vm1855_vm14, %v5208_v63, %v5209_v53  ;;  %v5404_v30 = vsel %vm5266_vm5, %v5209_v53, %v5208_v63  ;;  %vm13073_vm3 = vmmov %vm13070_vm10 }
 0x883   :  { %v5383_v45 = vsel %vm3780_vm12, %v5381_v3, %v5382_v20  ;;  %v4803_v62 = vpop.permute.xlu0 %4802  ;;  %v5412_v58 = vsel %vm13033_vm7, %v5208_v63, %v5209_v53  ;;  %v5405_v48 = vsel %vm13072_vm6, %v5210_v54, %v5211_v4  ;;  %v5413_v41 = vsel %vm1843_vm9, %v5210_v54, %v5211_v4  ;;  %v4647_v53 = vld [vmem:[#allocation4 + $0x32] sm:$0x1f] }
 0x884   :  { %v5384_v10 = vsel %vm13066_vm15, %v5380_v15, %v5383_v45  ;;  %v4843_v50 = vpop.permute.xlu1 %4842  ;;  %v5048_v29 = vsel %vm13073_vm3, %v4586_v25, %v4803_v62  ;;  %v11021_v28 = vpop.permute.xlu2 %4804  ;;  %v5393_v55 = vsel %vm1843_vm9, %v10944_v52, %v5205_v57  ;;  %vm13074_vm10 = vcmask 1043459   ;;  %vm13075_vm15 = vmmov %vm13073_vm3 }
 0x885   :  { %5809 = vst [vmem:[#allocation1 + $0x7] ss:$9 sm:$0xff] %v5384_v10  ;;  %v5401_v23 = vsel %vm13074_vm10, %v10944_v52, %v5205_v57  ;;  %v5390_v49 = vsel %vm5268_vm1, %v5388_v31, %v5389_v44  ;;  %v5058_v59 = vsel %vm13075_vm15, %v4606_v39, %v4843_v50  ;;  %v5409_v35 = vsel %vm1849_vm11, %v10944_v52, %v5205_v57 }
 0x886   :  { %vm13076_vm4 = vcmask 1045504   ;;  %v11032_v40 = vrot.slane %v5058_v59, 5  ;;  %v11034_v12 = vrot.slane %v5048_v29, 6  ;;  %v5402_v9 = vsel %vm1852_vm13, %v10940_v36, %v10933_v0  ;;  %5010 = vrot.lane.b32.xlu2 %v4702_v26, %s8020_s2 }
 0x887   :  { %v5398_v37 = vsel %vm13076_vm4, %v5397_v17, %v5396_v42  ;;  %vm13077_vm6 = vcmask 1042433   ;;  %v5406_v19 = vsel %vm5287_vm8, %v5405_v48, %v5404_v30  ;;  %v5414_v54 = vsel %vm2339_vm0, %v5412_v58, %v5413_v41 }
 0x888   :  { %v5387_v33 = vsel %vm13077_vm6, %v5385_v27, %v5386_v14  ;;  %v5417_v52 = vsel %vm13033_vm7, %v11007_v51, %v10986_v32  ;;  %v5410_v57 = vsel %vm1855_vm14, %v10940_v36, %v10933_v0  ;;  %vm13078_vm3 = vcmask 1043458  }
 0x889   :  { %v5395_v2 = vsel %vm13078_vm3, %v5393_v55, %v5394_v43  ;;  %v5391_v46 = vsel %vm13034_vm2, %v5387_v33, %v5390_v49  ;;  %vm13079_vm10 = vcmask 1041409   ;;  %vm13080_vm15 = vcmask 1044483  }
 0x88a   :  { %v5424_v61 = vsel %vm13079_vm10, %v11007_v51, %v10986_v32  ;;  %v5403_v4 = vsel %vm13080_vm15, %v5401_v23, %v5402_v9  ;;  %v5411_v47 = vsel %vm3780_vm12, %v5409_v35, %v5410_v57  ;;  %vm13081_vm4 = vcmask 1045506  }
 0x88b   :  { %v5399_v63 = vsel %vm13081_vm4, %v5395_v2, %v5398_v37  ;;  %vm13082_vm6 = vcmask 523264   ;;  %vm13083_vm7 = vcmask 1046531   ;;  %vm13084_vm3 = vcmask 1043456   ;;  %v4923_v27 = vpop.permute.xlu0 %4922 }
 0x88c   :  { %v5068_v20 = vsel %vm13082_vm6, %v4627_v18, %v10963_v38  ;;  %v5407_v0 = vsel %vm13083_vm7, %v5403_v4, %v5406_v19  ;;  %v5415_v36 = vsel %vm13084_vm3, %v5414_v54, %v5411_v47  ;;  %v5810_v7 = vld [vmem:[#allocation1] sm:$0xff]  ;;  %v5811_v3 = vld [vmem:[#allocation1 + $0x9] sm:$0xff]  ;;  %v11061_v24 = vld [vmem:[#allocation1 + $0x12] sm:$0xff]  ;;  %v5418_v14 = vsel %vm1843_vm9, %v11034_v12, %v11032_v40  ;;  %v11088_v48 = vpop.permute.xlu2 %4846  ;;  %v11090_v41 = vpop.permute.xlu1 %4766 }
 0x88d   :  { %v5392_v43 = vrot.slane %v5391_v46, 1  ;;  %v5813_v15 = vld [vmem:[#allocation1 + $0x1b] sm:$0xff]  ;;  %v5814_v45 = vld [vmem:[#allocation1 + $0x24] sm:$0xff]  ;;  %v11066_v31 = vld [vmem:[#allocation1 + $0x2d] sm:$0xff]  ;;  %vm13085_vm10 = vcmask 1043459   ;;  %v5433_v10 = vsel %vm1849_vm11, %v11034_v12, %v11032_v40  ;;  %v5441_v44 = vsel %vm1852_vm13, %v11034_v12, %v11032_v40  ;;  %5967 = vmatmul.f32.gmra.mxu0 %v5810_v7  ;;  %6005 = vmatmul.f32.gmra.mxu3 %v5811_v3 }
 0x88e   :  { %v5425_v38 = vsel %vm13085_vm10, %v11034_v12, %v11032_v40  ;;  %v5432_v42 = vsel %vm1843_vm9, %v11007_v51, %v10986_v32  ;;  %vm13086_vm7 = vmmov %vm13085_vm10  ;;  %v5400_v17 = vrot.slane %v5399_v63, 2  ;;  %v11083_v62 = vld [vmem:[#allocation1 + $0x36] sm:$0xff]  ;;  %v11085_v25 = vld [vmem:[#allocation1 + $0x3f] sm:$0xff]  ;;  %6081 = vmatmul.f32.gmra.mxu1 %v5813_v15  ;;  %6119 = vmatmul.f32.gmra.mxu2 %v5814_v45  ;;  %v5215_v50 = vrot.slane %v5068_v20, 4 }
 0x88f   :  { %v5440_v30 = vsel %vm13086_vm7, %v11007_v51, %v10986_v32  ;;  %vm13087_vm15 = vmmov %vm13082_vm6  ;;  %v5408_v39 = vrot.slane %v5407_v0, 3  ;;  %v5416_v29 = vrot.slane %v5415_v36, 4  ;;  %5818 = vst [vmem:[#allocation1] ss:$9 sm:$0xff] %v5392_v43  ;;  %v5419_v23 = vsel %vm2339_vm0, %v5417_v52, %v5418_v14 }
 0x890   :  { %v5078_v58 = vsel %vm13087_vm15, %v4647_v53, %v4923_v27  ;;  %5819 = vst [vmem:[#allocation1 + $0x1] ss:$9 sm:$0xff] %v5400_v17  ;;  %vm13088_vm4 = vcmask 1042433   ;;  %vm13089_vm6 = vcmask 1043458   ;;  %vm13090_vm3 = vcmask 1044483  }
 0x891   :  { %v5216_v55 = vrot.slane %v5078_v58, 3  ;;  %v5426_v49 = vsel %vm13088_vm4, %v5424_v61, %v5425_v38  ;;  %v5434_v59 = vsel %vm13089_vm6, %v5432_v42, %v5433_v10  ;;  %v5442_v35 = vsel %vm13090_vm3, %v5440_v30, %v5441_v44  ;;  %5820 = vst [vmem:[#allocation1 + $0x2] ss:$9 sm:$0xff] %v5408_v39  ;;  %v4567_v27 = vld [vmem:[#allocation4 + $0x42] sm:$0x1f] }
 0x892   :  { %5821 = vst [vmem:[#allocation1 + $0x3] ss:$9 sm:$0xff] %v5416_v29  ;;  %vm13091_vm10 = vcmask 1045504   ;;  %vm13092_vm7 = vcmask 1043456   ;;  %vm13093_vm15 = vcmask 1045506   ;;  %vm13094_vm4 = vcmask 1046531  }
 0x893   :  { %v5420_v37 = vsel %vm1849_vm11, %v5215_v50, %v5216_v55  ;;  %v5427_v26 = vsel %vm1852_vm13, %v5215_v50, %v5216_v55  ;;  %v5435_v9 = vsel %vm1855_vm14, %v5215_v50, %v5216_v55  ;;  %v5443_v33 = vsel %vm5266_vm5, %v5216_v55, %v5215_v50  ;;  %v4807_v63 = vpop.permute.xlu0 %4806  ;;  %vm13096_vm3 = vmmov %vm13092_vm7  ;;  %v4547_v39 = vld [vmem:[#allocation4 + $0x40] sm:$0x1f]  ;;  %v4607_v29 = vld [vmem:[#allocation4 + $0x4a] sm:$0x1f] }
 0x894   :  { %v5422_v19 = vsel %vm3780_vm12, %v5420_v37, %v10908_v13  ;;  %v5429_v54 = vsel %vm5268_vm1, %v5427_v26, %v10979_v60  ;;  %v5437_v52 = vsel %vm13091_vm10, %v10984_v6, %v5435_v9  ;;  %v5445_v57 = vsel %vm5287_vm8, %v10995_v21, %v5443_v33  ;;  %v11112_v60 = vpop.permute.xlu2 %4924  ;;  %v4845_v6 = vpop.permute.xlu1 %4844  ;;  %v4588_v37 = vld [vmem:[#allocation4 + $0x50] sm:$0x1f] }
 0x895   :  { %v5423_v2 = vsel %vm13092_vm7, %v5419_v23, %v5422_v19  ;;  %v5430_v46 = vsel %vm13034_vm2, %v5426_v49, %v5429_v54  ;;  %v5438_v61 = vsel %vm13093_vm15, %v5434_v59, %v5437_v52  ;;  %v5446_v4 = vsel %vm13094_vm4, %v5442_v35, %v5445_v57  ;;  %v4587_v49 = vld [vmem:[#allocation4 + $0x48] sm:$0x1f]  ;;  %v4608_v26 = vld [vmem:[#allocation4 + $0x52] sm:$0x1f] }
 0x896   :  { %v5431_v47 = vrot.slane %v5430_v46, 1  ;;  %v5439_v18 = vrot.slane %v5438_v61, 2  ;;  %v5447_v13 = vrot.slane %v5446_v4, 3  ;;  %5822 = vst [vmem:[#allocation1 + $0x4] ss:$9 sm:$0xff] %v5423_v2  ;;  %vm13095_vm6 = vcmask 1040384  }
 0x897   :  { %v5451_v21 = vsel %vm13095_vm6, %v5215_v50, %v5216_v55  ;;  %v5449_v53 = vsel %vm1855_vm14, %v11034_v12, %v11032_v40  ;;  %v5452_v20 = vsel %vm1843_vm9, %v10879_v5, %v10877_v56  ;;  %v5448_v36 = vsel %vm1849_vm11, %v11007_v51, %v10986_v32  ;;  %v4568_v19 = vld [vmem:[#allocation4 + $0x4a] sm:$0x1f]  ;;  %v4628_v46 = vld [vmem:[#allocation4 + $0x50] sm:$0x1f] }
 0x898   :  { %5823 = vst [vmem:[#allocation1 + $0x5] ss:$9 sm:$0xff] %v5431_v47  ;;  %v5453_v0 = vsel %vm2339_vm0, %v5451_v21, %v5452_v20  ;;  %v5450_v7 = vsel %vm3780_vm12, %v5448_v36, %v5449_v53  ;;  %v7989_v44 = vunpack.i.l.bf16 %v10454_v8  ;;  %v7990_v30 = vunpack.i.h.bf16 %v10454_v8 }
 0x899   :  { %5824 = vst [vmem:[#allocation1 + $0x6] ss:$9 sm:$0xff] %v5439_v18  ;;  %v5454_v14 = vsel %vm13096_vm3, %v5453_v0, %v5450_v7  ;;  %vm13097_vm10 = vcmask 523264   ;;  %vm13104_vm2 = vcmask 1041409   ;;  %v4648_v18 = vld [vmem:[#allocation4 + $0x52] sm:$0x1f] }
 0x89a   :  { %5825 = vst [vmem:[#allocation1 + $0x7] ss:$9 sm:$0xff] %v5447_v13  ;;  %v5455_v10 = vrot.slane %v5454_v14, 4  ;;  %v5039_v17 = vsel %vm13097_vm10, %v4567_v27, %v7989_v44  ;;  %vm13098_vm7 = vmmov %vm13097_vm10  ;;  %vm13103_vm10 = vcmask 1040384   ;;  %v4649_v14 = vld [vmem:[#allocation4 + $0x5a] sm:$0x1f] }
 0x89b   :  { %v4885_v3 = vpop.permute.xlu0 %4884  ;;  %v5059_v55 = vsel %vm13098_vm7, %v4607_v29, %v4845_v6  ;;  %v5219_v23 = vrot.slane %v5039_v17, 7  ;;  %vm13099_vm15 = vmmov %vm13098_vm7 }
 0x89c   :  { %v11127_v43 = vpop.permute.xlu1 %4728  ;;  %v4727_v15 = vpop.permute.xlu2 %4726  ;;  %v5029_v59 = vsel %vm13099_vm15, %v4547_v39, %v7990_v30  ;;  %vm13100_vm4 = vmmov %vm13098_vm7  ;;  %v5221_v8 = vrot.slane %v5059_v55, 5  ;;  %vm13106_vm15 = vcmask 1043459   ;;  %v4629_v30 = vld [vmem:[#allocation4 + $0x58] sm:$0x1f] }
 0x89d   :  { %v5049_v35 = vsel %vm13100_vm4, %v4587_v49, %v11021_v28  ;;  %vm13101_vm6 = vmmov %vm13100_vm4  ;;  %v5456_v54 = vsel %vm13103_vm10, %v5029_v59, %v5219_v23  ;;  %v5463_v52 = vsel %vm13104_vm2, %v5029_v59, %v5219_v23  ;;  %v5471_v28 = vsel %vm1843_vm9, %v5029_v59, %v5219_v23  ;;  %v4669_v55 = vld [vmem:[#allocation4 + $0x58] sm:$0x1f] }
 0x89e   :  { %v5050_v9 = vsel %vm13101_vm6, %v4588_v37, %v4807_v63  ;;  %vm13102_vm3 = vmmov %vm13100_vm4  ;;  %v5220_v57 = vrot.slane %v5049_v35, 6  ;;  %v5479_v4 = vsel %vm13106_vm15, %v5029_v59, %v5219_v23  ;;  %v5487_v63 = vsel %vm1849_vm11, %v5029_v59, %v5219_v23  ;;  %v4670_v59 = vld [vmem:[#allocation4 + $0x60] sm:$0x1f] }
 0x89f   :  { %v5060_v33 = vsel %vm13102_vm3, %v4608_v26, %v11088_v48  ;;  %vm13105_vm7 = vmmov %vm13102_vm3  ;;  %v11155_v47 = vrot.slane %v5050_v9, 6 }
 0x8a0   :  { %v5040_v2 = vsel %vm13105_vm7, %v4568_v19, %v11090_v41  ;;  %vm13107_vm4 = vmmov %vm13102_vm3  ;;  %v11159_v6 = vrot.slane %v5060_v33, 5  ;;  %v5457_v41 = vsel %vm1843_vm9, %v5220_v57, %v5221_v8  ;;  %v5472_v36 = vsel %vm1849_vm11, %v5220_v57, %v5221_v8  ;;  %v4689_v33 = vld [vmem:[#allocation4 + $0x5a] sm:$0x1f] }
 0x8a1   :  { %v5826_v45 = vld [vmem:[#allocation1] sm:$0xff]  ;;  %v5827_v40 = vld [vmem:[#allocation1 + $0x9] sm:$0xff]  ;;  %v11129_v12 = vld [vmem:[#allocation1 + $0x12] sm:$0xff]  ;;  %v5069_v48 = vsel %vm13107_vm4, %v4628_v46, %v4885_v3  ;;  %v11166_v20 = vrot.slane %v5040_v2, 7  ;;  %v5480_v7 = vsel %vm1852_vm13, %v5220_v57, %v5221_v8  ;;  %vm13114_vm4 = vcmask 1043458  }
 0x8a2   :  { %v5829_v38 = vld [vmem:[#allocation1 + $0x1b] sm:$0xff]  ;;  %v11131_v56 = vld [vmem:[#allocation1 + $0x2d] sm:$0xff]  ;;  %5970 = vmatmul.f32.gmra.mxu0 %v5826_v45  ;;  %6008 = vmatmul.f32.gmra.mxu3 %v5827_v40  ;;  %v5830_v51 = vld [vmem:[#allocation1 + $0x24] sm:$0xff]  ;;  %v5488_v45 = vsel %vm1855_vm14, %v5220_v57, %v5221_v8  ;;  %v5222_v40 = vrot.slane %v5069_v48, 4  ;;  %v5496_v44 = vsel %vm1843_vm9, %v11155_v47, %v11159_v6  ;;  %v5473_v39 = vsel %vm13114_vm4, %v5471_v28, %v5472_v36 }
 0x8a3   :  { %v11133_v5 = vld [vmem:[#allocation1 + $0x36] sm:$0xff]  ;;  %v11135_v32 = vld [vmem:[#allocation1 + $0x3f] sm:$0xff]  ;;  %6084 = vmatmul.f32.gmra.mxu1 %v5829_v38  ;;  %6122 = vmatmul.f32.gmra.mxu2 %v5830_v51  ;;  %v11138_v42 = vpop.permute.xlu0 %4768  ;;  %vm13108_vm2 = vmmov %vm13102_vm3  ;;  %v5458_v51 = vsel %vm2339_vm0, %v5456_v54, %v5457_v41  ;;  %v5489_v23 = vsel %vm3780_vm12, %v5487_v63, %v5488_v45 }
 0x8a4   :  { %5834 = vst [vmem:[#allocation1] ss:$9 sm:$0xff] %v5455_v10  ;;  %v4967_v58 = vpop.permute.xlu2 %4966  ;;  %v4887_v50 = vpop.permute.xlu1 %4886  ;;  %v5079_v21 = vsel %vm13108_vm2, %v4648_v18, %v11112_v60  ;;  %vm13109_vm6 = vmmov %vm13106_vm15  ;;  %v4548_v3 = vld [vmem:[#allocation4 + $0x48] sm:$0x1f]  ;;  %vm13113_vm15 = vcmask 1042433   ;;  %v5698_v54 = vld [vmem:[%s13017_s9 + $0x178] sm:$0xff] }
 0x8a5   :  { %v5464_v0 = vsel %vm13109_vm6, %v5220_v57, %v5221_v8  ;;  %vm13110_vm3 = vmmov %vm13108_vm2  ;;  %v5223_v10 = vrot.slane %v5079_v21, 3  ;;  %6024 = vmatpush.msra.mxu0 %v5698_v54 }
 0x8a6   :  { %v11173_v38 = vsel %vm13110_vm3, %v4548_v3, %v4727_v15  ;;  %vm13111_vm10 = vmmov %vm13108_vm2  ;;  %v5465_v17 = vsel %vm13113_vm15, %v5463_v52, %v5464_v0  ;;  %vm13115_vm2 = vcmask 1044483  }
 0x8a7   :  { %vm13112_vm7 = vmmov %vm13109_vm6  ;;  %v5481_v15 = vsel %vm13115_vm2, %v5479_v4, %v5480_v7  ;;  %v5459_v26 = vsel %vm1849_vm11, %v5222_v40, %v5223_v10  ;;  %v5466_v9 = vsel %vm1852_vm13, %v5222_v40, %v5223_v10  ;;  %v5474_v52 = vsel %vm1855_vm14, %v5222_v40, %v5223_v10 }
 0x8a8   :  { %v5503_v27 = vsel %vm13112_vm7, %v11155_v47, %v11159_v6  ;;  %vm13116_vm6 = vmmov %vm13110_vm3  ;;  %vm13117_vm3 = vcmask 1040384   ;;  %vm13119_vm7 = vcmask 1041409   ;;  %v5482_v57 = vsel %vm5266_vm5, %v5223_v10, %v5222_v40 }
 0x8a9   :  { %v5070_v29 = vsel %vm13116_vm6, %v4629_v30, %v4887_v50  ;;  %v5495_v49 = vsel %vm13117_vm3, %v11173_v38, %v11166_v20  ;;  %v5502_v50 = vsel %vm13119_vm7, %v11173_v38, %v11166_v20  ;;  %vm13120_vm15 = vmmov %vm13116_vm6 }
 0x8aa   :  { %v5090_v8 = vsel %vm13120_vm15, %v4670_v59, %v4967_v58  ;;  %v11205_v2 = vrot.slane %v5070_v29, 4  ;;  %vm13121_vm4 = vmmov %vm13116_vm6  ;;  %vm13127_vm15 = vcmask 1043456  }
 0x8ab   :  { %v4927_v61 = vpop.permute.xlu0 %4926  ;;  %vm13122_vm2 = vmmov %vm13117_vm3  ;;  %v5231_v63 = vrot.slane %v5090_v8, 2 }
 0x8ac   :  { %v4965_v13 = vpop.permute.xlu1 %4964  ;;  %v11164_v53 = vpop.permute.xlu2 %4848  ;;  %v5080_v60 = vsel %vm13111_vm10, %v4649_v14, %v4927_v61  ;;  %vm13118_vm10 = vmmov %vm13116_vm6  ;;  %v4690_v61 = vld [vmem:[#allocation4 + $0x62] sm:$0x1f]  ;;  %v5490_v4 = vsel %vm13122_vm2, %v5222_v40, %v5223_v10 }
 0x8ad   :  { %v11191_v35 = vrot.slane %v5080_v60, 3  ;;  %v5089_v37 = vsel %vm13118_vm10, %v4669_v55, %v4965_v13  ;;  %vm13123_vm6 = vmmov %vm13121_vm4  ;;  %v5497_v13 = vsel %vm2339_vm0, %v5495_v49, %v5496_v44 }
 0x8ae   :  { %v5224_v58 = vrot.slane %v5089_v37, 2  ;;  %vm13124_vm3 = vmmov %vm13122_vm2  ;;  %vm13129_vm2 = vcmask 1045506  }
 0x8af   :  { %v5498_v21 = vsel %vm1849_vm11, %v11205_v2, %v11191_v35  ;;  %vm13125_vm10 = vmmov %vm13119_vm7  ;;  %vm13126_vm7 = vcmask 1045504  }
 0x8b3   :  { %v5005_v19 = vpop.permute.xlu0 %5004 }
 0x8b4   :  { %v5099_v46 = vsel %vm13121_vm4, %v4689_v33, %v5005_v19  ;;  %v5007_v28 = vpop.permute.xlu1 %5006  ;;  %v11218_v14 = vpop.permute.xlu2 %4770  ;;  %vm13128_vm4 = vcmask 1044481  }
 0x8b5   :  { %v5225_v18 = vrot.slane %v5099_v46, 1  ;;  %v5100_v48 = vsel %vm13123_vm6, %v4690_v61, %v5007_v28  ;;  %vm13130_vm6 = vcmask 1046531  }
 0x8b6   :  { %v5232_v41 = vrot.slane %v5100_v48, 1 }
 0x8b7   :  { %v5460_v0 = vsel %vm1855_vm14, %v5224_v58, %v5225_v18  ;;  %v5467_v36 = vsel %vm5266_vm5, %v5225_v18, %v5224_v58  ;;  %v5475_v7 = vsel %vm13124_vm3, %v5224_v58, %v5225_v18  ;;  %v5483_v3 = vsel %vm13125_vm10, %v5224_v58, %v5225_v18  ;;  %vm13132_vm10 = vmmov %vm13127_vm15 }
 0x8b8   :  { %v5461_v45 = vsel %vm3780_vm12, %v5459_v26, %v5460_v0  ;;  %v5468_v40 = vsel %vm5268_vm1, %v5466_v9, %v5467_v36  ;;  %v5476_v60 = vsel %vm13126_vm7, %v5475_v7, %v5474_v52  ;;  %v5484_v10 = vsel %vm5287_vm8, %v5483_v3, %v5482_v57  ;;  %vm13133_vm7 = vmmov %vm13132_vm10  ;;  %v5697_v3 = vld [vmem:[%s13017_s9 + $0x170] sm:$0xff] }
 0x8b9   :  { %v5462_v44 = vsel %vm13127_vm15, %v5458_v51, %v5461_v45  ;;  %v5469_v30 = vsel %vm13128_vm4, %v5465_v17, %v5468_v40  ;;  %v5477_v29 = vsel %vm13129_vm2, %v5473_v39, %v5476_v60  ;;  %v5485_v55 = vsel %vm13130_vm6, %v5481_v15, %v5484_v10  ;;  %vm13134_vm15 = vmmov %vm13128_vm4  ;;  %v5696_v45 = vld [vmem:[%s13017_s9 + $0x168] sm:$0xff]  ;;  %6025 = vmatpush.msra.mxu0 %v5697_v3 }
 0x8ba   :  { %v5470_v49 = vrot.slane %v5469_v30, 1  ;;  %v5478_v59 = vrot.slane %v5477_v29, 2  ;;  %v5486_v37 = vrot.slane %v5485_v55, 3  ;;  %v5491_v8 = vsel %vm1843_vm9, %v5224_v58, %v5225_v18  ;;  %5835 = vst [vmem:[#allocation1 + $0x1] ss:$9 sm:$0xff] %v5462_v44  ;;  %v5695_v29 = vld [vmem:[%s13017_s9 + $0x160] sm:$0xff] }
 0x8bb   :  { %v5505_v26 = vsel %vm1852_vm13, %v11205_v2, %v11191_v35  ;;  %v5492_v9 = vsel %vm2339_vm0, %v5490_v4, %v5491_v8  ;;  %v5499_v51 = vsel %vm1855_vm14, %v5231_v63, %v5232_v41  ;;  %v5506_v17 = vsel %vm5266_vm5, %v5232_v41, %v5231_v63  ;;  %v11235_v33 = vpop.permute.xlu0 %4888  ;;  %6026 = vmatpush.msra.mxu0 %v5696_v45 }
 0x8bc   :  { %vm13131_vm3 = vcmask 1042433   ;;  %v5493_v15 = vsel %vm13132_vm10, %v5492_v9, %v5489_v23  ;;  %5836 = vst [vmem:[#allocation1 + $0x2] ss:$9 sm:$0xff] %v5470_v49  ;;  %v5500_v19 = vsel %vm3780_vm12, %v5498_v21, %v5499_v51  ;;  %v5507_v54 = vsel %vm5268_vm1, %v5505_v26, %v5506_v17  ;;  %v4809_v52 = vpop.permute.xlu1 %4808 }
 0x8bd   :  { %v5504_v39 = vsel %vm13131_vm3, %v5502_v50, %v5503_v27  ;;  %v5494_v57 = vrot.slane %v5493_v15, 4  ;;  %5837 = vst [vmem:[#allocation1 + $0x3] ss:$9 sm:$0xff] %v5478_v59  ;;  %v5501_v46 = vsel %vm13133_vm7, %v5497_v13, %v5500_v19  ;;  %vm13135_vm4 = vcmask 1040384   ;;  %v11245_v23 = vpop.permute.xlu2 %4968  ;;  %v5694_v15 = vld [vmem:[%s13017_s9 + $0x158] sm:$0xff]  ;;  %6027 = vmatpush.msra.mxu0 %v5695_v29 }
 0x8be   :  { %v5508_v61 = vsel %vm13134_vm15, %v5504_v39, %v5507_v54  ;;  %5838 = vst [vmem:[#allocation1 + $0x4] ss:$9 sm:$0xff] %v5486_v37  ;;  %v5514_v4 = vsel %vm13135_vm4, %v5231_v63, %v5232_v41  ;;  %vm13136_vm2 = vcmask 1041409   ;;  %v5510_v50 = vsel %vm1843_vm9, %v11173_v38, %v11166_v20  ;;  %vm13139_vm10 = vmmov %vm13135_vm4  ;;  %v4589_v54 = vld [vmem:[#allocation4 + $0x58] sm:$0x1f] }
 0x8bf   :  { %v5509_v28 = vrot.slane %v5508_v61, 1  ;;  %5839 = vst [vmem:[#allocation1 + $0x5] ss:$9 sm:$0xff] %v5494_v57  ;;  %v5522_v27 = vsel %vm13136_vm2, %v5231_v63, %v5232_v41  ;;  %v5513_v58 = vsel %vm1855_vm14, %v11205_v2, %v11191_v35  ;;  %v5530_v18 = vsel %vm1843_vm9, %v5231_v63, %v5232_v41  ;;  %6028 = vmatpush.msra.mxu0 %v5694_v15  ;;  %v4609_v61 = vld [vmem:[#allocation4 + $0x5a] sm:$0x1f] }
 0x8c0   :  { %5840 = vst [vmem:[#allocation1 + $0x6] ss:$9 sm:$0xff] %v5501_v46  ;;  %vm13137_vm6 = vcmask 1043459   ;;  %v5521_v13 = vsel %vm5266_vm5, %v11191_v35, %v11205_v2  ;;  %vm13138_vm3 = vcmask 1045504   ;;  %v5511_v0 = vsel %vm1849_vm11, %v11155_v47, %v11159_v6  ;;  %v4569_v46 = vld [vmem:[#allocation4 + $0x52] sm:$0x1f] }
 0x8c1   :  { %5841 = vst [vmem:[#allocation1 + $0x7] ss:$9 sm:$0xff] %v5509_v28  ;;  %v5518_v48 = vsel %vm13137_vm6, %v11173_v38, %v11166_v20  ;;  %v5515_v21 = vsel %vm13138_vm3, %v5514_v4, %v5513_v58  ;;  %v5526_v36 = vsel %vm1849_vm11, %v11173_v38, %v11166_v20  ;;  %v5529_v63 = vsel %vm13139_vm10, %v11205_v2, %v11191_v35 }
 0x8c2   :  { %v5523_v41 = vsel %vm5287_vm8, %v5522_v27, %v5521_v13  ;;  %v5519_v20 = vsel %vm1852_vm13, %v11155_v47, %v11159_v6  ;;  %vm13140_vm7 = vcmask 1043458   ;;  %v5531_v35 = vsel %vm2339_vm0, %v5529_v63, %v5530_v18 }
 0x8c3   :  { %v11271_v7 = vpop.permute.xlu0 %4772  ;;  %v5512_v38 = vsel %vm13140_vm7, %v5510_v50, %v5511_v0  ;;  %v5527_v40 = vsel %vm1855_vm14, %v11155_v47, %v11159_v6  ;;  %vm13141_vm15 = vcmask 1044483   ;;  %vm13142_vm4 = vcmask 1045506  }
 0x8c4   :  { %v4929_v2 = vpop.permute.xlu1 %4928  ;;  %v5520_v60 = vsel %vm13141_vm15, %v5518_v48, %v5519_v20  ;;  %v5516_v10 = vsel %vm13142_vm4, %v5512_v38, %v5515_v21  ;;  %v5528_v44 = vsel %vm3780_vm12, %v5526_v36, %v5527_v40  ;;  %vm13143_vm2 = vcmask 1046531   ;;  %v4673_v48 = vld [vmem:[#allocation4 + $0x78] sm:$0x1f]  ;;  %v4650_v21 = vld [vmem:[#allocation4 + $0x62] sm:$0x1f]  ;;  %v5746_v38 = vld [vmem:[%s13017_s9 + $0x2f8] sm:$0xff] }
 0x8c5   :  { %v5524_v30 = vsel %vm13143_vm2, %v5520_v60, %v5523_v41  ;;  %vm13144_vm6 = vcmask 1043456   ;;  %v5517_v47 = vrot.slane %v5516_v10, 2  ;;  %vm13145_vm3 = vcmask 523264   ;;  %v4549_v36 = vld [vmem:[#allocation4 + $0x50] sm:$0x1f]  ;;  %v5691_v10 = vld [vmem:[%s13017_s9 + $0x140] sm:$0xff]  ;;  %6138 = vmatpush.msrb.mxu3 %v5746_v38 }
 0x8c6   :  { %v5532_v55 = vsel %vm13144_vm6, %v5531_v35, %v5528_v44  ;;  %v5525_v51 = vrot.slane %v5524_v30, 3  ;;  %v5051_v57 = vsel %vm13145_vm3, %v4589_v54, %v4809_v52  ;;  %v7995_v4 = vunpack.i.h.bf16 %v10446_v11  ;;  %vm13146_vm10 = vmmov %vm13145_vm3  ;;  %v4693_v52 = vld [vmem:[#allocation4 + $0x7a] sm:$0x1f]  ;;  %v4630_v20 = vld [vmem:[#allocation4 + $0x60] sm:$0x1f] }
 0x8c7   :  { %v11297_v6 = vpop.permute.xlu2 %4812  ;;  %v5533_v19 = vrot.slane %v5532_v55, 4  ;;  %v7994_v27 = vunpack.i.l.bf16 %v10446_v11  ;;  %v5041_v50 = vsel %vm13146_vm10, %v4569_v46, %v11138_v42  ;;  %vm13147_vm7 = vmmov %vm13145_vm3  ;;  %v5234_v13 = vrot.slane %v5051_v57, 6  ;;  %v5693_v11 = vld [vmem:[%s13017_s9 + $0x150] sm:$0xff]  ;;  %v5692_v42 = vld [vmem:[%s13017_s9 + $0x148] sm:$0xff] }
 0x8c8   :  { %v5842_v49 = vld [vmem:[#allocation1] sm:$0xff]  ;;  %v5843_v59 = vld [vmem:[#allocation1 + $0x9] sm:$0xff]  ;;  %v11295_v37 = vld [vmem:[#allocation1 + $0x12] sm:$0xff]  ;;  %v5061_v58 = vsel %vm13147_vm7, %v4609_v61, %v11164_v53  ;;  %v5233_v63 = vrot.slane %v5041_v50, 7  ;;  %6029 = vmatpush.msra.mxu0 %v5693_v11  ;;  %vm13153_vm10 = vcmask 1043459   ;;  %vm13154_vm7 = vcmask 1040384  }
 0x8c9   :  { %v5845_v8 = vld [vmem:[#allocation1 + $0x1b] sm:$0xff]  ;;  %v11299_v26 = vld [vmem:[#allocation1 + $0x2d] sm:$0xff]  ;;  %5973 = vmatmul.f32.gmra.mxu0 %v5842_v49  ;;  %6011 = vmatmul.f32.gmra.mxu3 %v5843_v59  ;;  %v5846_v39 = vld [vmem:[#allocation1 + $0x24] sm:$0xff]  ;;  %v5235_v41 = vrot.slane %v5061_v58, 5 }
 0x8ca   :  { %v11301_v9 = vld [vmem:[#allocation1 + $0x36] sm:$0xff]  ;;  %v11303_v17 = vld [vmem:[#allocation1 + $0x3f] sm:$0xff]  ;;  %6087 = vmatmul.f32.gmra.mxu1 %v5845_v8  ;;  %6125 = vmatmul.f32.gmra.mxu2 %v5846_v39  ;;  %vm13148_vm15 = vmmov %vm13145_vm3 }
 0x8cb   :  { %5850 = vst [vmem:[#allocation1] ss:$9 sm:$0xff] %v5517_v47  ;;  %v11309_v28 = vpop.permute.xlu0 %4850  ;;  %v5081_v3 = vsel %vm13148_vm15, %v4650_v21, %v4929_v2  ;;  %vm13149_vm4 = vmmov %vm13145_vm3  ;;  %v5778_v35 = vld [vmem:[%s13017_s9 + $0x3f8] sm:$0xff]  ;;  %v5535_v60 = vsel %vm1843_vm9, %v5234_v13, %v5235_v41  ;;  %v5542_v44 = vsel %vm13153_vm10, %v5234_v13, %v5235_v41  ;;  %v5550_v30 = vsel %vm1849_vm11, %v5234_v13, %v5235_v41  ;;  %v4671_v55 = vld [vmem:[#allocation4 + $0x68] sm:$0x1f] }
 0x8cc   :  { %5851 = vst [vmem:[#allocation1 + $0x1] ss:$9 sm:$0xff] %v5525_v51  ;;  %v11317_v18 = vpop.permute.xlu1 %4810  ;;  %v5103_v53 = vsel %vm13149_vm4, %v4693_v52, %v7995_v4  ;;  %vm13150_vm2 = vmmov %vm13145_vm3  ;;  %6214 = vmatpush.msrb.mxu1 %v5778_v35  ;;  %v5558_v29 = vsel %vm1852_vm13, %v5234_v13, %v5235_v41  ;;  %v5237_v49 = vrot.slane %v5081_v3, 3  ;;  %6030 = vmatpush.msra.mxu0 %v5692_v42  ;;  %vm13155_vm15 = vcmask 1041409   ;;  %v4691_v4 = vld [vmem:[#allocation4 + $0x6a] sm:$0x1f] }
 0x8cd   :  { %5852 = vst [vmem:[#allocation1 + $0x2] ss:$9 sm:$0xff] %v5533_v19  ;;  %v5093_v45 = vsel %vm13150_vm2, %v4673_v48, %v7994_v27  ;;  %vm13151_vm6 = vmmov %vm13150_vm2  ;;  %v4610_v58 = vld [vmem:[#allocation4 + $0x62] sm:$0x1f] }
 0x8ce   :  { %v5031_v2 = vsel %vm13151_vm6, %v4549_v36, %v11127_v43  ;;  %vm13152_vm3 = vmmov %vm13150_vm2  ;;  %v11347_v43 = vrot.slane %v5103_v53, 1  ;;  %6031 = vmatpush.msra.mxu0 %v5691_v10  ;;  %vm13158_vm6 = vcmask 1042433   ;;  %v4590_v48 = vld [vmem:[#allocation4 + $0x60] sm:$0x1f]  ;;  %v5690_v53 = vld [vmem:[%s13017_s9 + $0x138] sm:$0xff] }
 0x8cf   :  { %v11319_v0 = vpop.permute.xlu2 %4890  ;;  %v5071_v40 = vsel %vm13152_vm3, %v4630_v20, %v11235_v33  ;;  %v5534_v33 = vsel %vm13154_vm7, %v5031_v2, %v5233_v63  ;;  %v5541_v59 = vsel %vm13155_vm15, %v5031_v2, %v5233_v63  ;;  %vm13156_vm4 = vmmov %vm13150_vm2  ;;  %v5549_v8 = vsel %vm1843_vm9, %v5031_v2, %v5233_v63 }
 0x8d0   :  { %v5091_v47 = vsel %vm13156_vm4, %v4671_v55, %v11245_v23  ;;  %vm13157_vm2 = vmmov %vm13153_vm10  ;;  %v5565_v39 = vsel %vm1849_vm11, %v5031_v2, %v5233_v63  ;;  %v5236_v15 = vrot.slane %v5071_v40, 4  ;;  %v5536_v19 = vsel %vm2339_vm0, %v5534_v33, %v5535_v60  ;;  %v5744_v40 = vld [vmem:[%s13017_s9 + $0x2e8] sm:$0xff]  ;;  %6032 = vmatpush.msra.mxu0 %v5690_v53  ;;  %v4652_v53 = vld [vmem:[#allocation4 + $0x72] sm:$0x1f] }
 0x8d1   :  { %v5557_v51 = vsel %vm13157_vm2, %v5031_v2, %v5233_v63  ;;  %v5543_v54 = vsel %vm13158_vm6, %v5541_v59, %v5542_v44  ;;  %vm13159_vm3 = vcmask 1043458   ;;  %vm13160_vm10 = vcmask 1044483   ;;  %vm13161_vm7 = vmmov %vm13156_vm4  ;;  %v5776_v60 = vld [vmem:[%s13017_s9 + $0x3e8] sm:$0xff]  ;;  %v5775_v59 = vld [vmem:[%s13017_s9 + $0x3e0] sm:$0xff] }
 0x8d2   :  { %v5551_v57 = vsel %vm13159_vm3, %v5549_v8, %v5550_v30  ;;  %v5559_v46 = vsel %vm13160_vm10, %v5557_v51, %v5558_v29  ;;  %v5566_v23 = vsel %vm1855_vm14, %v5234_v13, %v5235_v41  ;;  %v5238_v27 = vrot.slane %v5091_v47, 2  ;;  %v5745_v13 = vld [vmem:[%s13017_s9 + $0x2f0] sm:$0xff]  ;;  %vm13163_vm2 = vmmov %vm13156_vm4 }
 0x8d3   :  { %v5009_v61 = vpop.permute.xlu0 %5008  ;;  %v5537_v50 = vsel %vm1849_vm11, %v5236_v15, %v5237_v49  ;;  %v5544_v36 = vsel %vm1852_vm13, %v5236_v15, %v5237_v49  ;;  %v5552_v63 = vsel %vm1855_vm14, %v5236_v15, %v5237_v49  ;;  %v5560_v3 = vsel %vm5266_vm5, %v5237_v49, %v5236_v15  ;;  %v5777_v41 = vld [vmem:[%s13017_s9 + $0x3f0] sm:$0xff]  ;;  %6139 = vmatpush.msrb.mxu3 %v5745_v13 }
 0x8d4   :  { %v5101_v52 = vsel %vm13161_vm7, %v4691_v4, %v5009_v61  ;;  %v11377_v20 = vrot.slane %v5093_v45, 2  ;;  %vm13162_vm15 = vcmask 1040384   ;;  %v5062_v35 = vsel %vm13156_vm4, %v4610_v58, %v11309_v28  ;;  %6215 = vmatpush.msrb.mxu1 %v5777_v41  ;;  %v5689_v30 = vld [vmem:[%s13017_s9 + $0x130] sm:$0xff]  ;;  %v5742_v61 = vld [vmem:[%s13017_s9 + $0x2d8] sm:$0xff] }
 0x8d5   :  { %v4853_v21 = vpop.permute.xlu1 %4852  ;;  %v5239_v11 = vrot.slane %v5101_v52, 1  ;;  %v5568_v38 = vsel %vm13162_vm15, %v5236_v15, %v5237_v49  ;;  %v5052_v2 = vsel %vm13163_vm2, %v4590_v48, %v11317_v18  ;;  %vm13164_vm6 = vmmov %vm13162_vm15  ;;  %vm13165_vm3 = vcmask 1041409   ;;  %v5743_v18 = vld [vmem:[%s13017_s9 + $0x2e0] sm:$0xff]  ;;  %6140 = vmatpush.msrb.mxu3 %v5744_v40  ;;  %v4591_v4 = vld [vmem:[#allocation4 + $0x68] sm:$0x1f]  ;;  %6033 = vmatpush.msra.mxu0 %v5689_v30 }
 0x8d6   :  { %vm13166_vm10 = vcmask 1045504   ;;  %vm13167_vm7 = vcmask 1043456   ;;  %vm13168_vm15 = vcmask 1044481   ;;  %vm13169_vm4 = vcmask 1045506   ;;  %6216 = vmatpush.msrb.mxu1 %v5776_v60 }
 0x8d7   :  { %v11366_v42 = vpop.permute.xlu2 %4932  ;;  %v5538_v45 = vsel %vm1855_vm14, %v5238_v27, %v5239_v11  ;;  %v5545_v10 = vsel %vm5266_vm5, %v5239_v11, %v5238_v27  ;;  %v5553_v44 = vsel %vm13164_vm6, %v5238_v27, %v5239_v11  ;;  %v5561_v28 = vsel %vm13165_vm3, %v5238_v27, %v5239_v11  ;;  %6141 = vmatpush.msrb.mxu3 %v5743_v18  ;;  %vm13171_vm6 = vmmov %vm13167_vm7  ;;  %v5773_v18 = vld [vmem:[%s13017_s9 + $0x3d0] sm:$0xff] }
 0x8d8   :  { %v5539_v29 = vsel %vm3780_vm12, %v5537_v50, %v5538_v45  ;;  %v5546_v55 = vsel %vm5268_vm1, %v5544_v36, %v5545_v10  ;;  %v5554_v49 = vsel %vm13166_vm10, %v5553_v44, %v5552_v63  ;;  %v5562_v33 = vsel %vm5287_vm8, %v5561_v28, %v5560_v3  ;;  %v4611_v36 = vld [vmem:[#allocation4 + $0x6a] sm:$0x1f]  ;;  %v4632_v63 = vld [vmem:[#allocation4 + $0x70] sm:$0x1f]  ;;  %6217 = vmatpush.msrb.mxu1 %v5775_v59  ;;  %v5687_v59 = vld [vmem:[%s13017_s9 + $0x120] sm:$0xff] }
 0x8d9   :  { %v5540_v47 = vsel %vm13167_vm7, %v5536_v19, %v5539_v29  ;;  %v5547_v8 = vsel %vm13168_vm15, %v5543_v54, %v5546_v55  ;;  %v5555_v51 = vsel %vm13169_vm4, %v5551_v57, %v5554_v49  ;;  %vm13170_vm2 = vcmask 1046531   ;;  %v5774_v19 = vld [vmem:[%s13017_s9 + $0x3d8] sm:$0xff]  ;;  %v4651_v45 = vld [vmem:[#allocation4 + $0x6a] sm:$0x1f]  ;;  %6142 = vmatpush.msrb.mxu3 %v5742_v61 }
 0x8da   :  { %v5563_v15 = vsel %vm13170_vm2, %v5559_v46, %v5562_v33  ;;  %v5548_v50 = vrot.slane %v5547_v8, 1  ;;  %v5556_v58 = vrot.slane %v5555_v51, 2  ;;  %v5569_v52 = vsel %vm1843_vm9, %v5238_v27, %v5239_v11  ;;  %5853 = vst [vmem:[#allocation1 + $0x3] ss:$9 sm:$0xff] %v5540_v47  ;;  %v5688_v27 = vld [vmem:[%s13017_s9 + $0x128] sm:$0xff]  ;;  %6218 = vmatpush.msrb.mxu1 %v5774_v19 }
 0x8db   :  { %v5564_v48 = vrot.slane %v5563_v15, 3  ;;  %v5567_v54 = vsel %vm3780_vm12, %v5565_v39, %v5566_v23  ;;  %v5242_v57 = vrot.slane %v5062_v35, 5  ;;  %v5570_v46 = vsel %vm2339_vm0, %v5568_v38, %v5569_v52  ;;  %v4893_v3 = vpop.permute.xlu0 %4892  ;;  %v4570_v35 = vld [vmem:[#allocation4 + $0x5a] sm:$0x1f]  ;;  %v4571_v38 = vld [vmem:[#allocation4 + $0x62] sm:$0x1f]  ;;  %6034 = vmatpush.msra.mxu0 %v5688_v27 }
 0x8dc   :  { %v5241_v11 = vrot.slane %v5052_v2, 6  ;;  %v5571_v13 = vsel %vm13171_vm6, %v5570_v46, %v5567_v54  ;;  %5854 = vst [vmem:[#allocation1 + $0x4] ss:$9 sm:$0xff] %v5548_v50  ;;  %vm13172_vm3 = vcmask 523264   ;;  %v11431_v2 = vsel %vm1855_vm14, %v11377_v20, %v11347_v43  ;;  %v4631_v10 = vld [vmem:[#allocation4 + $0x68] sm:$0x1f]  ;;  %6219 = vmatpush.msrb.mxu1 %v5773_v18 }
 0x8dd   :  { %v5063_v41 = vsel %vm13172_vm3, %v4611_v36, %v4853_v21  ;;  %vm13173_vm10 = vmmov %vm13172_vm3  ;;  %v5572_v60 = vrot.slane %v5571_v13, 4  ;;  %5855 = vst [vmem:[#allocation1 + $0x5] ss:$9 sm:$0xff] %v5556_v58  ;;  %v5741_v21 = vld [vmem:[%s13017_s9 + $0x2d0] sm:$0xff]  ;;  %v11442_v28 = vsel %vm5266_vm5, %v11347_v43, %v11377_v20  ;;  %vm13178_vm6 = vcmask 1040384   ;;  %v5740_v33 = vld [vmem:[%s13017_s9 + $0x2c8] sm:$0xff]  ;;  %6035 = vmatpush.msra.mxu0 %v5687_v59 }
 0x8de   :  { %v5073_v39 = vsel %vm13173_vm10, %v4632_v63, %v4893_v3  ;;  %vm13174_vm7 = vmmov %vm13172_vm3  ;;  %5856 = vst [vmem:[#allocation1 + $0x6] ss:$9 sm:$0xff] %v5564_v48  ;;  %v11449_v29 = vrot.slane %v5063_v41, 5  ;;  %v5631_v49 = vsel %vm13178_vm6, %v11377_v20, %v11347_v43  ;;  %v11471_v51 = vsel %vm1843_vm9, %v5241_v11, %v5242_v57  ;;  %6143 = vmatpush.msrb.mxu3 %v5741_v21  ;;  %v5772_v15 = vld [vmem:[%s13017_s9 + $0x3c8] sm:$0xff]  ;;  %v4692_v50 = vld [vmem:[#allocation4 + $0x72] sm:$0x1f] }
 0x8df   :  { %v4931_v23 = vpop.permute.xlu1 %4930  ;;  %v5053_v40 = vsel %vm13174_vm7, %v4591_v4, %v11297_v6  ;;  %vm13175_vm15 = vmmov %vm13172_vm3  ;;  %5857 = vst [vmem:[#allocation1 + $0x7] ss:$9 sm:$0xff] %v5572_v60  ;;  %v11451_v55 = vrot.slane %v5073_v39, 4  ;;  %vm13181_vm7 = vcmask 1043459   ;;  %v5739_v58 = vld [vmem:[%s13017_s9 + $0x2c0] sm:$0xff]  ;;  %v5686_v48 = vld [vmem:[%s13017_s9 + $0x118] sm:$0xff]  ;;  %v11496_v54 = vsel %vm1852_vm13, %v5241_v11, %v5242_v57  ;;  %6220 = vmatpush.msrb.mxu1 %v5772_v15 }
 0x8e0   :  { %v5083_v44 = vsel %vm13175_vm15, %v4652_v53, %v11366_v42  ;;  %vm13176_vm4 = vmmov %vm13172_vm3  ;;  %v5011_v42 = vpop.permute.xlu2 %5010  ;;  %v11468_v8 = vrot.slane %v5053_v40, 6  ;;  %v11499_v46 = vsel %vm1855_vm14, %v5241_v11, %v5242_v57  ;;  %6144 = vmatpush.msrb.mxu3 %v5740_v33  ;;  %v5771_v36 = vld [vmem:[%s13017_s9 + $0x3c0] sm:$0xff]  ;;  %v4672_v3 = vld [vmem:[#allocation4 + $0x70] sm:$0x1f]  ;;  %6036 = vmatpush.msra.mxu0 %v5686_v48 }
 0x8e1   :  { %v5082_v6 = vsel %vm13176_vm4, %v4651_v45, %v4931_v23  ;;  %vm13177_vm2 = vmmov %vm13172_vm3  ;;  %v11476_v61 = vrot.slane %v5083_v44, 3  ;;  %v5738_v41 = vld [vmem:[%s13017_s9 + $0x2b8] sm:$0xff]  ;;  %6221 = vmatpush.msrb.mxu1 %v5771_v36 }
 0x8e2   :  { %v5072_v30 = vsel %vm13177_vm2, %v4631_v10, %v11319_v0  ;;  %vm13179_vm3 = vmmov %vm13177_vm2  ;;  %v11478_v4 = vrot.slane %v5082_v6, 3  ;;  %v5613_v13 = vsel %vm1843_vm9, %v11468_v8, %v11449_v29  ;;  %6145 = vmatpush.msrb.mxu3 %v5739_v58  ;;  %v5770_v48 = vld [vmem:[%s13017_s9 + $0x3b8] sm:$0xff] }
 0x8e3   :  { %v11464_v0 = vsel %vm13179_vm3, %v4570_v35, %v11218_v14  ;;  %vm13180_vm10 = vmmov %vm13177_vm2  ;;  %v11481_v14 = vsel %vm13181_vm7, %v5241_v11, %v5242_v57  ;;  %v11492_v52 = vrot.slane %v5072_v30, 4  ;;  %v5615_v63 = vsel %vm1849_vm11, %v11451_v55, %v11476_v61  ;;  %v4971_v27 = vpop.permute.xlu0 %4970  ;;  %6222 = vmatpush.msrb.mxu1 %v5770_v48  ;;  %v5736_v48 = vld [vmem:[%s13017_s9 + $0x2a8] sm:$0xff] }
 0x8e4   :  { %v5043_v47 = vsel %vm13180_vm10, %v4571_v38, %v11271_v7  ;;  %v11484_v7 = vsel %vm1849_vm11, %v5241_v11, %v5242_v57  ;;  %vm13182_vm15 = vmmov %vm13177_vm2  ;;  %v5628_v11 = vsel %vm1849_vm11, %v11468_v8, %v11449_v29  ;;  %v5622_v39 = vsel %vm1852_vm13, %v11451_v55, %v11476_v61  ;;  %v4551_v38 = vld [vmem:[#allocation4 + $0x60] sm:$0x1f]  ;;  %6146 = vmatpush.msrb.mxu3 %v5738_v41 }
 0x8e5   :  { %v5102_v19 = vsel %vm13182_vm15, %v4692_v50, %v5011_v42  ;;  %vm13183_vm4 = vmmov %vm13181_vm7  ;;  %v11519_v53 = vrot.slane %v5043_v47, 7  ;;  %v5630_v23 = vsel %vm1855_vm14, %v11451_v55, %v11476_v61  ;;  %v5092_v35 = vsel %vm13177_vm2, %v4672_v3, %v4971_v27  ;;  %v5685_v27 = vld [vmem:[%s13017_s9 + $0x110] sm:$0xff] }
 0x8e6   :  { %v5620_v57 = vsel %vm13183_vm4, %v11468_v8, %v11449_v29  ;;  %v5576_v60 = vsel %vm1849_vm11, %v11492_v52, %v11478_v4  ;;  %v5246_v45 = vrot.slane %v5102_v19, 1  ;;  %v5245_v21 = vrot.slane %v5092_v35, 2  ;;  %vm13184_vm6 = vmmov %vm13177_vm2  ;;  %v5858_v42 = vld [vmem:[#allocation1] sm:$0xff]  ;;  %v5859_v33 = vld [vmem:[#allocation1 + $0x9] sm:$0xff]  ;;  %6037 = vmatpush.msra.mxu0 %v5685_v27 }
 0x8e7   :  { %v4733_v40 = vpop.permute.xlu1 %4732  ;;  %v5583_v44 = vsel %vm1852_vm13, %v11492_v52, %v11478_v4  ;;  %vm13185_vm3 = vcmask 1040384   ;;  %vm13186_vm10 = vcmask 1041409   ;;  %v5617_v47 = vsel %vm3780_vm12, %v5615_v63, %v11431_v2  ;;  %v5861_v58 = vld [vmem:[#allocation1 + $0x1b] sm:$0xff]  ;;  %5976 = vmatmul.f32.gmra.mxu0 %v5858_v42  ;;  %v5737_v19 = vld [vmem:[%s13017_s9 + $0x2b0] sm:$0xff]  ;;  %6014 = vmatmul.f32.gmra.mxu3 %v5859_v33 }
 0x8e8   :  { %v11532_v10 = vsel %vm13184_vm6, %v4551_v38, %v4733_v40  ;;  %v5577_v59 = vsel %vm1855_vm14, %v5245_v21, %v5246_v45  ;;  %v5624_v15 = vsel %vm5268_vm1, %v5622_v39, %v11442_v28  ;;  %vm13187_vm7 = vcmask 1045504   ;;  %v11562_v63 = vld [vmem:[#allocation1 + $0x12] sm:$0xff]  ;;  %vm13190_vm2 = vmmov %vm13185_vm3  ;;  %6090 = vmatmul.f32.gmra.mxu1 %v5861_v58  ;;  %6147 = vmatpush.msrb.mxu3 %v5737_v19  ;;  %v5767_v27 = vld [vmem:[%s13017_s9 + $0x3a0] sm:$0xff] }
 0x8e9   :  { %v5612_v6 = vsel %vm13185_vm3, %v11532_v10, %v11519_v53  ;;  %v5619_v18 = vsel %vm13186_vm10, %v11532_v10, %v11519_v53  ;;  %v5627_v30 = vsel %vm1843_vm9, %v11532_v10, %v11519_v53  ;;  %v5632_v50 = vsel %vm13187_vm7, %v5631_v49, %v5630_v23  ;;  %v5862_v49 = vld [vmem:[#allocation1 + $0x24] sm:$0xff]  ;;  %v11571_v35 = vld [vmem:[#allocation1 + $0x2d] sm:$0xff]  ;;  %vm13194_vm7 = vmmov %vm13190_vm2 }
 0x8ea   :  { %v5584_v36 = vsel %vm5266_vm5, %v5246_v45, %v5245_v21  ;;  %v5614_v3 = vsel %vm2339_vm0, %v5612_v6, %v5613_v13  ;;  %vm13188_vm15 = vcmask 1042433   ;;  %vm13189_vm4 = vcmask 1043458   ;;  %6128 = vmatmul.f32.gmra.mxu2 %v5862_v49  ;;  %6148 = vmatpush.msrb.mxu3 %v5736_v48 }
 0x8eb   :  { %v5621_v2 = vsel %vm13188_vm15, %v5619_v18, %v5620_v57  ;;  %v5629_v28 = vsel %vm13189_vm4, %v5627_v30, %v5628_v11  ;;  %v5592_v41 = vsel %vm13190_vm2, %v5245_v21, %v5246_v45  ;;  %vm13191_vm6 = vcmask 1043456   ;;  %v11573_v57 = vld [vmem:[#allocation1 + $0x36] sm:$0xff]  ;;  %v11575_v11 = vld [vmem:[#allocation1 + $0x3f] sm:$0xff]  ;;  %v4731_v58 = vpop.permute.xlu0 %4730 }
 0x8ec   :  { %v5618_v39 = vsel %vm13191_vm6, %v5614_v3, %v5617_v47  ;;  %vm13192_vm3 = vcmask 1044481   ;;  %vm13193_vm10 = vcmask 1045506   ;;  %v5591_v38 = vsel %vm1855_vm14, %v11492_v52, %v11478_v4  ;;  %v5769_v30 = vld [vmem:[%s13017_s9 + $0x3b0] sm:$0xff]  ;;  %vm13198_vm6 = vmmov %vm13194_vm7 }
 0x8ed   :  { %v5625_v23 = vsel %vm13192_vm3, %v5621_v2, %v5624_v15  ;;  %v5633_v13 = vsel %vm13193_vm10, %v5629_v28, %v5632_v50  ;;  %v5599_v40 = vsel %vm5266_vm5, %v11478_v4, %v11492_v52  ;;  %5871 = vst [vmem:[#allocation1 + $0x5] ss:$9 sm:$0xff] %v5618_v39  ;;  %v5240_v42 = vrot.slane %v11464_v0, 7  ;;  %v4550_v50 = vld [vmem:[#allocation4 + $0x58] sm:$0x1f]  ;;  %6223 = vmatpush.msrb.mxu1 %v5769_v30  ;;  %v5762_v30 = vld [vmem:[%s13017_s9 + $0x378] sm:$0xff] }
 0x8ee   :  { %v5626_v6 = vrot.slane %v5625_v23, 1  ;;  %v5634_v18 = vrot.slane %v5633_v13, 2  ;;  %v5607_v33 = vsel %vm13194_vm7, %v11492_v52, %v11478_v4  ;;  %vm13195_vm15 = vcmask 1041409   ;;  %v5768_v52 = vld [vmem:[%s13017_s9 + $0x3a8] sm:$0xff] }
 0x8ef   :  { %v5600_v47 = vsel %vm13195_vm15, %v5245_v21, %v5246_v45  ;;  %v5608_v15 = vsel %vm1843_vm9, %v5245_v21, %v5246_v45  ;;  %vm13196_vm4 = vcmask 523264   ;;  %v5578_v0 = vsel %vm3780_vm12, %v5576_v60, %v5577_v59  ;;  %vm13199_vm3 = vmmov %vm13195_vm15  ;;  %v5735_v60 = vld [vmem:[%s13017_s9 + $0x2a0] sm:$0xff]  ;;  %6224 = vmatpush.msrb.mxu1 %v5768_v52 }
 0x8f0   :  { %5872 = vst [vmem:[#allocation1 + $0x6] ss:$9 sm:$0xff] %v5626_v6  ;;  %v5032_v3 = vsel %vm13196_vm4, %v4550_v50, %v4731_v58  ;;  %v5585_v2 = vsel %vm5268_vm1, %v5583_v44, %v5584_v36  ;;  %vm13197_vm2 = vcmask 1045504   ;;  %v5684_v44 = vld [vmem:[%s13017_s9 + $0x108] sm:$0xff]  ;;  %vm13200_vm1 = vcmask 1042433   ;;  %6149 = vmatpush.msrb.mxu3 %v5735_v60 }
 0x8f1   :  { %v5593_v4 = vsel %vm13197_vm2, %v5592_v41, %v5591_v38  ;;  %5873 = vst [vmem:[#allocation1 + $0x7] ss:$9 sm:$0xff] %v5634_v18  ;;  %v5573_v45 = vsel %vm13198_vm6, %v5032_v3, %v5240_v42  ;;  %v5580_v21 = vsel %vm13199_vm3, %v5032_v3, %v5240_v42  ;;  %v5588_v19 = vsel %vm1843_vm9, %v5032_v3, %v5240_v42 }
 0x8f2   :  { %v5575_v59 = vsel %vm2339_vm0, %v5573_v45, %v11471_v51  ;;  %v5582_v36 = vsel %vm13200_vm1, %v5580_v21, %v11481_v14  ;;  %vm13201_vm10 = vcmask 1043458   ;;  %vm13202_vm7 = vcmask 1043459   ;;  %v5734_v14 = vld [vmem:[%s13017_s9 + $0x298] sm:$0xff]  ;;  %6038 = vmatpush.msra.mxu0 %v5684_v44  ;;  %6225 = vmatpush.msrb.mxu1 %v5767_v27  ;;  %v5731_v45 = vld [vmem:[%s13017_s9 + $0x280] sm:$0xff] }
 0x8f3   :  { %v5590_v28 = vsel %vm13201_vm10, %v5588_v19, %v11484_v7  ;;  %v5596_v49 = vsel %vm13202_vm7, %v5032_v3, %v5240_v42  ;;  %vm13203_vm15 = vcmask 1043456   ;;  %vm13204_vm4 = vcmask 1044481   ;;  %v5683_v7 = vld [vmem:[%s13017_s9 + $0x100] sm:$0xff]  ;;  %6150 = vmatpush.msrb.mxu3 %v5734_v14  ;;  %vm13209_vm10 = vmmov %vm13202_vm7 }
 0x8f4   :  { %v5579_v41 = vsel %vm13203_vm15, %v5575_v59, %v5578_v0  ;;  %v5586_v39 = vsel %vm13204_vm4, %v5582_v36, %v5585_v2  ;;  %vm13205_vm2 = vcmask 1045506   ;;  %vm13206_vm6 = vcmask 1044483   ;;  %vm13208_vm1 = vmmov %vm13203_vm15  ;;  %6039 = vmatpush.msra.mxu0 %v5683_v7  ;;  %v5764_v2 = vld [vmem:[%s13017_s9 + $0x388] sm:$0xff] }
 0x8f5   :  { %v5594_v23 = vsel %vm13205_vm2, %v5590_v28, %v5593_v4  ;;  %v5598_v51 = vsel %vm13206_vm6, %v5596_v49, %v11496_v54  ;;  %v5587_v13 = vrot.slane %v5586_v39, 1  ;;  %v5601_v6 = vsel %vm5287_vm8, %v5600_v47, %v5599_v40  ;;  %5866 = vst [vmem:[#allocation1] ss:$9 sm:$0xff] %v5579_v41  ;;  %v5766_v54 = vld [vmem:[%s13017_s9 + $0x398] sm:$0xff]  ;;  %v5760_v4 = vld [vmem:[%s13017_s9 + $0x368] sm:$0xff]  ;;  %vm13211_vm7 = vmmov %vm13206_vm6 }
 0x8f6   :  { %v5595_v38 = vrot.slane %v5594_v23, 2  ;;  %v5604_v18 = vsel %vm1849_vm11, %v5032_v3, %v5240_v42  ;;  %vm13207_vm3 = vcmask 1046531   ;;  %v5609_v40 = vsel %vm2339_vm0, %v5607_v33, %v5608_v15  ;;  %v5733_v42 = vld [vmem:[%s13017_s9 + $0x290] sm:$0xff]  ;;  %6226 = vmatpush.msrb.mxu1 %v5766_v54  ;;  %v5732_v15 = vld [vmem:[%s13017_s9 + $0x288] sm:$0xff]  ;;  %6176 = vmatpush.msrb.mxu0 %v5762_v30 }
 0x8f7   :  { %v5602_v50 = vsel %vm13207_vm3, %v5598_v51, %v5601_v6  ;;  %v5606_v58 = vsel %vm3780_vm12, %v5604_v18, %v11499_v46  ;;  %5867 = vst [vmem:[#allocation1 + $0x1] ss:$9 sm:$0xff] %v5587_v13  ;;  %v5765_v3 = vld [vmem:[%s13017_s9 + $0x390] sm:$0xff]  ;;  %v5635_v0 = vsel %vm13209_vm10, %v11532_v10, %v11519_v53  ;;  %6151 = vmatpush.msrb.mxu3 %v5733_v42  ;;  %v5756_v18 = vld [vmem:[%s13017_s9 + $0x348] sm:$0xff]  ;;  %v5754_v42 = vld [vmem:[%s13017_s9 + $0x338] sm:$0xff] }
 0x8f8   :  { %v5603_v47 = vrot.slane %v5602_v50, 3  ;;  %v5610_v48 = vsel %vm13208_vm1, %v5609_v40, %v5606_v58  ;;  %v5761_v46 = vld [vmem:[%s13017_s9 + $0x370] sm:$0xff]  ;;  %5868 = vst [vmem:[#allocation1 + $0x2] ss:$9 sm:$0xff] %v5595_v38  ;;  %v5643_v52 = vsel %vm1849_vm11, %v11532_v10, %v11519_v53  ;;  %6227 = vmatpush.msrb.mxu1 %v5765_v3  ;;  %v5638_v21 = vsel %vm5266_vm5, %v11476_v61, %v11451_v55  ;;  %v5763_v53 = vld [vmem:[%s13017_s9 + $0x380] sm:$0xff] }
 0x8f9   :  { %v5611_v33 = vrot.slane %v5610_v48, 4  ;;  %6177 = vmatpush.msrb.mxu0 %v5761_v46  ;;  %v5636_v19 = vsel %vm1852_vm13, %v11468_v8, %v11449_v29  ;;  %6152 = vmatpush.msrb.mxu3 %v5732_v15  ;;  %vm13210_vm11 = vcmask 1040384   ;;  %v5644_v44 = vsel %vm1855_vm14, %v11468_v8, %v11449_v29  ;;  %v5759_v29 = vld [vmem:[%s13017_s9 + $0x360] sm:$0xff]  ;;  %v5758_v8 = vld [vmem:[%s13017_s9 + $0x358] sm:$0xff]  ;;  %vm13213_vm14 = vmmov %vm13207_vm3 }
 0x8fa   :  { %5869 = vst [vmem:[#allocation1 + $0x3] ss:$9 sm:$0xff] %v5603_v47  ;;  %v5646_v10 = vsel %vm13210_vm11, %v11451_v55, %v11476_v61  ;;  %v5637_v60 = vsel %vm13211_vm7, %v5635_v0, %v5636_v19  ;;  %6228 = vmatpush.msrb.mxu1 %v5764_v2  ;;  %vm13212_vm13 = vcmask 1041409   ;;  %v5645_v36 = vsel %vm3780_vm12, %v5643_v52, %v5644_v44  ;;  %vm13214_vm12 = vmmov %vm13208_vm1  ;;  %v5757_v6 = vld [vmem:[%s13017_s9 + $0x350] sm:$0xff]  ;;  %v5755_v40 = vld [vmem:[%s13017_s9 + $0x340] sm:$0xff] }
 0x8fb   :  { %5870 = vst [vmem:[#allocation1 + $0x4] ss:$9 sm:$0xff] %v5611_v33  ;;  %6178 = vmatpush.msrb.mxu0 %v5760_v4  ;;  %v5639_v59 = vsel %vm13212_vm13, %v11377_v20, %v11347_v43  ;;  %6153 = vmatpush.msrb.mxu3 %v5731_v45  ;;  %v5647_v28 = vsel %vm1843_vm9, %v11377_v20, %v11347_v43  ;;  %v5753_v47 = vld [vmem:[%s13017_s9 + $0x330] sm:$0xff]  ;;  %v5752_v48 = vld [vmem:[%s13017_s9 + $0x328] sm:$0xff]  ;;  %v5751_v3 = vld [vmem:[%s13017_s9 + $0x320] sm:$0xff] }
 0x8fc   :  { %v5640_v55 = vsel %vm5287_vm8, %v5639_v59, %v5638_v21  ;;  %6229 = vmatpush.msrb.mxu1 %v5763_v53  ;;  %v5648_v49 = vsel %vm2339_vm0, %v5646_v10, %v5647_v28  ;;  %vm13215_vm11 = vmmov %vm13214_vm12 }
 0x8fd   :  { %v5641_v61 = vsel %vm13213_vm14, %v5637_v60, %v5640_v55  ;;  %6179 = vmatpush.msrb.mxu0 %v5759_v29  ;;  %v5649_v27 = vsel %vm13214_vm12, %v5648_v49, %v5645_v36  ;;  %v6117_v55 = vpop.f32.mrf.mxu2  ;;  %vm13216_vm7 = vmmov %vm13215_vm11 }
 0x8fe   :  { %v5642_v39 = vrot.slane %v5641_v61, 3  ;;  %v5650_v7 = vrot.slane %v5649_v27, 4  ;;  %vm13217_vm13 = vmmov %vm13216_vm7 }
 0x8ff   :  { %6180 = vmatpush.msrb.mxu0 %v5758_v8  ;;  %vm13218_vm14 = vmmov %vm13216_vm7 }
 0x900   :  { %vm13219_vm12 = vmmov %vm13216_vm7 }
 0x901   :  { %6181 = vmatpush.msrb.mxu0 %v5757_v6 }
 0x902   :  { %v5874_v41 = vld [vmem:[#allocation1] sm:$0xff]  ;;  %v5875_v43 = vld [vmem:[#allocation1 + $0x9] sm:$0xff]  ;;  %v5876_v20 = vld [vmem:[#allocation1 + $0x12] sm:$0xff] }
 0x903   :  { %v5877_v23 = vld [vmem:[#allocation1 + $0x1b] sm:$0xff]  ;;  %v5879_v51 = vld [vmem:[#allocation1 + $0x2d] sm:$0xff]  ;;  %5979 = vmatmul.f32.gmra.mxu0 %v5874_v41  ;;  %6017 = vmatmul.f32.gmra.mxu3 %v5875_v43  ;;  %v5878_v38 = vld [vmem:[#allocation1 + $0x24] sm:$0xff] }
 0x904   :  { %v11705_v14 = vld [vmem:[#allocation1 + $0x36] sm:$0xff]  ;;  %v5881_v13 = vld [vmem:[#allocation1 + $0x3f] sm:$0xff]  ;;  %6093 = vmatmul.f32.gmra.mxu1 %v5877_v23  ;;  %6131 = vmatmul.f32.gmra.mxu2 %v5878_v38 }
 0x905   :  { %5882 = vst [vmem:[#allocation1] ss:$9 sm:$0xff] %v5642_v39  ;;  %6182 = vmatpush.msrb.mxu0 %v5756_v18 }
 0x906   :  { %5883 = vst [vmem:[#allocation1 + $0x1] ss:$9 sm:$0xff] %v5650_v7 }
 0x907   :  { %6183 = vmatpush.msrb.mxu0 %v5755_v40 }
 0x909   :  { %6184 = vmatpush.msrb.mxu0 %v5754_v42 }
 0x90b   :  { %6185 = vmatpush.msrb.mxu0 %v5753_v47 }
 0x90d   :  { %v5884_v54 = vld [vmem:[#allocation1] sm:$0xff]  ;;  %v5885_v30 = vld [vmem:[#allocation1 + $0x9] sm:$0xff]  ;;  %6186 = vmatpush.msrb.mxu0 %v5752_v48 }
 0x90e   :  { %v5887_v50 = vld [vmem:[#allocation1 + $0x1b] sm:$0xff]  ;;  %5982 = vmatmul.f32.gmra.mxu0 %v5884_v54  ;;  %6020 = vmatmul.f32.gmra.mxu3 %v5885_v30  ;;  %v5888_v58 = vld [vmem:[#allocation1 + $0x24] sm:$0xff] }
 0x90f   :  { %6096 = vmatmul.f32.gmra.mxu1 %v5887_v50  ;;  %6134 = vmatmul.f32.gmra.mxu2 %v5888_v58 }
 0x910   :  { %6187 = vmatpush.msrb.mxu0 %v5751_v3 }
 0x911   :  { %v6120_v61 = vpop.f32.mrf.mxu2 }
 0x916   :  { %6040 = vmatmul.f32.vlgmr.msra.gmra.mxu0 %v10881_v34  ;;  %6154 = vmatmul.f32.vlgmr.msrb.gmra.mxu3 %v10889_v1  ;;  %v5750_v34 = vld [vmem:[%s13017_s9 + $0x318] sm:$0xff]  ;;  %v5749_v1 = vld [vmem:[%s13017_s9 + $0x310] sm:$0xff] }
 0x917   :  { %6230 = vmatmul.f32.vlgmr.msrb.gmra.mxu1 %v10895_v22  ;;  %6188 = vmatpush.msrb.mxu0 %v5750_v34  ;;  %v5748_v22 = vld [vmem:[%s13017_s9 + $0x308] sm:$0xff] }
 0x919   :  { %6189 = vmatpush.msrb.mxu0 %v5749_v1 }
 0x91b   :  { %6190 = vmatpush.msrb.mxu0 %v5748_v22 }
 0x91e   :  { %6043 = vmatmul.f32.gmra.mxu0 %v11061_v24  ;;  %6157 = vmatmul.f32.gmra.mxu3 %v11066_v31  ;;  %v5747_v24 = vld [vmem:[%s13017_s9 + $0x300] sm:$0xff]  ;;  %v5889_v31 = vld [vmem:[#allocation1 + $0x2d] sm:$0xff] }
 0x91f   :  { %6233 = vmatmul.f32.gmra.mxu1 %v11085_v25  ;;  %6191 = vmatpush.msrb.mxu0 %v5747_v24  ;;  %v5886_v25 = vld [vmem:[#allocation1 + $0x12] sm:$0xff] }
 0x926   :  { %6046 = vmatmul.f32.gmra.mxu0 %v11129_v12  ;;  %6160 = vmatmul.f32.gmra.mxu3 %v11131_v56  ;;  %v5891_v12 = vld [vmem:[#allocation1 + $0x3f] sm:$0xff]  ;;  %v5965_v56 = vpop.f32.mrf.mxu0  ;;  %v6123_v43 = vpop.f32.mrf.mxu2 }
 0x927   :  { %6236 = vmatmul.f32.gmra.mxu1 %v11135_v32 }
 0x92e   :  { %6049 = vmatmul.f32.gmra.mxu0 %v11295_v37  ;;  %6163 = vmatmul.f32.gmra.mxu3 %v11299_v26  ;;  %v5968_v32 = vpop.f32.mrf.mxu0 }
 0x92f   :  { %6239 = vmatmul.f32.gmra.mxu1 %v11303_v17 }
 0x936   :  { %6052 = vmatmul.f32.gmra.mxu0 %v11562_v63  ;;  %6166 = vmatmul.f32.gmra.mxu3 %v11571_v35  ;;  %v5971_v37 = vpop.f32.mrf.mxu0  ;;  %v5890_v63 = vld [vmem:[#allocation1 + $0x36] sm:$0xff]  ;;  %v6003_v35 = vpop.f32.mrf.mxu3 }
 0x937   :  { %6242 = vmatmul.f32.gmra.mxu1 %v11575_v11  ;;  %v6004_v38 = vadd.f32 %v6003_v35, %v5965_v56 }
 0x93e   :  { %6055 = vmatmul.f32.gmra.mxu0 %v5876_v20  ;;  %6169 = vmatmul.f32.gmra.mxu3 %v5879_v51  ;;  %v6006_v46 = vpop.f32.mrf.mxu3 }
 0x93f   :  { %6245 = vmatmul.f32.gmra.mxu1 %v5881_v13  ;;  %v6007_v7 = vadd.f32 %v6006_v46, %v5968_v32 }
 0x946   :  { %6058 = vmatmul.f32.gmra.mxu0 %v5886_v25  ;;  %6172 = vmatmul.f32.gmra.mxu3 %v5889_v31  ;;  %v5974_v26 = vpop.f32.mrf.mxu0  ;;  %v6009_v15 = vpop.f32.mrf.mxu3 }
 0x947   :  { %6248 = vmatmul.f32.gmra.mxu1 %v5891_v12  ;;  %v6010_v6 = vadd.f32 %v6009_v15, %v5971_v37 }
 0x94d   :  { %v6126_v51 = vpop.f32.mrf.mxu2 }
 0x94e   :  { %6192 = vmatmul.f32.vlgmr.msrb.gmra.mxu0 %v10893_v16  ;;  %v6079_v16 = vpop.f32.mrf.mxu1  ;;  %v6012_v2 = vpop.f32.mrf.mxu3 }
 0x94f   :  { %v6013_v30 = vadd.f32 %v6012_v2, %v5974_v26 }
 0x956   :  { %6195 = vmatmul.f32.gmra.mxu0 %v11083_v62  ;;  %v6082_v33 = vpop.f32.mrf.mxu1 }
 0x95e   :  { %6198 = vmatmul.f32.gmra.mxu0 %v11133_v5  ;;  %v6085_v0 = vpop.f32.mrf.mxu1 }
 0x964   :  { %v5977_v17 = vpop.f32.mrf.mxu0 }
 0x966   :  { %6201 = vmatmul.f32.gmra.mxu0 %v11301_v9  ;;  %v6088_v4 = vpop.f32.mrf.mxu1 }
 0x96a   :  { %v6015_v52 = vpop.f32.mrf.mxu3 }
 0x96b   :  { %v6016_v47 = vadd.f32 %v6015_v52, %v5977_v17 }
 0x96d   :  { %v6129_v54 = vpop.f32.mrf.mxu2 }
 0x96e   :  { %6204 = vmatmul.f32.gmra.mxu0 %v11573_v57  ;;  %v6091_v45 = vpop.f32.mrf.mxu1 }
 0x976   :  { %6207 = vmatmul.f32.gmra.mxu0 %v11705_v14 }
 0x97e   :  { %6210 = vmatmul.f32.gmra.mxu0 %v5890_v63 }
 0x980   :  { %v5980_v11 = vpop.f32.mrf.mxu0 }
 0x981   :  { %v6094_v53 = vpop.f32.mrf.mxu1 }
 0x986   :  { %v6018_v21 = vpop.f32.mrf.mxu3 }
 0x987   :  { %v6019_v34 = vadd.f32 %v6018_v21, %v5980_v11  ;;  %v6132_v56 = vpop.f32.mrf.mxu2 }
 0x98b   :  { %v5983_v62 = vpop.f32.mrf.mxu0 }
 0x98c   :  { %v6097_v44 = vpop.f32.mrf.mxu1 }
 0x991   :  { %v6021_v10 = vpop.f32.mrf.mxu3 }
 0x992   :  { %v6022_v46 = vadd.f32 %v6021_v10, %v5983_v62  ;;  %v8026_v62 = vmov 50.0   ;;  %v6135_v10 = vpop.f32.mrf.mxu2 }
 0x993   :  { %v6041_v5 = vpop.f32.mrf.mxu0  ;;  %8012 = vrcp.f32 %v8026_v62 }
 0x994   :  { %v11761_v28 = vpop.f32.mrf.mxu1  ;;  %v6042_v50 = vadd.f32 %v6041_v5, %v6004_v38 }
 0x996   :  { %v6080_v1 = vadd.f32 %v6079_v16, %v6042_v50 }
 0x998   :  { %v6118_v37 = vadd.f32 %v6117_v55, %v6080_v1 }
 0x999   :  { %v6155_v59 = vpop.f32.mrf.mxu3 }
 0x99b   :  { %v6044_v9 = vpop.f32.mrf.mxu0 }
 0x99c   :  { %v6234_v49 = vpop.f32.mrf.mxu1  ;;  %v6045_v18 = vadd.f32 %v6044_v9, %v6007_v7  ;;  %v6156_v9 = vadd.f32 %v6155_v59, %v6118_v37 }
 0x99e   :  { %v6083_v48 = vadd.f32 %v6082_v33, %v6045_v18 }
 0x9a0   :  { %v6121_v31 = vadd.f32 %v6120_v61, %v6083_v48 }
 0x9a1   :  { %v6158_v8 = vpop.f32.mrf.mxu3 }
 0x9a2   :  { %v6159_v15 = vadd.f32 %v6158_v8, %v6121_v31 }
 0x9a3   :  { %v6047_v57 = vpop.f32.mrf.mxu0 }
 0x9a4   :  { %v6237_v39 = vpop.f32.mrf.mxu1  ;;  %v6048_v58 = vadd.f32 %v6047_v57, %v6010_v6 }
 0x9a6   :  { %v6086_v22 = vadd.f32 %v6085_v0, %v6048_v58 }
 0x9a8   :  { %v6124_v63 = vadd.f32 %v6123_v43, %v6086_v22 }
 0x9a9   :  { %v6161_v41 = vpop.f32.mrf.mxu3 }
 0x9aa   :  { %v6162_v11 = vadd.f32 %v6161_v41, %v6124_v63 }
 0x9ab   :  { %v6050_v19 = vpop.f32.mrf.mxu0 }
 0x9ac   :  { %v6240_v13 = vpop.f32.mrf.mxu1  ;;  %v6051_v3 = vadd.f32 %v6050_v19, %v6013_v30 }
 0x9ae   :  { %v6089_v25 = vadd.f32 %v6088_v4, %v6051_v3 }
 0x9b0   :  { %v6127_v5 = vadd.f32 %v6126_v51, %v6089_v25  ;;  %v8013_v51 = vpop.eup %8012 }
 0x9b1   :  { %v6164_v23 = vpop.f32.mrf.mxu3  ;;  %vm6270_vm8 = vweird.f32 %v8013_v51 }
 0x9b2   :  { %v6165_v52 = vadd.f32 %v6164_v23, %v6127_v5 }
 0x9b3   :  { %v6053_v60 = vpop.f32.mrf.mxu0 }
 0x9b4   :  { %v6054_v24 = vadd.f32 %v6053_v60, %v6016_v47  ;;  %v6243_v12 = vpop.f32.mrf.mxu1 }
 0x9b6   :  { %v6092_v35 = vadd.f32 %v6091_v45, %v6054_v24 }
 0x9b8   :  { %v6130_v16 = vadd.f32 %v6129_v54, %v6092_v35  ;;  %v6266_v54 = vmul.f32 50.0, %v8013_v51 }
 0x9b9   :  { %v6167_v40 = vpop.f32.mrf.mxu3 }
 0x9ba   :  { %v6168_v60 = vadd.f32 %v6167_v40, %v6130_v16  ;;  %v6267_v40 = vsub.f32 1.0, %v6266_v54  ;;  %v6921_v54 = vld [vmem:[%s13020_s12 + $0x68] sm:$0xff] }
 0x9bb   :  { %v6056_v36 = vpop.f32.mrf.mxu0 }
 0x9bc   :  { %v6057_v32 = vadd.f32 %v6056_v36, %v6019_v34  ;;  %v6246_v36 = vpop.f32.mrf.mxu1 }
 0x9be   :  { %v6095_v2 = vadd.f32 %v6094_v53, %v6057_v32 }
 0x9c0   :  { %v6133_v57 = vadd.f32 %v6132_v56, %v6095_v2 }
 0x9c1   :  { %v6170_v17 = vpop.f32.mrf.mxu3 }
 0x9c2   :  { %v6171_v53 = vadd.f32 %v6170_v17, %v6133_v57 }
 0x9c3   :  { %v6059_v29 = vpop.f32.mrf.mxu0 }
 0x9c4   :  { %v6060_v33 = vadd.f32 %v6059_v29, %v6022_v46  ;;  %v6249_v30 = vpop.f32.mrf.mxu1 }
 0x9c6   :  { %v6098_v19 = vadd.f32 %v6097_v44, %v6060_v33 }
 0x9c8   :  { %v6136_v41 = vadd.f32 %v6135_v10, %v6098_v19 }
 0x9c9   :  { %v6173_v43 = vpop.f32.mrf.mxu3 }
 0x9ca   :  { %v6174_v7 = vadd.f32 %v6173_v43, %v6136_v41  ;;  %v6970_v43 = vld [vmem:[%s13020_s12 + $0x1f0] sm:$0xff] }
 0x9cb   :  { %v6193_v27 = vpop.f32.mrf.mxu0 }
 0x9cc   :  { %v6194_v4 = vadd.f32 %v6193_v27, %v6156_v9 }
 0x9ce   :  { %v6232_v29 = vadd.f32 %v11761_v28, %v6194_v4 }
 0x9d3   :  { %v6196_v20 = vpop.f32.mrf.mxu0 }
 0x9d4   :  { %v6197_v0 = vadd.f32 %v6196_v20, %v6159_v15 }
 0x9d6   :  { %v6235_v55 = vadd.f32 %v6234_v49, %v6197_v0 }
 0x9d8   :  { %v6252_v20 = vadd.f32 %v6235_v55, %v6232_v29 }
 0x9db   :  { %v6199_v14 = vpop.f32.mrf.mxu0 }
 0x9dc   :  { %v6200_v21 = vadd.f32 %v6199_v14, %v6162_v11 }
 0x9de   :  { %v6238_v59 = vadd.f32 %v6237_v39, %v6200_v21 }
 0x9e0   :  { %v6253_v44 = vadd.f32 %v6252_v20, %v6238_v59  ;;  %v6986_v20 = vld [vmem:[%s13020_s12 + $0x270] sm:$0xff] }
 0x9e3   :  { %v6202_v42 = vpop.f32.mrf.mxu0 }
 0x9e4   :  { %v6203_v45 = vadd.f32 %v6202_v42, %v6165_v52 }
 0x9e6   :  { %v6241_v23 = vadd.f32 %v6240_v13, %v6203_v45  ;;  %v6268_v13 = vmul.f32 %v8013_v51, %v6267_v40  ;;  %v6920_v40 = vld [vmem:[%s13020_s12 + $0x60] sm:$0xff] }
 0x9e8   :  { %v6254_v49 = vadd.f32 %v6253_v44, %v6241_v23  ;;  %v6269_v34 = vadd.f32 %v8013_v51, %v6268_v13 }
 0x9ea   :  { %v6271_v24 = vsel %vm6270_vm8, %v8013_v51, %v6269_v34  ;;  %v6923_v51 = vld [vmem:[%s13020_s12 + $0x78] sm:$0xff]  ;;  %vm13220_vm8 = vmmov %vm13216_vm7 }
 0x9eb   :  { %v6205_v26 = vpop.f32.mrf.mxu0  ;;  %7367 = vmatpush.msrb.mxu2 %v6923_v51  ;;  %v6959_v51 = vld [vmem:[%s13020_s12 + $0x198] sm:$0xff] }
 0x9ec   :  { %v6206_v8 = vadd.f32 %v6205_v26, %v6168_v60 }
 0x9ee   :  { %v6244_v14 = vadd.f32 %v6243_v12, %v6206_v8  ;;  %v6987_v8 = vld [vmem:[%s13020_s12 + $0x278] sm:$0xff] }
 0x9ef   :  { %7483 = vmatpush.msra.mxu1 %v6987_v8  ;;  %v6976_v8 = vld [vmem:[%s13020_s12 + $0x220] sm:$0xff] }
 0x9f0   :  { %v6255_v50 = vadd.f32 %v6254_v49, %v6244_v14  ;;  %v6984_v49 = vld [vmem:[%s13020_s12 + $0x260] sm:$0xff] }
 0x9f1   :  { %7484 = vmatpush.msra.mxu1 %v6986_v20  ;;  %v6931_v20 = vld [vmem:[%s13020_s12 + $0xb8] sm:$0xff] }
 0x9f3   :  { %v6208_v61 = vpop.f32.mrf.mxu0 }
 0x9f4   :  { %v6209_v27 = vadd.f32 %v6208_v61, %v6171_v53 }
 0x9f6   :  { %v6247_v38 = vadd.f32 %v6246_v36, %v6209_v27  ;;  %v6985_v27 = vld [vmem:[%s13020_s12 + $0x268] sm:$0xff] }
 0x9f7   :  { %7485 = vmatpush.msra.mxu1 %v6985_v27 }
 0x9f8   :  { %v6256_v28 = vadd.f32 %v6255_v50, %v6247_v38  ;;  %v6983_v50 = vld [vmem:[%s13020_s12 + $0x258] sm:$0xff] }
 0x9f9   :  { %7486 = vmatpush.msra.mxu1 %v6984_v49 }
 0x9fb   :  { %v6211_v6 = vpop.f32.mrf.mxu0  ;;  %7487 = vmatpush.msra.mxu1 %v6983_v50  ;;  %v6973_v50 = vld [vmem:[%s13020_s12 + $0x208] sm:$0xff] }
 0x9fc   :  { %v6212_v18 = vadd.f32 %v6211_v6, %v6174_v7  ;;  %v6939_v7 = vld [vmem:[%s13020_s12 + $0xf8] sm:$0xff]  ;;  %v6938_v6 = vld [vmem:[%s13020_s12 + $0xf0] sm:$0xff] }
 0x9fd   :  { %7396 = vmatpush.msra.mxu3 %v6939_v7  ;;  %v6930_v7 = vld [vmem:[%s13020_s12 + $0xb0] sm:$0xff] }
 0x9fe   :  { %v6250_v58 = vadd.f32 %v6249_v30, %v6212_v18  ;;  %v6967_v30 = vld [vmem:[%s13020_s12 + $0x1d8] sm:$0xff] }
 0x9ff   :  { %7397 = vmatpush.msra.mxu3 %v6938_v6  ;;  %v6974_v6 = vld [vmem:[%s13020_s12 + $0x210] sm:$0xff] }
 0xa00   :  { %v6257_v39 = vsel %vm2339_vm0, %v6250_v58, 0.0 }
 0xa01   :  { %v6258_v42 = vadd.f32 %v6257_v39, %v6256_v28  ;;  %v11845_v39 = vld [vmem:[%s13018_s10] ss:$0 sm:$0xff] }
 0xa03   :  { %v6259_v47 = vrot.slane %v6258_v42, 4 }
 0xa05   :  { %v6260_v48 = vadd.f32 %v6259_v47, %v6258_v42  ;;  %v6966_v42 = vld [vmem:[%s13020_s12 + $0x1d0] sm:$0xff] }
 0xa06   :  { %v6982_v47 = vld [vmem:[%s13020_s12 + $0x250] sm:$0xff] }
 0xa07   :  { %v6261_v3 = vrot.slane %v6260_v48, 2  ;;  %7488 = vmatpush.msra.mxu1 %v6982_v47  ;;  %v6972_v47 = vld [vmem:[%s13020_s12 + $0x200] sm:$0xff] }
 0xa09   :  { %v6262_v1 = vadd.f32 %v6261_v3, %v6260_v48  ;;  %v6936_v48 = vld [vmem:[%s13020_s12 + $0xe0] sm:$0xff] }
 0xa0b   :  { %v6263_v22 = vrot.slane %v6262_v1, 1 }
 0xa0d   :  { %v6264_v31 = vadd.f32 %v6263_v22, %v6262_v1 }
 0xa0f   :  { %v6272_v25 = vmul.f32 %v6271_v24, %v6264_v31  ;;  %v6965_v31 = vld [vmem:[%s13020_s12 + $0x1c8] sm:$0xff] }
 0xa11   :  { %v11765_v12 = vsub.f32 %v6232_v29, %v6272_v25  ;;  %v11767_v32 = vsub.f32 %v6235_v55, %v6272_v25  ;;  %v11769_v56 = vsub.f32 %v6238_v59, %v6272_v25  ;;  %v11771_v37 = vsub.f32 %v6241_v23, %v6272_v25  ;;  %v6971_v59 = vld [vmem:[%s13020_s12 + $0x1f8] sm:$0xff]  ;;  %v6969_v23 = vld [vmem:[%s13020_s12 + $0x1e8] sm:$0xff] }
 0xa12   :  { %v11777_v26 = vsub.f32 %v6244_v14, %v6272_v25  ;;  %v11781_v5 = vsub.f32 %v6250_v58, %v6272_v25  ;;  %v11783_v2 = vsub.f32 %v6247_v38, %v6272_v25  ;;  %7454 = vmatpush.msra.mxu0 %v6971_v59  ;;  %v6968_v14 = vld [vmem:[%s13020_s12 + $0x1e0] sm:$0xff]  ;;  %v6922_v38 = vld [vmem:[%s13020_s12 + $0x70] sm:$0xff]  ;;  %v6937_v58 = vld [vmem:[%s13020_s12 + $0xe8] sm:$0xff] }
 0xa13   :  { %v6280_v63 = vmul.f32 %v11765_v12, %v11765_v12  ;;  %v6281_v35 = vmul.f32 %v11767_v32, %v11767_v32  ;;  %v6282_v46 = vmul.f32 %v11769_v56, %v11769_v56  ;;  %v6283_v17 = vmul.f32 %v11771_v37, %v11771_v37  ;;  %7368 = vmatpush.msrb.mxu2 %v6922_v38  ;;  %v6981_v25 = vld [vmem:[%s13020_s12 + $0x248] sm:$0xff]  ;;  %v6960_v59 = vld [vmem:[%s13020_s12 + $0x1a0] sm:$0xff]  ;;  %v6958_v38 = vld [vmem:[%s13020_s12 + $0x190] sm:$0xff] }
 0xa14   :  { %v6284_v9 = vmul.f32 %v11777_v26, %v11777_v26  ;;  %v6286_v16 = vmul.f32 %v11781_v5, %v11781_v5  ;;  %v6285_v0 = vmul.f32 %v11783_v2, %v11783_v2  ;;  %7455 = vmatpush.msra.mxu0 %v6970_v43  ;;  %7398 = vmatpush.msra.mxu3 %v6937_v58  ;;  %v6915_v43 = vld [vmem:[%s13020_s12 + $0x38] sm:$0xff]  ;;  %v6912_v58 = vld [vmem:[%s13020_s12 + $0x20] sm:$0xff] }
 0xa15   :  { %v6287_v15 = vadd.f32 %v6281_v35, %v6280_v63  ;;  %7369 = vmatpush.msrb.mxu2 %v6921_v54  ;;  %v6964_v35 = vld [vmem:[%s13020_s12 + $0x1c0] sm:$0xff]  ;;  %7489 = vmatpush.msra.mxu1 %v6981_v25  ;;  %v6929_v54 = vld [vmem:[%s13020_s12 + $0xa8] sm:$0xff] }
 0xa16   :  { %v6292_v4 = vsel %vm2339_vm0, %v6286_v16, 0.0  ;;  %7456 = vmatpush.msra.mxu0 %v6969_v23  ;;  %7399 = vmatpush.msra.mxu3 %v6936_v48  ;;  %v6927_v48 = vld [vmem:[%s13020_s12 + $0x98] sm:$0xff] }
 0xa17   :  { %v6288_v33 = vadd.f32 %v6287_v15, %v6282_v46  ;;  %7370 = vmatpush.msrb.mxu2 %v6920_v40 }
 0xa18   :  { %7457 = vmatpush.msra.mxu0 %v6968_v14  ;;  %v6914_v14 = vld [vmem:[%s13020_s12 + $0x30] sm:$0xff] }
 0xa19   :  { %v6289_v11 = vadd.f32 %v6288_v33, %v6283_v17  ;;  %v6918_v17 = vld [vmem:[%s13020_s12 + $0x50] sm:$0xff] }
 0xa1a   :  { %7458 = vmatpush.msra.mxu0 %v6967_v30  ;;  %v6957_v30 = vld [vmem:[%s13020_s12 + $0x188] sm:$0xff] }
 0xa1b   :  { %v6290_v52 = vadd.f32 %v6289_v11, %v6284_v9  ;;  %v6963_v9 = vld [vmem:[%s13020_s12 + $0x1b8] sm:$0xff] }
 0xa1c   :  { %7459 = vmatpush.msra.mxu0 %v6966_v42  ;;  %v6979_v11 = vld [vmem:[%s13020_s12 + $0x238] sm:$0xff]  ;;  %v6956_v42 = vld [vmem:[%s13020_s12 + $0x180] sm:$0xff] }
 0xa1d   :  { %v6291_v57 = vadd.f32 %v6290_v52, %v6285_v0 }
 0xa1e   :  { %7460 = vmatpush.msra.mxu0 %v6965_v31 }
 0xa1f   :  { %v6293_v21 = vadd.f32 %v6292_v4, %v6291_v57  ;;  %v6934_v57 = vld [vmem:[%s13020_s12 + $0xd0] sm:$0xff]  ;;  %v6917_v4 = vld [vmem:[%s13020_s12 + $0x48] sm:$0xff] }
 0xa20   :  { %7461 = vmatpush.msra.mxu0 %v6964_v35 }
 0xa21   :  { %v6294_v19 = vrot.slane %v6293_v21, 4 }
 0xa22   :  { %7462 = vmatpush.msra.mxu0 %v6963_v9 }
 0xa23   :  { %v6295_v60 = vadd.f32 %v6294_v19, %v6293_v21  ;;  %v6962_v21 = vld [vmem:[%s13020_s12 + $0x1b0] sm:$0xff] }
 0xa24   :  { %v6978_v19 = vld [vmem:[%s13020_s12 + $0x230] sm:$0xff]  ;;  %7463 = vmatpush.msra.mxu0 %v6962_v21 }
 0xa25   :  { %v6296_v36 = vrot.slane %v6295_v60, 2 }
 0xa27   :  { %v6297_v55 = vadd.f32 %v6296_v36, %v6295_v60  ;;  %v6933_v36 = vld [vmem:[%s13020_s12 + $0xc8] sm:$0xff] }
 0xa29   :  { %v6298_v45 = vrot.slane %v6297_v55, 1 }
 0xa2b   :  { %v6299_v61 = vadd.f32 %v6298_v45, %v6297_v55  ;;  %v6961_v55 = vld [vmem:[%s13020_s12 + $0x1a8] sm:$0xff] }
 0xa2c   :  { %v6977_v45 = vld [vmem:[%s13020_s12 + $0x228] sm:$0xff]  ;;  %7464 = vmatpush.msra.mxu0 %v6961_v55 }
 0xa2d   :  { %v6300_v62 = vmul.f32 %v6299_v61, %v6271_v24  ;;  %v11871_v24 = vld [vmem:[%s13019_s11] ss:$0 sm:$0xff] }
 0xa2e   :  { %7465 = vmatpush.msra.mxu0 %v6960_v59 }
 0xa2f   :  { %v6301_v10 = vadd.f32 1e-05, %v6300_v62  ;;  %v6916_v62 = vld [vmem:[%s13020_s12 + $0x40] sm:$0xff] }
 0xa30   :  { %7466 = vmatpush.msra.mxu0 %v6959_v51 }
 0xa31   :  { %8014 = vrsqrt.f32 %v6301_v10  ;;  %vm6308_vm0 = vweird.f32 %v6301_v10 }
 0xa32   :  { %7467 = vmatpush.msra.mxu0 %v6958_v38 }
 0xa34   :  { %7468 = vmatpush.msra.mxu0 %v6957_v30 }
 0xa36   :  { %7469 = vmatpush.msra.mxu0 %v6956_v42  ;;  %v6925_v42 = vld [vmem:[%s13020_s12 + $0x88] sm:$0xff] }
 0xa37   :  { %v8015_v53 = vpop.eup %8014 }
 0xa38   :  { %v6303_v29 = vmul.f32 %v8015_v53, %v6301_v10  ;;  %vm6309_vm9 = vweird.f32 %v8015_v53  ;;  %v6932_v10 = vld [vmem:[%s13020_s12 + $0xc0] sm:$0xff] }
 0xa39   :  { %vm6310_vm5 = vmor %vm6308_vm0, %vm6309_vm9 }
 0xa3a   :  { %v6304_v41 = vmul.f32 %v8015_v53, %v6303_v29  ;;  %vm13221_vm9 = vmmov %vm13216_vm7 }
 0xa3b   :  { %vm13222_vm0 = vmmov %vm13216_vm7 }
 0xa3c   :  { %v6305_v44 = vmul.f32 0.5, %v6304_v41 }
 0xa3e   :  { %v6306_v18 = vsub.f32 1.5, %v6305_v44  ;;  %v6975_v44 = vld [vmem:[%s13020_s12 + $0x218] sm:$0xff] }
 0xa40   :  { %v6307_v28 = vmul.f32 %v8015_v53, %v6306_v18  ;;  %v6913_v18 = vld [vmem:[%s13020_s12 + $0x28] sm:$0xff] }
 0xa42   :  { %v6311_v13 = vsel %vm6310_vm5, %v8015_v53, %v6307_v28  ;;  %v6928_v28 = vld [vmem:[%s13020_s12 + $0xa0] sm:$0xff]  ;;  %vm13223_vm5 = vmmov %vm13222_vm0 }
 0xa43   :  { %v6312_v3 = vmul.f32 %v6311_v13, %v11765_v12  ;;  %v6313_v34 = vmul.f32 %v6311_v13, %v11767_v32  ;;  %v11863_v1 = vmul.f32 %v6311_v13, %v11769_v56  ;;  %v11866_v22 = vmul.f32 %v6311_v13, %v11771_v37  ;;  %v6919_v37 = vld [vmem:[%s13020_s12 + $0x58] sm:$0xff] }
 0xa44   :  { %v6316_v12 = vmul.f32 %v6311_v13, %v11777_v26  ;;  %v6317_v32 = vmul.f32 %v6311_v13, %v11783_v2  ;;  %v6318_v56 = vmul.f32 %v6311_v13, %v11781_v5  ;;  %v6980_v26 = vld [vmem:[%s13020_s12 + $0x240] sm:$0xff]  ;;  %v6935_v2 = vld [vmem:[%s13020_s12 + $0xd8] sm:$0xff]  ;;  %7371 = vmatpush.msrb.mxu2 %v6919_v37 }
 0xa45   :  { %v6323_v63 = vmul.f32 %v11845_v39, %v6312_v3  ;;  %7490 = vmatpush.msra.mxu1 %v6980_v26  ;;  %7400 = vmatpush.msra.mxu3 %v6935_v2  ;;  %v6324_v53 = vmul.f32 %v11845_v39, %v6313_v34  ;;  %v6911_v13 = vld [vmem:[%s13020_s12 + $0x18] sm:$0xff] }
 0xa46   :  { %v6327_v46 = vmul.f32 %v11845_v39, %v6316_v12  ;;  %v6328_v15 = vmul.f32 %v11845_v39, %v6317_v32  ;;  %v6329_v5 = vmul.f32 %v11845_v39, %v6318_v56  ;;  %7372 = vmatpush.msrb.mxu2 %v6918_v17  ;;  %v6325_v56 = vmul.f32 %v11845_v39, %v11863_v1 }
 0xa47   :  { %v6334_v33 = vadd.f32 %v11871_v24, %v6323_v63  ;;  %7491 = vmatpush.msra.mxu1 %v6979_v11  ;;  %7401 = vmatpush.msra.mxu3 %v6934_v57  ;;  %v6335_v49 = vadd.f32 %v11871_v24, %v6324_v53 }
 0xa48   :  { %v11909_v16 = vadd.f32 %v11871_v24, %v6327_v46  ;;  %v11912_v0 = vadd.f32 %v11871_v24, %v6328_v15  ;;  %v11915_v52 = vadd.f32 %v11871_v24, %v6329_v5  ;;  %7373 = vmatpush.msrb.mxu2 %v6917_v4  ;;  %v6336_v46 = vadd.f32 %v11871_v24, %v6325_v56 }
 0xa49   :  { %vm6341_vm15 = vcmp.ge.f32.partialorder %v6334_v33, 0.0  ;;  %v6348_v60 = vmul.f32 0.2, %v6334_v33  ;;  %7492 = vmatpush.msra.mxu1 %v6978_v19  ;;  %7402 = vmatpush.msra.mxu3 %v6933_v36  ;;  %v6349_v40 = vmul.f32 0.2, %v6335_v49  ;;  %vm6342_vm4 = vcmp.ge.f32.partialorder %v6335_v49, 0.0 }
 0xa4a   :  { %7374 = vmatpush.msrb.mxu2 %v6916_v62  ;;  %v6350_v2 = vmul.f32 0.2, %v6336_v46  ;;  %vm6343_vm2 = vcmp.ge.f32.partialorder %v6336_v46, 0.0  ;;  %v6326_v4 = vmul.f32 %v11845_v39, %v11866_v22  ;;  %v6352_v59 = vmul.f32 0.2, %v11909_v16 }
 0xa4b   :  { %v11938_v61 = vsel %vm6341_vm15, %v6334_v33, %v6348_v60  ;;  %7493 = vmatpush.msra.mxu1 %v6977_v45  ;;  %7403 = vmatpush.msra.mxu3 %v6932_v10  ;;  %v6356_v34 = vsel %vm6342_vm4, %v6335_v49, %v6349_v40  ;;  %vm6345_vm3 = vcmp.ge.f32.partialorder %v11909_v16, 0.0  ;;  %vm6346_vm1 = vcmp.ge.f32.partialorder %v11912_v0, 0.0  ;;  %vm13224_vm15 = vmmov %vm13222_vm0 }
 0xa4c   :  { %v6369_v29 = vrot.slane %v11938_v61, 1  ;;  %6438 = vst [vmem:[#allocation1] ss:$9 sm:$0xff] %v11938_v61  ;;  %v6370_v41 = vrot.slane %v11938_v61, 2  ;;  %v6371_v23 = vrot.slane %v11938_v61, 3  ;;  %v6372_v27 = vrot.slane %v11938_v61, 4  ;;  %7375 = vmatpush.msrb.mxu2 %v6915_v43  ;;  %vm13225_vm4 = vmmov %vm13222_vm0 }
 0xa4d   :  { %7494 = vmatpush.msra.mxu1 %v6976_v8  ;;  %7404 = vmatpush.msra.mxu3 %v6931_v20  ;;  %v6373_v3 = vrot.slane %v11938_v61, 5  ;;  %v6374_v31 = vrot.slane %v11938_v61, 6  ;;  %v6375_v12 = vrot.slane %v11938_v61, 7  ;;  %v6376_v32 = vrot.slane %v6356_v34, 1 }
 0xa4e   :  { %6440 = vst [vmem:[#allocation1 + $0x1] ss:$9 sm:$0xff] %v6369_v29  ;;  %7376 = vmatpush.msrb.mxu2 %v6914_v14  ;;  %v6377_v37 = vrot.slane %v6356_v34, 2  ;;  %v6378_v63 = vrot.slane %v6356_v34, 3  ;;  %v6379_v26 = vrot.slane %v6356_v34, 4  ;;  %v6380_v15 = vrot.slane %v6356_v34, 5 }
 0xa4f   :  { %6442 = vst [vmem:[#allocation1 + $0x2] ss:$9 sm:$0xff] %v6370_v41  ;;  %7495 = vmatpush.msra.mxu1 %v6975_v44  ;;  %7405 = vmatpush.msra.mxu3 %v6930_v7  ;;  %v6381_v5 = vrot.slane %v6356_v34, 6  ;;  %v6357_v17 = vsel %vm6343_vm2, %v6336_v46, %v6350_v2  ;;  %v6382_v33 = vrot.slane %v6356_v34, 7  ;;  %v6337_v21 = vadd.f32 %v11871_v24, %v6326_v4  ;;  %vm13226_vm2 = vmmov %vm13222_vm0 }
 0xa50   :  { %6444 = vst [vmem:[#allocation1 + $0x3] ss:$9 sm:$0xff] %v6371_v23  ;;  %7377 = vmatpush.msrb.mxu2 %v6913_v18  ;;  %v6383_v1 = vrot.slane %v6357_v17, 1  ;;  %v6384_v11 = vrot.slane %v6357_v17, 2  ;;  %v6385_v57 = vrot.slane %v6357_v17, 3  ;;  %v6386_v19 = vrot.slane %v6357_v17, 4 }
 0xa51   :  { %6446 = vst [vmem:[#allocation1 + $0x4] ss:$9 sm:$0xff] %v6372_v27  ;;  %7496 = vmatpush.msra.mxu1 %v6974_v6  ;;  %7406 = vmatpush.msra.mxu3 %v6929_v54  ;;  %v6351_v60 = vmul.f32 0.2, %v6337_v21  ;;  %v6387_v36 = vrot.slane %v6357_v17, 5  ;;  %vm6344_vm6 = vcmp.ge.f32.partialorder %v6337_v21, 0.0  ;;  %v6359_v8 = vsel %vm6345_vm3, %v11909_v16, %v6352_v59  ;;  %vm13228_vm3 = vmmov %vm13222_vm0 }
 0xa52   :  { %7378 = vmatpush.msrb.mxu2 %v6912_v58  ;;  %v6388_v45 = vrot.slane %v6357_v17, 6  ;;  %v6389_v61 = vrot.slane %v6357_v17, 7  ;;  %v6397_v23 = vrot.slane %v6359_v8, 1  ;;  %v6398_v27 = vrot.slane %v6359_v8, 2  ;;  %v6910_v58 = vld [vmem:[%s13020_s12 + $0x10] sm:$0xff] }
 0xa53   :  { %7497 = vmatpush.msra.mxu1 %v6973_v50  ;;  %7407 = vmatpush.msra.mxu3 %v6928_v28  ;;  %v6358_v62 = vsel %vm6344_vm6, %v6337_v21, %v6351_v60  ;;  %v6399_v51 = vrot.slane %v6359_v8, 3  ;;  %v6400_v44 = vrot.slane %v6359_v8, 4  ;;  %v6401_v7 = vrot.slane %v6359_v8, 5  ;;  %v6926_v28 = vld [vmem:[%s13020_s12 + $0x90] sm:$0xff]  ;;  %v6530_v21 = vld [vmem:[#allocation5 + $0x1] sm:$0xf]  ;;  %vm13227_vm6 = vmmov %vm13222_vm0 }
 0xa54   :  { %7379 = vmatpush.msrb.mxu2 %v6911_v13  ;;  %v6390_v39 = vrot.slane %v6358_v62, 1  ;;  %v6391_v22 = vrot.slane %v6358_v62, 2  ;;  %v6392_v53 = vrot.slane %v6358_v62, 3  ;;  %v6393_v24 = vrot.slane %v6358_v62, 4  ;;  %v6924_v13 = vld [vmem:[%s13020_s12 + $0x80] sm:$0xff] }
 0xa55   :  { %7498 = vmatpush.msra.mxu1 %v6972_v47  ;;  %7408 = vmatpush.msra.mxu3 %v6927_v48  ;;  %v6394_v29 = vrot.slane %v6358_v62, 5  ;;  %v6395_v41 = vrot.slane %v6358_v62, 6  ;;  %v6396_v43 = vrot.slane %v6358_v62, 7  ;;  %v6402_v49 = vrot.slane %v6359_v8, 6  ;;  %v6908_v47 = vld [vmem:[%s13020_s12] sm:$0xff] }
 0xa56   :  { %v6403_v38 = vrot.slane %v6359_v8, 7  ;;  %v6353_v16 = vmul.f32 0.2, %v11912_v0  ;;  %7380 = vmatpush.msrb.mxu2 %v6910_v58  ;;  %v6354_v48 = vmul.f32 0.2, %v11915_v52  ;;  %vm6347_vm10 = vcmp.ge.f32.partialorder %v11915_v52, 0.0 }
 0xa57   :  { %7409 = vmatpush.msra.mxu3 %v6926_v28 }
 0xa58   :  { %v6447_v25 = vld [vmem:[#allocation1] sm:$0xff]  ;;  %v6360_v6 = vsel %vm6346_vm1, %v11912_v0, %v6353_v16  ;;  %v6909_v0 = vld [vmem:[%s13020_s12 + $0x8] sm:$0xff]  ;;  %vm13229_vm1 = vmmov %vm13222_vm0 }
 0xa59   :  { %6448 = vst [vmem:[#allocation1] ss:$9 sm:$0xff] %v6373_v3  ;;  %v6404_v18 = vrot.slane %v6360_v6, 1  ;;  %v6405_v30 = vrot.slane %v6360_v6, 2  ;;  %v6406_v50 = vrot.slane %v6360_v6, 3  ;;  %v6407_v40 = vrot.slane %v6360_v6, 4  ;;  %7381 = vmatpush.msrb.mxu2 %v6909_v0  ;;  %7410 = vmatpush.msra.mxu3 %v6925_v42 }
 0xa5a   :  { %6449 = vst [vmem:[#allocation1 + $0x1] ss:$9 sm:$0xff] %v6374_v31  ;;  %v6546_v3 = vld [vmem:[#allocation5 + $0x3] sm:$0xf]  ;;  %v6408_v31 = vrot.slane %v6360_v6, 5  ;;  %v7035_v0 = vld [vmem:[%s13020_s12 + $0x3f8] sm:$0xff] }
 0xa5b   :  { %6450 = vst [vmem:[#allocation1 + $0x2] ss:$9 sm:$0xff] %v6375_v12  ;;  %7382 = vmatpush.msrb.mxu2 %v6908_v47  ;;  %7411 = vmatpush.msra.mxu3 %v6924_v13  ;;  %v6781_v12 = vrot.slane %v6546_v3, 4  ;;  %v7051_v13 = vld [vmem:[%s13020_s12 + $0x478] sm:$0xff]  ;;  %v7034_v3 = vld [vmem:[%s13020_s12 + $0x3f0] sm:$0xff] }
 0xa5c   :  { %6451 = vst [vmem:[#allocation1 + $0x3] ss:$9 sm:$0xff] %v6356_v34  ;;  %v6361_v34 = vsel %vm6347_vm10, %v11915_v52, %v6354_v48  ;;  %7570 = vmatpush.msrb.mxu0 %v7035_v0  ;;  %7599 = vmatpush.msrb.mxu1 %v7051_v13  ;;  %vm13230_vm10 = vmmov %vm13222_vm0  ;;  %v7001_v0 = vld [vmem:[%s13020_s12 + $0x2e8] sm:$0xff]  ;;  %v6623_v13 = vld [vmem:[#allocation5 + $0x30] sm:$0xf] }
 0xa5d   :  { %6452 = vst [vmem:[#allocation1 + $0x4] ss:$9 sm:$0xff] %v6376_v32  ;;  %v6409_v32 = vrot.slane %v6360_v6, 6 }
 0xa5e   :  { %6512 = vst [vmem:[#allocation5 + $0x9] sm:$0x1f] %v6447_v25  ;;  %7571 = vmatpush.msrb.mxu0 %v7034_v3  ;;  %v7029_v3 = vld [vmem:[%s13020_s12 + $0x3c8] sm:$0xff] }
 0xa64   :  { %v6453_v35 = vld [vmem:[#allocation1] sm:$0xff] }
 0xa65   :  { %6454 = vst [vmem:[#allocation1] ss:$9 sm:$0xff] %v6377_v37  ;;  %v6547_v25 = vld [vmem:[#allocation5 + $0xb] sm:$0xf]  ;;  %v6538_v37 = vld [vmem:[#allocation5 + $0x2] sm:$0xf] }
 0xa66   :  { %6455 = vst [vmem:[#allocation1 + $0x1] ss:$9 sm:$0xff] %v6378_v63  ;;  %v6410_v63 = vrot.slane %v6360_v6, 7  ;;  %v6789_v46 = vrot.slane %v6547_v25, 4  ;;  %v6845_v2 = vsel %vm13215_vm11, %v6538_v37, %v6781_v12  ;;  %v6531_v60 = vld [vmem:[#allocation5 + $0x9] sm:$0xf]  ;;  %vm13231_vm11 = vmmov %vm13222_vm0 }
 0xa67   :  { %6456 = vst [vmem:[#allocation1 + $0x2] ss:$9 sm:$0xff] %v6379_v26  ;;  %v6411_v26 = vrot.slane %v6361_v34, 1  ;;  %v6523_v16 = vld [vmem:[#allocation5 + $0x8] sm:$0xf] }
 0xa68   :  { %6457 = vst [vmem:[#allocation1 + $0x3] ss:$9 sm:$0xff] %v6380_v15 }
 0xa69   :  { %6458 = vst [vmem:[#allocation1 + $0x4] ss:$9 sm:$0xff] %v6381_v5  ;;  %v6539_v5 = vld [vmem:[#allocation5 + $0xa] sm:$0xf] }
 0xa6a   :  { %6513 = vst [vmem:[#allocation5 + $0x11] sm:$0x1f] %v6453_v35  ;;  %v6562_v35 = vld [vmem:[#allocation5 + $0x9] sm:$0xf] }
 0xa6b   :  { %v6782_v52 = vrot.slane %v6562_v35, 4 }
 0xa70   :  { %v6459_v9 = vld [vmem:[#allocation1] sm:$0xff] }
 0xa71   :  { %6460 = vst [vmem:[#allocation1] ss:$9 sm:$0xff] %v6382_v33  ;;  %v6563_v15 = vld [vmem:[#allocation5 + $0x11] sm:$0xf] }
 0xa72   :  { %6461 = vst [vmem:[#allocation1 + $0x1] ss:$9 sm:$0xff] %v6357_v17  ;;  %v6578_v17 = vld [vmem:[#allocation5 + $0xb] sm:$0xf]  ;;  %v6579_v33 = vld [vmem:[#allocation5 + $0x13] sm:$0xf] }
 0xa73   :  { %6462 = vst [vmem:[#allocation1 + $0x2] ss:$9 sm:$0xff] %v6383_v1  ;;  %v6790_v1 = vrot.slane %v6563_v15, 4  ;;  %v6783_v4 = vrot.slane %v6578_v17, 4  ;;  %v6603_v59 = vld [vmem:[#allocation5 + $0x12] sm:$0xf] }
 0xa74   :  { %6463 = vst [vmem:[#allocation1 + $0x3] ss:$9 sm:$0xff] %v6384_v11  ;;  %v6611_v11 = vld [vmem:[#allocation5 + $0x13] sm:$0xf] }
 0xa75   :  { %6464 = vst [vmem:[#allocation1 + $0x4] ss:$9 sm:$0xff] %v6385_v57  ;;  %v6853_v57 = vsel %vm13216_vm7, %v6539_v5, %v6789_v46  ;;  %v6540_v25 = vld [vmem:[#allocation5 + $0x12] sm:$0xf]  ;;  %v7049_v46 = vld [vmem:[%s13020_s12 + $0x468] sm:$0xff]  ;;  %v7032_v5 = vld [vmem:[%s13020_s12 + $0x3e0] sm:$0xff] }
 0xa76   :  { %6514 = vst [vmem:[#allocation5 + $0x19] sm:$0x1f] %v6459_v9  ;;  %v6554_v9 = vld [vmem:[#allocation5 + $0x8] sm:$0xf]  ;;  %v6955_v15 = vld [vmem:[%s13020_s12 + $0x178] sm:$0xff]  ;;  %vm13232_vm7 = vmmov %vm13222_vm0 }
 0xa77   :  { %7425 = vmatpush.msra.mxu2 %v6955_v15  ;;  %v7028_v15 = vld [vmem:[%s13020_s12 + $0x3c0] sm:$0xff] }
 0xa7c   :  { %v6465_v55 = vld [vmem:[#allocation1] sm:$0xff] }
 0xa7d   :  { %6466 = vst [vmem:[#allocation1] ss:$9 sm:$0xff] %v6386_v19  ;;  %v6791_v19 = vrot.slane %v6579_v33, 4  ;;  %v6596_v58 = vld [vmem:[#allocation5 + $0x19] sm:$0xf] }
 0xa7e   :  { %6467 = vst [vmem:[#allocation1 + $0x1] ss:$9 sm:$0xff] %v6387_v36  ;;  %v6612_v36 = vld [vmem:[#allocation5 + $0x1b] sm:$0xf]  ;;  %v6792_v35 = vrot.slane %v6596_v58, 4 }
 0xa7f   :  { %6468 = vst [vmem:[#allocation1 + $0x2] ss:$9 sm:$0xff] %v6388_v45  ;;  %v6555_v45 = vld [vmem:[#allocation5 + $0x10] sm:$0xf]  ;;  %v6549_v12 = vld [vmem:[#allocation5 + $0x1b] sm:$0xf] }
 0xa80   :  { %6469 = vst [vmem:[#allocation1 + $0x3] ss:$9 sm:$0xff] %v6389_v61  ;;  %v6628_v61 = vld [vmem:[#allocation5 + $0x19] sm:$0xf] }
 0xa81   :  { %6470 = vst [vmem:[#allocation1 + $0x4] ss:$9 sm:$0xff] %v6358_v62  ;;  %v6854_v62 = vsel %vm13218_vm14, %v6555_v45, %v6790_v1  ;;  %v6805_v1 = vrot.slane %v6549_v12, 4  ;;  %v6556_v45 = vld [vmem:[#allocation5 + $0x18] sm:$0xf]  ;;  %vm13234_vm14 = vmmov %vm13222_vm0 }
 0xa82   :  { %6515 = vst [vmem:[#allocation5 + $0x21] sm:$0x1f] %v6465_v55  ;;  %v6846_v55 = vsel %vm13217_vm13, %v6554_v9, %v6782_v52  ;;  %v12094_v9 = vld [vmem:[#allocation5 + $0x11] sm:$0xf]  ;;  %vm13233_vm13 = vmmov %vm13222_vm0 }
 0xa88   :  { %v6471_v10 = vld [vmem:[#allocation1] sm:$0xff] }
 0xa89   :  { %6472 = vst [vmem:[#allocation1] ss:$9 sm:$0xff] %v6390_v39  ;;  %v6570_v39 = vld [vmem:[#allocation5 + $0xa] sm:$0xf]  ;;  %v6621_v48 = vld [vmem:[#allocation5 + $0x20] sm:$0xf] }
 0xa8a   :  { %6473 = vst [vmem:[#allocation1 + $0x1] ss:$9 sm:$0xff] %v6391_v22  ;;  %v6780_v22 = vrot.slane %v6530_v21, 4  ;;  %v6565_v37 = vld [vmem:[#allocation5 + $0x21] sm:$0xf] }
 0xa8b   :  { %6474 = vst [vmem:[#allocation1 + $0x2] ss:$9 sm:$0xff] %v6392_v53  ;;  %v6571_v53 = vld [vmem:[#allocation5 + $0x12] sm:$0xf] }
 0xa8c   :  { %6475 = vst [vmem:[#allocation1 + $0x3] ss:$9 sm:$0xff] %v6393_v24  ;;  %v6847_v24 = vsel %vm13219_vm12, %v6570_v39, %v6783_v4  ;;  %v12103_v39 = vld [vmem:[#allocation5 + $0x21] sm:$0xf]  ;;  %vm13235_vm12 = vmmov %vm13222_vm0 }
 0xa8d   :  { %6476 = vst [vmem:[#allocation1 + $0x4] ss:$9 sm:$0xff] %v6394_v29  ;;  %v6522_v29 = vld [vmem:[#allocation5] sm:$0xf] }
 0xa8e   :  { %6516 = vst [vmem:[#allocation5 + $0x29] sm:$0x1f] %v6471_v10  ;;  %v6785_v10 = vrot.slane %v6611_v11, 4 }
 0xa94   :  { %v6477_v20 = vld [vmem:[#allocation1] sm:$0xff] }
 0xa95   :  { %6478 = vst [vmem:[#allocation1] ss:$9 sm:$0xff] %v6395_v41  ;;  %v6548_v41 = vld [vmem:[#allocation5 + $0x13] sm:$0xf]  ;;  %v12143_v58 = vld [vmem:[#allocation5 + $0x29] sm:$0xf] }
 0xa96   :  { %6479 = vst [vmem:[#allocation1 + $0x1] ss:$9 sm:$0xff] %v6396_v43  ;;  %v6855_v43 = vsel %vm13220_vm8, %v6571_v53, %v6791_v19  ;;  %vm13236_vm8 = vmmov %vm13222_vm0 }
 0xa97   :  { %6480 = vst [vmem:[#allocation1 + $0x2] ss:$9 sm:$0xff] %v6359_v8  ;;  %v6793_v8 = vrot.slane %v6612_v36, 4  ;;  %v6533_v36 = vld [vmem:[#allocation5 + $0x19] sm:$0xf] }
 0xa98   :  { %6481 = vst [vmem:[#allocation1 + $0x3] ss:$9 sm:$0xff] %v6397_v23  ;;  %v6604_v23 = vld [vmem:[#allocation5 + $0x1a] sm:$0xf] }
 0xa99   :  { %6482 = vst [vmem:[#allocation1 + $0x4] ss:$9 sm:$0xff] %v6398_v27  ;;  %v6786_v27 = vrot.slane %v6628_v61, 4  ;;  %v6806_v61 = vrot.slane %v6565_v37, 4  ;;  %v6606_v37 = vld [vmem:[#allocation5 + $0x2a] sm:$0xf] }
 0xa9a   :  { %6517 = vst [vmem:[#allocation5 + $0x41] sm:$0x1f] %v6477_v20 }
 0xaa0   :  { %v6483_v14 = vld [vmem:[#allocation1] sm:$0xff] }
 0xaa1   :  { %6484 = vst [vmem:[#allocation1] ss:$9 sm:$0xff] %v6399_v51  ;;  %v6788_v51 = vrot.slane %v6531_v60, 4  ;;  %v6541_v60 = vld [vmem:[#allocation5 + $0x1a] sm:$0xf] }
 0xaa2   :  { %6485 = vst [vmem:[#allocation1 + $0x1] ss:$9 sm:$0xff] %v6400_v44  ;;  %v6629_v44 = vld [vmem:[#allocation5 + $0x21] sm:$0xf] }
 0xaa3   :  { %6486 = vst [vmem:[#allocation1 + $0x2] ss:$9 sm:$0xff] %v6401_v7  ;;  %v6849_v7 = vsel %vm13222_vm0, %v6603_v59, %v6785_v10  ;;  %v6852_v28 = vsel %vm13224_vm15, %v6523_v16, %v6788_v51  ;;  %v6557_v10 = vld [vmem:[#allocation5 + $0x20] sm:$0xf]  ;;  %v6869_v59 = vsel %vm13230_vm10, %v6541_v60, %v6805_v1  ;;  %v7030_v16 = vld [vmem:[%s13020_s12 + $0x3d0] sm:$0xff]  ;;  %v6808_v1 = vrot.slane %v12143_v58, 4  ;;  %vm13239_vm15 = vmmov %vm13222_vm0 }
 0xaa4   :  { %6487 = vst [vmem:[#allocation1 + $0x3] ss:$9 sm:$0xff] %v6402_v49  ;;  %v6870_v51 = vsel %vm13232_vm7, %v6557_v10, %v6806_v61  ;;  %v6950_v61 = vld [vmem:[%s13020_s12 + $0x150] sm:$0xff]  ;;  %v6948_v58 = vld [vmem:[%s13020_s12 + $0x140] sm:$0xff]  ;;  %vm13245_vm10 = vmmov %vm13222_vm0 }
 0xaa5   :  { %6488 = vst [vmem:[#allocation1 + $0x4] ss:$9 sm:$0xff] %v6403_v38  ;;  %vm13247_vm7 = vmmov %vm13222_vm0 }
 0xaa6   :  { %6518 = vst [vmem:[#allocation5 + $0x49] sm:$0x1f] %v6483_v14  ;;  %v6844_v14 = vsel %vm13221_vm9, %v6522_v29, %v6780_v22  ;;  %v12105_v22 = vld [vmem:[#allocation5 + $0x23] sm:$0xf]  ;;  %v12111_v29 = vld [vmem:[#allocation5 + $0x2b] sm:$0xf]  ;;  %vm13237_vm9 = vmmov %vm13222_vm0 }
 0xaac   :  { %v6489_v54 = vld [vmem:[#allocation1] sm:$0xff] }
 0xaad   :  { %6490 = vst [vmem:[#allocation1] ss:$9 sm:$0xff] %v6360_v6  ;;  %v6857_v6 = vsel %vm13223_vm5, %v6604_v23, %v6793_v8  ;;  %v6796_v8 = vrot.slane %v12094_v9, 4  ;;  %v7047_v23 = vld [vmem:[%s13020_s12 + $0x458] sm:$0xff]  ;;  %vm13238_vm5 = vmmov %vm13222_vm0 }
 0xaae   :  { %6491 = vst [vmem:[#allocation1 + $0x1] ss:$9 sm:$0xff] %v6404_v18  ;;  %v6620_v18 = vld [vmem:[#allocation5 + $0x18] sm:$0xf] }
 0xaaf   :  { %6492 = vst [vmem:[#allocation1 + $0x2] ss:$9 sm:$0xff] %v6405_v30  ;;  %v6794_v30 = vrot.slane %v6629_v44, 4  ;;  %v6850_v42 = vsel %vm13225_vm4, %v6620_v18, %v6786_v27  ;;  %v12125_v27 = vld [vmem:[#allocation5 + $0x31] sm:$0xf]  ;;  %v6954_v44 = vld [vmem:[%s13020_s12 + $0x170] sm:$0xff]  ;;  %vm13240_vm4 = vmmov %vm13222_vm0 }
 0xab0   :  { %6493 = vst [vmem:[#allocation1 + $0x3] ss:$9 sm:$0xff] %v6406_v50  ;;  %v6797_v50 = vrot.slane %v6548_v41, 4  ;;  %7426 = vmatpush.msra.mxu2 %v6954_v44  ;;  %v6949_v44 = vld [vmem:[%s13020_s12 + $0x148] sm:$0xff] }
 0xab1   :  { %6494 = vst [vmem:[#allocation1 + $0x4] ss:$9 sm:$0xff] %v6407_v40 }
 0xab2   :  { %6519 = vst [vmem:[#allocation5 + $0x51] sm:$0x1f] %v6489_v54  ;;  %v6595_v54 = vld [vmem:[#allocation5 + $0x11] sm:$0xf]  ;;  %v6861_v33 = vsel %vm13227_vm6, %v6540_v25, %v6797_v50  ;;  %v6801_v50 = vrot.slane %v12105_v22, 4  ;;  %vm13242_vm6 = vmmov %vm13222_vm0 }
 0xab3   :  { %v6636_v22 = vld [vmem:[#allocation5 + $0x1a] sm:$0xf] }
 0xab8   :  { %v6495_v56 = vld [vmem:[#allocation1] sm:$0xff] }
 0xab9   :  { %6496 = vst [vmem:[#allocation1] ss:$9 sm:$0xff] %v6408_v31  ;;  %v6858_v31 = vsel %vm13226_vm2, %v6621_v48, %v6794_v30  ;;  %v6800_v30 = vrot.slane %v12103_v39, 4  ;;  %v6810_v48 = vrot.slane %v12125_v27, 4  ;;  %v7043_v27 = vld [vmem:[%s13020_s12 + $0x438] sm:$0xff]  ;;  %vm13241_vm2 = vmmov %vm13222_vm0  ;;  %v7041_v39 = vld [vmem:[%s13020_s12 + $0x428] sm:$0xff] }
 0xaba   :  { %6497 = vst [vmem:[#allocation1 + $0x1] ss:$9 sm:$0xff] %v6409_v32  ;;  %v6564_v32 = vld [vmem:[#allocation5 + $0x19] sm:$0xf] }
 0xabb   :  { %6498 = vst [vmem:[#allocation1 + $0x2] ss:$9 sm:$0xff] %v6410_v63  ;;  %v7033_v63 = vld [vmem:[%s13020_s12 + $0x3e8] sm:$0xff]  ;;  %v6798_v11 = vrot.slane %v6564_v32, 4 }
 0xabc   :  { %6499 = vst [vmem:[#allocation1 + $0x3] ss:$9 sm:$0xff] %v6361_v34  ;;  %v7050_v34 = vld [vmem:[%s13020_s12 + $0x470] sm:$0xff]  ;;  %7572 = vmatpush.msrb.mxu0 %v7033_v63 }
 0xabd   :  { %6500 = vst [vmem:[#allocation1 + $0x4] ss:$9 sm:$0xff] %v6411_v26  ;;  %7600 = vmatpush.msrb.mxu1 %v7050_v34  ;;  %v6587_v26 = vld [vmem:[#allocation5 + $0x10] sm:$0xf]  ;;  %v6862_v41 = vsel %vm13231_vm11, %v6556_v45, %v6798_v11  ;;  %v7045_v34 = vld [vmem:[%s13020_s12 + $0x448] sm:$0xff]  ;;  %vm13246_vm11 = vmmov %vm13222_vm0 }
 0xabe   :  { %7172 = vst [vmem:[#allocation1 + $0x10] ss:$2 sm:$0xff] %v6845_v2  ;;  %v6588_v2 = vld [vmem:[#allocation5 + $0x18] sm:$0xf]  ;;  %7573 = vmatpush.msrb.mxu0 %v7032_v5  ;;  %v6622_v5 = vld [vmem:[#allocation5 + $0x28] sm:$0xf] }
 0xabf   :  { %7174 = vst [vmem:[#allocation1 + $0x11] ss:$2 sm:$0xff] %v6853_v57  ;;  %7601 = vmatpush.msrb.mxu1 %v7049_v46  ;;  %v7048_v57 = vld [vmem:[%s13020_s12 + $0x460] sm:$0xff] }
 0xac0   :  { %6520 = vst [vmem:[#allocation5 + $0x59] sm:$0x1f] %v6495_v56  ;;  %v6784_v56 = vrot.slane %v6595_v54, 4  ;;  %v6525_v54 = vld [vmem:[#allocation5 + $0x18] sm:$0xf] }
 0xac1   :  { %7176 = vst [vmem:[#allocation1 + $0x20] ss:$2 sm:$0xff] %v6846_v55  ;;  %7602 = vmatpush.msrb.mxu1 %v7048_v57  ;;  %v6856_v55 = vsel %vm13229_vm1, %v6588_v2, %v6792_v35  ;;  %v12165_v35 = vld [vmem:[#allocation5 + $0x3b] sm:$0xf]  ;;  %v12183_v57 = vld [vmem:[#allocation5 + $0x43] sm:$0xf]  ;;  %vm13244_vm1 = vmmov %vm13222_vm0 }
 0xac2   :  { %7178 = vst [vmem:[#allocation1 + $0x21] ss:$2 sm:$0xff] %v6854_v62  ;;  %v6848_v4 = vsel %vm13228_vm3, %v6587_v26, %v6784_v56  ;;  %v12101_v62 = vld [vmem:[#allocation5 + $0x1b] sm:$0xf]  ;;  %vm13243_vm3 = vmmov %vm13222_vm0 }
 0xac3   :  { %7180 = vst [vmem:[#allocation1 + $0x30] ss:$2 sm:$0xff] %v6847_v24  ;;  %7603 = vmatpush.msrb.mxu1 %v7047_v23  ;;  %v6787_v18 = vrot.slane %v12101_v62, 4  ;;  %v6952_v26 = vld [vmem:[%s13020_s12 + $0x160] sm:$0xff]  ;;  %v12209_v23 = vld [vmem:[#allocation5 + $0x49] sm:$0xf] }
 0xac4   :  { %v6501_v20 = vld [vmem:[#allocation1] sm:$0xff]  ;;  %7182 = vst [vmem:[#allocation1 + $0x31] ss:$2 sm:$0xff] %v6855_v43  ;;  %v7003_v43 = vld [vmem:[%s13020_s12 + $0x2f8] sm:$0xff] }
 0xac5   :  { %6521 = vst [vmem:[#allocation5 + $0x61] sm:$0x1f] %v6501_v20  ;;  %v7031_v20 = vld [vmem:[%s13020_s12 + $0x3d8] sm:$0xff]  ;;  %7512 = vmatpush.msrb.mxu3 %v7003_v43  ;;  %v7000_v46 = vld [vmem:[%s13020_s12 + $0x2e0] sm:$0xff]  ;;  %v6589_v43 = vld [vmem:[#allocation5 + $0x20] sm:$0xf] }
 0xac6   :  { %v12057_v49 = vld.sshfl [vmem:[#allocation1 + $0x10] sm:$0xff pattern:$0x75316420]  ;;  %v7186_v38 = vld.sshfl [vmem:[#allocation1 + $0x18] sm:$0xff pattern:$0x75316420]  ;;  %7574 = vmatpush.msrb.mxu0 %v7031_v20  ;;  %v6864_v62 = vsel %vm13239_vm15, %v6589_v43, %v6800_v30  ;;  %vm13254_vm15 = vmmov %vm13222_vm0 }
 0xac7   :  { %7193 = vst [vmem:[#allocation1 + $0x10] ss:$2 sm:$0xff] %v6849_v7  ;;  %7470 = vmatmul.f32.vlgmr.msra.gmra.mxu0 %v7186_v38  ;;  %v6804_v7 = vrot.slane %v6533_v36, 4  ;;  %v6524_v38 = vld [vmem:[#allocation5 + $0x10] sm:$0xf]  ;;  %v6813_v20 = vrot.slane %v12165_v35, 4 }
 0xac8   :  { %7194 = vst [vmem:[#allocation1 + $0x11] ss:$2 sm:$0xff] %v6857_v6  ;;  %v7046_v6 = vld [vmem:[%s13020_s12 + $0x450] sm:$0xff]  ;;  %7575 = vmatpush.msrb.mxu0 %v7030_v16  ;;  %v6860_v25 = vsel %vm13233_vm13, %v6524_v38, %v6796_v8  ;;  %v12203_v8 = vld [vmem:[#allocation5 + $0x41] sm:$0xf]  ;;  %v6996_v30 = vld [vmem:[%s13020_s12 + $0x2c0] sm:$0xff] }
 0xac9   :  { %7168 = vst [vmem:[#allocation1] ss:$2 sm:$0xff] %v6844_v14  ;;  %v7187_v40 = vld.sshfl [vmem:[#allocation1 + $0x20] sm:$0xff pattern:$0x75316420]  ;;  %v7002_v14 = vld [vmem:[%s13020_s12 + $0x2f0] sm:$0xff]  ;;  %7604 = vmatpush.msrb.mxu1 %v7046_v6  ;;  %v6868_v56 = vsel %vm13234_vm14, %v6525_v54, %v6804_v7  ;;  %v6851_v6 = vsel %vm13238_vm5, %v6636_v22, %v6787_v18  ;;  %vm13248_vm13 = vmmov %vm13222_vm0 }
 0xaca   :  { %7170 = vst [vmem:[#allocation1 + $0x1] ss:$2 sm:$0xff] %v6852_v28  ;;  %v12065_v47 = vld.sshfl [vmem:[#allocation1 + $0x28] sm:$0xff pattern:$0x75316420]  ;;  %7499 = vmatmul.f32.vlgmr.msra.gmra.mxu1 %v7187_v40  ;;  %7513 = vmatpush.msrb.mxu3 %v7002_v14  ;;  %v7026_v38 = vld [vmem:[%s13020_s12 + $0x3b0] sm:$0xff]  ;;  %vm13249_vm14 = vmmov %vm13222_vm0 }
 0xacb   :  { %7195 = vst [vmem:[#allocation1 + $0x20] ss:$2 sm:$0xff] %v6850_v42  ;;  %v6630_v28 = vld [vmem:[#allocation5 + $0x29] sm:$0xf]  ;;  %v6953_v40 = vld [vmem:[%s13020_s12 + $0x168] sm:$0xff]  ;;  %v6809_v42 = vrot.slane %v12111_v29, 4  ;;  %7576 = vmatpush.msrb.mxu0 %v7029_v3  ;;  %7605 = vmatpush.msrb.mxu1 %v7045_v34  ;;  %vm13253_vm5 = vmmov %vm13222_vm0 }
 0xacc   :  { %7196 = vst [vmem:[#allocation1 + $0x21] ss:$2 sm:$0xff] %v6858_v31  ;;  %7427 = vmatpush.msra.mxu2 %v6953_v40  ;;  %v6605_v31 = vld [vmem:[#allocation5 + $0x22] sm:$0xf]  ;;  %7514 = vmatpush.msrb.mxu3 %v7001_v0  ;;  %v6802_v63 = vrot.slane %v6630_v28, 4  ;;  %v6821_v54 = vrot.slane %v12183_v57, 4 }
 0xacd   :  { %v6865_v9 = vsel %vm13235_vm12, %v6605_v31, %v6801_v50  ;;  %7577 = vmatpush.msrb.mxu0 %v7028_v15  ;;  %v12193_v60 = vld.sshfl [vmem:[#allocation1 + $0x38] sm:$0xff pattern:$0x75316420]  ;;  %v6873_v36 = vsel %vm13236_vm8, %v6606_v37, %v6809_v42  ;;  %v6590_v14 = vld [vmem:[#allocation5 + $0x28] sm:$0xf]  ;;  %v6997_v16 = vld [vmem:[%s13020_s12 + $0x2c8] sm:$0xff] }
 0xace   :  { %7428 = vmatpush.msra.mxu2 %v6952_v26  ;;  %7515 = vmatpush.msrb.mxu3 %v7000_v46  ;;  %v6866_v10 = vsel %vm13222_vm0, %v6622_v5, %v6802_v63  ;;  %v12220_v7 = vld [vmem:[#allocation5 + $0x39] sm:$0xf]  ;;  %v7042_v50 = vld [vmem:[%s13020_s12 + $0x430] sm:$0xff]  ;;  %v7025_v28 = vld [vmem:[%s13020_s12 + $0x3a8] sm:$0xff]  ;;  %v6872_v42 = vsel %vm13240_vm4, %v6590_v14, %v6808_v1  ;;  %v6822_v63 = vrot.slane %v12209_v23, 4 }
 0xacf   :  { %v12089_v17 = vld.sshfl [vmem:[#allocation1 + $0x10] sm:$0xff pattern:$0x75316420]  ;;  %v12091_v52 = vld.sshfl [vmem:[#allocation1 + $0x18] sm:$0xff pattern:$0x75316420]  ;;  %vm13250_vm12 = vmmov %vm13222_vm0 }
 0xad0   :  { %7209 = vst [vmem:[#allocation1 + $0x10] ss:$2 sm:$0xff] %v6861_v33  ;;  %v6951_v33 = vld [vmem:[%s13020_s12 + $0x158] sm:$0xff]  ;;  %v12241_v40 = vld [vmem:[#allocation5 + $0x23] sm:$0xf]  ;;  %v6812_v37 = vrot.slane %v12220_v7, 4  ;;  %vm13251_vm8 = vmmov %vm13222_vm0 }
 0xad1   :  { %v7183_v21 = vld.sshfl [vmem:[#allocation1] sm:$0xff pattern:$0x75316420]  ;;  %v7184_v19 = vld.sshfl [vmem:[#allocation1 + $0x8] sm:$0xff pattern:$0x75316420]  ;;  %7429 = vmatpush.msra.mxu2 %v6951_v33  ;;  %vm13255_vm4 = vmmov %vm13222_vm0 }
 0xad2   :  { %7383 = vmatmul.f32.vlgmr.msrb.gmra.mxu2 %v7183_v21  ;;  %7191 = vst [vmem:[#allocation1] ss:$2 sm:$0xff] %v6848_v4  ;;  %7412 = vmatmul.f32.vlgmr.msra.gmra.mxu3 %v7184_v19  ;;  %v7044_v4 = vld [vmem:[%s13020_s12 + $0x440] sm:$0xff]  ;;  %v6999_v21 = vld [vmem:[%s13020_s12 + $0x2d8] sm:$0xff]  ;;  %v6558_v5 = vld [vmem:[#allocation5 + $0x40] sm:$0xf] }
 0xad3   :  { %7192 = vst [vmem:[#allocation1 + $0x1] ss:$2 sm:$0xff] %v6856_v55  ;;  %v12107_v53 = vld.sshfl [vmem:[#allocation1 + $0x20] sm:$0xff pattern:$0x75316420]  ;;  %v6874_v55 = vsel %vm13237_vm9, %v6623_v13, %v6810_v48  ;;  %7516 = vmatpush.msrb.mxu3 %v6999_v21  ;;  %7606 = vmatpush.msrb.mxu1 %v7044_v4  ;;  %v6814_v48 = vrot.slane %v12203_v8, 4  ;;  %vm13252_vm9 = vmmov %vm13222_vm0 }
 0xad4   :  { %v12109_v24 = vld.sshfl [vmem:[#allocation1 + $0x28] sm:$0xff pattern:$0x75316420]  ;;  %7210 = vst [vmem:[#allocation1 + $0x11] ss:$2 sm:$0xff] %v6869_v59  ;;  %7430 = vmatpush.msra.mxu2 %v6950_v61  ;;  %v6947_v34 = vld [vmem:[%s13020_s12 + $0x138] sm:$0xff] }
 0xad5   :  { %7211 = vst [vmem:[#allocation1 + $0x20] ss:$2 sm:$0xff] %v6862_v41  ;;  %v12191_v19 = vld.sshfl [vmem:[#allocation1 + $0x30] sm:$0xff pattern:$0x75316420]  ;;  %v7027_v41 = vld [vmem:[%s13020_s12 + $0x3b8] sm:$0xff]  ;;  %7607 = vmatpush.msrb.mxu1 %v7043_v27 }
 0xad6   :  { %7212 = vst [vmem:[#allocation1 + $0x21] ss:$2 sm:$0xff] %v6870_v51  ;;  %v6542_v59 = vld [vmem:[#allocation5 + $0x3a] sm:$0xf]  ;;  %v6998_v51 = vld [vmem:[%s13020_s12 + $0x2d0] sm:$0xff]  ;;  %7578 = vmatpush.msrb.mxu0 %v7027_v41  ;;  %7431 = vmatpush.msra.mxu2 %v6949_v44  ;;  %v6995_v1 = vld [vmem:[%s13020_s12 + $0x2b8] sm:$0xff] }
 0xad7   :  { %7517 = vmatpush.msrb.mxu3 %v6998_v51  ;;  %7197 = vst [vmem:[#allocation1 + $0x30] ss:$2 sm:$0xff] %v6851_v6  ;;  %v12247_v13 = vld [vmem:[#allocation5 + $0x41] sm:$0xf]  ;;  %v6877_v3 = vsel %vm13241_vm2, %v6542_v59, %v6813_v20  ;;  %v6526_v31 = vld [vmem:[#allocation5 + $0x38] sm:$0xf]  ;;  %7608 = vmatpush.msrb.mxu1 %v7042_v50  ;;  %vm13256_vm2 = vmmov %vm13222_vm0 }
 0xad8   :  { %7579 = vmatpush.msrb.mxu0 %v7026_v38  ;;  %7432 = vmatpush.msra.mxu2 %v6948_v58  ;;  %v7024_v35 = vld [vmem:[%s13020_s12 + $0x3a0] sm:$0xff]  ;;  %v12274_v33 = vld [vmem:[#allocation5 + $0x49] sm:$0xf]  ;;  %v7023_v57 = vld [vmem:[%s13020_s12 + $0x398] sm:$0xff]  ;;  %v6795_v4 = vrot.slane %v12241_v40, 4  ;;  %v6820_v22 = vrot.slane %v12247_v13, 4  ;;  %v6876_v27 = vsel %vm13244_vm1, %v6526_v31, %v6812_v37 }
 0xad9   :  { %7518 = vmatpush.msrb.mxu3 %v6997_v16  ;;  %v7040_v26 = vld [vmem:[%s13020_s12 + $0x420] sm:$0xff]  ;;  %7609 = vmatpush.msrb.mxu1 %v7041_v39  ;;  %v12293_v61 = vld [vmem:[#allocation5 + $0x51] sm:$0xf]  ;;  %v12297_v59 = vld [vmem:[#allocation5 + $0x4b] sm:$0xf]  ;;  %v6816_v16 = vrot.slane %v12274_v33, 4 }
 0xada   :  { %v12160_v12 = vld.sshfl [vmem:[#allocation1] sm:$0xff pattern:$0x75316420]  ;;  %v12162_v32 = vld.sshfl [vmem:[#allocation1 + $0x8] sm:$0xff pattern:$0x75316420]  ;;  %7580 = vmatpush.msrb.mxu0 %v7025_v28  ;;  %7433 = vmatpush.msra.mxu2 %v6947_v34  ;;  %vm13259_vm1 = vmmov %vm13222_vm0 }
 0xadb   :  { %7207 = vst [vmem:[#allocation1] ss:$2 sm:$0xff] %v6860_v25  ;;  %v12176_v2 = vld.sshfl [vmem:[#allocation1 + $0x10] sm:$0xff pattern:$0x75316420]  ;;  %7519 = vmatpush.msrb.mxu3 %v6996_v30  ;;  %7610 = vmatpush.msrb.mxu1 %v7040_v26  ;;  %v7039_v8 = vld [vmem:[%s13020_s12 + $0x418] sm:$0xff] }
 0xadc   :  { %7208 = vst [vmem:[#allocation1 + $0x1] ss:$2 sm:$0xff] %v6868_v56  ;;  %v7218_v11 = vld.sshfl [vmem:[#allocation1 + $0x18] sm:$0xff pattern:$0x75316420]  ;;  %7581 = vmatpush.msrb.mxu0 %v7024_v35  ;;  %v6994_v41 = vld [vmem:[%s13020_s12 + $0x2b0] sm:$0xff] }
 0xadd   :  { %7225 = vst [vmem:[#allocation1 + $0x10] ss:$2 sm:$0xff] %v6865_v9  ;;  %7473 = vmatmul.f32.gmra.mxu0 %v7218_v11  ;;  %v7219_v45 = vld.sshfl [vmem:[#allocation1 + $0x20] sm:$0xff pattern:$0x75316420]  ;;  %v6946_v11 = vld [vmem:[%s13020_s12 + $0x130] sm:$0xff]  ;;  %7520 = vmatpush.msrb.mxu3 %v6995_v1 }
 0xade   :  { %7226 = vst [vmem:[#allocation1 + $0x11] ss:$2 sm:$0xff] %v6873_v36  ;;  %v12201_v29 = vld.sshfl [vmem:[#allocation1 + $0x28] sm:$0xff pattern:$0x75316420]  ;;  %7502 = vmatmul.f32.gmra.mxu1 %v7219_v45  ;;  %7434 = vmatpush.msra.mxu2 %v6946_v11  ;;  %v7022_v14 = vld [vmem:[%s13020_s12 + $0x390] sm:$0xff] }
 0xadf   :  { %7227 = vst [vmem:[#allocation1 + $0x20] ss:$2 sm:$0xff] %v6866_v10  ;;  %v6543_v25 = vld [vmem:[#allocation5 + $0x42] sm:$0xf]  ;;  %v12260_v56 = vld [vmem:[#allocation5 + $0x4b] sm:$0xf]  ;;  %v6878_v10 = vsel %vm13243_vm3, %v6558_v5, %v6814_v48  ;;  %7582 = vmatpush.msrb.mxu0 %v7023_v57  ;;  %7521 = vmatpush.msrb.mxu3 %v6994_v41  ;;  %vm13258_vm3 = vmmov %vm13222_vm0 }
 0xae0   :  { %7228 = vst [vmem:[#allocation1 + $0x21] ss:$2 sm:$0xff] %v6874_v55  ;;  %v6559_v9 = vld [vmem:[#allocation5 + $0x48] sm:$0xf]  ;;  %v12290_v55 = vld [vmem:[#allocation5 + $0x53] sm:$0xf]  ;;  %v6885_v45 = vsel %vm13242_vm6, %v6543_v25, %v6821_v54  ;;  %7611 = vmatpush.msrb.mxu1 %v7039_v8  ;;  %vm13257_vm6 = vmmov %vm13222_vm0 }
 0xae1   :  { %v6945_v43 = vld [vmem:[%s13020_s12 + $0x128] sm:$0xff]  ;;  %v6817_v23 = vrot.slane %v12260_v56, 4  ;;  %v12310_v51 = vld [vmem:[#allocation5 + $0x59] sm:$0xf]  ;;  %v6886_v44 = vsel %vm13245_vm10, %v6559_v9, %v6822_v63  ;;  %v7038_v7 = vld [vmem:[%s13020_s12 + $0x410] sm:$0xff]  ;;  %7583 = vmatpush.msrb.mxu0 %v7022_v14  ;;  %v6818_v30 = vrot.slane %v12293_v61, 4 }
 0xae2   :  { %v6527_v20 = vld [vmem:[#allocation5 + $0x40] sm:$0xf]  ;;  %7435 = vmatpush.msra.mxu2 %v6945_v43  ;;  %v6944_v6 = vld [vmem:[%s13020_s12 + $0x120] sm:$0xff]  ;;  %7612 = vmatpush.msrb.mxu1 %v7038_v7  ;;  %v6943_v48 = vld [vmem:[%s13020_s12 + $0x118] sm:$0xff]  ;;  %v6829_v34 = vrot.slane %v12297_v59, 4  ;;  %v6826_v37 = vrot.slane %v12310_v51, 4 }
 0xae3   :  { %v7215_v18 = vld.sshfl [vmem:[#allocation1] sm:$0xff pattern:$0x75316420]  ;;  %v7216_v0 = vld.sshfl [vmem:[#allocation1 + $0x8] sm:$0xff pattern:$0x75316420]  ;;  %vm13260_vm10 = vmmov %vm13222_vm0 }
 0xae4   :  { %7386 = vmatmul.f32.gmra.mxu2 %v7215_v18  ;;  %7223 = vst [vmem:[#allocation1] ss:$2 sm:$0xff] %v6864_v62  ;;  %7415 = vmatmul.f32.gmra.mxu3 %v7216_v0  ;;  %v6993_v38 = vld [vmem:[%s13020_s12 + $0x2a8] sm:$0xff]  ;;  %v12336_v62 = vld [vmem:[#allocation5 + $0x51] sm:$0xf]  ;;  %v6825_v0 = vrot.slane %v12290_v55, 4 }
 0xae5   :  { %7224 = vst [vmem:[#allocation1 + $0x1] ss:$2 sm:$0xff] %v6872_v42  ;;  %v12270_v46 = vld.sshfl [vmem:[#allocation1 + $0x10] sm:$0xff pattern:$0x75316420]  ;;  %v7021_v54 = vld [vmem:[%s13020_s12 + $0x388] sm:$0xff]  ;;  %7522 = vmatpush.msrb.mxu3 %v6993_v38  ;;  %v6884_v42 = vsel %vm13246_vm11, %v6527_v20, %v6820_v22  ;;  %7436 = vmatpush.msra.mxu2 %v6944_v6  ;;  %vm13261_vm11 = vmmov %vm13222_vm0 }
 0xae6   :  { %v12272_v15 = vld.sshfl [vmem:[#allocation1 + $0x18] sm:$0xff pattern:$0x75316420]  ;;  %v7037_v50 = vld [vmem:[%s13020_s12 + $0x408] sm:$0xff]  ;;  %v6607_v18 = vld [vmem:[#allocation5 + $0x4a] sm:$0xf]  ;;  %7584 = vmatpush.msrb.mxu0 %v7021_v54 }
 0xae7   :  { %7241 = vst [vmem:[#allocation1 + $0x10] ss:$2 sm:$0xff] %v6877_v3  ;;  %v12286_v21 = vld.sshfl [vmem:[#allocation1 + $0x20] sm:$0xff pattern:$0x75316420]  ;;  %v6991_v25 = vld [vmem:[%s13020_s12 + $0x298] sm:$0xff]  ;;  %7613 = vmatpush.msrb.mxu1 %v7037_v50  ;;  %7437 = vmatpush.msra.mxu2 %v6943_v48  ;;  %v6881_v5 = vsel %vm13248_vm13, %v6607_v18, %v6817_v23  ;;  %vm13263_vm13 = vmmov %vm13222_vm0 }
 0xae8   :  { %v12288_v36 = vld.sshfl [vmem:[#allocation1 + $0x28] sm:$0xff pattern:$0x75316420]  ;;  %7242 = vst [vmem:[#allocation1 + $0x11] ss:$2 sm:$0xff] %v6885_v45  ;;  %v6992_v13 = vld [vmem:[%s13020_s12 + $0x2a0] sm:$0xff] }
 0xae9   :  { %7243 = vst [vmem:[#allocation1 + $0x20] ss:$2 sm:$0xff] %v6878_v10  ;;  %v6637_v58 = vld [vmem:[#allocation5 + $0x22] sm:$0xf]  ;;  %v7020_v3 = vld [vmem:[%s13020_s12 + $0x380] sm:$0xff]  ;;  %7523 = vmatpush.msrb.mxu3 %v6992_v13  ;;  %v6942_v63 = vld [vmem:[%s13020_s12 + $0x110] sm:$0xff] }
 0xaea   :  { %7244 = vst [vmem:[#allocation1 + $0x21] ss:$2 sm:$0xff] %v6886_v44  ;;  %v6608_v39 = vld [vmem:[#allocation5 + $0x52] sm:$0xf]  ;;  %v7036_v31 = vld [vmem:[%s13020_s12 + $0x400] sm:$0xff]  ;;  %v6859_v56 = vsel %vm13247_vm7, %v6637_v58, %v6795_v4  ;;  %v6990_v26 = vld [vmem:[%s13020_s12 + $0x290] sm:$0xff]  ;;  %7585 = vmatpush.msrb.mxu0 %v7020_v3  ;;  %7438 = vmatpush.msra.mxu2 %v6942_v63 }
 0xaeb   :  { %7198 = vst [vmem:[#allocation1 + $0x31] ss:$2 sm:$0xff] %v6859_v56  ;;  %v7099_v35 = vld [vmem:[%s13020_s12 + $0x5f8] sm:$0xff]  ;;  %7524 = vmatpush.msrb.mxu3 %v6991_v25  ;;  %v6824_v57 = vrot.slane %v12336_v62, 4  ;;  %v6889_v4 = vsel %vm13249_vm14, %v6608_v39, %v6825_v0  ;;  %7614 = vmatpush.msrb.mxu1 %v7036_v31  ;;  %v6941_v61 = vld [vmem:[%s13020_s12 + $0x108] sm:$0xff]  ;;  %v7098_v22 = vld [vmem:[%s13020_s12 + $0x5f0] sm:$0xff] }
 0xaec   :  { %v12332_v28 = vld.sshfl [vmem:[#allocation1] sm:$0xff pattern:$0x75316420]  ;;  %v12334_v40 = vld.sshfl [vmem:[#allocation1 + $0x8] sm:$0xff pattern:$0x75316420]  ;;  %7686 = vmatpush.msra.mxu0 %v7099_v35  ;;  %7439 = vmatpush.msra.mxu2 %v6941_v61  ;;  %vm13262_vm7 = vmmov %vm13222_vm0 }
 0xaed   :  { %7239 = vst [vmem:[#allocation1] ss:$2 sm:$0xff] %v6876_v27  ;;  %v6624_v11 = vld [vmem:[#allocation5 + $0x50] sm:$0xf]  ;;  %v6989_v8 = vld [vmem:[%s13020_s12 + $0x288] sm:$0xff]  ;;  %7525 = vmatpush.msrb.mxu3 %v6990_v26  ;;  %v7114_v51 = vld [vmem:[%s13020_s12 + $0x670] sm:$0xff] }
 0xaee   :  { %7240 = vst [vmem:[#allocation1 + $0x1] ss:$2 sm:$0xff] %v6884_v42  ;;  %v12373_v55 = vld [vmem:[#allocation5 + $0x53] sm:$0xf]  ;;  %v6591_v41 = vld [vmem:[#allocation5 + $0x48] sm:$0xf]  ;;  %v6882_v20 = vsel %vm13250_vm12, %v6624_v11, %v6818_v30  ;;  %7687 = vmatpush.msra.mxu0 %v7098_v22  ;;  %vm13264_vm14 = vmmov %vm13222_vm0 }
 0xaef   :  { %v12369_v9 = vld.sshfl [vmem:[#allocation1 + $0x10] sm:$0xff pattern:$0x75316420]  ;;  %v7250_v1 = vld.sshfl [vmem:[#allocation1 + $0x18] sm:$0xff pattern:$0x75316420]  ;;  %7526 = vmatpush.msrb.mxu3 %v6989_v8  ;;  %v6880_v18 = vsel %vm13252_vm9, %v6591_v41, %v6816_v16  ;;  %vm13265_vm12 = vmmov %vm13222_vm0 }
 0xaf0   :  { %7257 = vst [vmem:[#allocation1 + $0x10] ss:$2 sm:$0xff] %v6881_v5  ;;  %7476 = vmatmul.f32.gmra.mxu0 %v7250_v1  ;;  %v7115_v45 = vld [vmem:[%s13020_s12 + $0x678] sm:$0xff]  ;;  %v6625_v43 = vld [vmem:[#allocation5 + $0x58] sm:$0xf]  ;;  %v7097_v6 = vld [vmem:[%s13020_s12 + $0x5e8] sm:$0xff] }
 0xaf1   :  { %7258 = vst [vmem:[#allocation1 + $0x11] ss:$2 sm:$0xff] %v6889_v4  ;;  %v7251_v10 = vld.sshfl [vmem:[#allocation1 + $0x20] sm:$0xff pattern:$0x75316420]  ;;  %v6890_v14 = vsel %vm13251_vm8, %v6625_v43, %v6826_v37  ;;  %7715 = vmatpush.msra.mxu1 %v7115_v45  ;;  %v7113_v58 = vld [vmem:[%s13020_s12 + $0x668] sm:$0xff]  ;;  %7688 = vmatpush.msra.mxu0 %v7097_v6  ;;  %vm13266_vm8 = vmmov %vm13222_vm0 }
 0xaf2   :  { %v12388_v23 = vld.sshfl [vmem:[#allocation1 + $0x28] sm:$0xff pattern:$0x75316420]  ;;  %7505 = vmatmul.f32.gmra.mxu1 %v7251_v10  ;;  %v12390_v27 = vld [vmem:[#allocation5 + $0x51] sm:$0xf]  ;;  %v6940_v38 = vld [vmem:[%s13020_s12 + $0x100] sm:$0xff] }
 0xaf3   :  { %v6592_v44 = vld [vmem:[#allocation5 + $0x50] sm:$0xf]  ;;  %7259 = vst [vmem:[#allocation1 + $0x20] ss:$2 sm:$0xff] %v6882_v20  ;;  %v12396_v7 = vld [vmem:[#allocation5 + $0x59] sm:$0xf]  ;;  %7716 = vmatpush.msra.mxu1 %v7114_v51  ;;  %7440 = vmatpush.msra.mxu2 %v6940_v38  ;;  %vm13267_vm9 = vmmov %vm13222_vm0 }
 0xaf4   :  { %v12404_v54 = vld [vmem:[#allocation5 + $0x49] sm:$0xf]  ;;  %7260 = vst [vmem:[#allocation1 + $0x21] ss:$2 sm:$0xff] %v6890_v14  ;;  %v12409_v62 = vld [vmem:[#allocation5 + $0x51] sm:$0xf]  ;;  %v6888_v39 = vsel %vm13222_vm0, %v6592_v44, %v6824_v57 }
 0xaf5   :  { %v7247_v50 = vld.sshfl [vmem:[#allocation1] sm:$0xff pattern:$0x75316420]  ;;  %v7248_v0 = vld.sshfl [vmem:[#allocation1 + $0x8] sm:$0xff pattern:$0x75316420]  ;;  %7717 = vmatpush.msra.mxu1 %v7113_v58 }
 0xaf6   :  { %7389 = vmatmul.f32.gmra.mxu2 %v7247_v50  ;;  %v6544_v42 = vld [vmem:[#allocation5 + $0x4a] sm:$0xf]  ;;  %v6837_v13 = vrot.slane %v12373_v55, 4  ;;  %v6988_v48 = vld [vmem:[%s13020_s12 + $0x280] sm:$0xff]  ;;  %v7019_v3 = vld [vmem:[%s13020_s12 + $0x378] sm:$0xff]  ;;  %7418 = vmatmul.f32.gmra.mxu3 %v7248_v0  ;;  %v6830_v31 = vrot.slane %v12390_v27, 4 }
 0xaf7   :  { %7255 = vst [vmem:[#allocation1] ss:$2 sm:$0xff] %v6880_v18  ;;  %v6545_v33 = vld [vmem:[#allocation5 + $0x52] sm:$0xf]  ;;  %v7096_v16 = vld [vmem:[%s13020_s12 + $0x5e0] sm:$0xff]  ;;  %v6838_v25 = vrot.slane %v12396_v7, 4  ;;  %v6893_v5 = vsel %vm13253_vm5, %v6544_v42, %v6829_v34  ;;  %7527 = vmatpush.msrb.mxu3 %v6988_v48  ;;  %7541 = vmatpush.msrb.mxu2 %v7019_v3  ;;  %vm13268_vm5 = vmmov %vm13222_vm0 }
 0xaf8   :  { %v7112_v30 = vld [vmem:[%s13020_s12 + $0x660] sm:$0xff]  ;;  %7256 = vst [vmem:[#allocation1 + $0x1] ss:$2 sm:$0xff] %v6888_v39  ;;  %v7067_v37 = vld [vmem:[%s13020_s12 + $0x4f8] sm:$0xff]  ;;  %v7018_v63 = vld [vmem:[%s13020_s12 + $0x370] sm:$0xff]  ;;  %v6828_v57 = vrot.slane %v12404_v54, 4  ;;  %v6901_v4 = vsel %vm13254_vm15, %v6545_v33, %v6837_v13  ;;  %7689 = vmatpush.msra.mxu0 %v7096_v16 }
 0xaf9   :  { %v12430_v56 = vld [vmem:[#allocation5 + $0x1b] sm:$0xf]  ;;  %v12438_v35 = vld.sshfl [vmem:[#allocation1 + $0x10] sm:$0xff pattern:$0x75316420]  ;;  %7718 = vmatpush.msra.mxu1 %v7112_v30  ;;  %v7095_v45 = vld [vmem:[%s13020_s12 + $0x5d8] sm:$0xff]  ;;  %7628 = vmatpush.msra.mxu3 %v7067_v37 }
 0xafa   :  { %v12440_v26 = vld.sshfl [vmem:[#allocation1 + $0x18] sm:$0xff pattern:$0x75316420]  ;;  %v12445_v11 = vld [vmem:[#allocation5 + $0x23] sm:$0xf]  ;;  %v7066_v34 = vld [vmem:[%s13020_s12 + $0x4f0] sm:$0xff]  ;;  %7542 = vmatpush.msrb.mxu2 %v7018_v63  ;;  %7690 = vmatpush.msra.mxu0 %v7095_v45 }
 0xafb   :  { %v6560_v1 = vld [vmem:[#allocation5 + $0x50] sm:$0xf]  ;;  %7273 = vst [vmem:[#allocation1 + $0x10] ss:$2 sm:$0xff] %v6893_v5  ;;  %v6561_v55 = vld [vmem:[#allocation5 + $0x58] sm:$0xf]  ;;  %7629 = vmatpush.msra.mxu3 %v7066_v34  ;;  %vm13269_vm15 = vmmov %vm13222_vm0 }
 0xafc   :  { %v7111_v59 = vld [vmem:[%s13020_s12 + $0x658] sm:$0xff]  ;;  %v6836_v61 = vrot.slane %v12409_v62, 4  ;;  %7274 = vst [vmem:[#allocation1 + $0x11] ss:$2 sm:$0xff] %v6901_v4  ;;  %v7017_v22 = vld [vmem:[%s13020_s12 + $0x368] sm:$0xff]  ;;  %v7094_v10 = vld [vmem:[%s13020_s12 + $0x5d0] sm:$0xff]  ;;  %v6894_v27 = vsel %vm13255_vm4, %v6560_v1, %v6830_v31  ;;  %v6902_v44 = vsel %vm13256_vm2, %v6561_v55, %v6838_v25 }
 0xafd   :  { %v7110_v8 = vld [vmem:[%s13020_s12 + $0x650] sm:$0xff]  ;;  %v12468_v43 = vld.sshfl [vmem:[#allocation1 + $0x20] sm:$0xff pattern:$0x75316420]  ;;  %7719 = vmatpush.msra.mxu1 %v7111_v59  ;;  %v6529_v51 = vld [vmem:[#allocation5 + $0x50] sm:$0xf]  ;;  %7543 = vmatpush.msrb.mxu2 %v7017_v22 }
 0xafe   :  { %v6528_v41 = vld [vmem:[#allocation5 + $0x48] sm:$0xf]  ;;  %v12470_v20 = vld.sshfl [vmem:[#allocation1 + $0x28] sm:$0xff pattern:$0x75316420]  ;;  %v6799_v38 = vrot.slane %v12430_v56, 4  ;;  %7691 = vmatpush.msra.mxu0 %v7094_v10  ;;  %v6900_v39 = vsel %vm13258_vm3, %v6529_v51, %v6836_v61  ;;  %vm13270_vm4 = vmmov %vm13222_vm0 }
 0xaff   :  { %7275 = vst [vmem:[#allocation1 + $0x20] ss:$2 sm:$0xff] %v6894_v27  ;;  %v12474_v14 = vld.sshfl [vmem:[#allocation1 + $0x30] sm:$0xff pattern:$0x75316420]  ;;  %v7065_v6 = vld [vmem:[%s13020_s12 + $0x4e8] sm:$0xff]  ;;  %7720 = vmatpush.msra.mxu1 %v7110_v8  ;;  %v6892_v13 = vsel %vm13257_vm6, %v6528_v41, %v6828_v57  ;;  %vm13271_vm2 = vmmov %vm13222_vm0 }
 0xb00   :  { %v12476_v7 = vld.sshfl [vmem:[#allocation1 + $0x38] sm:$0xff pattern:$0x75316420]  ;;  %v7016_v54 = vld [vmem:[%s13020_s12 + $0x360] sm:$0xff]  ;;  %v7093_v50 = vld [vmem:[%s13020_s12 + $0x5c8] sm:$0xff]  ;;  %v6807_v62 = vrot.slane %v12445_v11, 4  ;;  %7630 = vmatpush.msra.mxu3 %v7065_v6 }
 0xb01   :  { %7276 = vst [vmem:[#allocation1 + $0x21] ss:$2 sm:$0xff] %v6902_v44  ;;  %v6572_v58 = vld [vmem:[#allocation5 + $0x1a] sm:$0xf]  ;;  %v7109_v18 = vld [vmem:[%s13020_s12 + $0x648] sm:$0xff]  ;;  %v7015_v42 = vld [vmem:[%s13020_s12 + $0x358] sm:$0xff]  ;;  %7544 = vmatpush.msrb.mxu2 %v7016_v54  ;;  %7692 = vmatpush.msra.mxu0 %v7093_v50 }
 0xb02   :  { %v7064_v0 = vld [vmem:[%s13020_s12 + $0x4e0] sm:$0xff]  ;;  %v12501_v3 = vld.sshfl [vmem:[#allocation1 + $0x8] sm:$0xff pattern:$0x75316420]  ;;  %7721 = vmatpush.msra.mxu1 %v7109_v18  ;;  %v6863_v56 = vsel %vm13259_vm1, %v6572_v58, %v6799_v38  ;;  %v6647_v5 = vld [vmem:[#allocation5 + $0x33] sm:$0xf] }
 0xb03   :  { %v12499_v48 = vld.sshfl [vmem:[#allocation1] sm:$0xff pattern:$0x75316420]  ;;  %v6573_v33 = vld [vmem:[#allocation5 + $0x22] sm:$0xf]  ;;  %7631 = vmatpush.msra.mxu3 %v7064_v0  ;;  %7545 = vmatpush.msrb.mxu2 %v7015_v42  ;;  %v6811_v34 = vrot.slane %v6647_v5, 4  ;;  %vm13272_vm6 = vmmov %vm13222_vm0 }
 0xb04   :  { %7271 = vst [vmem:[#allocation1] ss:$2 sm:$0xff] %v6892_v13  ;;  %v7092_v16 = vld [vmem:[%s13020_s12 + $0x5c0] sm:$0xff]  ;;  %v6602_v31 = vld [vmem:[#allocation5 + $0x61] sm:$0xf]  ;;  %v6871_v63 = vsel %vm13260_vm10, %v6573_v33, %v6807_v62  ;;  %v7063_v61 = vld [vmem:[%s13020_s12 + $0x4d8] sm:$0xff] }
 0xb05   :  { %v7108_v30 = vld [vmem:[%s13020_s12 + $0x640] sm:$0xff]  ;;  %7272 = vst [vmem:[#allocation1 + $0x1] ss:$2 sm:$0xff] %v6900_v39  ;;  %v7282_v37 = vld.sshfl [vmem:[#allocation1 + $0x18] sm:$0xff pattern:$0x75316420]  ;;  %7693 = vmatpush.msra.mxu0 %v7092_v16  ;;  %7632 = vmatpush.msra.mxu3 %v7063_v61  ;;  %vm13273_vm3 = vmmov %vm13222_vm0 }
 0xb06   :  { %v6601_v25 = vld [vmem:[#allocation5 + $0x59] sm:$0xf]  ;;  %7213 = vst [vmem:[#allocation1 + $0x30] ss:$2 sm:$0xff] %v6863_v56  ;;  %7722 = vmatpush.msra.mxu1 %v7108_v30  ;;  %7479 = vmatmul.f32.gmra.mxu0 %v7282_v37  ;;  %v6646_v11 = vld [vmem:[#allocation5 + $0x2b] sm:$0xf]  ;;  %vm13274_vm1 = vmmov %vm13222_vm0 }
 0xb07   :  { %7214 = vst [vmem:[#allocation1 + $0x31] ss:$2 sm:$0xff] %v6871_v63  ;;  %v6832_v1 = vrot.slane %v6601_v25, 4  ;;  %v6840_v57 = vrot.slane %v6602_v31, 4  ;;  %v6593_v4 = vld [vmem:[#allocation5 + $0x58] sm:$0xf]  ;;  %vm13275_vm10 = vmmov %vm13222_vm0 }
 0xb08   :  { %v7283_v55 = vld.sshfl [vmem:[#allocation1 + $0x20] sm:$0xff pattern:$0x75316420]  ;;  %v6639_v45 = vld [vmem:[#allocation5 + $0x32] sm:$0xf]  ;;  %v7014_v22 = vld [vmem:[%s13020_s12 + $0x350] sm:$0xff] }
 0xb09   :  { %v6594_v59 = vld [vmem:[#allocation5 + $0x60] sm:$0xf]  ;;  %7508 = vmatmul.f32.gmra.mxu1 %v7283_v55  ;;  %v7091_v10 = vld [vmem:[%s13020_s12 + $0x5b8] sm:$0xff]  ;;  %v6803_v8 = vrot.slane %v6646_v11, 4  ;;  %7546 = vmatpush.msrb.mxu2 %v7014_v22  ;;  %v7062_v27 = vld [vmem:[%s13020_s12 + $0x4d0] sm:$0xff]  ;;  %v6896_v44 = vsel %vm13261_vm11, %v6593_v4, %v6832_v1  ;;  %v6875_v0 = vsel %vm13263_vm13, %v6639_v45, %v6811_v34 }
 0xb0a   :  { %v7107_v41 = vld [vmem:[%s13020_s12 + $0x638] sm:$0xff]  ;;  %v7013_v51 = vld [vmem:[%s13020_s12 + $0x348] sm:$0xff]  ;;  %v6638_v54 = vld [vmem:[#allocation5 + $0x2a] sm:$0xf]  ;;  %7694 = vmatpush.msra.mxu0 %v7091_v10  ;;  %v6904_v50 = vsel %vm13262_vm7, %v6594_v59, %v6840_v57  ;;  %7633 = vmatpush.msra.mxu3 %v7062_v27 }
 0xb0b   :  { %7723 = vmatpush.msra.mxu1 %v7107_v41  ;;  %v7090_v58 = vld [vmem:[%s13020_s12 + $0x5b0] sm:$0xff]  ;;  %v7061_v18 = vld [vmem:[%s13020_s12 + $0x4c8] sm:$0xff]  ;;  %7547 = vmatpush.msrb.mxu2 %v7013_v51  ;;  %v7012_v13 = vld [vmem:[%s13020_s12 + $0x340] sm:$0xff]  ;;  %v6867_v39 = vsel %vm13264_vm14, %v6638_v54, %v6803_v8 }
 0xb0c   :  { %v7279_v38 = vld.sshfl [vmem:[#allocation1] sm:$0xff pattern:$0x75316420]  ;;  %v7280_v6 = vld.sshfl [vmem:[#allocation1 + $0x8] sm:$0xff pattern:$0x75316420]  ;;  %7695 = vmatpush.msra.mxu0 %v7090_v58  ;;  %7634 = vmatpush.msra.mxu3 %v7061_v18 }
 0xb0d   :  { %7392 = vmatmul.f32.gmra.mxu2 %v7279_v38  ;;  %7421 = vmatmul.f32.gmra.mxu3 %v7280_v6  ;;  %7287 = vst [vmem:[#allocation1] ss:$2 sm:$0xff] %v6896_v44  ;;  %v7106_v62 = vld [vmem:[%s13020_s12 + $0x630] sm:$0xff]  ;;  %v7089_v16 = vld [vmem:[%s13020_s12 + $0x5a8] sm:$0xff]  ;;  %v7060_v31 = vld [vmem:[%s13020_s12 + $0x4c0] sm:$0xff] }
 0xb0e   :  { %7288 = vst [vmem:[#allocation1 + $0x1] ss:$2 sm:$0xff] %v6904_v50  ;;  %v12542_v42 = vld.sshfl [vmem:[#allocation1 + $0x30] sm:$0xff pattern:$0x75316420]  ;;  %7586 = vmatmul.f32.vlgmr.msrb.gmra.mxu0 %v12193_v60  ;;  %7724 = vmatpush.msra.mxu1 %v7106_v62  ;;  %v7105_v30 = vld [vmem:[%s13020_s12 + $0x628] sm:$0xff] }
 0xb0f   :  { %v7222_v33 = vld.sshfl [vmem:[#allocation1 + $0x38] sm:$0xff pattern:$0x75316420]  ;;  %v6582_v25 = vld [vmem:[#allocation5 + $0x43] sm:$0xf]  ;;  %7548 = vmatpush.msrb.mxu2 %v7012_v13  ;;  %v7088_v56 = vld [vmem:[%s13020_s12 + $0x5a0] sm:$0xff]  ;;  %7696 = vmatpush.msra.mxu0 %v7089_v16 }
 0xb10   :  { %7229 = vst [vmem:[#allocation1 + $0x30] ss:$2 sm:$0xff] %v6867_v39  ;;  %v7011_v60 = vld [vmem:[%s13020_s12 + $0x338] sm:$0xff]  ;;  %7725 = vmatpush.msra.mxu1 %v7105_v30  ;;  %v7104_v37 = vld [vmem:[%s13020_s12 + $0x620] sm:$0xff]  ;;  %v6583_v63 = vld [vmem:[#allocation5 + $0x4b] sm:$0xf]  ;;  %7635 = vmatpush.msra.mxu3 %v7060_v31 }
 0xb11   :  { %7230 = vst [vmem:[#allocation1 + $0x31] ss:$2 sm:$0xff] %v6875_v0  ;;  %7615 = vmatmul.f32.vlgmr.msrb.gmra.mxu1 %v12160_v12  ;;  %v6634_v5 = vld [vmem:[#allocation5 + $0x61] sm:$0xf]  ;;  %v6617_v1 = vld [vmem:[#allocation5 + $0x5b] sm:$0xf]  ;;  %7549 = vmatpush.msrb.mxu2 %v7011_v60 }
 0xb12   :  { %v6815_v11 = vrot.slane %v6582_v25, 4  ;;  %7697 = vmatpush.msra.mxu0 %v7088_v56  ;;  %7726 = vmatpush.msra.mxu1 %v7104_v37  ;;  %v7059_v57 = vld [vmem:[%s13020_s12 + $0x4b8] sm:$0xff]  ;;  %v7010_v4 = vld [vmem:[%s13020_s12 + $0x330] sm:$0xff]  ;;  %v6618_v55 = vld [vmem:[#allocation5 + $0x63] sm:$0xf]  ;;  %v6823_v45 = vrot.slane %v6583_v63, 4 }
 0xb13   :  { %v6574_v12 = vld [vmem:[#allocation5 + $0x42] sm:$0xf]  ;;  %v7087_v59 = vld [vmem:[%s13020_s12 + $0x598] sm:$0xff]  ;;  %v7058_v61 = vld [vmem:[%s13020_s12 + $0x4b0] sm:$0xff]  ;;  %v6833_v10 = vrot.slane %v6617_v1, 4  ;;  %7636 = vmatpush.msra.mxu3 %v7059_v57  ;;  %7550 = vmatpush.msrb.mxu2 %v7010_v4  ;;  %v6834_v8 = vrot.slane %v6634_v5, 4 }
 0xb14   :  { %v7103_v34 = vld [vmem:[%s13020_s12 + $0x618] sm:$0xff]  ;;  %v6575_v22 = vld [vmem:[#allocation5 + $0x4a] sm:$0xf]  ;;  %v6609_v41 = vld [vmem:[#allocation5 + $0x5a] sm:$0xf]  ;;  %v6841_v38 = vrot.slane %v6618_v55, 4  ;;  %v6879_v62 = vsel %vm13265_vm12, %v6574_v12, %v6815_v11  ;;  %7698 = vmatpush.msra.mxu0 %v7087_v59 }
 0xb15   :  { %7441 = vmatmul.f32.vlgmr.msra.gmra.mxu2 %v12057_v49  ;;  %7528 = vmatmul.f32.vlgmr.msrb.gmra.mxu3 %v12065_v47  ;;  %v7009_v49 = vld [vmem:[%s13020_s12 + $0x328] sm:$0xff]  ;;  %v7102_v47 = vld [vmem:[%s13020_s12 + $0x610] sm:$0xff]  ;;  %v7008_v44 = vld [vmem:[%s13020_s12 + $0x320] sm:$0xff]  ;;  %v6887_v0 = vsel %vm13266_vm8, %v6575_v22, %v6823_v45  ;;  %v6897_v16 = vsel %vm13267_vm9, %v6609_v41, %v6833_v10 }
 0xb16   :  { %7589 = vmatmul.f32.gmra.mxu0 %v7222_v33  ;;  %7727 = vmatpush.msra.mxu1 %v7103_v34  ;;  %v7086_v27 = vld [vmem:[%s13020_s12 + $0x590] sm:$0xff]  ;;  %v7057_v51 = vld [vmem:[%s13020_s12 + $0x4a8] sm:$0xff]  ;;  %v6648_v58 = vld [vmem:[#allocation5 + $0x53] sm:$0xf] }
 0xb17   :  { %v6626_v6 = vld [vmem:[#allocation5 + $0x60] sm:$0xf]  ;;  %7637 = vmatpush.msra.mxu3 %v7058_v61  ;;  %v6649_v18 = vld [vmem:[#allocation5 + $0x5b] sm:$0xf]  ;;  %7551 = vmatpush.msrb.mxu2 %v7009_v49  ;;  %v6819_v5 = vrot.slane %v6648_v58, 4  ;;  %v7055_v1 = vld [vmem:[%s13020_s12 + $0x498] sm:$0xff] }
 0xb18   :  { %v12600_v54 = vld.sshfl [vmem:[#allocation1 + $0x30] sm:$0xff pattern:$0x75316420]  ;;  %v12602_v50 = vld.sshfl [vmem:[#allocation1 + $0x38] sm:$0xff pattern:$0x75316420]  ;;  %7728 = vmatpush.msra.mxu1 %v7102_v47  ;;  %7699 = vmatpush.msra.mxu0 %v7086_v27  ;;  %v6898_v60 = vsel %vm13222_vm0, %v6626_v6, %v6834_v8 }
 0xb19   :  { %7245 = vst [vmem:[#allocation1 + $0x30] ss:$2 sm:$0xff] %v6879_v62  ;;  %v7085_v13 = vld [vmem:[%s13020_s12 + $0x588] sm:$0xff]  ;;  %7618 = vmatmul.f32.gmra.mxu1 %v12332_v28  ;;  %v7056_v30 = vld [vmem:[%s13020_s12 + $0x4a0] sm:$0xff]  ;;  %7638 = vmatpush.msra.mxu3 %v7057_v51  ;;  %v7007_v28 = vld [vmem:[%s13020_s12 + $0x318] sm:$0xff]  ;;  %v6827_v57 = vrot.slane %v6649_v18, 4 }
 0xb1a   :  { %v7101_v39 = vld [vmem:[%s13020_s12 + $0x608] sm:$0xff]  ;;  %7246 = vst [vmem:[#allocation1 + $0x31] ss:$2 sm:$0xff] %v6887_v0  ;;  %v12617_v31 = vld.sshfl [vmem:[#allocation1 + $0x10] sm:$0xff pattern:$0x75316420]  ;;  %7552 = vmatpush.msrb.mxu2 %v7008_v44  ;;  %7700 = vmatpush.msra.mxu0 %v7085_v13 }
 0xb1b   :  { %v6610_v33 = vld [vmem:[#allocation5 + $0x62] sm:$0xf]  ;;  %7289 = vst [vmem:[#allocation1 + $0x10] ss:$2 sm:$0xff] %v6897_v16  ;;  %7729 = vmatpush.msra.mxu1 %v7101_v39  ;;  %v7084_v56 = vld [vmem:[%s13020_s12 + $0x580] sm:$0xff]  ;;  %v7006_v11 = vld [vmem:[%s13020_s12 + $0x310] sm:$0xff]  ;;  %7639 = vmatpush.msra.mxu3 %v7056_v30 }
 0xb1c   :  { %v12620_v25 = vld.sshfl [vmem:[#allocation1 + $0x28] sm:$0xff pattern:$0x75316420]  ;;  %v7100_v37 = vld [vmem:[%s13020_s12 + $0x600] sm:$0xff]  ;;  %v6905_v63 = vsel %vm13268_vm5, %v6610_v33, %v6841_v38  ;;  %7553 = vmatpush.msrb.mxu2 %v7007_v28  ;;  %v12643_v4 = vld [vmem:[%s13020_s12 + $0x7f8] sm:$0xff]  ;;  %7701 = vmatpush.msra.mxu0 %v7084_v56 }
 0xb1d   :  { %7291 = vst [vmem:[#allocation1 + $0x20] ss:$2 sm:$0xff] %v6898_v60  ;;  %7444 = vmatmul.f32.gmra.mxu2 %v12176_v2  ;;  %7531 = vmatmul.f32.gmra.mxu3 %v12201_v29  ;;  %v6640_v2 = vld [vmem:[#allocation5 + $0x52] sm:$0xf]  ;;  %v6641_v29 = vld [vmem:[#allocation5 + $0x5a] sm:$0xf] }
 0xb1e   :  { %7290 = vst [vmem:[#allocation1 + $0x11] ss:$2 sm:$0xff] %v6905_v63  ;;  %7730 = vmatpush.msra.mxu1 %v7100_v37  ;;  %v7054_v55 = vld [vmem:[%s13020_s12 + $0x490] sm:$0xff]  ;;  %7640 = vmatpush.msra.mxu3 %v7055_v1  ;;  %v7005_v12 = vld [vmem:[%s13020_s12 + $0x308] sm:$0xff]  ;;  %v6883_v59 = vsel %vm13269_vm15, %v6640_v2, %v6819_v5  ;;  %v6891_v22 = vsel %vm13270_vm4, %v6641_v29, %v6827_v57  ;;  %v6584_v10 = vld [vmem:[#allocation5 + $0x53] sm:$0xf] }
 0xb1f   :  { %7554 = vmatpush.msrb.mxu2 %v7006_v11  ;;  %v12654_v45 = vld [vmem:[%s13020_s12 + $0x7f0] sm:$0xff]  ;;  %7802 = vmatpush.msrb.mxu0 %v12643_v4  ;;  %v7053_v49 = vld [vmem:[%s13020_s12 + $0x488] sm:$0xff]  ;;  %v7004_v47 = vld [vmem:[%s13020_s12 + $0x300] sm:$0xff]  ;;  %v6831_v51 = vrot.slane %v6584_v10, 4 }
 0xb20   :  { %7903 = vmatpush.msrb.mxu1 %v12643_v4  ;;  %7641 = vmatpush.msra.mxu3 %v7054_v55  ;;  %v6585_v8 = vld [vmem:[#allocation5 + $0x5b] sm:$0xf]  ;;  %v7083_v27 = vld [vmem:[%s13020_s12 + $0x578] sm:$0xff]  ;;  %v7082_v62 = vld [vmem:[%s13020_s12 + $0x570] sm:$0xff] }
 0xb21   :  { %v12657_v34 = vld.sshfl [vmem:[#allocation1 + $0x30] sm:$0xff pattern:$0x75316420]  ;;  %v7254_v61 = vld.sshfl [vmem:[#allocation1 + $0x38] sm:$0xff pattern:$0x75316420]  ;;  %7621 = vmatmul.f32.gmra.mxu1 %v12499_v48  ;;  %7555 = vmatpush.msrb.mxu2 %v7005_v12 }
 0xb22   :  { %7261 = vst [vmem:[#allocation1 + $0x30] ss:$2 sm:$0xff] %v6883_v59  ;;  %7592 = vmatmul.f32.gmra.mxu0 %v7254_v61  ;;  %7905 = vmatpush.msrb.mxu1 %v12654_v45  ;;  %v12674_v48 = vld [vmem:[%s13020_s12 + $0x7e8] sm:$0xff]  ;;  %v7052_v41 = vld [vmem:[%s13020_s12 + $0x480] sm:$0xff]  ;;  %v6576_v38 = vld [vmem:[#allocation5 + $0x52] sm:$0xf] }
 0xb23   :  { %7262 = vst [vmem:[#allocation1 + $0x31] ss:$2 sm:$0xff] %v6891_v22  ;;  %7803 = vmatpush.msrb.mxu0 %v12654_v45  ;;  %7642 = vmatpush.msra.mxu3 %v7053_v49  ;;  %v12687_v44 = vld [vmem:[%s13020_s12 + $0x7e0] sm:$0xff]  ;;  %v12700_v18 = vld [vmem:[%s13020_s12 + $0x7d8] sm:$0xff]  ;;  %v7130_v0 = vld [vmem:[%s13020_s12 + $0x6f0] sm:$0xff]  ;;  %v6895_v30 = vsel %vm13271_vm2, %v6576_v38, %v6831_v51 }
 0xb24   :  { %7556 = vmatpush.msrb.mxu2 %v7004_v47  ;;  %7907 = vmatpush.msrb.mxu1 %v12674_v48  ;;  %v6577_v6 = vld [vmem:[#allocation5 + $0x5a] sm:$0xf]  ;;  %v7081_v13 = vld [vmem:[%s13020_s12 + $0x568] sm:$0xff]  ;;  %v12713_v39 = vld [vmem:[%s13020_s12 + $0x7d0] sm:$0xff] }
 0xb25   :  { %7447 = vmatmul.f32.gmra.mxu2 %v12369_v9  ;;  %7534 = vmatmul.f32.gmra.mxu3 %v12388_v23  ;;  %v6839_v9 = vrot.slane %v6585_v8, 4  ;;  %v7131_v23 = vld [vmem:[%s13020_s12 + $0x6f8] sm:$0xff]  ;;  %v7295_v58 = vld.sshfl [vmem:[#allocation1] sm:$0xff pattern:$0x75316420]  ;;  %v7129_v37 = vld [vmem:[%s13020_s12 + $0x6e8] sm:$0xff] }
 0xb26   :  { %7804 = vmatpush.msrb.mxu0 %v12674_v48  ;;  %7643 = vmatpush.msra.mxu3 %v7052_v41  ;;  %v6635_v28 = vld [vmem:[#allocation5 + $0x69] sm:$0xf]  ;;  %v6650_v63 = vld [vmem:[#allocation5 + $0x63] sm:$0xf]  ;;  %v7080_v5 = vld [vmem:[%s13020_s12 + $0x560] sm:$0xff] }
 0xb27   :  { %7657 = vmatpush.msra.mxu2 %v7083_v27  ;;  %7909 = vmatpush.msrb.mxu1 %v12687_v44  ;;  %v6903_v60 = vsel %vm13272_vm6, %v6577_v6, %v6839_v9  ;;  %v6651_v56 = vld [vmem:[#allocation5 + $0x6b] sm:$0xf]  ;;  %v12734_v1 = vld [vmem:[%s13020_s12 + $0x7c8] sm:$0xff]  ;;  %v6842_v11 = vrot.slane %v6635_v28, 4  ;;  %v7128_v57 = vld [vmem:[%s13020_s12 + $0x6e0] sm:$0xff]  ;;  %v6835_v2 = vrot.slane %v6650_v63, 4 }
 0xb28   :  { %7805 = vmatpush.msrb.mxu0 %v12687_v44  ;;  %7744 = vmatpush.msrb.mxu3 %v7131_v23  ;;  %v12748_v29 = vld [vmem:[%s13020_s12 + $0x7c0] sm:$0xff]  ;;  %v6627_v55 = vld [vmem:[#allocation5 + $0x68] sm:$0xf]  ;;  %v7127_v12 = vld [vmem:[%s13020_s12 + $0x6d8] sm:$0xff] }
 0xb29   :  { %7624 = vmatmul.f32.gmra.mxu1 %v7295_v58  ;;  %7658 = vmatpush.msra.mxu2 %v7082_v62  ;;  %v6906_v59 = vsel %vm13273_vm3, %v6627_v55, %v6842_v11  ;;  %v6643_v61 = vld [vmem:[#allocation5 + $0x6a] sm:$0xf]  ;;  %v12762_v10 = vld [vmem:[%s13020_s12 + $0x7b8] sm:$0xff]  ;;  %v6642_v49 = vld [vmem:[#allocation5 + $0x62] sm:$0xf] }
 0xb2a   :  { %v12715_v33 = vld.sshfl [vmem:[#allocation1 + $0x30] sm:$0xff pattern:$0x75316420]  ;;  %v12717_v16 = vld.sshfl [vmem:[#allocation1 + $0x38] sm:$0xff pattern:$0x75316420]  ;;  %7806 = vmatpush.msrb.mxu0 %v12700_v18  ;;  %7911 = vmatpush.msrb.mxu1 %v12700_v18  ;;  %v6899_v41 = vsel %vm13275_vm10, %v6642_v49, %v6835_v2 }
 0xb2b   :  { %7277 = vst [vmem:[#allocation1 + $0x30] ss:$2 sm:$0xff] %v6895_v30  ;;  %7745 = vmatpush.msrb.mxu3 %v7130_v0  ;;  %7659 = vmatpush.msra.mxu2 %v7081_v13  ;;  %v7078_v22 = vld [vmem:[%s13020_s12 + $0x550] sm:$0xff]  ;;  %v7077_v51 = vld [vmem:[%s13020_s12 + $0x548] sm:$0xff]  ;;  %v7124_v23 = vld [vmem:[%s13020_s12 + $0x6c0] sm:$0xff] }
 0xb2c   :  { %7278 = vst [vmem:[#allocation1 + $0x31] ss:$2 sm:$0xff] %v6903_v60  ;;  %7807 = vmatpush.msrb.mxu0 %v12713_v39  ;;  %7913 = vmatpush.msrb.mxu1 %v12713_v39  ;;  %v7126_v27 = vld [vmem:[%s13020_s12 + $0x6d0] sm:$0xff]  ;;  %v7125_v9 = vld [vmem:[%s13020_s12 + $0x6c8] sm:$0xff]  ;;  %v7075_v6 = vld [vmem:[%s13020_s12 + $0x538] sm:$0xff] }
 0xb2d   :  { %7450 = vmatmul.f32.gmra.mxu2 %v12617_v31  ;;  %7537 = vmatmul.f32.gmra.mxu3 %v12620_v25  ;;  %v6843_v31 = vrot.slane %v6651_v56, 4  ;;  %v7079_v25 = vld [vmem:[%s13020_s12 + $0x558] sm:$0xff]  ;;  %7292 = vst [vmem:[#allocation1 + $0x21] ss:$2 sm:$0xff] %v6906_v59  ;;  %v12781_v38 = vld [vmem:[%s13020_s12 + $0x7b0] sm:$0xff]  ;;  %v12810_v58 = vld [vmem:[%s13020_s12 + $0x7a0] sm:$0xff] }
 0xb2e   :  { %7746 = vmatpush.msrb.mxu3 %v7129_v37  ;;  %7660 = vmatpush.msra.mxu2 %v7080_v5  ;;  %v7074_v62 = vld [vmem:[%s13020_s12 + $0x530] sm:$0xff]  ;;  %v12824_v0 = vld [vmem:[%s13020_s12 + $0x798] sm:$0xff]  ;;  %v7121_v13 = vld [vmem:[%s13020_s12 + $0x6a8] sm:$0xff] }
 0xb2f   :  { %7808 = vmatpush.msrb.mxu0 %v12734_v1  ;;  %7915 = vmatpush.msrb.mxu1 %v12734_v1  ;;  %v6907_v47 = vsel %vm13274_vm1, %v6643_v61, %v6843_v31  ;;  %v7072_v30 = vld [vmem:[%s13020_s12 + $0x520] sm:$0xff]  ;;  %v12853_v60 = vld [vmem:[%s13020_s12 + $0x788] sm:$0xff]  ;;  %v7071_v28 = vld [vmem:[%s13020_s12 + $0x518] sm:$0xff] }
 0xb30   :  { %7747 = vmatpush.msrb.mxu3 %v7128_v57  ;;  %7661 = vmatpush.msra.mxu2 %v7079_v25  ;;  %v12867_v56 = vld [vmem:[%s13020_s12 + $0x780] sm:$0xff]  ;;  %v7069_v63 = vld [vmem:[%s13020_s12 + $0x508] sm:$0xff]  ;;  %v7147_v31 = vld [vmem:[%s13020_s12 + $0x778] sm:$0xff] }
 0xb31   :  { %7731 = vmatmul.f32.vlgmr.msra.gmra.mxu1 %v12107_v53  ;;  %7809 = vmatpush.msrb.mxu0 %v12748_v29  ;;  %v7117_v5 = vld [vmem:[%s13020_s12 + $0x688] sm:$0xff]  ;;  %v7068_v11 = vld [vmem:[%s13020_s12 + $0x500] sm:$0xff]  ;;  %v7146_v2 = vld [vmem:[%s13020_s12 + $0x770] sm:$0xff] }
 0xb32   :  { %7917 = vmatpush.msrb.mxu1 %v12748_v29  ;;  %7748 = vmatpush.msrb.mxu3 %v7127_v12  ;;  %v7296_v57 = vld.sshfl [vmem:[#allocation1 + $0x8] sm:$0xff pattern:$0x75316420]  ;;  %v7116_v25 = vld [vmem:[%s13020_s12 + $0x680] sm:$0xff] }
 0xb33   :  { %v7286_v8 = vld.sshfl [vmem:[#allocation1 + $0x38] sm:$0xff pattern:$0x75316420]  ;;  %v12767_v53 = vld.sshfl [vmem:[#allocation1 + $0x30] sm:$0xff pattern:$0x75316420]  ;;  %7662 = vmatpush.msra.mxu2 %v7078_v22  ;;  %7810 = vmatpush.msrb.mxu0 %v12762_v10 }
 0xb34   :  { %7595 = vmatmul.f32.gmra.mxu0 %v7286_v8  ;;  %7293 = vst [vmem:[#allocation1 + $0x30] ss:$2 sm:$0xff] %v6899_v41  ;;  %7919 = vmatpush.msrb.mxu1 %v12762_v10  ;;  %v7299_v37 = vld.sshfl [vmem:[#allocation1 + $0x20] sm:$0xff pattern:$0x75316420]  ;;  %v7141_v59 = vld [vmem:[%s13020_s12 + $0x748] sm:$0xff] }
 0xb35   :  { %7557 = vmatmul.f32.vlgmr.msrb.gmra.mxu2 %v12191_v19  ;;  %7644 = vmatmul.f32.vlgmr.msra.gmra.mxu3 %v12162_v32  ;;  %7294 = vst [vmem:[#allocation1 + $0x31] ss:$2 sm:$0xff] %v6907_v47  ;;  %v7076_v32 = vld [vmem:[%s13020_s12 + $0x540] sm:$0xff]  ;;  %v12795_v19 = vld [vmem:[%s13020_s12 + $0x7a8] sm:$0xff] }
 0xb36   :  { %7749 = vmatpush.msrb.mxu3 %v7126_v27  ;;  %7663 = vmatpush.msra.mxu2 %v7077_v51  ;;  %v7298_v55 = vld.sshfl [vmem:[#allocation1 + $0x18] sm:$0xff pattern:$0x75316420]  ;;  %v7144_v12 = vld [vmem:[%s13020_s12 + $0x760] sm:$0xff] }
 0xb37   :  { %7811 = vmatpush.msrb.mxu0 %v12781_v38  ;;  %7921 = vmatpush.msrb.mxu1 %v12781_v38  ;;  %v7132_v49 = vld [vmem:[%s13020_s12 + $0x700] sm:$0xff] }
 0xb38   :  { %7750 = vmatpush.msrb.mxu3 %v7125_v9  ;;  %7664 = vmatpush.msra.mxu2 %v7076_v32 }
 0xb39   :  { %7734 = vmatmul.f32.gmra.mxu1 %v12286_v21  ;;  %7812 = vmatpush.msrb.mxu0 %v12795_v19  ;;  %v7123_v21 = vld [vmem:[%s13020_s12 + $0x6b8] sm:$0xff] }
 0xb3a   :  { %7923 = vmatpush.msrb.mxu1 %v12795_v19  ;;  %7751 = vmatpush.msrb.mxu3 %v7124_v23 }
 0xb3b   :  { %7665 = vmatpush.msra.mxu2 %v7075_v6  ;;  %7813 = vmatpush.msrb.mxu0 %v12810_v58 }
 0xb3c   :  { %7702 = vmatmul.f32.vlgmr.msra.gmra.mxu0 %v12091_v52  ;;  %v7122_v52 = vld [vmem:[%s13020_s12 + $0x6b0] sm:$0xff]  ;;  %7925 = vmatpush.msrb.mxu1 %v12810_v58  ;;  %v7302_v8 = vld.sshfl [vmem:[#allocation1 + $0x38] sm:$0xff pattern:$0x75316420] }
 0xb3d   :  { %7560 = vmatmul.f32.gmra.mxu2 %v12542_v42  ;;  %7647 = vmatmul.f32.gmra.mxu3 %v12334_v40  ;;  %v7073_v40 = vld [vmem:[%s13020_s12 + $0x528] sm:$0xff]  ;;  %v12838_v42 = vld [vmem:[%s13020_s12 + $0x790] sm:$0xff] }
 0xb3e   :  { %7752 = vmatpush.msrb.mxu3 %v7123_v21  ;;  %7666 = vmatpush.msra.mxu2 %v7074_v62  ;;  %v7301_v9 = vld.sshfl [vmem:[#allocation1 + $0x30] sm:$0xff pattern:$0x75316420] }
 0xb3f   :  { %7814 = vmatpush.msrb.mxu0 %v12824_v0  ;;  %7927 = vmatpush.msrb.mxu1 %v12824_v0 }
 0xb40   :  { %7753 = vmatpush.msrb.mxu3 %v7122_v52  ;;  %7667 = vmatpush.msra.mxu2 %v7073_v40 }
 0xb41   :  { %7737 = vmatmul.f32.gmra.mxu1 %v12468_v43  ;;  %7815 = vmatpush.msrb.mxu0 %v12838_v42  ;;  %v7120_v43 = vld [vmem:[%s13020_s12 + $0x6a0] sm:$0xff] }
 0xb42   :  { %7929 = vmatpush.msrb.mxu1 %v12838_v42  ;;  %7754 = vmatpush.msrb.mxu3 %v7121_v13 }
 0xb43   :  { %7668 = vmatpush.msra.mxu2 %v7072_v30  ;;  %7816 = vmatpush.msrb.mxu0 %v12853_v60 }
 0xb44   :  { %7705 = vmatmul.f32.gmra.mxu0 %v12272_v15  ;;  %v7119_v15 = vld [vmem:[%s13020_s12 + $0x698] sm:$0xff]  ;;  %7931 = vmatpush.msrb.mxu1 %v12853_v60 }
 0xb45   :  { %7563 = vmatmul.f32.gmra.mxu2 %v12657_v34  ;;  %7650 = vmatmul.f32.gmra.mxu3 %v12501_v3  ;;  %v7070_v3 = vld [vmem:[%s13020_s12 + $0x510] sm:$0xff] }
 0xb46   :  { %7755 = vmatpush.msrb.mxu3 %v7120_v43  ;;  %7669 = vmatpush.msra.mxu2 %v7071_v28  ;;  %v7118_v34 = vld [vmem:[%s13020_s12 + $0x690] sm:$0xff] }
 0xb47   :  { %7817 = vmatpush.msrb.mxu0 %v12867_v56  ;;  %7933 = vmatpush.msrb.mxu1 %v12867_v56  ;;  %v7500_v21 = vpop.f32.mrf.mxu1 }
 0xb48   :  { %7756 = vmatpush.msrb.mxu3 %v7119_v15  ;;  %7670 = vmatpush.msra.mxu2 %v7070_v3 }
 0xb49   :  { %7740 = vmatmul.f32.gmra.mxu1 %v7299_v37 }
 0xb4a   :  { %7757 = vmatpush.msrb.mxu3 %v7118_v34  ;;  %7671 = vmatpush.msra.mxu2 %v7069_v63 }
 0xb4c   :  { %7708 = vmatmul.f32.gmra.mxu0 %v12440_v26  ;;  %7758 = vmatpush.msrb.mxu3 %v7117_v5  ;;  %v7145_v26 = vld [vmem:[%s13020_s12 + $0x768] sm:$0xff] }
 0xb4d   :  { %7566 = vmatmul.f32.gmra.mxu2 %v12767_v53  ;;  %7653 = vmatmul.f32.gmra.mxu3 %v7296_v57 }
 0xb4e   :  { %7672 = vmatpush.msra.mxu2 %v7068_v11  ;;  %7759 = vmatpush.msrb.mxu3 %v7116_v25 }
 0xb50   :  { %7773 = vmatpush.msrb.mxu2 %v7147_v31  ;;  %7904 = vmatpush.msra.mxu3 %v12643_v4  ;;  %v7143_v4 = vld [vmem:[%s13020_s12 + $0x758] sm:$0xff] }
 0xb51   :  { %7824 = vmatmul.f32.vlgmr.msrb.gmra.mxu1 %v12717_v16  ;;  %v7142_v16 = vld [vmem:[%s13020_s12 + $0x750] sm:$0xff] }
 0xb52   :  { %7774 = vmatpush.msrb.mxu2 %v7146_v2  ;;  %7906 = vmatpush.msra.mxu3 %v12654_v45  ;;  %v12920_v45 = vld [vmem:[%s13021_s13] ss:$0 sm:$0xff] }
 0xb54   :  { %7775 = vmatpush.msrb.mxu2 %v7145_v26  ;;  %7711 = vmatmul.f32.gmra.mxu0 %v7298_v55 }
 0xb55   :  { %7673 = vmatmul.f32.vlgmr.msra.gmra.mxu2 %v12089_v17  ;;  %7760 = vmatmul.f32.vlgmr.msrb.gmra.mxu3 %v12109_v24  ;;  %v7384_v17 = vpop.f32.mrf.mxu2 }
 0xb56   :  { %7908 = vmatpush.msra.mxu3 %v12674_v48  ;;  %7776 = vmatpush.msrb.mxu2 %v7144_v12  ;;  %v7385_v24 = vadd.f32 %v12920_v45, %v7384_v17  ;;  %v7413_v48 = vpop.f32.mrf.mxu3 }
 0xb58   :  { %7910 = vmatpush.msra.mxu3 %v12687_v44  ;;  %7777 = vmatpush.msrb.mxu2 %v7143_v4  ;;  %v12932_v61 = vadd.f32 %v7413_v48, %v7385_v24  ;;  %v7140_v44 = vld [vmem:[%s13020_s12 + $0x740] sm:$0xff] }
 0xb5a   :  { %7912 = vmatpush.msra.mxu3 %v12700_v18  ;;  %7778 = vmatpush.msrb.mxu2 %v7142_v16  ;;  %v7139_v18 = vld [vmem:[%s13020_s12 + $0x738] sm:$0xff] }
 0xb5c   :  { %7818 = vmatmul.f32.vlgmr.msrb.gmra.mxu0 %v12476_v7  ;;  %7914 = vmatpush.msra.mxu3 %v12713_v39  ;;  %v7136_v7 = vld [vmem:[%s13020_s12 + $0x720] sm:$0xff]  ;;  %v7135_v39 = vld [vmem:[%s13020_s12 + $0x718] sm:$0xff] }
 0xb5d   :  { %7676 = vmatmul.f32.gmra.mxu2 %v12270_v46  ;;  %7763 = vmatmul.f32.gmra.mxu3 %v12288_v36  ;;  %v7138_v46 = vld [vmem:[%s13020_s12 + $0x730] sm:$0xff]  ;;  %v7137_v36 = vld [vmem:[%s13020_s12 + $0x728] sm:$0xff] }
 0xb5e   :  { %7779 = vmatpush.msrb.mxu2 %v7141_v59  ;;  %7916 = vmatpush.msra.mxu3 %v12734_v1  ;;  %v7297_v1 = vld.sshfl [vmem:[#allocation1 + $0x10] sm:$0xff pattern:$0x75316420] }
 0xb60   :  { %7780 = vmatpush.msrb.mxu2 %v7140_v44  ;;  %7918 = vmatpush.msra.mxu3 %v12748_v29  ;;  %v7300_v29 = vld.sshfl [vmem:[#allocation1 + $0x28] sm:$0xff pattern:$0x75316420] }
 0xb62   :  { %7781 = vmatpush.msrb.mxu2 %v7139_v18  ;;  %7920 = vmatpush.msra.mxu3 %v12762_v10 }
 0xb64   :  { %7821 = vmatmul.f32.gmra.mxu0 %v12602_v50  ;;  %7782 = vmatpush.msrb.mxu2 %v7138_v46  ;;  %v7133_v50 = vld [vmem:[%s13020_s12 + $0x708] sm:$0xff] }
 0xb65   :  { %7679 = vmatmul.f32.gmra.mxu2 %v12438_v35  ;;  %7766 = vmatmul.f32.gmra.mxu3 %v12470_v20  ;;  %v7134_v35 = vld [vmem:[%s13020_s12 + $0x710] sm:$0xff] }
 0xb66   :  { %7922 = vmatpush.msra.mxu3 %v12781_v38  ;;  %7783 = vmatpush.msrb.mxu2 %v7137_v36  ;;  %v7471_v38 = vpop.f32.mrf.mxu0 }
 0xb67   :  { %v7387_v20 = vpop.f32.mrf.mxu2  ;;  %v7416_v10 = vpop.f32.mrf.mxu3 }
 0xb68   :  { %7924 = vmatpush.msra.mxu3 %v12795_v19  ;;  %7784 = vmatpush.msrb.mxu2 %v7136_v7  ;;  %v7388_v22 = vadd.f32 %v12920_v45, %v7387_v20 }
 0xb6a   :  { %7926 = vmatpush.msra.mxu3 %v12810_v58  ;;  %7785 = vmatpush.msrb.mxu2 %v7135_v39  ;;  %v7417_v47 = vadd.f32 %v7416_v10, %v7388_v22 }
 0xb6c   :  { %7928 = vmatpush.msra.mxu3 %v12824_v0  ;;  %7786 = vmatpush.msrb.mxu2 %v7134_v35 }
 0xb6d   :  { %7682 = vmatmul.f32.gmra.mxu2 %v7297_v1  ;;  %7769 = vmatmul.f32.gmra.mxu3 %v7300_v29 }
 0xb6e   :  { %7930 = vmatpush.msra.mxu3 %v12838_v42  ;;  %7787 = vmatpush.msrb.mxu2 %v7133_v50  ;;  %v7474_v32 = vpop.f32.mrf.mxu0  ;;  %v7503_v42 = vpop.f32.mrf.mxu1 }
 0xb70   :  { %7932 = vmatpush.msra.mxu3 %v12853_v60  ;;  %7788 = vmatpush.msrb.mxu2 %v7132_v49 }
 0xb72   :  { %7934 = vmatpush.msra.mxu3 %v12867_v56 }
 0xb75   :  { %7789 = vmatmul.f32.vlgmr.msrb.gmra.mxu2 %v12474_v14  ;;  %7827 = vmatmul.f32.vlgmr.msra.gmra.mxu3 %v7302_v8 }
 0xb76   :  { %v7477_v14 = vpop.f32.mrf.mxu0  ;;  %v7506_v43 = vpop.f32.mrf.mxu1 }
 0xb79   :  { %v7390_v53 = vpop.f32.mrf.mxu2  ;;  %v7419_v27 = vpop.f32.mrf.mxu3 }
 0xb7a   :  { %v7391_v41 = vadd.f32 %v12920_v45, %v7390_v53 }
 0xb7c   :  { %v7420_v51 = vadd.f32 %v7419_v27, %v7391_v41 }
 0xb7d   :  { %7792 = vmatmul.f32.gmra.mxu2 %v12600_v54 }
 0xb83   :  { %v7480_v40 = vpop.f32.mrf.mxu0 }
 0xb85   :  { %7795 = vmatmul.f32.gmra.mxu2 %v12715_v33 }
 0xb86   :  { %v7509_v37 = vpop.f32.mrf.mxu1 }
 0xb8b   :  { %v7587_v28 = vpop.f32.mrf.mxu0 }
 0xb8d   :  { %7798 = vmatmul.f32.gmra.mxu2 %v7301_v9 }
 0xb8e   :  { %v7616_v2 = vpop.f32.mrf.mxu1 }
 0xb90   :  { %v7393_v19 = vpop.f32.mrf.mxu2  ;;  %v7422_v23 = vpop.f32.mrf.mxu3 }
 0xb91   :  { %v7394_v6 = vadd.f32 %v12920_v45, %v7393_v19 }
 0xb93   :  { %v7423_v58 = vadd.f32 %v7422_v23, %v7394_v6  ;;  %v7590_v11 = vpop.f32.mrf.mxu0 }
 0xb96   :  { %v7619_v4 = vpop.f32.mrf.mxu1 }
 0xb98   :  { %v7442_v62 = vpop.f32.mrf.mxu2  ;;  %v7529_v0 = vpop.f32.mrf.mxu3 }
 0xb99   :  { %v7443_v54 = vadd.f32 %v7442_v62, %v12932_v61 }
 0xb9b   :  { %v7472_v52 = vadd.f32 %v7471_v38, %v7443_v54 }
 0xb9d   :  { %v7501_v44 = vadd.f32 %v7500_v21, %v7472_v52 }
 0xb9e   :  { %v7622_v24 = vpop.f32.mrf.mxu1 }
 0xb9f   :  { %v7593_v26 = vpop.f32.mrf.mxu0  ;;  %v7530_v7 = vadd.f32 %v7529_v0, %v7501_v44 }
 0xba0   :  { %v7445_v13 = vpop.f32.mrf.mxu2  ;;  %v7532_v60 = vpop.f32.mrf.mxu3 }
 0xba1   :  { %v7446_v33 = vadd.f32 %v7445_v13, %v7417_v47 }
 0xba3   :  { %v7475_v30 = vadd.f32 %v7474_v32, %v7446_v33 }
 0xba5   :  { %v7504_v35 = vadd.f32 %v7503_v42, %v7475_v30 }
 0xba6   :  { %v7625_v18 = vpop.f32.mrf.mxu1 }
 0xba7   :  { %v7533_v22 = vadd.f32 %v7532_v60, %v7504_v35 }
 0xba8   :  { %v7448_v56 = vpop.f32.mrf.mxu2  ;;  %v7535_v34 = vpop.f32.mrf.mxu3 }
 0xba9   :  { %v7449_v15 = vadd.f32 %v7448_v56, %v7420_v51 }
 0xbab   :  { %v7478_v3 = vadd.f32 %v7477_v14, %v7449_v15 }
 0xbad   :  { %v7507_v8 = vadd.f32 %v7506_v43, %v7478_v3 }
 0xbae   :  { %v7732_v29 = vpop.f32.mrf.mxu1 }
 0xbaf   :  { %v7536_v38 = vadd.f32 %v7535_v34, %v7507_v8 }
 0xbb0   :  { %v7451_v63 = vpop.f32.mrf.mxu2  ;;  %v7538_v31 = vpop.f32.mrf.mxu3 }
 0xbb1   :  { %v7452_v5 = vadd.f32 %v7451_v63, %v7423_v58  ;;  %v7596_v45 = vpop.f32.mrf.mxu0 }
 0xbb3   :  { %v7481_v57 = vadd.f32 %v7480_v40, %v7452_v5 }
 0xbb5   :  { %v7510_v58 = vadd.f32 %v7509_v37, %v7481_v57 }
 0xbb6   :  { %v7735_v32 = vpop.f32.mrf.mxu1 }
 0xbb7   :  { %v7539_v0 = vadd.f32 %v7538_v31, %v7510_v58 }
 0xbb8   :  { %v7558_v25 = vpop.f32.mrf.mxu2  ;;  %v7645_v12 = vpop.f32.mrf.mxu3 }
 0xbb9   :  { %v7703_v48 = vpop.f32.mrf.mxu0  ;;  %v7559_v39 = vadd.f32 %v7558_v25, %v7530_v7 }
 0xbbb   :  { %v7588_v1 = vadd.f32 %v7587_v28, %v7559_v39 }
 0xbbd   :  { %v7617_v49 = vadd.f32 %v7616_v2, %v7588_v1 }
 0xbbe   :  { %v7738_v30 = vpop.f32.mrf.mxu1 }
 0xbbf   :  { %v7646_v41 = vadd.f32 %v7645_v12, %v7617_v49 }
 0xbc0   :  { %v7561_v55 = vpop.f32.mrf.mxu2  ;;  %v7648_v17 = vpop.f32.mrf.mxu3 }
 0xbc1   :  { %v7706_v36 = vpop.f32.mrf.mxu0  ;;  %v7562_v47 = vadd.f32 %v7561_v55, %v7533_v22 }
 0xbc3   :  { %v7591_v27 = vadd.f32 %v7590_v11, %v7562_v47 }
 0xbc5   :  { %v7620_v19 = vadd.f32 %v7619_v4, %v7591_v27 }
 0xbc7   :  { %v7649_v62 = vadd.f32 %v7648_v17, %v7620_v19 }
 0xbc8   :  { %v7564_v16 = vpop.f32.mrf.mxu2  ;;  %v7651_v61 = vpop.f32.mrf.mxu3 }
 0xbc9   :  { %v7709_v10 = vpop.f32.mrf.mxu0  ;;  %v7565_v23 = vadd.f32 %v7564_v16, %v7536_v38 }
 0xbcb   :  { %v7594_v54 = vadd.f32 %v7593_v26, %v7565_v23  ;;  %v7741_v26 = vpop.f32.mrf.mxu1 }
 0xbcd   :  { %v7623_v13 = vadd.f32 %v7622_v24, %v7594_v54 }
 0xbcf   :  { %v7652_v15 = vadd.f32 %v7651_v61, %v7623_v13 }
 0xbd0   :  { %v7567_v59 = vpop.f32.mrf.mxu2  ;;  %v7654_v20 = vpop.f32.mrf.mxu3 }
 0xbd1   :  { %v7712_v6 = vpop.f32.mrf.mxu0  ;;  %v7568_v33 = vadd.f32 %v7567_v59, %v7539_v0 }
 0xbd3   :  { %v7597_v3 = vadd.f32 %v7596_v45, %v7568_v33 }
 0xbd5   :  { %v7626_v11 = vadd.f32 %v7625_v18, %v7597_v3 }
 0xbd7   :  { %v7655_v12 = vadd.f32 %v7654_v20, %v7626_v11 }
 0xbd8   :  { %v7674_v46 = vpop.f32.mrf.mxu2  ;;  %v7761_v51 = vpop.f32.mrf.mxu3 }
 0xbd9   :  { %v7675_v9 = vadd.f32 %v7674_v46, %v7646_v41  ;;  %v7819_v28 = vpop.f32.mrf.mxu0 }
 0xbdb   :  { %v7704_v14 = vadd.f32 %v7703_v48, %v7675_v9 }
 0xbdd   :  { %v7733_v52 = vadd.f32 %v7732_v29, %v7704_v14 }
 0xbdf   :  { %v7762_v60 = vadd.f32 %v7761_v51, %v7733_v52 }
 0xbe0   :  { %v7677_v50 = vpop.f32.mrf.mxu2  ;;  %v7764_v42 = vpop.f32.mrf.mxu3 }
 0xbe1   :  { %v7678_v40 = vadd.f32 %v7677_v50, %v7649_v62  ;;  %v7822_v45 = vpop.f32.mrf.mxu0 }
 0xbe3   :  { %v7707_v43 = vadd.f32 %v7706_v36, %v7678_v40  ;;  %v7825_v36 = vpop.f32.mrf.mxu1 }
 0xbe5   :  { %v7736_v63 = vadd.f32 %v7735_v32, %v7707_v43 }
 0xbe7   :  { %v7765_v25 = vadd.f32 %v7764_v42, %v7736_v63 }
 0xbe8   :  { %v7680_v53 = vpop.f32.mrf.mxu2  ;;  %v7767_v31 = vpop.f32.mrf.mxu3 }
 0xbe9   :  { %v7681_v37 = vadd.f32 %v7680_v53, %v7652_v15 }
 0xbeb   :  { %v7710_v2 = vadd.f32 %v7709_v10, %v7681_v37 }
 0xbed   :  { %v7739_v16 = vadd.f32 %v7738_v30, %v7710_v2 }
 0xbef   :  { %v7768_v59 = vadd.f32 %v7767_v31, %v7739_v16 }
 0xbf0   :  { %v7683_v21 = vpop.f32.mrf.mxu2  ;;  %v7770_v44 = vpop.f32.mrf.mxu3 }
 0xbf1   :  { %v7684_v17 = vadd.f32 %v7683_v21, %v7655_v12 }
 0xbf3   :  { %v7713_v61 = vadd.f32 %v7712_v6, %v7684_v17 }
 0xbf5   :  { %v7742_v7 = vadd.f32 %v7741_v26, %v7713_v61 }
 0xbf7   :  { %v7771_v20 = vadd.f32 %v7770_v44, %v7742_v7 }
 0xbf8   :  { %v7790_v56 = vpop.f32.mrf.mxu2  ;;  %v7828_v29 = vpop.f32.mrf.mxu3 }
 0xbf9   :  { %v7791_v34 = vadd.f32 %v7790_v56, %v7762_v60 }
 0xbfb   :  { %v7820_v5 = vadd.f32 %v7819_v28, %v7791_v34 }
 0xbfd   :  { %v7835_v57 = vrot.slane %v7820_v5, 4  ;;  %7843 = vst [vmem:[%s13022_s14] sm:$0xf] %v7820_v5 }
 0xbff   :  { %7844 = vst [vmem:[%s13022_s14 + $0x4] sm:$0xf] %v7835_v57 }
 0xc00   :  { %v7793_v55 = vpop.f32.mrf.mxu2 }
 0xc01   :  { %v7794_v4 = vadd.f32 %v7793_v55, %v7765_v25 }
 0xc03   :  { %v7823_v24 = vadd.f32 %v7822_v45, %v7794_v4 }
 0xc05   :  { %v7836_v48 = vrot.slane %v7823_v24, 4  ;;  %7845 = vst [vmem:[%s13022_s14 + $0x8] sm:$0xf] %v7823_v24 }
 0xc07   :  { %7846 = vst [vmem:[%s13022_s14 + $0xc] sm:$0xf] %v7836_v48 }
 0xc08   :  { %v7796_v18 = vpop.f32.mrf.mxu2 }
 0xc09   :  { %v7797_v46 = vadd.f32 %v7796_v18, %v7768_v59 }
 0xc0b   :  { %v7826_v39 = vadd.f32 %v7825_v36, %v7797_v46 }
 0xc0d   :  { %v7837_v35 = vrot.slane %v7826_v39, 4  ;;  %7847 = vst [vmem:[%s13022_s14 + $0x10] sm:$0xf] %v7826_v39 }
 0xc0f   :  { %7848 = vst [vmem:[%s13022_s14 + $0x14] sm:$0xf] %v7837_v35 }
 0xc10   :  { %v7799_v50 = vpop.f32.mrf.mxu2 }
 0xc11   :  { %v7800_v1 = vadd.f32 %v7799_v50, %v7771_v20 }
 0xc13   :  { %v7829_v22 = vadd.f32 %v7828_v29, %v7800_v1 }
 0xc15   :  { %v7838_v10 = vrot.slane %v7829_v22, 4  ;;  %7849 = vst [vmem:[%s13022_s14 + $0x18] sm:$0xf] %v7829_v22 }
 0xc17   :  { %7850 = vst [vmem:[%s13022_s14 + $0x1c] sm:$0xf] %v7838_v10 }

</bundles_post_ra>
